<compile_context>
chip_gen: v7x
topology: tpu7x:2x2x1
jax: 0.10.0
libtpu: 0.0.40
codegen_flags: <defaults>
</compile_context>

<pallas_src>
import jax
import jax.numpy as jnp
from jax.experimental import pallas as pl
from jax.experimental.pallas import tpu as pltpu

C_IN, C_OUT, KH, KW = 3, 64, 7, 7
K_TAP = 4 * C_IN            # channels of one 2x2 space-to-depth "super pixel" (=12)
BN_EPS = 1e-5


def _round_up(x, m):
    return (x + m - 1) // m * m


# ---------------- fused Pallas kernel: conv1 + bn1 + relu + maxpool ----------------

def stem_kernel(x_ref, w_ref, b_ref, o_ref, acc_ref, rm_ref):
    """One (image, pool-row-band) grid step.

    x_ref  : (Hsp, Wsp, 12)   bf16  space-to-depth input, resident per image
    w_ref  : (16, 12, C_OUT)  bf16  per-tap conv weights (BN scale folded in)
    b_ref  : (1, C_OUT)       f32   folded BN bias
    o_ref  : (tp, PW, C_OUT)  f32   pooled output band
    acc_ref: (NR*OWp, C_OUT)  f32   conv rows of this band (NR = 2*tp + 1, incl. halo)
    rm_ref : (OWp, C_OUT)     f32   vertical 3-max of one pool row (for strided reads)
    """
    r = pl.program_id(1)
    tp, pw, _ = o_ref.shape
    owp = rm_ref.shape[0]
    nr = acc_ref.shape[0] // owp                   # = 2 * tp + 1
    start = pl.multiple_of(2 * tp * r, 2 * tp)     # first s2d input row of this band

    # ---- conv as 16 per-tap MXU matmuls (K=12), accumulated in f32 in VMEM ----
    # (a single K=192 matmul over an in-VMEM patch concat would cut MXU pushes ~16x,
    #  but requires unaligned lane concatenation; kept per-tap for robust lowering.)
    for t in range(16):
        sy, sx = t // 4, t % 4
        xs = x_ref[pl.ds(start + sy, nr), pl.ds(sx, owp), :]     # (nr, owp, 12) bf16
        xs = xs.reshape(nr * owp, K_TAP)
        tap = jnp.dot(xs, w_ref[t], preferred_element_type=jnp.float32)
        if t == 0:
            acc_ref[...] = tap
        else:
            acc_ref[...] += tap

    # ---- bn (scale pre-folded into the weights) + relu ----
    acc_ref[...] = jnp.maximum(acc_ref[...] + b_ref[...], 0.0)

    # ---- top halo: conv row "-1" does not exist -> replicate conv row 0 (max-safe) ----
    @pl.when(r == 0)
    def _():
        acc_ref[pl.ds(0, owp), :] = acc_ref[pl.ds(owp, owp), :]

    # ---- fused 3x3 / stride-2 / pad-1 max-pool, separable + decimated ----
    for j in range(tp):
        r0 = acc_ref[pl.ds((2 * j + 0) * owp, owp), :]
        r1 = acc_ref[pl.ds((2 * j + 1) * owp, owp), :]
        r2 = acc_ref[pl.ds((2 * j + 2) * owp, owp), :]
        rm_ref[...] = jnp.maximum(jnp.maximum(r0, r1), r2)       # vertical 3-max
        even = rm_ref[pl.ds(0, pw, stride=2), :]                 # conv col 2*pw
        odd = rm_ref[pl.ds(1, pw, stride=2), :]                  # conv col 2*pw + 1
        left = pltpu.roll(odd, shift=1, axis=0)                  # conv col 2*pw - 1
        col = jax.lax.broadcasted_iota(jnp.int32, left.shape, 0)
        left = jnp.where(col == 0, -jnp.inf, left)               # left pool-pad edge
        o_ref[j] = jnp.maximum(jnp.maximum(even, odd), left)


# ---------------- wrapper (NCHW in / NCHW out, matching the PyTorch module) ----------------

def thermal_module_forward(x_nchw, w_oihw, gamma, beta, run_mean, run_var):
    N, cin, H, W = x_nchw.shape
    assert cin == C_IN
    # TODO(synk): odd spatial sizes would need extra edge handling; the resnet stem is
    # only ever fed H, W divisible by 4 (e.g. 224/480), which keeps OH, OW even.
    assert H % 4 == 0 and W % 4 == 0, "expects H, W divisible by 4"

    OH, OW = H // 2, W // 2        # conv1 output
    PH, PW = OH // 2, OW // 2      # maxpool output
    OWp = _round_up(OW, 16)        # sublane-tile-aligned conv width computed in-kernel
    Wsp = OWp + 3                  # s2d cols needed for OWp conv cols
    Hsp = H // 2 + 4               # s2d rows: OH + 3, plus 1 zero halo row on top

    if PH % 4 == 0:
        tp = 4                     # pool rows per grid step
    elif PH % 2 == 0:
        tp = 2
    else:
        tp = 1
    NR = 2 * tp + 1                # conv rows per band (incl. 1 recomputed halo row)

    # ---- glue (one cheap pass over the small input): NCHW -> NHWC, zero-pad,
    #      2x2 space-to-depth -> (N, Hsp, Wsp, 12) bf16. The conv patches themselves
    #      are built in VMEM inside the kernel (no HBM im2col). ----
    x = jnp.transpose(x_nchw, (0, 2, 3, 1)).astype(jnp.float32)
    x_pad = jnp.pad(x, ((0, 0), (5, 3), (3, 2 * OWp + 3 - W), (0, 0)))
    x_s2d = x_pad.reshape(N, Hsp, 2, Wsp, 2, C_IN)
    x_s2d = x_s2d.transpose(0, 1, 3, 2, 4, 5).reshape(N, Hsp, Wsp, K_TAP)
    x_s2d = x_s2d.astype(jnp.bfloat16)

    # ---- fold BN (eval / running stats) into the conv weights and a bias vector ----
    scale = gamma / jnp.sqrt(run_var + BN_EPS)
    bias = (beta - run_mean * scale).astype(jnp.float32).reshape(1, C_OUT)
    # 7x7 weights -> 16 space-to-depth taps of shape (12, C_OUT); ky=2*sy+py, kx=2*sx+px
    w_pad = jnp.pad(w_oihw.astype(jnp.float32), ((0, 0), (0, 0), (0, 1), (0, 1)))
    w_s2d = w_pad.reshape(C_OUT, C_IN, 4, 2, 4, 2).transpose(2, 4, 3, 5, 1, 0)
    w_s2d = w_s2d * scale.reshape(1, 1, 1, 1, 1, C_OUT)
    w_taps = w_s2d.reshape(16, K_TAP, C_OUT).astype(jnp.bfloat16)

    pooled = pl.pallas_call(
        stem_kernel,
        out_shape=jax.ShapeDtypeStruct((N, PH, PW, C_OUT), jnp.float32),
        grid=(N, PH // tp),
        in_specs=[
            # full image resident in VMEM across the band axis (read from HBM once)
            pl.BlockSpec((None, Hsp, Wsp, K_TAP), lambda n, r: (n, 0, 0, 0)),
            pl.BlockSpec((16, K_TAP, C_OUT), lambda n, r: (0, 0, 0)),
            pl.BlockSpec((1, C_OUT), lambda n, r: (0, 0)),
        ],
        out_specs=pl.BlockSpec((None, tp, PW, C_OUT), lambda n, r: (n, r, 0, 0)),
        scratch_shapes=[
            pltpu.VMEM((NR * OWp, C_OUT), jnp.float32),
            pltpu.VMEM((OWp, C_OUT), jnp.float32),
        ],
        compiler_params=pltpu.CompilerParams(
            dimension_semantics=("parallel", "parallel"),
            vmem_limit_bytes=32 * 1024 * 1024,   # budget safe for v7x (64 MiB physical)
        ),
    )(x_s2d, w_taps, bias)

    # NHWC -> NCHW to match the PyTorch module exactly
    return jnp.transpose(pooled, (0, 3, 1, 2))


# ---------------- pure-JAX reference for correctness ----------------

def reference(x_nchw, w_oihw, gamma, beta, run_mean, run_var):
    y = jax.lax.conv_general_dilated(
        x_nchw, w_oihw, window_strides=(2, 2), padding=((3, 3), (3, 3)),
        dimension_numbers=("NCHW", "OIHW", "NCHW"))
    scale = gamma / jnp.sqrt(run_var + BN_EPS)
    shift = beta - run_mean * scale
    y = y * scale[None, :, None, None] + shift[None, :, None, None]
    y = jnp.maximum(y, 0.0)
    y = jax.lax.reduce_window(
        y, -jnp.inf, jax.lax.max,
        window_dimensions=(1, 1, 3, 3), window_strides=(1, 1, 2, 2),
        padding=((0, 0), (0, 0), (1, 1), (1, 1)))
    return y


if __name__ == "__main__":
    key = jax.random.PRNGKey(0)
    k_w, k_g, k_b, k_m, k_v, k_x = jax.random.split(key, 6)

    # Deterministic synthetic "resnet50 conv1/bn1" parameters (no checkpoint load).
    w = 0.05 * jax.random.normal(k_w, (C_OUT, C_IN, KH, KW), jnp.float32)
    gamma = 1.0 + 0.1 * jax.random.normal(k_g, (C_OUT,), jnp.float32)
    beta = 0.1 * jax.random.normal(k_b, (C_OUT,), jnp.float32)
    run_mean = 0.1 * jax.random.normal(k_m, (C_OUT,), jnp.float32)
    run_var = 0.5 + 0.5 * jnp.abs(jax.random.normal(k_v, (C_OUT,), jnp.float32))

    # Small NCHW input consistent with the module (3-channel image).
    x = jax.random.normal(k_x, (2, 3, 32, 32), jnp.float32)

    fwd = jax.jit(thermal_module_forward)
    out = jax.block_until_ready(fwd(x, w, gamma, beta, run_mean, run_var))
    ref = jax.block_until_ready(reference(x, w, gamma, beta, run_mean, run_var))

    assert out.shape == (2, C_OUT, 8, 8), out.shape
    max_err = float(jnp.max(jnp.abs(out - ref)))
    # bf16 matmul operands with f32 accumulation -> loosened tolerance vs f32 reference
    assert jnp.allclose(out, ref, atol=5e-2, rtol=5e-2), max_err

    print("KERNEL_OK")
</pallas_src>

<mosaic_0001>
module attributes {stable_mosaic.version = 11 : i64} {
  func.func @stem_kernel(%arg0: i32, %arg1: i32, %arg2: memref<1x20x19x12xbf16, #tpu.memory_space<vmem>>, %arg3: memref<16x12x64xbf16, #tpu.memory_space<vmem>>, %arg4: memref<1x64xf32, #tpu.memory_space<vmem>>, %arg5: memref<1x4x8x64xf32, #tpu.memory_space<vmem>>, %arg6: memref<144x64xf32, #tpu.memory_space<vmem>>, %arg7: memref<16x64xf32, #tpu.memory_space<vmem>>) attributes {dimension_semantics = [#tpu.dimension_semantics<parallel>, #tpu.dimension_semantics<parallel>], iteration_bounds = array<i64: 2, 2>, scalar_prefetch = 0 : i64, scratch_operands = 2 : i64, tpu.core_type = #tpu.core_type<tc>, window_params = [{transform_indices = @transform_0, window_bounds = array<i64: 1, 20, 19, 12>}, {pipeline_mode = #tpu.pipeline_mode<synchronous>, transform_indices = @transform_1, window_bounds = array<i64: 16, 12, 64>}, {pipeline_mode = #tpu.pipeline_mode<synchronous>, transform_indices = @transform_2, window_bounds = array<i64: 1, 64>}, {transform_indices = @transform_3, window_bounds = array<i64: 1, 4, 8, 64>}]} {
    %c8_i32 = arith.constant 8 : i32
    %0 = arith.muli %c8_i32, %arg1 : i32
    %1 = tpu.assume_multiple %0, 8 : i32
    %c0_i32 = arith.constant 0 : i32
    %2 = arith.addi %1, %c0_i32 : i32
    %c0 = arith.constant 0 : index
    %3 = arith.index_cast %2 : i32 to index
    %c0_0 = arith.constant 0 : index
    %c0_1 = arith.constant 0 : index
    %4 = vector.load %arg2[%c0, %3, %c0_0, %c0_1] : memref<1x20x19x12xbf16, #tpu.memory_space<vmem>>, vector<1x9x16x12xbf16>
    %5 = vector.shape_cast %4 : vector<1x9x16x12xbf16> to vector<9x16x12xbf16>
    %6 = vector.shape_cast %5 : vector<9x16x12xbf16> to vector<144x12xbf16>
    %c0_2 = arith.constant 0 : index
    %c0_3 = arith.constant 0 : index
    %c0_4 = arith.constant 0 : index
    %7 = vector.load %arg3[%c0_2, %c0_3, %c0_4] : memref<16x12x64xbf16, #tpu.memory_space<vmem>>, vector<1x12x64xbf16>
    %8 = vector.shape_cast %7 : vector<1x12x64xbf16> to vector<12x64xbf16>
    %cst = arith.constant dense<0.000000e+00> : vector<144x64xf32>
    %9 = tpu.matmul %6, %8, %cst {dimension_numbers = #tpu.dot_dimension_numbers<[1], [0], [0], [1], [0, 0, 1, 1], [], []>} : vector<144x12xbf16>, vector<12x64xbf16>, vector<144x64xf32> -> vector<144x64xf32>
    %c0_5 = arith.constant 0 : index
    %c0_6 = arith.constant 0 : index
    %10 = vector.load %arg6[%c0_5, %c0_6] : memref<144x64xf32, #tpu.memory_space<vmem>>, vector<144x64xf32>
    tpu.vector_store %arg6[%c0_5, %c0_6], %9 {strides = array<i32>} : memref<144x64xf32, #tpu.memory_space<vmem>>, vector<144x64xf32>,
    %c0_i32_7 = arith.constant 0 : i32
    %11 = arith.addi %1, %c0_i32_7 : i32
    %c0_8 = arith.constant 0 : index
    %12 = arith.index_cast %11 : i32 to index
    %c1 = arith.constant 1 : index
    %c0_9 = arith.constant 0 : index
    %13 = vector.load %arg2[%c0_8, %12, %c1, %c0_9] : memref<1x20x19x12xbf16, #tpu.memory_space<vmem>>, vector<1x9x16x12xbf16>
    %14 = vector.shape_cast %13 : vector<1x9x16x12xbf16> to vector<9x16x12xbf16>
    %15 = vector.shape_cast %14 : vector<9x16x12xbf16> to vector<144x12xbf16>
    %c1_10 = arith.constant 1 : index
    %c0_11 = arith.constant 0 : index
    %c0_12 = arith.constant 0 : index
    %16 = vector.load %arg3[%c1_10, %c0_11, %c0_12] : memref<16x12x64xbf16, #tpu.memory_space<vmem>>, vector<1x12x64xbf16>
    %17 = vector.shape_cast %16 : vector<1x12x64xbf16> to vector<12x64xbf16>
    %cst_13 = arith.constant dense<0.000000e+00> : vector<144x64xf32>
    %18 = tpu.matmul %15, %17, %cst_13 {dimension_numbers = #tpu.dot_dimension_numbers<[1], [0], [0], [1], [0, 0, 1, 1], [], []>} : vector<144x12xbf16>, vector<12x64xbf16>, vector<144x64xf32> -> vector<144x64xf32>
    %c0_14 = arith.constant 0 : index
    %c0_15 = arith.constant 0 : index
    %19 = vector.load %arg6[%c0_14, %c0_15] : memref<144x64xf32, #tpu.memory_space<vmem>>, vector<144x64xf32>
    %20 = arith.addf %19, %18 : vector<144x64xf32>
    %c0_16 = arith.constant 0 : index
    %c0_17 = arith.constant 0 : index
    %21 = vector.load %arg6[%c0_16, %c0_17] : memref<144x64xf32, #tpu.memory_space<vmem>>, vector<144x64xf32>
    tpu.vector_store %arg6[%c0_16, %c0_17], %20 {strides = array<i32>} : memref<144x64xf32, #tpu.memory_space<vmem>>, vector<144x64xf32>,
    %c0_i32_18 = arith.constant 0 : i32
    %22 = arith.addi %1, %c0_i32_18 : i32
    %c0_19 = arith.constant 0 : index
    %23 = arith.index_cast %22 : i32 to index
    %c2 = arith.constant 2 : index
    %c0_20 = arith.constant 0 : index
    %24 = vector.load %arg2[%c0_19, %23, %c2, %c0_20] : memref<1x20x19x12xbf16, #tpu.memory_space<vmem>>, vector<1x9x16x12xbf16>
    %25 = vector.shape_cast %24 : vector<1x9x16x12xbf16> to vector<9x16x12xbf16>
    %26 = vector.shape_cast %25 : vector<9x16x12xbf16> to vector<144x12xbf16>
    %c2_21 = arith.constant 2 : index
    %c0_22 = arith.constant 0 : index
    %c0_23 = arith.constant 0 : index
    %27 = vector.load %arg3[%c2_21, %c0_22, %c0_23] : memref<16x12x64xbf16, #tpu.memory_space<vmem>>, vector<1x12x64xbf16>
    %28 = vector.shape_cast %27 : vector<1x12x64xbf16> to vector<12x64xbf16>
    %cst_24 = arith.constant dense<0.000000e+00> : vector<144x64xf32>
    %29 = tpu.matmul %26, %28, %cst_24 {dimension_numbers = #tpu.dot_dimension_numbers<[1], [0], [0], [1], [0, 0, 1, 1], [], []>} : vector<144x12xbf16>, vector<12x64xbf16>, vector<144x64xf32> -> vector<144x64xf32>
    %c0_25 = arith.constant 0 : index
    %c0_26 = arith.constant 0 : index
    %30 = vector.load %arg6[%c0_25, %c0_26] : memref<144x64xf32, #tpu.memory_space<vmem>>, vector<144x64xf32>
    %31 = arith.addf %30, %29 : vector<144x64xf32>
    %c0_27 = arith.constant 0 : index
    %c0_28 = arith.constant 0 : index
    %32 = vector.load %arg6[%c0_27, %c0_28] : memref<144x64xf32, #tpu.memory_space<vmem>>, vector<144x64xf32>
    tpu.vector_store %arg6[%c0_27, %c0_28], %31 {strides = array<i32>} : memref<144x64xf32, #tpu.memory_space<vmem>>, vector<144x64xf32>,
    %c0_i32_29 = arith.constant 0 : i32
    %33 = arith.addi %1, %c0_i32_29 : i32
    %c0_30 = arith.constant 0 : index
    %34 = arith.index_cast %33 : i32 to index
    %c3 = arith.constant 3 : index
    %c0_31 = arith.constant 0 : index
    %35 = vector.load %arg2[%c0_30, %34, %c3, %c0_31] : memref<1x20x19x12xbf16, #tpu.memory_space<vmem>>, vector<1x9x16x12xbf16>
    %36 = vector.shape_cast %35 : vector<1x9x16x12xbf16> to vector<9x16x12xbf16>
    %37 = vector.shape_cast %36 : vector<9x16x12xbf16> to vector<144x12xbf16>
    %c3_32 = arith.constant 3 : index
    %c0_33 = arith.constant 0 : index
    %c0_34 = arith.constant 0 : index
    %38 = vector.load %arg3[%c3_32, %c0_33, %c0_34] : memref<16x12x64xbf16, #tpu.memory_space<vmem>>, vector<1x12x64xbf16>
    %39 = vector.shape_cast %38 : vector<1x12x64xbf16> to vector<12x64xbf16>
    %cst_35 = arith.constant dense<0.000000e+00> : vector<144x64xf32>
    %40 = tpu.matmul %37, %39, %cst_35 {dimension_numbers = #tpu.dot_dimension_numbers<[1], [0], [0], [1], [0, 0, 1, 1], [], []>} : vector<144x12xbf16>, vector<12x64xbf16>, vector<144x64xf32> -> vector<144x64xf32>
    %c0_36 = arith.constant 0 : index
    %c0_37 = arith.constant 0 : index
    %41 = vector.load %arg6[%c0_36, %c0_37] : memref<144x64xf32, #tpu.memory_space<vmem>>, vector<144x64xf32>
    %42 = arith.addf %41, %40 : vector<144x64xf32>
    %c0_38 = arith.constant 0 : index
    %c0_39 = arith.constant 0 : index
    %43 = vector.load %arg6[%c0_38, %c0_39] : memref<144x64xf32, #tpu.memory_space<vmem>>, vector<144x64xf32>
    tpu.vector_store %arg6[%c0_38, %c0_39], %42 {strides = array<i32>} : memref<144x64xf32, #tpu.memory_space<vmem>>, vector<144x64xf32>,
    %c1_i32 = arith.constant 1 : i32
    %44 = arith.addi %1, %c1_i32 : i32
    %c0_40 = arith.constant 0 : index
    %45 = arith.index_cast %44 : i32 to index
    %c0_41 = arith.constant 0 : index
    %c0_42 = arith.constant 0 : index
    %46 = vector.load %arg2[%c0_40, %45, %c0_41, %c0_42] : memref<1x20x19x12xbf16, #tpu.memory_space<vmem>>, vector<1x9x16x12xbf16>
    %47 = vector.shape_cast %46 : vector<1x9x16x12xbf16> to vector<9x16x12xbf16>
    %48 = vector.shape_cast %47 : vector<9x16x12xbf16> to vector<144x12xbf16>
    %c4 = arith.constant 4 : index
    %c0_43 = arith.constant 0 : index
    %c0_44 = arith.constant 0 : index
    %49 = vector.load %arg3[%c4, %c0_43, %c0_44] : memref<16x12x64xbf16, #tpu.memory_space<vmem>>, vector<1x12x64xbf16>
    %50 = vector.shape_cast %49 : vector<1x12x64xbf16> to vector<12x64xbf16>
    %cst_45 = arith.constant dense<0.000000e+00> : vector<144x64xf32>
    %51 = tpu.matmul %48, %50, %cst_45 {dimension_numbers = #tpu.dot_dimension_numbers<[1], [0], [0], [1], [0, 0, 1, 1], [], []>} : vector<144x12xbf16>, vector<12x64xbf16>, vector<144x64xf32> -> vector<144x64xf32>
    %c0_46 = arith.constant 0 : index
    %c0_47 = arith.constant 0 : index
    %52 = vector.load %arg6[%c0_46, %c0_47] : memref<144x64xf32, #tpu.memory_space<vmem>>, vector<144x64xf32>
    %53 = arith.addf %52, %51 : vector<144x64xf32>
    %c0_48 = arith.constant 0 : index
    %c0_49 = arith.constant 0 : index
    %54 = vector.load %arg6[%c0_48, %c0_49] : memref<144x64xf32, #tpu.memory_space<vmem>>, vector<144x64xf32>
    tpu.vector_store %arg6[%c0_48, %c0_49], %53 {strides = array<i32>} : memref<144x64xf32, #tpu.memory_space<vmem>>, vector<144x64xf32>,
    %c1_i32_50 = arith.constant 1 : i32
    %55 = arith.addi %1, %c1_i32_50 : i32
    %c0_51 = arith.constant 0 : index
    %56 = arith.index_cast %55 : i32 to index
    %c1_52 = arith.constant 1 : index
    %c0_53 = arith.constant 0 : index
    %57 = vector.load %arg2[%c0_51, %56, %c1_52, %c0_53] : memref<1x20x19x12xbf16, #tpu.memory_space<vmem>>, vector<1x9x16x12xbf16>
    %58 = vector.shape_cast %57 : vector<1x9x16x12xbf16> to vector<9x16x12xbf16>
    %59 = vector.shape_cast %58 : vector<9x16x12xbf16> to vector<144x12xbf16>
    %c5 = arith.constant 5 : index
    %c0_54 = arith.constant 0 : index
    %c0_55 = arith.constant 0 : index
    %60 = vector.load %arg3[%c5, %c0_54, %c0_55] : memref<16x12x64xbf16, #tpu.memory_space<vmem>>, vector<1x12x64xbf16>
    %61 = vector.shape_cast %60 : vector<1x12x64xbf16> to vector<12x64xbf16>
    %cst_56 = arith.constant dense<0.000000e+00> : vector<144x64xf32>
    %62 = tpu.matmul %59, %61, %cst_56 {dimension_numbers = #tpu.dot_dimension_numbers<[1], [0], [0], [1], [0, 0, 1, 1], [], []>} : vector<144x12xbf16>, vector<12x64xbf16>, vector<144x64xf32> -> vector<144x64xf32>
    %c0_57 = arith.constant 0 : index
    %c0_58 = arith.constant 0 : index
    %63 = vector.load %arg6[%c0_57, %c0_58] : memref<144x64xf32, #tpu.memory_space<vmem>>, vector<144x64xf32>
    %64 = arith.addf %63, %62 : vector<144x64xf32>
    %c0_59 = arith.constant 0 : index
    %c0_60 = arith.constant 0 : index
    %65 = vector.load %arg6[%c0_59, %c0_60] : memref<144x64xf32, #tpu.memory_space<vmem>>, vector<144x64xf32>
    tpu.vector_store %arg6[%c0_59, %c0_60], %64 {strides = array<i32>} : memref<144x64xf32, #tpu.memory_space<vmem>>, vector<144x64xf32>,
    %c1_i32_61 = arith.constant 1 : i32
    %66 = arith.addi %1, %c1_i32_61 : i32
    %c0_62 = arith.constant 0 : index
    %67 = arith.index_cast %66 : i32 to index
    %c2_63 = arith.constant 2 : index
    %c0_64 = arith.constant 0 : index
    %68 = vector.load %arg2[%c0_62, %67, %c2_63, %c0_64] : memref<1x20x19x12xbf16, #tpu.memory_space<vmem>>, vector<1x9x16x12xbf16>
    %69 = vector.shape_cast %68 : vector<1x9x16x12xbf16> to vector<9x16x12xbf16>
    %70 = vector.shape_cast %69 : vector<9x16x12xbf16> to vector<144x12xbf16>
    %c6 = arith.constant 6 : index
    %c0_65 = arith.constant 0 : index
    %c0_66 = arith.constant 0 : index
    %71 = vector.load %arg3[%c6, %c0_65, %c0_66] : memref<16x12x64xbf16, #tpu.memory_space<vmem>>, vector<1x12x64xbf16>
    %72 = vector.shape_cast %71 : vector<1x12x64xbf16> to vector<12x64xbf16>
    %cst_67 = arith.constant dense<0.000000e+00> : vector<144x64xf32>
    %73 = tpu.matmul %70, %72, %cst_67 {dimension_numbers = #tpu.dot_dimension_numbers<[1], [0], [0], [1], [0, 0, 1, 1], [], []>} : vector<144x12xbf16>, vector<12x64xbf16>, vector<144x64xf32> -> vector<144x64xf32>
    %c0_68 = arith.constant 0 : index
    %c0_69 = arith.constant 0 : index
    %74 = vector.load %arg6[%c0_68, %c0_69] : memref<144x64xf32, #tpu.memory_space<vmem>>, vector<144x64xf32>
    %75 = arith.addf %74, %73 : vector<144x64xf32>
    %c0_70 = arith.constant 0 : index
    %c0_71 = arith.constant 0 : index
    %76 = vector.load %arg6[%c0_70, %c0_71] : memref<144x64xf32, #tpu.memory_space<vmem>>, vector<144x64xf32>
    tpu.vector_store %arg6[%c0_70, %c0_71], %75 {strides = array<i32>} : memref<144x64xf32, #tpu.memory_space<vmem>>, vector<144x64xf32>,
    %c1_i32_72 = arith.constant 1 : i32
    %77 = arith.addi %1, %c1_i32_72 : i32
    %c0_73 = arith.constant 0 : index
    %78 = arith.index_cast %77 : i32 to index
    %c3_74 = arith.constant 3 : index
    %c0_75 = arith.constant 0 : index
    %79 = vector.load %arg2[%c0_73, %78, %c3_74, %c0_75] : memref<1x20x19x12xbf16, #tpu.memory_space<vmem>>, vector<1x9x16x12xbf16>
    %80 = vector.shape_cast %79 : vector<1x9x16x12xbf16> to vector<9x16x12xbf16>
    %81 = vector.shape_cast %80 : vector<9x16x12xbf16> to vector<144x12xbf16>
    %c7 = arith.constant 7 : index
    %c0_76 = arith.constant 0 : index
    %c0_77 = arith.constant 0 : index
    %82 = vector.load %arg3[%c7, %c0_76, %c0_77] : memref<16x12x64xbf16, #tpu.memory_space<vmem>>, vector<1x12x64xbf16>
    %83 = vector.shape_cast %82 : vector<1x12x64xbf16> to vector<12x64xbf16>
    %cst_78 = arith.constant dense<0.000000e+00> : vector<144x64xf32>
    %84 = tpu.matmul %81, %83, %cst_78 {dimension_numbers = #tpu.dot_dimension_numbers<[1], [0], [0], [1], [0, 0, 1, 1], [], []>} : vector<144x12xbf16>, vector<12x64xbf16>, vector<144x64xf32> -> vector<144x64xf32>
    %c0_79 = arith.constant 0 : index
    %c0_80 = arith.constant 0 : index
    %85 = vector.load %arg6[%c0_79, %c0_80] : memref<144x64xf32, #tpu.memory_space<vmem>>, vector<144x64xf32>
    %86 = arith.addf %85, %84 : vector<144x64xf32>
    %c0_81 = arith.constant 0 : index
    %c0_82 = arith.constant 0 : index
    %87 = vector.load %arg6[%c0_81, %c0_82] : memref<144x64xf32, #tpu.memory_space<vmem>>, vector<144x64xf32>
    tpu.vector_store %arg6[%c0_81, %c0_82], %86 {strides = array<i32>} : memref<144x64xf32, #tpu.memory_space<vmem>>, vector<144x64xf32>,
    %c2_i32 = arith.constant 2 : i32
    %88 = arith.addi %1, %c2_i32 : i32
    %c0_83 = arith.constant 0 : index
    %89 = arith.index_cast %88 : i32 to index
    %c0_84 = arith.constant 0 : index
    %c0_85 = arith.constant 0 : index
    %90 = vector.load %arg2[%c0_83, %89, %c0_84, %c0_85] : memref<1x20x19x12xbf16, #tpu.memory_space<vmem>>, vector<1x9x16x12xbf16>
    %91 = vector.shape_cast %90 : vector<1x9x16x12xbf16> to vector<9x16x12xbf16>
    %92 = vector.shape_cast %91 : vector<9x16x12xbf16> to vector<144x12xbf16>
    %c8 = arith.constant 8 : index
    %c0_86 = arith.constant 0 : index
    %c0_87 = arith.constant 0 : index
    %93 = vector.load %arg3[%c8, %c0_86, %c0_87] : memref<16x12x64xbf16, #tpu.memory_space<vmem>>, vector<1x12x64xbf16>
    %94 = vector.shape_cast %93 : vector<1x12x64xbf16> to vector<12x64xbf16>
    %cst_88 = arith.constant dense<0.000000e+00> : vector<144x64xf32>
    %95 = tpu.matmul %92, %94, %cst_88 {dimension_numbers = #tpu.dot_dimension_numbers<[1], [0], [0], [1], [0, 0, 1, 1], [], []>} : vector<144x12xbf16>, vector<12x64xbf16>, vector<144x64xf32> -> vector<144x64xf32>
    %c0_89 = arith.constant 0 : index
    %c0_90 = arith.constant 0 : index
    %96 = vector.load %arg6[%c0_89, %c0_90] : memref<144x64xf32, #tpu.memory_space<vmem>>, vector<144x64xf32>
    %97 = arith.addf %96, %95 : vector<144x64xf32>
    %c0_91 = arith.constant 0 : index
    %c0_92 = arith.constant 0 : index
    %98 = vector.load %arg6[%c0_91, %c0_92] : memref<144x64xf32, #tpu.memory_space<vmem>>, vector<144x64xf32>
    tpu.vector_store %arg6[%c0_91, %c0_92], %97 {strides = array<i32>} : memref<144x64xf32, #tpu.memory_space<vmem>>, vector<144x64xf32>,
    %c2_i32_93 = arith.constant 2 : i32
    %99 = arith.addi %1, %c2_i32_93 : i32
    %c0_94 = arith.constant 0 : index
    %100 = arith.index_cast %99 : i32 to index
    %c1_95 = arith.constant 1 : index
    %c0_96 = arith.constant 0 : index
    %101 = vector.load %arg2[%c0_94, %100, %c1_95, %c0_96] : memref<1x20x19x12xbf16, #tpu.memory_space<vmem>>, vector<1x9x16x12xbf16>
    %102 = vector.shape_cast %101 : vector<1x9x16x12xbf16> to vector<9x16x12xbf16>
    %103 = vector.shape_cast %102 : vector<9x16x12xbf16> to vector<144x12xbf16>
    %c9 = arith.constant 9 : index
    %c0_97 = arith.constant 0 : index
    %c0_98 = arith.constant 0 : index
    %104 = vector.load %arg3[%c9, %c0_97, %c0_98] : memref<16x12x64xbf16, #tpu.memory_space<vmem>>, vector<1x12x64xbf16>
    %105 = vector.shape_cast %104 : vector<1x12x64xbf16> to vector<12x64xbf16>
    %cst_99 = arith.constant dense<0.000000e+00> : vector<144x64xf32>
    %106 = tpu.matmul %103, %105, %cst_99 {dimension_numbers = #tpu.dot_dimension_numbers<[1], [0], [0], [1], [0, 0, 1, 1], [], []>} : vector<144x12xbf16>, vector<12x64xbf16>, vector<144x64xf32> -> vector<144x64xf32>
    %c0_100 = arith.constant 0 : index
    %c0_101 = arith.constant 0 : index
    %107 = vector.load %arg6[%c0_100, %c0_101] : memref<144x64xf32, #tpu.memory_space<vmem>>, vector<144x64xf32>
    %108 = arith.addf %107, %106 : vector<144x64xf32>
    %c0_102 = arith.constant 0 : index
    %c0_103 = arith.constant 0 : index
    %109 = vector.load %arg6[%c0_102, %c0_103] : memref<144x64xf32, #tpu.memory_space<vmem>>, vector<144x64xf32>
    tpu.vector_store %arg6[%c0_102, %c0_103], %108 {strides = array<i32>} : memref<144x64xf32, #tpu.memory_space<vmem>>, vector<144x64xf32>,
    %c2_i32_104 = arith.constant 2 : i32
    %110 = arith.addi %1, %c2_i32_104 : i32
    %c0_105 = arith.constant 0 : index
    %111 = arith.index_cast %110 : i32 to index
    %c2_106 = arith.constant 2 : index
    %c0_107 = arith.constant 0 : index
    %112 = vector.load %arg2[%c0_105, %111, %c2_106, %c0_107] : memref<1x20x19x12xbf16, #tpu.memory_space<vmem>>, vector<1x9x16x12xbf16>
    %113 = vector.shape_cast %112 : vector<1x9x16x12xbf16> to vector<9x16x12xbf16>
    %114 = vector.shape_cast %113 : vector<9x16x12xbf16> to vector<144x12xbf16>
    %c10 = arith.constant 10 : index
    %c0_108 = arith.constant 0 : index
    %c0_109 = arith.constant 0 : index
    %115 = vector.load %arg3[%c10, %c0_108, %c0_109] : memref<16x12x64xbf16, #tpu.memory_space<vmem>>, vector<1x12x64xbf16>
    %116 = vector.shape_cast %115 : vector<1x12x64xbf16> to vector<12x64xbf16>
    %cst_110 = arith.constant dense<0.000000e+00> : vector<144x64xf32>
    %117 = tpu.matmul %114, %116, %cst_110 {dimension_numbers = #tpu.dot_dimension_numbers<[1], [0], [0], [1], [0, 0, 1, 1], [], []>} : vector<144x12xbf16>, vector<12x64xbf16>, vector<144x64xf32> -> vector<144x64xf32>
    %c0_111 = arith.constant 0 : index
    %c0_112 = arith.constant 0 : index
    %118 = vector.load %arg6[%c0_111, %c0_112] : memref<144x64xf32, #tpu.memory_space<vmem>>, vector<144x64xf32>
    %119 = arith.addf %118, %117 : vector<144x64xf32>
    %c0_113 = arith.constant 0 : index
    %c0_114 = arith.constant 0 : index
    %120 = vector.load %arg6[%c0_113, %c0_114] : memref<144x64xf32, #tpu.memory_space<vmem>>, vector<144x64xf32>
    tpu.vector_store %arg6[%c0_113, %c0_114], %119 {strides = array<i32>} : memref<144x64xf32, #tpu.memory_space<vmem>>, vector<144x64xf32>,
    %c2_i32_115 = arith.constant 2 : i32
    %121 = arith.addi %1, %c2_i32_115 : i32
    %c0_116 = arith.constant 0 : index
    %122 = arith.index_cast %121 : i32 to index
    %c3_117 = arith.constant 3 : index
    %c0_118 = arith.constant 0 : index
    %123 = vector.load %arg2[%c0_116, %122, %c3_117, %c0_118] : memref<1x20x19x12xbf16, #tpu.memory_space<vmem>>, vector<1x9x16x12xbf16>
    %124 = vector.shape_cast %123 : vector<1x9x16x12xbf16> to vector<9x16x12xbf16>
    %125 = vector.shape_cast %124 : vector<9x16x12xbf16> to vector<144x12xbf16>
    %c11 = arith.constant 11 : index
    %c0_119 = arith.constant 0 : index
    %c0_120 = arith.constant 0 : index
    %126 = vector.load %arg3[%c11, %c0_119, %c0_120] : memref<16x12x64xbf16, #tpu.memory_space<vmem>>, vector<1x12x64xbf16>
    %127 = vector.shape_cast %126 : vector<1x12x64xbf16> to vector<12x64xbf16>
    %cst_121 = arith.constant dense<0.000000e+00> : vector<144x64xf32>
    %128 = tpu.matmul %125, %127, %cst_121 {dimension_numbers = #tpu.dot_dimension_numbers<[1], [0], [0], [1], [0, 0, 1, 1], [], []>} : vector<144x12xbf16>, vector<12x64xbf16>, vector<144x64xf32> -> vector<144x64xf32>
    %c0_122 = arith.constant 0 : index
    %c0_123 = arith.constant 0 : index
    %129 = vector.load %arg6[%c0_122, %c0_123] : memref<144x64xf32, #tpu.memory_space<vmem>>, vector<144x64xf32>
    %130 = arith.addf %129, %128 : vector<144x64xf32>
    %c0_124 = arith.constant 0 : index
    %c0_125 = arith.constant 0 : index
    %131 = vector.load %arg6[%c0_124, %c0_125] : memref<144x64xf32, #tpu.memory_space<vmem>>, vector<144x64xf32>
    tpu.vector_store %arg6[%c0_124, %c0_125], %130 {strides = array<i32>} : memref<144x64xf32, #tpu.memory_space<vmem>>, vector<144x64xf32>,
    %c3_i32 = arith.constant 3 : i32
    %132 = arith.addi %1, %c3_i32 : i32
    %c0_126 = arith.constant 0 : index
    %133 = arith.index_cast %132 : i32 to index
    %c0_127 = arith.constant 0 : index
    %c0_128 = arith.constant 0 : index
    %134 = vector.load %arg2[%c0_126, %133, %c0_127, %c0_128] : memref<1x20x19x12xbf16, #tpu.memory_space<vmem>>, vector<1x9x16x12xbf16>
    %135 = vector.shape_cast %134 : vector<1x9x16x12xbf16> to vector<9x16x12xbf16>
    %136 = vector.shape_cast %135 : vector<9x16x12xbf16> to vector<144x12xbf16>
    %c12 = arith.constant 12 : index
    %c0_129 = arith.constant 0 : index
    %c0_130 = arith.constant 0 : index
    %137 = vector.load %arg3[%c12, %c0_129, %c0_130] : memref<16x12x64xbf16, #tpu.memory_space<vmem>>, vector<1x12x64xbf16>
    %138 = vector.shape_cast %137 : vector<1x12x64xbf16> to vector<12x64xbf16>
    %cst_131 = arith.constant dense<0.000000e+00> : vector<144x64xf32>
    %139 = tpu.matmul %136, %138, %cst_131 {dimension_numbers = #tpu.dot_dimension_numbers<[1], [0], [0], [1], [0, 0, 1, 1], [], []>} : vector<144x12xbf16>, vector<12x64xbf16>, vector<144x64xf32> -> vector<144x64xf32>
    %c0_132 = arith.constant 0 : index
    %c0_133 = arith.constant 0 : index
    %140 = vector.load %arg6[%c0_132, %c0_133] : memref<144x64xf32, #tpu.memory_space<vmem>>, vector<144x64xf32>
    %141 = arith.addf %140, %139 : vector<144x64xf32>
    %c0_134 = arith.constant 0 : index
    %c0_135 = arith.constant 0 : index
    %142 = vector.load %arg6[%c0_134, %c0_135] : memref<144x64xf32, #tpu.memory_space<vmem>>, vector<144x64xf32>
    tpu.vector_store %arg6[%c0_134, %c0_135], %141 {strides = array<i32>} : memref<144x64xf32, #tpu.memory_space<vmem>>, vector<144x64xf32>,
    %c3_i32_136 = arith.constant 3 : i32
    %143 = arith.addi %1, %c3_i32_136 : i32
    %c0_137 = arith.constant 0 : index
    %144 = arith.index_cast %143 : i32 to index
    %c1_138 = arith.constant 1 : index
    %c0_139 = arith.constant 0 : index
    %145 = vector.load %arg2[%c0_137, %144, %c1_138, %c0_139] : memref<1x20x19x12xbf16, #tpu.memory_space<vmem>>, vector<1x9x16x12xbf16>
    %146 = vector.shape_cast %145 : vector<1x9x16x12xbf16> to vector<9x16x12xbf16>
    %147 = vector.shape_cast %146 : vector<9x16x12xbf16> to vector<144x12xbf16>
    %c13 = arith.constant 13 : index
    %c0_140 = arith.constant 0 : index
    %c0_141 = arith.constant 0 : index
    %148 = vector.load %arg3[%c13, %c0_140, %c0_141] : memref<16x12x64xbf16, #tpu.memory_space<vmem>>, vector<1x12x64xbf16>
    %149 = vector.shape_cast %148 : vector<1x12x64xbf16> to vector<12x64xbf16>
    %cst_142 = arith.constant dense<0.000000e+00> : vector<144x64xf32>
    %150 = tpu.matmul %147, %149, %cst_142 {dimension_numbers = #tpu.dot_dimension_numbers<[1], [0], [0], [1], [0, 0, 1, 1], [], []>} : vector<144x12xbf16>, vector<12x64xbf16>, vector<144x64xf32> -> vector<144x64xf32>
    %c0_143 = arith.constant 0 : index
    %c0_144 = arith.constant 0 : index
    %151 = vector.load %arg6[%c0_143, %c0_144] : memref<144x64xf32, #tpu.memory_space<vmem>>, vector<144x64xf32>
    %152 = arith.addf %151, %150 : vector<144x64xf32>
    %c0_145 = arith.constant 0 : index
    %c0_146 = arith.constant 0 : index
    %153 = vector.load %arg6[%c0_145, %c0_146] : memref<144x64xf32, #tpu.memory_space<vmem>>, vector<144x64xf32>
    tpu.vector_store %arg6[%c0_145, %c0_146], %152 {strides = array<i32>} : memref<144x64xf32, #tpu.memory_space<vmem>>, vector<144x64xf32>,
    %c3_i32_147 = arith.constant 3 : i32
    %154 = arith.addi %1, %c3_i32_147 : i32
    %c0_148 = arith.constant 0 : index
    %155 = arith.index_cast %154 : i32 to index
    %c2_149 = arith.constant 2 : index
    %c0_150 = arith.constant 0 : index
    %156 = vector.load %arg2[%c0_148, %155, %c2_149, %c0_150] : memref<1x20x19x12xbf16, #tpu.memory_space<vmem>>, vector<1x9x16x12xbf16>
    %157 = vector.shape_cast %156 : vector<1x9x16x12xbf16> to vector<9x16x12xbf16>
    %158 = vector.shape_cast %157 : vector<9x16x12xbf16> to vector<144x12xbf16>
    %c14 = arith.constant 14 : index
    %c0_151 = arith.constant 0 : index
    %c0_152 = arith.constant 0 : index
    %159 = vector.load %arg3[%c14, %c0_151, %c0_152] : memref<16x12x64xbf16, #tpu.memory_space<vmem>>, vector<1x12x64xbf16>
    %160 = vector.shape_cast %159 : vector<1x12x64xbf16> to vector<12x64xbf16>
    %cst_153 = arith.constant dense<0.000000e+00> : vector<144x64xf32>
    %161 = tpu.matmul %158, %160, %cst_153 {dimension_numbers = #tpu.dot_dimension_numbers<[1], [0], [0], [1], [0, 0, 1, 1], [], []>} : vector<144x12xbf16>, vector<12x64xbf16>, vector<144x64xf32> -> vector<144x64xf32>
    %c0_154 = arith.constant 0 : index
    %c0_155 = arith.constant 0 : index
    %162 = vector.load %arg6[%c0_154, %c0_155] : memref<144x64xf32, #tpu.memory_space<vmem>>, vector<144x64xf32>
    %163 = arith.addf %162, %161 : vector<144x64xf32>
    %c0_156 = arith.constant 0 : index
    %c0_157 = arith.constant 0 : index
    %164 = vector.load %arg6[%c0_156, %c0_157] : memref<144x64xf32, #tpu.memory_space<vmem>>, vector<144x64xf32>
    tpu.vector_store %arg6[%c0_156, %c0_157], %163 {strides = array<i32>} : memref<144x64xf32, #tpu.memory_space<vmem>>, vector<144x64xf32>,
    %c3_i32_158 = arith.constant 3 : i32
    %165 = arith.addi %1, %c3_i32_158 : i32
    %c0_159 = arith.constant 0 : index
    %166 = arith.index_cast %165 : i32 to index
    %c3_160 = arith.constant 3 : index
    %c0_161 = arith.constant 0 : index
    %167 = vector.load %arg2[%c0_159, %166, %c3_160, %c0_161] : memref<1x20x19x12xbf16, #tpu.memory_space<vmem>>, vector<1x9x16x12xbf16>
    %168 = vector.shape_cast %167 : vector<1x9x16x12xbf16> to vector<9x16x12xbf16>
    %169 = vector.shape_cast %168 : vector<9x16x12xbf16> to vector<144x12xbf16>
    %c15 = arith.constant 15 : index
    %c0_162 = arith.constant 0 : index
    %c0_163 = arith.constant 0 : index
    %170 = vector.load %arg3[%c15, %c0_162, %c0_163] : memref<16x12x64xbf16, #tpu.memory_space<vmem>>, vector<1x12x64xbf16>
    %171 = vector.shape_cast %170 : vector<1x12x64xbf16> to vector<12x64xbf16>
    %cst_164 = arith.constant dense<0.000000e+00> : vector<144x64xf32>
    %172 = tpu.matmul %169, %171, %cst_164 {dimension_numbers = #tpu.dot_dimension_numbers<[1], [0], [0], [1], [0, 0, 1, 1], [], []>} : vector<144x12xbf16>, vector<12x64xbf16>, vector<144x64xf32> -> vector<144x64xf32>
    %c0_165 = arith.constant 0 : index
    %c0_166 = arith.constant 0 : index
    %173 = vector.load %arg6[%c0_165, %c0_166] : memref<144x64xf32, #tpu.memory_space<vmem>>, vector<144x64xf32>
    %174 = arith.addf %173, %172 : vector<144x64xf32>
    %c0_167 = arith.constant 0 : index
    %c0_168 = arith.constant 0 : index
    %175 = vector.load %arg6[%c0_167, %c0_168] : memref<144x64xf32, #tpu.memory_space<vmem>>, vector<144x64xf32>
    tpu.vector_store %arg6[%c0_167, %c0_168], %174 {strides = array<i32>} : memref<144x64xf32, #tpu.memory_space<vmem>>, vector<144x64xf32>,
    %c0_169 = arith.constant 0 : index
    %c0_170 = arith.constant 0 : index
    %176 = vector.load %arg6[%c0_169, %c0_170] : memref<144x64xf32, #tpu.memory_space<vmem>>, vector<144x64xf32>
    %c0_171 = arith.constant 0 : index
    %c0_172 = arith.constant 0 : index
    %177 = vector.load %arg4[%c0_171, %c0_172] : memref<1x64xf32, #tpu.memory_space<vmem>>, vector<1x64xf32>
    %178 = vector.broadcast %177 : vector<1x64xf32> to vector<144x64xf32>
    %179 = arith.addf %176, %178 : vector<144x64xf32>
    %cst_173 = arith.constant 0.000000e+00 : f32
    %180 = vector.broadcast %cst_173 : f32 to vector<144x64xf32>
    %181 = arith.maximumf %179, %180 : vector<144x64xf32>
    %c0_174 = arith.constant 0 : index
    %c0_175 = arith.constant 0 : index
    %182 = vector.load %arg6[%c0_174, %c0_175] : memref<144x64xf32, #tpu.memory_space<vmem>>, vector<144x64xf32>
    tpu.vector_store %arg6[%c0_174, %c0_175], %181 {strides = array<i32>} : memref<144x64xf32, #tpu.memory_space<vmem>>, vector<144x64xf32>,
    %c0_i32_176 = arith.constant 0 : i32
    %183 = arith.cmpi eq, %arg1, %c0_i32_176 : i32
    %184 = arith.extui %183 : i1 to i32
    %c0_i32_177 = arith.constant 0 : i32
    %185 = arith.cmpi ne, %184, %c0_i32_177 : i32
    scf.if %185 {
      %c16_246 = arith.constant 16 : index
      %c0_247 = arith.constant 0 : index
      %262 = vector.load %arg6[%c16_246, %c0_247] : memref<144x64xf32, #tpu.memory_space<vmem>>, vector<16x64xf32>
      %c0_248 = arith.constant 0 : index
      %c0_249 = arith.constant 0 : index
      %263 = vector.load %arg6[%c0_248, %c0_249] : memref<144x64xf32, #tpu.memory_space<vmem>>, vector<16x64xf32>
      tpu.vector_store %arg6[%c0_248, %c0_249], %262 {strides = array<i32>} : memref<144x64xf32, #tpu.memory_space<vmem>>, vector<16x64xf32>,
    } else {
    }
    %c0_178 = arith.constant 0 : index
    %c0_179 = arith.constant 0 : index
    %186 = vector.load %arg6[%c0_178, %c0_179] : memref<144x64xf32, #tpu.memory_space<vmem>>, vector<16x64xf32>
    %c16 = arith.constant 16 : index
    %c0_180 = arith.constant 0 : index
    %187 = vector.load %arg6[%c16, %c0_180] : memref<144x64xf32, #tpu.memory_space<vmem>>, vector<16x64xf32>
    %c32 = arith.constant 32 : index
    %c0_181 = arith.constant 0 : index
    %188 = vector.load %arg6[%c32, %c0_181] : memref<144x64xf32, #tpu.memory_space<vmem>>, vector<16x64xf32>
    %189 = arith.maximumf %186, %187 : vector<16x64xf32>
    %190 = arith.maximumf %189, %188 : vector<16x64xf32>
    %c0_182 = arith.constant 0 : index
    %c0_183 = arith.constant 0 : index
    %191 = vector.load %arg7[%c0_182, %c0_183] : memref<16x64xf32, #tpu.memory_space<vmem>>, vector<16x64xf32>
    tpu.vector_store %arg7[%c0_182, %c0_183], %190 {strides = array<i32>} : memref<16x64xf32, #tpu.memory_space<vmem>>, vector<16x64xf32>,
    %c0_184 = arith.constant 0 : index
    %c0_185 = arith.constant 0 : index
    %192 = tpu.strided_load %arg7[%c0_184, %c0_185] {strides = array<i32: 2, 1>} : memref<16x64xf32, #tpu.memory_space<vmem>>, vector<8x64xf32>
    %c1_186 = arith.constant 1 : index
    %c0_187 = arith.constant 0 : index
    %193 = tpu.strided_load %arg7[%c1_186, %c0_187] {strides = array<i32: 2, 1>} : memref<16x64xf32, #tpu.memory_space<vmem>>, vector<8x64xf32>
    %c1_i32_188 = arith.constant 1 : i32
    %194 = tpu.dynamic_rotate %193 by %c1_i32_188 dim 0 : vector<8x64xf32>, i32 -> vector<8x64xf32>
    %195 = tpu.iota {dimensions = array<i32: 0>} : vector<8x64xi32>
    %c0_i32_189 = arith.constant 0 : i32
    %196 = vector.broadcast %c0_i32_189 : i32 to vector<8x64xi32>
    %197 = arith.cmpi eq, %195, %196 : vector<8x64xi32>
    %cst_190 = arith.constant 0xFF800000 : f32
    %198 = vector.broadcast %cst_190 : f32 to vector<8x64xf32>
    %199 = arith.select %197, %198, %194 : vector<8x64xi1>, vector<8x64xf32>
    %200 = arith.maximumf %192, %193 : vector<8x64xf32>
    %201 = arith.maximumf %200, %199 : vector<8x64xf32>
    %c0_191 = arith.constant 0 : index
    %c0_192 = arith.constant 0 : index
    %c0_193 = arith.constant 0 : index
    %c0_194 = arith.constant 0 : index
    %202 = vector.load %arg5[%c0_191, %c0_192, %c0_193, %c0_194] : memref<1x4x8x64xf32, #tpu.memory_space<vmem>>, vector<1x1x8x64xf32>
    %203 = vector.shape_cast %202 : vector<1x1x8x64xf32> to vector<8x64xf32>
    %204 = vector.shape_cast %201 : vector<8x64xf32> to vector<1x1x8x64xf32>
    tpu.vector_store %arg5[%c0_191, %c0_192, %c0_193, %c0_194], %204 {strides = array<i32>} : memref<1x4x8x64xf32, #tpu.memory_space<vmem>>, vector<1x1x8x64xf32>,
    %c32_195 = arith.constant 32 : index
    %c0_196 = arith.constant 0 : index
    %205 = vector.load %arg6[%c32_195, %c0_196] : memref<144x64xf32, #tpu.memory_space<vmem>>, vector<16x64xf32>
    %c48 = arith.constant 48 : index
    %c0_197 = arith.constant 0 : index
    %206 = vector.load %arg6[%c48, %c0_197] : memref<144x64xf32, #tpu.memory_space<vmem>>, vector<16x64xf32>
    %c64 = arith.constant 64 : index
    %c0_198 = arith.constant 0 : index
    %207 = vector.load %arg6[%c64, %c0_198] : memref<144x64xf32, #tpu.memory_space<vmem>>, vector<16x64xf32>
    %208 = arith.maximumf %205, %206 : vector<16x64xf32>
    %209 = arith.maximumf %208, %207 : vector<16x64xf32>
    %c0_199 = arith.constant 0 : index
    %c0_200 = arith.constant 0 : index
    %210 = vector.load %arg7[%c0_199, %c0_200] : memref<16x64xf32, #tpu.memory_space<vmem>>, vector<16x64xf32>
    tpu.vector_store %arg7[%c0_199, %c0_200], %209 {strides = array<i32>} : memref<16x64xf32, #tpu.memory_space<vmem>>, vector<16x64xf32>,
    %c0_201 = arith.constant 0 : index
    %c0_202 = arith.constant 0 : index
    %211 = tpu.strided_load %arg7[%c0_201, %c0_202] {strides = array<i32: 2, 1>} : memref<16x64xf32, #tpu.memory_space<vmem>>, vector<8x64xf32>
    %c1_203 = arith.constant 1 : index
    %c0_204 = arith.constant 0 : index
    %212 = tpu.strided_load %arg7[%c1_203, %c0_204] {strides = array<i32: 2, 1>} : memref<16x64xf32, #tpu.memory_space<vmem>>, vector<8x64xf32>
    %c1_i32_205 = arith.constant 1 : i32
    %213 = tpu.dynamic_rotate %212 by %c1_i32_205 dim 0 : vector<8x64xf32>, i32 -> vector<8x64xf32>
    %214 = tpu.iota {dimensions = array<i32: 0>} : vector<8x64xi32>
    %c0_i32_206 = arith.constant 0 : i32
    %215 = vector.broadcast %c0_i32_206 : i32 to vector<8x64xi32>
    %216 = arith.cmpi eq, %214, %215 : vector<8x64xi32>
    %cst_207 = arith.constant 0xFF800000 : f32
    %217 = vector.broadcast %cst_207 : f32 to vector<8x64xf32>
    %218 = arith.select %216, %217, %213 : vector<8x64xi1>, vector<8x64xf32>
    %219 = arith.maximumf %211, %212 : vector<8x64xf32>
    %220 = arith.maximumf %219, %218 : vector<8x64xf32>
    %c0_208 = arith.constant 0 : index
    %c1_209 = arith.constant 1 : index
    %c0_210 = arith.constant 0 : index
    %c0_211 = arith.constant 0 : index
    %221 = vector.load %arg5[%c0_208, %c1_209, %c0_210, %c0_211] : memref<1x4x8x64xf32, #tpu.memory_space<vmem>>, vector<1x1x8x64xf32>
    %222 = vector.shape_cast %221 : vector<1x1x8x64xf32> to vector<8x64xf32>
    %223 = vector.shape_cast %220 : vector<8x64xf32> to vector<1x1x8x64xf32>
    tpu.vector_store %arg5[%c0_208, %c1_209, %c0_210, %c0_211], %223 {strides = array<i32>} : memref<1x4x8x64xf32, #tpu.memory_space<vmem>>, vector<1x1x8x64xf32>,
    %c64_212 = arith.constant 64 : index
    %c0_213 = arith.constant 0 : index
    %224 = vector.load %arg6[%c64_212, %c0_213] : memref<144x64xf32, #tpu.memory_space<vmem>>, vector<16x64xf32>
    %c80 = arith.constant 80 : index
    %c0_214 = arith.constant 0 : index
    %225 = vector.load %arg6[%c80, %c0_214] : memref<144x64xf32, #tpu.memory_space<vmem>>, vector<16x64xf32>
    %c96 = arith.constant 96 : index
    %c0_215 = arith.constant 0 : index
    %226 = vector.load %arg6[%c96, %c0_215] : memref<144x64xf32, #tpu.memory_space<vmem>>, vector<16x64xf32>
    %227 = arith.maximumf %224, %225 : vector<16x64xf32>
    %228 = arith.maximumf %227, %226 : vector<16x64xf32>
    %c0_216 = arith.constant 0 : index
    %c0_217 = arith.constant 0 : index
    %229 = vector.load %arg7[%c0_216, %c0_217] : memref<16x64xf32, #tpu.memory_space<vmem>>, vector<16x64xf32>
    tpu.vector_store %arg7[%c0_216, %c0_217], %228 {strides = array<i32>} : memref<16x64xf32, #tpu.memory_space<vmem>>, vector<16x64xf32>,
    %c0_218 = arith.constant 0 : index
    %c0_219 = arith.constant 0 : index
    %230 = tpu.strided_load %arg7[%c0_218, %c0_219] {strides = array<i32: 2, 1>} : memref<16x64xf32, #tpu.memory_space<vmem>>, vector<8x64xf32>
    %c1_220 = arith.constant 1 : index
    %c0_221 = arith.constant 0 : index
    %231 = tpu.strided_load %arg7[%c1_220, %c0_221] {strides = array<i32: 2, 1>} : memref<16x64xf32, #tpu.memory_space<vmem>>, vector<8x64xf32>
    %c1_i32_222 = arith.constant 1 : i32
    %232 = tpu.dynamic_rotate %231 by %c1_i32_222 dim 0 : vector<8x64xf32>, i32 -> vector<8x64xf32>
    %233 = tpu.iota {dimensions = array<i32: 0>} : vector<8x64xi32>
    %c0_i32_223 = arith.constant 0 : i32
    %234 = vector.broadcast %c0_i32_223 : i32 to vector<8x64xi32>
    %235 = arith.cmpi eq, %233, %234 : vector<8x64xi32>
    %cst_224 = arith.constant 0xFF800000 : f32
    %236 = vector.broadcast %cst_224 : f32 to vector<8x64xf32>
    %237 = arith.select %235, %236, %232 : vector<8x64xi1>, vector<8x64xf32>
    %238 = arith.maximumf %230, %231 : vector<8x64xf32>
    %239 = arith.maximumf %238, %237 : vector<8x64xf32>
    %c0_225 = arith.constant 0 : index
    %c2_226 = arith.constant 2 : index
    %c0_227 = arith.constant 0 : index
    %c0_228 = arith.constant 0 : index
    %240 = vector.load %arg5[%c0_225, %c2_226, %c0_227, %c0_228] : memref<1x4x8x64xf32, #tpu.memory_space<vmem>>, vector<1x1x8x64xf32>
    %241 = vector.shape_cast %240 : vector<1x1x8x64xf32> to vector<8x64xf32>
    %242 = vector.shape_cast %239 : vector<8x64xf32> to vector<1x1x8x64xf32>
    tpu.vector_store %arg5[%c0_225, %c2_226, %c0_227, %c0_228], %242 {strides = array<i32>} : memref<1x4x8x64xf32, #tpu.memory_space<vmem>>, vector<1x1x8x64xf32>,
    %c96_229 = arith.constant 96 : index
    %c0_230 = arith.constant 0 : index
    %243 = vector.load %arg6[%c96_229, %c0_230] : memref<144x64xf32, #tpu.memory_space<vmem>>, vector<16x64xf32>
    %c112 = arith.constant 112 : index
    %c0_231 = arith.constant 0 : index
    %244 = vector.load %arg6[%c112, %c0_231] : memref<144x64xf32, #tpu.memory_space<vmem>>, vector<16x64xf32>
    %c128 = arith.constant 128 : index
    %c0_232 = arith.constant 0 : index
    %245 = vector.load %arg6[%c128, %c0_232] : memref<144x64xf32, #tpu.memory_space<vmem>>, vector<16x64xf32>
    %246 = arith.maximumf %243, %244 : vector<16x64xf32>
    %247 = arith.maximumf %246, %245 : vector<16x64xf32>
    %c0_233 = arith.constant 0 : index
    %c0_234 = arith.constant 0 : index
    %248 = vector.load %arg7[%c0_233, %c0_234] : memref<16x64xf32, #tpu.memory_space<vmem>>, vector<16x64xf32>
    tpu.vector_store %arg7[%c0_233, %c0_234], %247 {strides = array<i32>} : memref<16x64xf32, #tpu.memory_space<vmem>>, vector<16x64xf32>,
    %c0_235 = arith.constant 0 : index
    %c0_236 = arith.constant 0 : index
    %249 = tpu.strided_load %arg7[%c0_235, %c0_236] {strides = array<i32: 2, 1>} : memref<16x64xf32, #tpu.memory_space<vmem>>, vector<8x64xf32>
    %c1_237 = arith.constant 1 : index
    %c0_238 = arith.constant 0 : index
    %250 = tpu.strided_load %arg7[%c1_237, %c0_238] {strides = array<i32: 2, 1>} : memref<16x64xf32, #tpu.memory_space<vmem>>, vector<8x64xf32>
    %c1_i32_239 = arith.constant 1 : i32
    %251 = tpu.dynamic_rotate %250 by %c1_i32_239 dim 0 : vector<8x64xf32>, i32 -> vector<8x64xf32>
    %252 = tpu.iota {dimensions = array<i32: 0>} : vector<8x64xi32>
    %c0_i32_240 = arith.constant 0 : i32
    %253 = vector.broadcast %c0_i32_240 : i32 to vector<8x64xi32>
    %254 = arith.cmpi eq, %252, %253 : vector<8x64xi32>
    %cst_241 = arith.constant 0xFF800000 : f32
    %255 = vector.broadcast %cst_241 : f32 to vector<8x64xf32>
    %256 = arith.select %254, %255, %251 : vector<8x64xi1>, vector<8x64xf32>
    %257 = arith.maximumf %249, %250 : vector<8x64xf32>
    %258 = arith.maximumf %257, %256 : vector<8x64xf32>
    %c0_242 = arith.constant 0 : index
    %c3_243 = arith.constant 3 : index
    %c0_244 = arith.constant 0 : index
    %c0_245 = arith.constant 0 : index
    %259 = vector.load %arg5[%c0_242, %c3_243, %c0_244, %c0_245] : memref<1x4x8x64xf32, #tpu.memory_space<vmem>>, vector<1x1x8x64xf32>
    %260 = vector.shape_cast %259 : vector<1x1x8x64xf32> to vector<8x64xf32>
    %261 = vector.shape_cast %258 : vector<8x64xf32> to vector<1x1x8x64xf32>
    tpu.vector_store %arg5[%c0_242, %c3_243, %c0_244, %c0_245], %261 {strides = array<i32>} : memref<1x4x8x64xf32, #tpu.memory_space<vmem>>, vector<1x1x8x64xf32>,
    return
  }
  func.func @transform_0(%arg0: i32, %arg1: i32) -> (i32, i32, i32, i32) {
    %c0_i32 = arith.constant 0 : i32
    %c0_i32_0 = arith.constant 0 : i32
    %c0_i32_1 = arith.constant 0 : i32
    %c0_i32_2 = arith.constant 0 : i32
    return %arg0, %c0_i32, %c0_i32_0, %c0_i32_1 : i32, i32, i32, i32
  }
  func.func @transform_1(%arg0: i32, %arg1: i32) -> (i32, i32, i32) {
    %c0_i32 = arith.constant 0 : i32
    %c0_i32_0 = arith.constant 0 : i32
    %c0_i32_1 = arith.constant 0 : i32
    %c0_i32_2 = arith.constant 0 : i32
    return %c0_i32, %c0_i32_0, %c0_i32_1 : i32, i32, i32
  }
  func.func @transform_2(%arg0: i32, %arg1: i32) -> (i32, i32) {
    %c0_i32 = arith.constant 0 : i32
    %c0_i32_0 = arith.constant 0 : i32
    %c0_i32_1 = arith.constant 0 : i32
    return %c0_i32, %c0_i32_0 : i32, i32
  }
  func.func @transform_3(%arg0: i32, %arg1: i32) -> (i32, i32, i32, i32) {
    %c0_i32 = arith.constant 0 : i32
    %c0_i32_0 = arith.constant 0 : i32
    %c0_i32_1 = arith.constant 0 : i32
    return %arg0, %arg1, %c0_i32, %c0_i32_0 : i32, i32, i32, i32
  }
}

</mosaic_0001>

<bundles_post_ra>
// kernel: thermal_module_forward.1
= control target key start
LH: loop header
LB: loop body
LE: loop exit
PB: predicated region body
PF: predicated region fallthrough
CT: control target
= control target key end

     0   :  { %8 = vsyncpa [#allocation5], 0  ;;  %s10819_s0 = inlined_call_operand.vmem [shape: bf16[2,20,19,12], index: 0, kind: input, shape index: {}]   ;;  %s10820_s1 = inlined_call_operand.vmem [shape: bf16[16,12,64], index: 1, kind: input, shape index: {}]   ;;  %s10821_s2 = inlined_call_operand.vmem [shape: f32[1,64], index: 2, kind: input, shape index: {}]   ;;  %s10822_s3 = inlined_call_operand.hbm [shape: f32[2,8,8,64], index: 3, kind: output, shape index: {}]  }
   0x1   :  { %10 = vsyncpa [#allocation5 + $0x1], 0  ;;  %s8448_s12 = smov 0   ;;  %s8450_s13 = smov 0  }
   0x2   :  { %s8452_s14 = smov 0   ;;  %s8454_s15 = smov 0  }
   0x3   :  { %s8456_s16 = smov 0   ;;  %s8458_s17 = smov 0  }
   0x4   :  { %s8460_s18 = smov 0   ;;  %s8462_s19 = smov 0  }
   0x5 LB: > { %s6736_s20 = sadd.s32 4294967295, %s8421_s19   ;;  %s6737_s21 = sadd.s32 4294967294, %s8421_s19   ;;  %s8421_s19 = sphi %s8462_s19, %s16_s19   ;;  %s8417_s18 = sphi %s8460_s18, %s10837_s18   ;;  %s8413_s17 = sphi %s8458_s17, %s10836_s17   ;;  %s8409_s16 = sphi %s8456_s16, %s10835_s16   ;;  %s8405_s15 = sphi %s8454_s15, %s10834_s15   ;;  %s8401_s14 = sphi %s8452_s14, %s10833_s14   ;;  %s8397_s13 = sphi %s8450_s13, %s10832_s13   ;;  %s8393_s12 = sphi %s8448_s12, %s10831_s12  }
   0x6   : > { %s25_s22 = sadd.s32 1, %s8413_s17  ;;  %s28_s23 = sadd.s32 1, %s8417_s18 }
   0x7   : > { %p26_p0 = scmp.ge.s32.totalorder %s25_s22, 2  ;;  %p115_p1 = scmp.ne.s32.totalorder %s8401_s14, %s8397_s13 }
   0x8   : > { %p116_p2 = scmp.eq.s32.totalorder %s6736_s20, 3  ;;  %p121_p5 = scmp.ne.s32.totalorder %s8397_s13, %s8393_s12 }
   0x9   : > { %s10839_s22 = smov (%p26_p0, %s25_s22), 0  ;;  %s10841_s23 = smov (!%p26_p0, %s28_s23), %s8417_s18 }
   0xa   : > { %s101_s24 = ssub.s32 %s8413_s17, %s10839_s22  ;;  %p8499_p3 = por %p116_p2, %p115_p1 }
   0xb   : > { %p30_p4 = scmp.ge.s32.totalorder %s10841_s23, 2  ;;  %p122_p6 = scmp.eq.s32.totalorder %s6737_s21, 3 }
   0xc   : > { %p6740_p7 = scmp.ge.s32.totalorder %s8421_s19, 1  ;;  %p154_p9 = scmp.lt.s32.totalorder %s8421_s19, 5 }
   0xd   : > { %s10843_s23 = smov (%p30_p4, %s10841_s23), 0  ;;  %p8508_p8 = por %p122_p6, %p121_p5 }
   0xe   : > { %s100_s27 = ssub.s32 %s8417_s18, %s10843_s23  ;;  %s105_s28 = sadd.s32 1, %s8401_s14 }
   0xf   : > { %s102_s29 = sor.u32 %s101_s24, %s100_s27  ;;  %p155_p10 = pnand %p6740_p7, %p154_p9 }
  0x10   : > { %p103_p11 = scmp.eq.s32.totalorder %s102_s29, 0  ;;  %s175_s4 = sand.u32 (!%p155_p10), 1, %s8397_s13   ;;  %v8423_v0 = vmov (!%p155_p10), 0.0   ;;  %v8275_v1 = vld [vmem:[%s10820_s1] sm:$0x3f] (!%p155_p10)   ;;  %vm287_vm0 = vcmask (!%p155_p10), 1045504  }
  0x11   : > { %158 = sbr.rel (%p155_p10) target bundleno = 898 (0x382), region = 32  ;;  %s8522_s5 = sshll.u32 (!%p155_p10), %s175_s4, 5  ;;  %7591 = vmatprep.subr.bf16.mxu0 (!%p155_p10), %v8423_v0  ;;  %7629 = vmatprep.subr.bf16.mxu1 (!%p155_p10), %v8423_v0  ;;  %vm8424_vm1 = vmmov (!%p155_p10), 0   ;;  %v289_v2 = vsel (!%p155_p10), %vm287_vm0, %v8275_v1, 0  ;;  %v8278_v3 = vld [vmem:[%s10820_s1 + $0x8] sm:$0x3f] (!%p155_p10)  }
  0x12   : > { %s8517_s30 = scalar_select %p103_p11, %s8401_s14, %s105_s28  }
  0x13   : > { %p178_p12 = scmp.lt.s32.totalorder (!%p155_p10), %s8409_s16, 1  ;;  %7593 = vmatprep.mubr.msk.bf16.mxu0 (!%p155_p10), %vm8424_vm1, %v8423_v0  ;;  %s7430_s8 = smul.u32 (!%p155_p10), 96, %s8405_s15  ;;  %7631 = vmatprep.mubr.msk.bf16.mxu1 (!%p155_p10), %vm8424_vm1, %v8423_v0  ;;  %v8277_v4 = vld [vmem:[%s10820_s1 + $0x10] sm:$0x3f] (!%p155_p10)   ;;  %v724_v5 = vsel (!%p155_p10), %vm287_vm0, %v8278_v3, 0  ;;  %vm259_vm2 = vcmask (!%p155_p10), 97280  }
  0x14   : > { %7592 = vmatpush3.bf16.msra.mxu0 (!%p155_p10), %v289_v2  ;;  %7630 = vmatpush3.bf16.msra.mxu1 (!%p155_p10), %v724_v5  ;;  %vm442_vm3 = vsmask.f32 (!%p155_p10), 3328  ;;  %v1068_v7 = vsel (!%p155_p10), %vm287_vm0, %v8277_v4, 0  ;;  %vm443_vm4 = vsmask.f32 (!%p155_p10), 7440  ;;  %vm939_vm6 = vcmask (!%p155_p10), 1042432  }
  0x15   : > { %7667 = vmatprep.subr.bf16.mxu0 (!%p155_p10), %v8423_v0  ;;  %7705 = vmatprep.subr.bf16.mxu1 (!%p155_p10), %v8423_v0  ;;  %v8280_v11 = vld [vmem:[%s10820_s1 + $0x18] sm:$0x3f] (!%p155_p10)   ;;  %vm8569_vm5 = vmor (!%p155_p10), %vm442_vm3, %vm443_vm4  ;;  %vm940_vm7 = vcmask (!%p155_p10), 1046532   ;;  %vm1256_vm9 = vsmask.f32 (!%p155_p10), 2304  ;;  %vm396_vm12 = vcmask (!%p155_p10), 523264  }
  0x16   : > { %v1574_v34 = vsel (!%p155_p10), %vm287_vm0, %v8280_v11, 0  ;;  %vm8689_vm8 = vmor (!%p155_p10), %vm939_vm6, %vm940_vm7  ;;  %vm1257_vm10 = vsmask.f32 (!%p155_p10), 6416  ;;  %p7420_p13 = scmp.ne.s32.totalorder (!%p155_p10), %s8405_s15, 0 }
  0x17   : > { %vm8726_vm11 = vmor (!%p155_p10), %vm1256_vm9, %vm1257_vm10 }
  0x18   : > { %s179_s9 = scalar_select %p178_p12, %s8409_s16, 1 }
  0x1a   : > { %s8199_s20 = smul.u32 240, %s179_s9 }
  0x1c   : > { %s182_s29 = scalar_lea.vmem %s10819_s0, %s8199_s20  ;;  %s10730_s20 = scalar_lea.vmem [#allocation4], %s8522_s5 }
  0x1d   : > { %s8548_s6 = scalar_lea.vmem %s182_s29, %s7430_s8 }
  0x1e   : > { %v8276_v6 = vld [vmem:[%s8548_s6] sm:$0xff]   ;;  %v417_v10 = vld [vmem:[%s8548_s6 + $0x8] sm:$0x1]  ;;  %v8279_v16 = vld [vmem:[%s8548_s6 + $0xc] sm:$0xff]  }
  0x1f   : > { %7594 = vmatmul.mubr.msk.bf16.vlgmr.msra.gmra.mrb[0].mxu0 %vm259_vm2, %v8276_v6  ;;  %v415_v8 = vld [vmem:[%s8548_s6] sm:$0xf]  ;;  %v416_v9 = vld [vmem:[%s8548_s6 + $0x4] sm:$0xf]  ;;  %v465_v17 = vshll.u32 %v417_v10, 16  ;;  %v8281_v62 = vld [vmem:[%s8548_s6 + $0x18] sm:$0xff]  }
  0x20   : > { %7668 = vmatpush3.bf16.msra.mxu0 %v1068_v7  ;;  %7597 = vmatprep.mubr.msk.bf16.mxu0 %vm8424_vm1, %v8423_v0  ;;  %v446_v12 = vshrl.u32 %v415_v8, 16  ;;  %v449_v13 = vshll.u32 %v415_v8, 16  ;;  %v455_v14 = vshll.u32 %v416_v9, 16  ;;  %v459_v15 = vshrl.u32 %v416_v9, 16  ;;  %v418_v18 = vld [vmem:[%s8548_s6 + $0xc] sm:$0xf] }
  0x21   : > { %7743 = vmatprep.subr.bf16.mxu0 %v8423_v0  ;;  %v419_v23 = vld [vmem:[%s8548_s6 + $0x10] sm:$0xf]  ;;  %v467_v24 = vrot.slane %v465_v17, 5  ;;  %v420_v25 = vld [vmem:[%s8548_s6 + $0x14] sm:$0x1]  ;;  %v470_v26 = vshrl.u32 %v418_v18, 16 }
  0x22   : > { %v448_v19 = vrot.slane %v446_v12, 4  ;;  %v451_v20 = vrot.slane %v449_v13, 5  ;;  %v457_v21 = vrot.slane %v455_v14, 5  ;;  %v461_v22 = vrot.slane %v459_v15, 4  ;;  %v421_v38 = vld [vmem:[%s8548_s6 + $0x18] sm:$0xf] }
  0x23   : > { %v473_v27 = vshll.u32 %v418_v18, 16  ;;  %v479_v28 = vshll.u32 %v419_v23, 16  ;;  %v483_v31 = vshrl.u32 %v419_v23, 16  ;;  %v489_v32 = vshll.u32 %v420_v25, 16  ;;  %v422_v43 = vld [vmem:[%s8548_s6 + $0x1c] sm:$0xf] }
  0x24   : > { %v452_v29 = vor.u32 %v451_v20, %v448_v19  ;;  %v462_v30 = vor.u32 %v461_v22, %v457_v21  ;;  %v472_v35 = vrot.slane %v470_v26, 4  ;;  %v423_v45 = vld [vmem:[%s8548_s6 + $0x20] sm:$0x1]  ;;  %v494_v46 = vshrl.u32 %v421_v38, 16  ;;  %v424_v57 = vld [vmem:[%s8548_s6 + $0x24] sm:$0xf] }
  0x25   : > { %v475_v36 = vrot.slane %v473_v27, 5  ;;  %v481_v37 = vrot.slane %v479_v28, 5  ;;  %v485_v41 = vrot.slane %v483_v31, 4  ;;  %v491_v42 = vrot.slane %v489_v32, 5  ;;  %v425_v61 = vld [vmem:[%s8548_s6 + $0x28] sm:$0xf] }
  0x26   : > { %v453_v39 = vrot.slane %v452_v29, 4  ;;  %v463_v40 = vrot.slane %v462_v30, 4  ;;  %v497_v47 = vshll.u32 %v421_v38, 16  ;;  %v503_v48 = vshll.u32 %v422_v43, 16  ;;  %v426_v9 = vld [vmem:[%s8548_s6 + $0x2c] sm:$0x1] }
  0x27   : > { %7598 = vmatmul.mubr.msk.bf16.gmra.mrb[4].mxu0 %vm259_vm2, %v8279_v16  ;;  %v476_v44 = vor.u32 %v475_v36, %v472_v35  ;;  %v486_v51 = vor.u32 %v485_v41, %v481_v37  ;;  %v507_v52 = vshrl.u32 %v422_v43, 16  ;;  %v496_v55 = vrot.slane %v494_v46, 4  ;;  %v427_v18 = vld [vmem:[%s8548_s6 + $0x30] sm:$0xf]  ;;  %v428_v19 = vld [vmem:[%s8548_s6 + $0x34] sm:$0xf] }
  0x28   : > { %v458_v49 = vsel %vm8569_vm5, %v453_v39, %v457_v21  ;;  %v468_v50 = vsel %vm8569_vm5, %v463_v40, %v467_v24  ;;  %7601 = vmatprep.mubr.msk.bf16.mxu0 %vm8424_vm1, %v8423_v0  ;;  %v499_v56 = vrot.slane %v497_v47, 5  ;;  %v505_v59 = vrot.slane %v503_v48, 5  ;;  %v8282_v20 = vld [vmem:[%s8548_s6 + $0x24] sm:$0xff]   ;;  %v429_v30 = vld [vmem:[%s8548_s6 + $0x38] sm:$0x1]  ;;  %v8283_v43 = vld [vmem:[%s8548_s6 + $0x30] sm:$0xff]  }
  0x29   : > { %v6767_v53 = vcombine.low %v458_v49, %v468_v50  ;;  %v477_v54 = vrot.slane %v476_v44, 4  ;;  %v487_v58 = vrot.slane %v486_v51, 4  ;;  %v509_v60 = vrot.slane %v507_v52, 4  ;;  %v430_v40 = vld [vmem:[%s8548_s6 + $0x3c] sm:$0xf] }
  0x2a   : > { %v500_v63 = vor.u32 %v499_v56, %v496_v55  ;;  %v513_v1 = vshll.u32 %v423_v45, 16  ;;  %v518_v2 = vshrl.u32 %v424_v57, 16  ;;  %v521_v3 = vshll.u32 %v424_v57, 16  ;;  %v431_v41 = vld [vmem:[%s8548_s6 + $0x40] sm:$0xf] }
  0x2b   : > { %7632 = vmatmul.mubr.msk.bf16.vlgmr.msra.gmra.mrb[0].mxu1 %vm259_vm2, %v6767_v53  ;;  %v482_v4 = vsel %vm8569_vm5, %v477_v54, %v481_v37  ;;  %v492_v5 = vsel %vm8569_vm5, %v487_v58, %v491_v42  ;;  %v510_v6 = vor.u32 %v509_v60, %v505_v59  ;;  %v527_v7 = vshll.u32 %v425_v61, 16  ;;  %v432_v52 = vld [vmem:[%s8548_s6 + $0x44] sm:$0x1]  ;;  %v433_v57 = vld [vmem:[%s8548_s6 + $0x48] sm:$0xf] }
  0x2c   : > { %7706 = vmatpush3.bf16.msra.mxu1 %v1574_v34  ;;  %7635 = vmatprep.mubr.msk.bf16.mxu1 %vm8424_vm1, %v8423_v0  ;;  %v501_v8 = vrot.slane %v500_v63, 4  ;;  %v531_v10 = vshrl.u32 %v425_v61, 16  ;;  %v6768_v11 = vcombine.low %v482_v4, %v492_v5  ;;  %v520_v12 = vrot.slane %v518_v2, 4  ;;  %v8284_v2 = vld [vmem:[%s8548_s6 + $0x3c] sm:$0xff]  }
  0x2d   : > { %7781 = vmatprep.subr.bf16.mxu1 %v8423_v0  ;;  %v523_v13 = vrot.slane %v521_v3, 5  ;;  %v511_v14 = vrot.slane %v510_v6, 4  ;;  %v515_v15 = vrot.slane %v513_v1, 5  ;;  %v529_v16 = vrot.slane %v527_v7, 5 }
  0x2e   : > { %v533_v17 = vrot.slane %v531_v10, 4  ;;  %v537_v21 = vshll.u32 %v426_v9, 16  ;;  %v506_v22 = vsel %vm8569_vm5, %v501_v8, %v505_v59  ;;  %v542_v24 = vshrl.u32 %v427_v18, 16 }
  0x2f   : > { %7602 = vmatmul.mubr.msk.bf16.gmra.mrb[8].mxu0 %vm259_vm2, %v8281_v62  ;;  %v524_v23 = vor.u32 %v523_v13, %v520_v12  ;;  %v545_v25 = vshll.u32 %v427_v18, 16  ;;  %v516_v26 = vsel %vm8569_vm5, %v511_v14, %v515_v15  ;;  %v551_v28 = vshll.u32 %v428_v19, 16  ;;  %v434_v62 = vld [vmem:[%s8548_s6 + $0x4c] sm:$0xf]  ;;  %v435_v13 = vld [vmem:[%s8548_s6 + $0x50] sm:$0x1] }
  0x30   : > { %7605 = vmatprep.mubr.msk.bf16.mxu0 %vm8424_vm1, %v8423_v0  ;;  %v534_v27 = vor.u32 %v533_v17, %v529_v16  ;;  %v555_v29 = vshrl.u32 %v428_v19, 16  ;;  %v6769_v31 = vcombine.low %v506_v22, %v516_v26  ;;  %v544_v34 = vrot.slane %v542_v24, 4 }
  0x31   : > { %v525_v32 = vrot.slane %v524_v23, 4  ;;  %v547_v35 = vrot.slane %v545_v25, 5  ;;  %v539_v37 = vrot.slane %v537_v21, 5  ;;  %v553_v38 = vrot.slane %v551_v28, 5  ;;  %v8285_v25 = vld [vmem:[%s8548_s6 + $0x48] sm:$0xff]  }
  0x32   : > { %v535_v36 = vrot.slane %v534_v27, 4  ;;  %v557_v39 = vrot.slane %v555_v29, 4  ;;  %v561_v42 = vshll.u32 %v429_v30, 16  ;;  %v566_v46 = vshrl.u32 %v430_v40, 16 }
  0x33   : > { %7636 = vmatmul.mubr.msk.bf16.gmra.mrb[4].mxu1 %vm259_vm2, %v6768_v11  ;;  %v530_v44 = vsel %vm8569_vm5, %v525_v32, %v529_v16  ;;  %v548_v45 = vor.u32 %v547_v35, %v544_v34  ;;  %v569_v47 = vshll.u32 %v430_v40, 16  ;;  %v575_v50 = vshll.u32 %v431_v41, 16  ;;  %v436_v16 = vld [vmem:[%s8548_s6 + $0x54] sm:$0xf] }
  0x34   : > { %7639 = vmatprep.mubr.msk.bf16.mxu1 %vm8424_vm1, %v8423_v0  ;;  %v540_v48 = vsel %vm8569_vm5, %v535_v36, %v539_v37  ;;  %v558_v49 = vor.u32 %v557_v39, %v553_v38  ;;  %v579_v51 = vshrl.u32 %v431_v41, 16  ;;  %v563_v55 = vrot.slane %v561_v42, 5  ;;  %v439_v41 = vld [vmem:[%s8548_s6 + $0x60] sm:$0xf]  ;;  %v440_v42 = vld [vmem:[%s8548_s6 + $0x64] sm:$0xf] }
  0x35   : > { %v6770_v53 = vcombine.low %v530_v44, %v540_v48  ;;  %v549_v54 = vrot.slane %v548_v45, 4  ;;  %v568_v56 = vrot.slane %v566_v46, 4  ;;  %v571_v59 = vrot.slane %v569_v47, 5  ;;  %v8286_v46 = vld [vmem:[%s8548_s6 + $0x54] sm:$0xff]  }
  0x36   : > { %v559_v58 = vrot.slane %v558_v49, 4  ;;  %v577_v60 = vrot.slane %v575_v50, 5  ;;  %v581_v61 = vrot.slane %v579_v51, 4  ;;  %v590_v63 = vshrl.u32 %v433_v57, 16  ;;  %v886_v49 = vld [vmem:[%s8548_s6 + $0x4] sm:$0xf] }
  0x37   : > { %7606 = vmatmul.mubr.msk.bf16.gmra.mrb[12].mxu0 %vm259_vm2, %v8282_v20  ;;  %v593_v1 = vshll.u32 %v433_v57, 16  ;;  %v585_v3 = vshll.u32 %v432_v52, 16  ;;  %v599_v4 = vshll.u32 %v434_v62, 16  ;;  %v603_v5 = vshrl.u32 %v434_v62, 16  ;;  %v437_v20 = vld [vmem:[%s8548_s6 + $0x58] sm:$0xf] }
  0x38   : > { %7609 = vmatprep.mubr.msk.bf16.mxu0 %vm8424_vm1, %v8423_v0  ;;  %v554_v6 = vsel %vm8569_vm5, %v549_v54, %v553_v38  ;;  %v564_v7 = vsel %vm8569_vm5, %v559_v58, %v563_v55  ;;  %v572_v8 = vor.u32 %v571_v59, %v568_v56  ;;  %v582_v9 = vor.u32 %v581_v61, %v577_v60  ;;  %v438_v38 = vld [vmem:[%s8548_s6 + $0x5c] sm:$0x1]  ;;  %v1229_v54 = vld [vmem:[%s8548_s6] sm:$0xe]  ;;  %v1230_v59 = vld [vmem:[%s8548_s6 + $0x4] sm:$0xf] }
  0x39   : > { %v592_v10 = vrot.slane %v590_v63, 4  ;;  %v595_v11 = vrot.slane %v593_v1, 5  ;;  %v6771_v12 = vcombine.low %v554_v6, %v564_v7  ;;  %v601_v14 = vrot.slane %v599_v4, 5  ;;  %v885_v57 = vld [vmem:[%s8548_s6] sm:$0xe] }
  0x3a   : > { %v605_v15 = vrot.slane %v603_v5, 4  ;;  %v573_v17 = vrot.slane %v572_v8, 4  ;;  %v583_v18 = vrot.slane %v582_v9, 4  ;;  %v587_v19 = vrot.slane %v585_v3, 5  ;;  %v887_v62 = vld [vmem:[%s8548_s6 + $0x8] sm:$0x1] }
  0x3b   : > { %7640 = vmatmul.mubr.msk.bf16.gmra.mrb[8].mxu1 %vm259_vm2, %v6769_v31  ;;  %v596_v21 = vor.u32 %v595_v11, %v592_v10  ;;  %v609_v22 = vshll.u32 %v435_v13, 16  ;;  %v614_v23 = vshrl.u32 %v436_v16, 16  ;;  %v617_v24 = vshll.u32 %v436_v16, 16  ;;  %v1231_v7 = vld [vmem:[%s8548_s6 + $0x8] sm:$0x3]  ;;  %v8287_v13 = vld [vmem:[%s8548_s6 + $0x60] sm:$0xff]  }
  0x3c   : > { %7643 = vmatprep.mubr.msk.bf16.mxu1 %vm8424_vm1, %v8423_v0  ;;  %v606_v26 = vor.u32 %v605_v15, %v601_v14  ;;  %v623_v27 = vshll.u32 %v437_v20, 16  ;;  %v627_v28 = vshrl.u32 %v437_v20, 16  ;;  %v578_v29 = vsel %vm8569_vm5, %v573_v17, %v577_v60  ;;  %v889_v20 = vld [vmem:[%s8548_s6 + $0x10] sm:$0xf] }
  0x3d   : > { %v588_v30 = vsel %vm8569_vm5, %v583_v18, %v587_v19  ;;  %v597_v31 = vrot.slane %v596_v21, 4  ;;  %v611_v32 = vrot.slane %v609_v22, 5  ;;  %v616_v34 = vrot.slane %v614_v23, 4 }
  0x3e   : > { %v619_v35 = vrot.slane %v617_v24, 5  ;;  %v6772_v36 = vcombine.low %v578_v29, %v588_v30  ;;  %v607_v37 = vrot.slane %v606_v26, 4  ;;  %v8653_v39 = vrot.slane %v623_v27, 5  ;;  %v1232_v29 = vld [vmem:[%s8548_s6 + $0xc] sm:$0xe] }
  0x3f   : > { %7610 = vmatmul.mubr.msk.bf16.gmra.mrb[16].mxu0 %vm259_vm2, %v8283_v43  ;;  %v629_v40 = vrot.slane %v627_v28, 4  ;;  %v602_v43 = vsel %vm8569_vm5, %v597_v31, %v601_v14  ;;  %v633_v45 = vshll.u32 %v438_v38, 16  ;;  %v638_v50 = vshrl.u32 %v439_v41, 16  ;;  %v8288_v28 = vld [vmem:[%s10820_s1 + $0x20] sm:$0x3f]  }
  0x40   : > { %7613 = vmatprep.mubr.msk.bf16.mxu0 %vm8424_vm1, %v8423_v0  ;;  %v620_v44 = vor.u32 %v619_v35, %v616_v34  ;;  %v612_v47 = vsel %vm8569_vm5, %v607_v37, %v611_v32  ;;  %v641_v51 = vshll.u32 %v439_v41, 16  ;;  %v647_v52 = vshll.u32 %v440_v42, 16  ;;  %v888_v34 = vld [vmem:[%s8548_s6 + $0xc] sm:$0xe] }
  0x41   : > { %v630_v48 = vor.u32 %v629_v40, %v8653_v39  ;;  %v6773_v55 = vcombine.low %v602_v43, %v612_v47  ;;  %v635_v56 = vrot.slane %v633_v45, 5  ;;  %v944_v58 = vrot.slane %v886_v49, 5 }
  0x42   : > { %v621_v60 = vrot.slane %v620_v44, 4  ;;  %v640_v63 = vrot.slane %v638_v50, 4  ;;  %v643_v1 = vrot.slane %v641_v51, 5  ;;  %v8677_v3 = vrot.slane %v647_v52, 5  ;;  %v892_v44 = vld [vmem:[%s8548_s6 + $0x1c] sm:$0xf] }
  0x43   : > { %7644 = vmatmul.mubr.msk.bf16.gmra.mrb[12].mxu1 %vm259_vm2, %v6770_v53  ;;  %v651_v53 = vshrl.u32 %v440_v42, 16  ;;  %v631_v61 = vrot.slane %v630_v48, 4  ;;  %v1260_v5 = vshrl.u32 %v1229_v54, 16  ;;  %v1263_v6 = vshll.u32 %v1229_v54, 16  ;;  %v891_v54 = vld [vmem:[%s8548_s6 + $0x18] sm:$0xe] }
  0x44   : > { %7647 = vmatprep.mubr.msk.bf16.mxu1 %vm8424_vm1, %v8423_v0  ;;  %v1269_v8 = vshrl.u32 %v1230_v59, 16  ;;  %v1272_v9 = vshll.u32 %v1230_v59, 16  ;;  %v6786_v10 = vrot.slane %v885_v57, 9  ;;  %v946_v11 = vrot.slane %v944_v58, 4 }
  0x45   : > { %v653_v4 = vrot.slane %v651_v53, 4  ;;  %v626_v14 = vsel %vm8569_vm5, %v621_v60, %v8653_v39  ;;  %v636_v15 = vsel %vm8569_vm5, %v631_v61, %v635_v56  ;;  %v644_v17 = vor.u32 %v643_v1, %v640_v63  ;;  %v890_v39 = vld [vmem:[%s8548_s6 + $0x14] sm:$0x1] }
  0x46   : > { %v1262_v21 = vrot.slane %v1260_v5, 5  ;;  %v1265_v22 = vrot.slane %v1263_v6, 6  ;;  %v1279_v23 = vshrl.u32 %v1231_v7, 16  ;;  %v1271_v24 = vrot.slane %v1269_v8, 5  ;;  %v1234_v56 = vld [vmem:[%s8548_s6 + $0x14] sm:$0x3] }
  0x47   : > { %7614 = vmatmul.mubr.msk.bf16.gmra.mrb[20].mxu0 %vm259_vm2, %v8284_v2  ;;  %v441_v2 = vld [vmem:[%s8548_s6 + $0x68] sm:$0x1]  ;;  %v654_v19 = vor.u32 %v653_v4, %v8677_v3  ;;  %v1282_v26 = vshll.u32 %v1231_v7, 16  ;;  %v945_v27 = vsel %vm8689_vm8, %v6786_v10, %v944_v58  ;;  %v6774_v30 = vcombine.low %v626_v14, %v636_v15  ;;  %v1235_v8 = vld [vmem:[%s8548_s6 + $0x18] sm:$0xe] }
  0x48   : > { %7617 = vmatprep.mubr.msk.bf16.mxu0 %vm8424_vm1, %v8423_v0  ;;  %v657_v18 = vshll.u32 %v441_v2, 16  ;;  %v951_v35 = vrot.slane %v889_v20, 5  ;;  %v645_v37 = vrot.slane %v644_v17, 4  ;;  %v1266_v40 = vor.u32 %v1265_v22, %v1262_v21 }
  0x49   : > { %v655_v38 = vrot.slane %v654_v19, 4  ;;  %v1281_v41 = vrot.slane %v1279_v23, 5  ;;  %v1284_v43 = vrot.slane %v1282_v26, 6  ;;  %v1288_v45 = vshrl.u32 %v1232_v29, 16 }
  0x4a   : > { %v659_v32 = vrot.slane %v657_v18, 5  ;;  %v1838_v47 = vsel %vm287_vm0, %v8288_v28, 0  ;;  %v6787_v51 = vrot.slane %v888_v34, 9  ;;  %v953_v52 = vrot.slane %v951_v35, 4  ;;  %v8289_v28 = vld [vmem:[%s10820_s1 + $0x28] sm:$0x3f]  }
  0x4b   : > { %7648 = vmatmul.mubr.msk.bf16.gmra.mrb[16].mxu1 %vm259_vm2, %v6771_v12  ;;  %v947_v12 = vrot.slane %v887_v62, 5  ;;  %v954_v53 = vrot.slane %v890_v39, 5  ;;  %v650_v57 = vsel %vm8569_vm5, %v645_v37, %v8677_v3  ;;  %v1267_v59 = vrot.slane %v1266_v40, 4  ;;  %v896_v37 = vld [vmem:[%s8548_s6 + $0x2c] sm:$0x1] }
  0x4c   : > { %7651 = vmatprep.mubr.msk.bf16.mxu1 %vm8424_vm1, %v8423_v0  ;;  %v660_v58 = vsel %vm8569_vm5, %v655_v38, %v659_v32  ;;  %v958_v60 = vrot.slane %v892_v44, 5  ;;  %v1285_v62 = vor.u32 %v1284_v43, %v1281_v41  ;;  %v1290_v63 = vrot.slane %v1288_v45, 5  ;;  %v1239_v38 = vld [vmem:[%s8548_s6 + $0x28] sm:$0xf] }
  0x4d   : > { %v948_v31 = vsel %vm8689_vm8, %v946_v11, %v947_v12  ;;  %v1307_v6 = vshrl.u32 %v1234_v56, 16  ;;  %v1310_v3 = vshll.u32 %v1234_v56, 16  ;;  %v6775_v7 = vcombine.low %v650_v57, %v660_v58 }
  0x4e   : > { %v6797_v50 = vcombine.low %v945_v27, %v948_v31  ;;  %v955_v10 = vsel %vm8689_vm8, %v953_v52, %v954_v53  ;;  %v6788_v11 = vrot.slane %v891_v54, 9  ;;  %v960_v17 = vrot.slane %v958_v60, 4  ;;  %v1240_v52 = vld [vmem:[%s8548_s6 + $0x2c] sm:$0x3] }
  0x4f   : > { %7618 = vmatmul.mubr.msk.bf16.gmra.mrb[24].mxu0 %vm259_vm2, %v8285_v25  ;;  %v1274_v25 = vrot.slane %v1272_v9, 6  ;;  %v952_v9 = vsel %vm8689_vm8, %v6787_v51, %v951_v35  ;;  %v1309_v20 = vrot.slane %v1307_v6, 5  ;;  %v1312_v21 = vrot.slane %v1310_v3, 6 }
  0x50   : > { %7621 = vmatprep.mubr.msk.bf16.mxu0 %vm8424_vm1, %v8423_v0  ;;  %v1316_v22 = vshrl.u32 %v1235_v8, 16  ;;  %v6798_v23 = vcombine.low %v952_v9, %v955_v10  ;;  %v959_v32 = vsel %vm8689_vm8, %v6788_v11, %v958_v60  ;;  %v1353_v53 = vshrl.u32 %v1239_v38, 16  ;;  %v1241_v10 = vld [vmem:[%s8548_s6 + $0x30] sm:$0xe] }
  0x51   : > { %v1275_v42 = vor.u32 %v1274_v25, %v1271_v24  ;;  %v895_v24 = vld [vmem:[%s8548_s6 + $0x28] sm:$0xf]  ;;  %v1319_v25 = vshll.u32 %v1235_v8, 16  ;;  %v1313_v40 = vor.u32 %v1312_v21, %v1309_v20  ;;  %v1356_v54 = vshll.u32 %v1239_v38, 16  ;;  %v899_v20 = vld [vmem:[%s8548_s6 + $0x38] sm:$0x1] }
  0x52   : > { %v965_v41 = vrot.slane %v895_v24, 5  ;;  %v968_v58 = vrot.slane %v896_v37, 5  ;;  %v1363_v6 = vshrl.u32 %v1240_v52, 16  ;;  %v1355_v3 = vrot.slane %v1353_v53, 5 }
  0x53   : > { %7652 = vmatmul.mubr.msk.bf16.gmra.mrb[20].mxu1 %vm259_vm2, %v6772_v36  ;;  %v1233_v36 = vld [vmem:[%s8548_s6 + $0x10] sm:$0xf]  ;;  %v1277_v61 = vrot.slane %v1275_v42, 4  ;;  %v1276_v14 = vsel %vm8726_vm11, %v1267_v59, %v1275_v42  ;;  %v1318_v42 = vrot.slane %v1316_v22, 5  ;;  %v1321_v43 = vrot.slane %v1319_v25, 6 }
  0x54   : > { %7655 = vmatprep.mubr.msk.bf16.mxu1 %vm8424_vm1, %v8423_v0  ;;  %v1297_v48 = vshrl.u32 %v1233_v36, 16  ;;  %v1300_v49 = vshll.u32 %v1233_v36, 16  ;;  %v894_v36 = vld [vmem:[%s8548_s6 + $0x24] sm:$0xe]  ;;  %v967_v57 = vrot.slane %v965_v41, 4  ;;  %v1366_v8 = vshll.u32 %v1240_v52, 16 }
  0x55   : > { %v1286_v15 = vsel %vm8726_vm11, %v1277_v61, %v1285_v62  ;;  %v6789_v56 = vrot.slane %v894_v36, 9  ;;  %v1322_v60 = vor.u32 %v1321_v43, %v1318_v42  ;;  %v1365_v22 = vrot.slane %v1363_v6, 5  ;;  %v901_v25 = vld [vmem:[%s8548_s6 + $0x40] sm:$0xf]  ;;  %v1243_v36 = vld [vmem:[%s8548_s6 + $0x38] sm:$0x3] }
  0x56   : > { %v1299_v4 = vrot.slane %v1297_v48, 5  ;;  %v1302_v5 = vrot.slane %v1300_v49, 6  ;;  %v6818_v31 = vcombine.low %v1276_v14, %v1286_v15  ;;  %v1242_v15 = vld [vmem:[%s8548_s6 + $0x34] sm:$0xf]  ;;  %v1368_v24 = vrot.slane %v1366_v8, 6 }
  0x57   : > { %7622 = vmatmul.mubr.msk.bf16.gmra.mrb[28].mxu0 %vm259_vm2, %v8286_v46  ;;  %v1291_v46 = vshll.u32 %v1232_v29, 16  ;;  %v1237_v29 = vld [vmem:[%s8548_s6 + $0x20] sm:$0x3]  ;;  %v966_v9 = vsel %vm8689_vm8, %v6789_v56, %v965_v41  ;;  %v979_v41 = vrot.slane %v901_v25, 5 }
  0x58   : > { %7625 = vmatprep.mubr.msk.bf16.mxu0 %vm8424_vm1, %v8423_v0  ;;  %v8744_v19 = vor.u32 %v1302_v5, %v1299_v4  ;;  %v1369_v43 = vor.u32 %v1368_v24, %v1365_v22 }
  0x59   : > { %v1293_v1 = vrot.slane %v1291_v46, 6  ;;  %v1335_v46 = vshrl.u32 %v1237_v29, 16 }
  0x5a   : > { %v1305_v39 = vrot.slane %v8744_v19, 4 }
  0x5b   : > { %7656 = vmatmul.mubr.msk.bf16.gmra.mrb[24].mxu1 %vm259_vm2, %v6773_v55  ;;  %v893_v55 = vld [vmem:[%s8548_s6 + $0x20] sm:$0x1]  ;;  %v1294_v18 = vor.u32 %v1293_v1, %v1290_v63  ;;  %v1337_v62 = vrot.slane %v1335_v46, 5  ;;  %v898_v63 = vld [vmem:[%s8548_s6 + $0x34] sm:$0xf] }
  0x5c   : > { %7659 = vmatprep.mubr.msk.bf16.mxu1 %vm8424_vm1, %v8423_v0  ;;  %v961_v12 = vrot.slane %v893_v55, 5  ;;  %v1314_v59 = vsel %vm8726_vm11, %v1305_v39, %v1313_v40  ;;  %v972_v14 = vrot.slane %v898_v63, 5  ;;  %v902_v40 = vld [vmem:[%s8548_s6 + $0x44] sm:$0x1] }
  0x5d   : > { %v1295_v35 = vrot.slane %v1294_v18, 4 }
  0x5e   : > { %v962_v34 = vsel %vm8689_vm8, %v960_v17, %v961_v12  ;;  %v969_v12 = vsel %vm8689_vm8, %v967_v57, %v968_v58  ;;  %v974_v38 = vrot.slane %v972_v14, 4  ;;  %v981_v58 = vrot.slane %v979_v41, 4 }
  0x5f   : > { %7626 = vmatmul.mubr.msk.bf16.gmra.mrb[32].mxu0 %vm259_vm2, %v8287_v13  ;;  %v1236_v13 = vld [vmem:[%s8548_s6 + $0x1c] sm:$0xf]  ;;  %v6799_v51 = vcombine.low %v959_v32, %v962_v34  ;;  %v1304_v55 = vsel %vm8726_vm11, %v1295_v35, %v8744_v19  ;;  %v897_v19 = vld [vmem:[%s8548_s6 + $0x30] sm:$0xe]  ;;  %v975_v34 = vrot.slane %v899_v20, 5 }
  0x60   : > { %7669 = vmatprep.mubr.msk.bf16.mxu0 %vm8424_vm1, %v8423_v0  ;;  %v1325_v26 = vshrl.u32 %v1236_v13, 16  ;;  %v1328_v27 = vshll.u32 %v1236_v13, 16  ;;  %v6819_v11 = vcombine.low %v1304_v55, %v1314_v59  ;;  %v1323_v13 = vrot.slane %v1322_v60, 4  ;;  %v900_v35 = vld [vmem:[%s8548_s6 + $0x3c] sm:$0xe] }
  0x61   : > { %v6790_v32 = vrot.slane %v897_v19, 9  ;;  %v976_v52 = vsel %vm8689_vm8, %v974_v38, %v975_v34  ;;  %v6791_v53 = vrot.slane %v900_v35, 9  ;;  %v1245_v55 = vld [vmem:[%s8548_s6 + $0x40] sm:$0xf]  ;;  %v982_v59 = vrot.slane %v902_v40, 5 }
  0x62   : > { %v1327_v44 = vrot.slane %v1325_v26, 5  ;;  %v1330_v45 = vrot.slane %v1328_v27, 6  ;;  %v1372_v26 = vshrl.u32 %v1241_v10, 16  ;;  %v1375_v27 = vshll.u32 %v1241_v10, 16  ;;  %v905_v20 = vld [vmem:[%s8548_s6 + $0x50] sm:$0x1] }
  0x63   : > { %7660 = vmatmul.mubr.msk.bf16.gmra.mrb[28].mxu1 %vm259_vm2, %v6774_v30  ;;  %v1238_v30 = vld [vmem:[%s8548_s6 + $0x24] sm:$0xe]  ;;  %v1412_v8 = vshll.u32 %v1245_v55, 16  ;;  %v980_v10 = vsel %vm8689_vm8, %v6791_v53, %v979_v41  ;;  %v989_v35 = vrot.slane %v905_v20, 5  ;;  %v1249_v41 = vld [vmem:[%s8548_s6 + $0x50] sm:$0x3] }
  0x64   : > { %7663 = vmatprep.mubr.msk.bf16.mxu1 %vm8424_vm1, %v8423_v0  ;;  %v1344_v48 = vshrl.u32 %v1238_v30, 16  ;;  %v1347_v49 = vshll.u32 %v1238_v30, 16  ;;  %v1331_v61 = vor.u32 %v1330_v45, %v1327_v44  ;;  %v6800_v30 = vcombine.low %v966_v9, %v969_v12  ;;  %v903_v12 = vld [vmem:[%s8548_s6 + $0x48] sm:$0xe] }
  0x65   : > { %v1374_v44 = vrot.slane %v1372_v26, 5  ;;  %v1377_v45 = vrot.slane %v1375_v27, 6  ;;  %v1414_v25 = vrot.slane %v1412_v8, 6 }
  0x66   : > { %v1346_v4 = vrot.slane %v1344_v48, 5  ;;  %v1349_v5 = vrot.slane %v1347_v49, 6  ;;  %v1333_v17 = vrot.slane %v1331_v61, 4  ;;  %v1391_v48 = vshrl.u32 %v1243_v36, 16 }
  0x67   : > { %7670 = vmatmul.mubr.msk.bf16.vlgmr.msra.gmra.mrb[36].mxu0 %vm259_vm2, %v6797_v50  ;;  %v2305_v50 = vsel %vm287_vm0, %v8289_v28, 0  ;;  %v1381_v28 = vshrl.u32 %v1242_v15, 16  ;;  %v1394_v49 = vshll.u32 %v1243_v36, 16  ;;  %v1378_v60 = vor.u32 %v1377_v45, %v1374_v44  ;;  %v907_v36 = vld [vmem:[%s8548_s6 + $0x58] sm:$0xf] }
  0x68   : > { %7744 = vmatpush3.bf16.msra.mxu0 %v1838_v47  ;;  %7673 = vmatprep.mubr.msk.bf16.mxu0 %vm8424_vm1, %v8423_v0  ;;  %v1338_v47 = vshll.u32 %v1237_v29, 16  ;;  %v1350_v21 = vor.u32 %v1349_v5, %v1346_v4  ;;  %v1384_v29 = vshll.u32 %v1242_v15, 16  ;;  %v904_v4 = vld [vmem:[%s8548_s6 + $0x4c] sm:$0xf] }
  0x69   : > { %7819 = vmatprep.subr.bf16.mxu0 %v8423_v0  ;;  %v1383_v46 = vrot.slane %v1381_v28, 5  ;;  %v1396_v63 = vrot.slane %v1394_v49, 6  ;;  %v1379_v15 = vrot.slane %v1378_v60, 4  ;;  %v986_v19 = vrot.slane %v904_v4, 5  ;;  %v906_v49 = vld [vmem:[%s8548_s6 + $0x54] sm:$0xe] }
  0x6a   : > { %v1340_v1 = vrot.slane %v1338_v47, 6  ;;  %v1351_v39 = vrot.slane %v1350_v21, 4  ;;  %v1386_v47 = vrot.slane %v1384_v29, 6 }
  0x6b   : > { %7664 = vmatmul.mubr.msk.bf16.gmra.mrb[32].mxu1 %vm259_vm2, %v6775_v7  ;;  %v1358_v7 = vrot.slane %v1356_v54, 6  ;;  %v1244_v54 = vld [vmem:[%s8548_s6 + $0x3c] sm:$0xe]  ;;  %v988_v34 = vrot.slane %v986_v19, 4 }
  0x6c   : > { %7707 = vmatprep.mubr.msk.bf16.mxu1 %vm8424_vm1, %v8423_v0  ;;  %v1341_v18 = vor.u32 %v1340_v1, %v1337_v62  ;;  %v1393_v62 = vrot.slane %v1391_v48, 5  ;;  %v1400_v5 = vshrl.u32 %v1244_v54, 16  ;;  %v1403_v6 = vshll.u32 %v1244_v54, 16 }
  0x6e   : > { %v1342_v37 = vsel %vm8726_vm11, %v1333_v17, %v1341_v18  ;;  %v1397_v18 = vor.u32 %v1396_v63, %v1393_v62  ;;  %v1402_v21 = vrot.slane %v1400_v5, 5  ;;  %v1405_v22 = vrot.slane %v1403_v6, 6 }
  0x6f   : > { %7674 = vmatmul.mubr.msk.bf16.gmra.mrb[40].mxu0 %vm259_vm2, %v6798_v23  ;;  %v1359_v23 = vor.u32 %v1358_v7, %v1355_v3  ;;  %v1409_v3 = vshrl.u32 %v1245_v55, 16  ;;  %v1246_v7 = vld [vmem:[%s8548_s6 + $0x44] sm:$0x3]  ;;  %v990_v55 = vsel %vm8689_vm8, %v988_v34, %v989_v35  ;;  %v6793_v62 = vrot.slane %v906_v49, 9 }
  0x70   : > { %7677 = vmatprep.mubr.msk.bf16.mxu0 %vm8424_vm1, %v8423_v0  ;;  %v1419_v24 = vshrl.u32 %v1246_v7, 16  ;;  %v1422_v26 = vshll.u32 %v1246_v7, 16 }
  0x71   : > { %v1361_v42 = vrot.slane %v1359_v23, 4  ;;  %v1360_v56 = vsel %vm8726_vm11, %v1351_v39, %v1359_v23  ;;  %v1411_v23 = vrot.slane %v1409_v3, 5  ;;  %v1406_v39 = vor.u32 %v1405_v22, %v1402_v21  ;;  %v910_v3 = vld [vmem:[%s8548_s6 + $0x64] sm:$0xf] }
  0x72   : > { %v1421_v40 = vrot.slane %v1419_v24, 5  ;;  %v1000_v21 = vrot.slane %v910_v3, 5 }
  0x73   : > { %7708 = vmatmul.mubr.msk.bf16.vlgmr.msra.gmra.mrb[36].mxu1 %vm259_vm2, %v6818_v31  ;;  %v1332_v31 = vsel %vm8726_vm11, %v1323_v13, %v1331_v61  ;;  %v1370_v57 = vsel %vm8726_vm11, %v1361_v42, %v1369_v43  ;;  %v1387_v61 = vor.u32 %v1386_v47, %v1383_v46  ;;  %v1247_v13 = vld [vmem:[%s8548_s6 + $0x48] sm:$0xe]  ;;  %v1415_v42 = vor.u32 %v1414_v25, %v1411_v23  ;;  %v911_v23 = vld [vmem:[%s8548_s6 + $0x68] sm:$0x1] }
  0x74   : > { %7782 = vmatpush3.bf16.msra.mxu1 %v2305_v50  ;;  %7711 = vmatprep.mubr.msk.bf16.mxu1 %vm8424_vm1, %v8423_v0  ;;  %v6820_v50 = vcombine.low %v1332_v31, %v1342_v37  ;;  %v6821_v9 = vcombine.low %v1360_v56, %v1370_v57  ;;  %v1428_v27 = vshrl.u32 %v1247_v13, 16  ;;  %v1431_v28 = vshll.u32 %v1247_v13, 16  ;;  %v1250_v56 = vld [vmem:[%s8548_s6 + $0x54] sm:$0xe] }
  0x75   : > { %7857 = vmatprep.subr.bf16.mxu1 %v8423_v0  ;;  %v1389_v17 = vrot.slane %v1387_v61, 4  ;;  %v1388_v37 = vsel %vm8726_vm11, %v1379_v15, %v1387_v61  ;;  %v1424_v43 = vrot.slane %v1422_v26, 6  ;;  %v993_v46 = vrot.slane %v907_v36, 5  ;;  %v1251_v61 = vld [vmem:[%s8548_s6 + $0x58] sm:$0xf] }
  0x76   : > { %v1430_v44 = vrot.slane %v1428_v27, 5  ;;  %v1433_v45 = vrot.slane %v1431_v28, 6  ;;  %v1407_v57 = vrot.slane %v1406_v39, 4  ;;  %v1456_v7 = vshrl.u32 %v1250_v56, 16 }
  0x77   : > { %7678 = vmatmul.mubr.msk.bf16.gmra.mrb[44].mxu0 %vm259_vm2, %v6799_v51  ;;  %v973_v51 = vsel %vm8689_vm8, %v6790_v32, %v972_v14  ;;  %v1248_v14 = vld [vmem:[%s8548_s6 + $0x4c] sm:$0xf]  ;;  %v6792_v32 = vrot.slane %v903_v12, 9  ;;  %v1398_v38 = vsel %vm8726_vm11, %v1389_v17, %v1397_v18  ;;  %v995_v63 = vrot.slane %v993_v46, 4  ;;  %v909_v17 = vld [vmem:[%s8548_s6 + $0x60] sm:$0xe] }
  0x78   : > { %7681 = vmatprep.mubr.msk.bf16.mxu0 %vm8424_vm1, %v8423_v0  ;;  %v6801_v1 = vcombine.low %v973_v51, %v976_v52  ;;  %v1437_v29 = vshrl.u32 %v1248_v14, 16  ;;  %v1447_v51 = vshrl.u32 %v1249_v41, 16  ;;  %v1450_v52 = vshll.u32 %v1249_v41, 16 }
  0x79   : > { %v6822_v53 = vcombine.low %v1388_v37, %v1398_v38  ;;  %v987_v54 = vsel %vm8689_vm8, %v6792_v32, %v986_v19  ;;  %v1434_v60 = vor.u32 %v1433_v45, %v1430_v44  ;;  %v1459_v8 = vshll.u32 %v1250_v56, 16  ;;  %v1254_v37 = vld [vmem:[%s8548_s6 + $0x64] sm:$0xf]  ;;  %v1255_v44 = vld [vmem:[%s8548_s6 + $0x68] sm:$0x3] }
  0x7a   : > { %v1439_v47 = vrot.slane %v1437_v29, 5  ;;  %v1449_v5 = vrot.slane %v1447_v51, 5  ;;  %v1452_v6 = vrot.slane %v1450_v52, 6  ;;  %v1468_v12 = vshll.u32 %v1251_v61, 16 }
  0x7b   : > { %7712 = vmatmul.mubr.msk.bf16.gmra.mrb[40].mxu1 %vm259_vm2, %v6819_v11  ;;  %v983_v11 = vsel %vm8689_vm8, %v981_v58, %v982_v59  ;;  %v1417_v58 = vrot.slane %v1415_v42, 4  ;;  %v1425_v59 = vor.u32 %v1424_v43, %v1421_v40  ;;  %v1416_v13 = vsel %vm8726_vm11, %v1407_v57, %v1415_v42 }
  0x7c   : > { %7715 = vmatprep.mubr.msk.bf16.mxu1 %vm8424_vm1, %v8423_v0  ;;  %v6802_v31 = vcombine.low %v980_v10, %v983_v11  ;;  %v1252_v10 = vld [vmem:[%s8548_s6 + $0x5c] sm:$0x3]  ;;  %v1465_v11 = vshrl.u32 %v1251_v61, 16  ;;  %v1435_v15 = vrot.slane %v1434_v60, 4  ;;  %v994_v18 = vsel %vm8689_vm8, %v6793_v62, %v993_v46  ;;  %v6878_v61 = vld [vmem:[%s8548_s6 + $0xc] sm:$0xf] }
  0x7d   : > { %v1453_v22 = vor.u32 %v1452_v6, %v1449_v5  ;;  %v1458_v24 = vrot.slane %v1456_v7, 5  ;;  %v1461_v25 = vrot.slane %v1459_v8, 6  ;;  %v1475_v26 = vshrl.u32 %v1252_v10, 16  ;;  %v6879_v62 = vld [vmem:[%s8548_s6 + $0x10] sm:$0xf] }
  0x7e   : > { %v1467_v28 = vrot.slane %v1465_v11, 5  ;;  %v1470_v29 = vrot.slane %v1468_v12, 6  ;;  %v6794_v35 = vrot.slane %v909_v17, 9  ;;  %v1003_v36 = vrot.slane %v911_v23, 5  ;;  %v8291_v23 = vld [vmem:[%s10820_s1 + $0x30] sm:$0x3f]  }
  0x7f   : > { %7682 = vmatmul.mubr.msk.bf16.gmra.mrb[48].mxu0 %vm259_vm2, %v6800_v30  ;;  %v1440_v30 = vshll.u32 %v1248_v14, 16  ;;  %v1426_v14 = vsel %vm8726_vm11, %v1417_v58, %v1425_v59  ;;  %v1002_v39 = vrot.slane %v1000_v21, 4  ;;  %v1462_v40 = vor.u32 %v1461_v25, %v1458_v24  ;;  %v6882_v24 = vld [vmem:[%s8548_s6 + $0x1c] sm:$0xf] }
  0x80   : > { %7685 = vmatprep.mubr.msk.bf16.mxu0 %vm8424_vm1, %v8423_v0  ;;  %v6823_v27 = vcombine.low %v1416_v13, %v1426_v14  ;;  %v1477_v41 = vrot.slane %v1475_v26, 5  ;;  %v1471_v42 = vor.u32 %v1470_v29, %v1467_v28  ;;  %v1001_v49 = vsel %vm8689_vm8, %v6794_v35, %v1000_v21  ;;  %v6880_v14 = vld [vmem:[%s8548_s6 + $0x14] sm:$0x1]  ;;  %v8290_v26 = vld [vmem:[%s8548_s6 + $0xc] sm:$0xff]  }
  0x81   : > { %v1442_v48 = vrot.slane %v1440_v30, 6  ;;  %v1478_v30 = vshll.u32 %v1252_v10, 16  ;;  %v1004_v51 = vsel %vm8689_vm8, %v1002_v39, %v1003_v36  ;;  %v1463_v52 = vrot.slane %v1462_v40, 4 }
  0x82   : > { %v1506_v60 = vshll.u32 %v1255_v44, 16  ;;  %v2027_v3 = vshrl.u32 %v6878_v61, 16  ;;  %v2030_v7 = vshll.u32 %v6878_v61, 16  ;;  %v2036_v10 = vshll.u32 %v6879_v62, 16 }
  0x83   : > { %7716 = vmatmul.mubr.msk.bf16.gmra.mrb[44].mxu1 %vm259_vm2, %v6820_v50  ;;  %v908_v50 = vld [vmem:[%s8548_s6 + $0x5c] sm:$0x1]  ;;  %v1443_v4 = vor.u32 %v1442_v48, %v1439_v47  ;;  %v1480_v43 = vrot.slane %v1478_v30, 6  ;;  %v1493_v47 = vshrl.u32 %v1254_v37, 16  ;;  %v1496_v48 = vshll.u32 %v1254_v37, 16 }
  0x84   : > { %7719 = vmatprep.mubr.msk.bf16.mxu1 %vm8424_vm1, %v8423_v0  ;;  %v2040_v11 = vshrl.u32 %v6879_v62, 16  ;;  %v2032_v17 = vrot.slane %v2030_v7, 5  ;;  %v2046_v25 = vshll.u32 %v6880_v14, 16  ;;  %v2064_v35 = vshrl.u32 %v6882_v24, 16 }
  0x85   : > { %v1445_v20 = vrot.slane %v1443_v4, 4  ;;  %v1444_v34 = vsel %vm8726_vm11, %v1435_v15, %v1443_v4  ;;  %v1495_v58 = vrot.slane %v1493_v47, 5  ;;  %v1498_v59 = vrot.slane %v1496_v48, 6  ;;  %v6885_v47 = vld [vmem:[%s8548_s6 + $0x28] sm:$0xf] }
  0x86   : > { %v2029_v15 = vrot.slane %v2027_v3, 4  ;;  %v2042_v21 = vrot.slane %v2040_v11, 4  ;;  %v2646_v36 = vsel %vm287_vm0, %v8291_v23, 0  ;;  %v6887_v3 = vld [vmem:[%s8548_s6 + $0x30] sm:$0xf] }
  0x87   : > { %7686 = vmatmul.mubr.msk.bf16.gmra.mrb[52].mxu0 %vm259_vm2, %v6801_v1  ;;  %v996_v1 = vrot.slane %v908_v50, 5  ;;  %v1454_v38 = vsel %vm8726_vm11, %v1445_v20, %v1453_v22  ;;  %v1499_v8 = vor.u32 %v1498_v59, %v1495_v58  ;;  %v2038_v20 = vrot.slane %v2036_v10, 5  ;;  %v6881_v22 = vld [vmem:[%s8548_s6 + $0x18] sm:$0xf]  ;;  %v6886_v59 = vld [vmem:[%s8548_s6 + $0x2c] sm:$0x1] }
  0x88   : > { %7689 = vmatprep.mubr.msk.bf16.mxu0 %vm8424_vm1, %v8423_v0  ;;  %v6824_v50 = vcombine.low %v1444_v34, %v1454_v38  ;;  %v2033_v28 = vor.u32 %v2032_v17, %v2029_v15  ;;  %v2051_v29 = vshrl.u32 %v6881_v22, 16  ;;  %v2054_v30 = vshll.u32 %v6881_v22, 16  ;;  %v8293_v58 = vld [vmem:[%s10820_s1 + $0x38] sm:$0x3f]  }
  0x89   : > { %v997_v19 = vsel %vm8689_vm8, %v995_v63, %v996_v1  ;;  %v6805_v63 = vcombine.low %v1001_v49, %v1004_v51  ;;  %v1472_v1 = vsel %vm8726_vm11, %v1463_v52, %v1471_v42  ;;  %v2060_v34 = vshll.u32 %v6882_v24, 16  ;;  %v8292_v49 = vld [vmem:[%s8548_s6 + $0x18] sm:$0xff]  }
  0x8a   : > { %v6804_v32 = vcombine.low %v994_v18, %v997_v19  ;;  %v1501_v18 = vrot.slane %v1499_v8, 4  ;;  %v2034_v38 = vrot.slane %v2033_v28, 4  ;;  %v2053_v39 = vrot.slane %v2051_v29, 4 }
  0x8b   : > { %7720 = vmatmul.mubr.msk.bf16.gmra.mrb[48].mxu1 %vm259_vm2, %v6821_v9  ;;  %v6803_v9 = vcombine.low %v987_v54, %v990_v55  ;;  %v1473_v54 = vrot.slane %v1471_v42, 4  ;;  %v1481_v55 = vor.u32 %v1480_v43, %v1477_v41  ;;  %v2056_v40 = vrot.slane %v2054_v30, 5  ;;  %v6884_v41 = vld [vmem:[%s8548_s6 + $0x24] sm:$0xf]  ;;  %v6889_v30 = vld [vmem:[%s8548_s6 + $0x38] sm:$0x1] }
  0x8c   : > { %7723 = vmatprep.mubr.msk.bf16.mxu1 %vm8424_vm1, %v8423_v0  ;;  %v2048_v43 = vrot.slane %v2046_v25, 5  ;;  %v2075_v48 = vshrl.u32 %v6884_v41, 16  ;;  %v3149_v7 = vsel %vm287_vm0, %v8293_v58, 0  ;;  %v2094_v10 = vshll.u32 %v6886_v59, 16  ;;  %v6891_v25 = vld [vmem:[%s8548_s6 + $0x40] sm:$0xf] }
  0x8d   : > { %v1482_v5 = vsel %vm8726_vm11, %v1473_v54, %v1481_v55  ;;  %v2057_v51 = vor.u32 %v2056_v40, %v2053_v39  ;;  %v2102_v14 = vshll.u32 %v6887_v3, 16  ;;  %v8296_v58 = vld [vmem:[%s8548_s6 + $0x3c] sm:$0xff]  }
  0x8e   : > { %v6825_v12 = vcombine.low %v1472_v1, %v1482_v5  ;;  %v2096_v23 = vrot.slane %v2094_v10, 5  ;;  %v6896_v10 = vld [vmem:[%s8548_s6 + $0x54] sm:$0xf] }
  0x8f   : > { %7690 = vmatmul.mubr.msk.bf16.gmra.mrb[56].mxu0 %vm259_vm2, %v6802_v31  ;;  %v1253_v31 = vld [vmem:[%s8548_s6 + $0x60] sm:$0xe]  ;;  %v2058_v62 = vrot.slane %v2057_v51, 4 }
  0x90   : > { %7693 = vmatprep.mubr.msk.bf16.mxu0 %vm8424_vm1, %v8423_v0  ;;  %v1484_v45 = vshrl.u32 %v1253_v31, 16  ;;  %v1487_v46 = vshll.u32 %v1253_v31, 16 }
  0x92   : > { %v1486_v56 = vrot.slane %v1484_v45, 5  ;;  %v1489_v57 = vrot.slane %v1487_v46, 6  ;;  %v2062_v45 = vrot.slane %v2060_v34, 5  ;;  %v2066_v46 = vrot.slane %v2064_v35, 4 }
  0x93   : > { %7724 = vmatmul.mubr.msk.bf16.gmra.mrb[52].mxu1 %vm259_vm2, %v6822_v53  ;;  %v1503_v53 = vshrl.u32 %v1255_v44, 16  ;;  %v6883_v44 = vld [vmem:[%s8548_s6 + $0x20] sm:$0x1]  ;;  %v2132_v34 = vshll.u32 %v6891_v25, 16  ;;  %v2136_v35 = vshrl.u32 %v6891_v25, 16 }
  0x94   : > { %7727 = vmatprep.mubr.msk.bf16.mxu1 %vm8424_vm1, %v8423_v0  ;;  %v1490_v6 = vor.u32 %v1489_v57, %v1486_v56  ;;  %v2070_v52 = vshll.u32 %v6883_v44, 16  ;;  %v2067_v55 = vor.u32 %v2066_v46, %v2062_v45  ;;  %v2084_v56 = vshll.u32 %v6885_v47, 16  ;;  %v6900_v25 = vld [vmem:[%s8548_s6 + $0x64] sm:$0xf] }
  0x95   : > { %v1505_v4 = vrot.slane %v1503_v53, 5  ;;  %v2078_v53 = vshll.u32 %v6884_v41, 16  ;;  %v2088_v57 = vshrl.u32 %v6885_v47, 16  ;;  %v2063_v11 = vsel %vm8569_vm5, %v2058_v62, %v2062_v45 }
  0x96   : > { %v1491_v13 = vrot.slane %v1490_v6, 4  ;;  %v2068_v1 = vrot.slane %v2067_v55, 4  ;;  %v2086_v5 = vrot.slane %v2084_v56, 5  ;;  %v2118_v41 = vshll.u32 %v6889_v30, 16  ;;  %v6898_v30 = vld [vmem:[%s8548_s6 + $0x5c] sm:$0x1] }
  0x97   : > { %7694 = vmatmul.mubr.msk.bf16.gmra.mrb[60].mxu0 %vm259_vm2, %v6803_v9  ;;  %v1508_v9 = vrot.slane %v1506_v60, 6  ;;  %v2077_v60 = vrot.slane %v2075_v48, 4  ;;  %v2090_v6 = vrot.slane %v2088_v57, 4  ;;  %v2134_v45 = vrot.slane %v2132_v34, 5  ;;  %v6892_v48 = vld [vmem:[%s8548_s6 + $0x44] sm:$0x1] }
  0x98   : > { %7697 = vmatprep.mubr.msk.bf16.mxu0 %vm8424_vm1, %v8423_v0  ;;  %v2138_v46 = vrot.slane %v2136_v35, 4  ;;  %v2120_v51 = vrot.slane %v2118_v41, 5  ;;  %v2142_v57 = vshll.u32 %v6892_v48, 16 }
  0x99   : > { %v1509_v19 = vor.u32 %v1508_v9, %v1505_v4  ;;  %v2072_v4 = vrot.slane %v2070_v52, 5  ;;  %v8294_v9 = vld [vmem:[%s8548_s6 + $0x24] sm:$0xff]   ;;  %v2091_v17 = vor.u32 %v2090_v6, %v2086_v5  ;;  %v6894_v52 = vld [vmem:[%s8548_s6 + $0x4c] sm:$0xf] }
  0x9a   : > { %v2139_v56 = vor.u32 %v2138_v46, %v2134_v45  ;;  %v2156_v59 = vshll.u32 %v6894_v52, 16  ;;  %v2144_v6 = vrot.slane %v2142_v57, 5 }
  0x9b   : > { %7728 = vmatmul.mubr.msk.bf16.gmra.mrb[56].mxu1 %vm259_vm2, %v6823_v27  ;;  %v1500_v27 = vsel %vm8726_vm11, %v1491_v13, %v1499_v8  ;;  %v1510_v31 = vsel %vm8726_vm11, %v1501_v18, %v1509_v19  ;;  %v6888_v8 = vld [vmem:[%s8548_s6 + $0x34] sm:$0xf]  ;;  %v2099_v13 = vshrl.u32 %v6887_v3, 16  ;;  %v2073_v15 = vsel %vm8569_vm5, %v2068_v1, %v2072_v4 }
  0x9c   : > { %7731 = vmatprep.mubr.msk.bf16.mxu1 %vm8424_vm1, %v8423_v0  ;;  %v6826_v37 = vcombine.low %v1500_v27, %v1510_v31  ;;  %v2108_v18 = vshll.u32 %v6888_v8, 16  ;;  %v2112_v19 = vshrl.u32 %v6888_v8, 16  ;;  %v2104_v27 = vrot.slane %v2102_v14, 5 }
  0x9d   : > { %v2101_v24 = vrot.slane %v2099_v13, 4  ;;  %v2158_v8 = vrot.slane %v2156_v59, 5  ;;  %v6927_v59 = vld [vmem:[%s8548_s6 + $0x10] sm:$0xf] }
  0x9e   : > { %v2110_v28 = vrot.slane %v2108_v18, 5  ;;  %v2114_v29 = vrot.slane %v2112_v19, 4  ;;  %v8297_v18 = vld [vmem:[%s8548_s6 + $0x48] sm:$0xff]  }
  0x9f   : > { %7698 = vmatmul.mubr.msk.bf16.gmra.mrb[64].mxu0 %vm259_vm2, %v6804_v32  ;;  %v2043_v32 = vor.u32 %v2042_v21, %v2038_v20  ;;  %v6908_v21 = vcombine.low %v2063_v11, %v2073_v15  ;;  %v2105_v39 = vor.u32 %v2104_v27, %v2101_v24  ;;  %v6897_v11 = vld [vmem:[%s8548_s6 + $0x58] sm:$0xf] }
  0xa0   : > { %7701 = vmatprep.mubr.msk.bf16.mxu0 %vm8424_vm1, %v8423_v0  ;;  %v2115_v40 = vor.u32 %v2114_v29, %v2110_v28 }
  0xa1   : > { %v2044_v42 = vrot.slane %v2043_v32, 4 }
  0xa3   : > { %7732 = vmatmul.mubr.msk.bf16.gmra.mrb[60].mxu1 %vm259_vm2, %v6824_v50  ;;  %v2039_v50 = vsel %vm8569_vm5, %v2034_v38, %v2038_v20  ;;  %v2049_v54 = vsel %vm8569_vm5, %v2044_v42, %v2048_v43  ;;  %v6890_v20 = vld [vmem:[%s8548_s6 + $0x3c] sm:$0xf]  ;;  %v6893_v42 = vld [vmem:[%s8548_s6 + $0x48] sm:$0xf] }
  0xa4   : > { %7735 = vmatprep.mubr.msk.bf16.mxu1 %vm8424_vm1, %v8423_v0  ;;  %v6907_v61 = vcombine.low %v2039_v50, %v2049_v54  ;;  %v2123_v31 = vshrl.u32 %v6890_v20, 16  ;;  %v2126_v32 = vshll.u32 %v6890_v20, 16  ;;  %v2116_v50 = vrot.slane %v2115_v40, 4  ;;  %v8298_v40 = vld [vmem:[%s8548_s6 + $0x54] sm:$0xff]  }
  0xa5   : > { %v2150_v54 = vshll.u32 %v6893_v42, 16  ;;  %v2174_v20 = vshll.u32 %v6896_v10, 16 }
  0xa6   : > { %v2125_v43 = vrot.slane %v2123_v31, 4  ;;  %v2128_v44 = vrot.slane %v2126_v32, 5  ;;  %v2121_v62 = vsel %vm8569_vm5, %v2116_v50, %v2120_v51  ;;  %v6902_v50 = vld [vmem:[%s8548_s6 + $0x6c] sm:$0xf] }
  0xa7   : > { %7702 = vmatmul.mubr.msk.bf16.gmra.mrb[68].mxu0 %vm259_vm2, %v6805_v63  ;;  %v2080_v63 = vrot.slane %v2078_v53, 5  ;;  %v2147_v53 = vshrl.u32 %v6893_v42, 16  ;;  %v2152_v1 = vrot.slane %v2150_v54, 5  ;;  %v2176_v31 = vrot.slane %v2174_v20, 5 }
  0xa8   : > { %7745 = vmatprep.mubr.msk.bf16.mxu0 %vm8424_vm1, %v8423_v0  ;;  %v2129_v55 = vor.u32 %v2128_v44, %v2125_v43 }
  0xaa   : > { %v2130_v4 = vrot.slane %v2129_v55, 4 }
  0xab   : > { %7736 = vmatmul.mubr.msk.bf16.gmra.mrb[64].mxu1 %vm259_vm2, %v6825_v12  ;;  %v2081_v12 = vor.u32 %v2080_v63, %v2077_v60  ;;  %v2160_v60 = vshrl.u32 %v6894_v52, 16  ;;  %v2149_v63 = vrot.slane %v2147_v53, 4  ;;  %v6903_v52 = vld [vmem:[%s8548_s6 + $0x70] sm:$0xf] }
  0xac   : > { %7739 = vmatprep.mubr.msk.bf16.mxu1 %vm8424_vm1, %v8423_v0  ;;  %v2135_v13 = vsel %vm8569_vm5, %v2130_v4, %v2134_v45  ;;  %v6901_v45 = vld [vmem:[%s8548_s6 + $0x68] sm:$0x1] }
  0xad   : > { %v2082_v22 = vrot.slane %v2081_v12, 4  ;;  %v2153_v12 = vor.u32 %v2152_v1, %v2149_v63  ;;  %v2232_v63 = vshrl.u32 %v6903_v52, 16  ;;  %v8299_v1 = vld [vmem:[%s8548_s6 + $0x60] sm:$0xff]  }
  0xaf   : > { %7746 = vmatmul.mubr.msk.bf16.vlgmr.msra.gmra.mrb[72].mxu0 %vm259_vm2, %v8290_v26  ;;  %v2092_v26 = vrot.slane %v2091_v17, 4  ;;  %v2171_v17 = vshrl.u32 %v6896_v10, 16  ;;  %v2154_v24 = vrot.slane %v2153_v12, 4 }
  0xb0   : > { %7820 = vmatpush3.bf16.msra.mxu0 %v2646_v36  ;;  %7749 = vmatprep.mubr.msk.bf16.mxu0 %vm8424_vm1, %v8423_v0  ;;  %v8295_v36 = vld [vmem:[%s8548_s6 + $0x30] sm:$0xff]  }
  0xb1   : > { %7895 = vmatprep.subr.bf16.mxu0 %v8423_v0  ;;  %v2097_v38 = vsel %vm8569_vm5, %v2092_v26, %v2096_v23  ;;  %v6899_v23 = vld [vmem:[%s8548_s6 + $0x60] sm:$0xf]  ;;  %v2159_v41 = vsel %vm8569_vm5, %v2154_v24, %v2158_v8 }
  0xb2   : > { %v2195_v35 = vshrl.u32 %v6899_v23, 16 }
  0xb3   : > { %7740 = vmatmul.mubr.msk.bf16.gmra.mrb[68].mxu1 %vm259_vm2, %v6826_v37  ;;  %v2087_v37 = vsel %vm8569_vm5, %v2082_v22, %v2086_v5  ;;  %v2140_v5 = vrot.slane %v2139_v56, 4  ;;  %v2184_v22 = vshrl.u32 %v6897_v11, 16  ;;  %v2214_v56 = vshll.u32 %v6901_v45, 16  ;;  %v6929_v45 = vld [vmem:[%s8548_s6 + $0x18] sm:$0xe] }
  0xb4   : > { %7783 = vmatprep.mubr.msk.bf16.mxu1 %vm8424_vm1, %v8423_v0  ;;  %v6909_v47 = vcombine.low %v2087_v37, %v2097_v38  ;;  %v2204_v37 = vshll.u32 %v6900_v25, 16  ;;  %v2208_v38 = vshrl.u32 %v6900_v25, 16  ;;  %v2197_v46 = vrot.slane %v2195_v35, 4 }
  0xb5   : > { %v2145_v14 = vsel %vm8569_vm5, %v2140_v5, %v2144_v6  ;;  %v2186_v34 = vrot.slane %v2184_v22, 4  ;;  %v2216_v4 = vrot.slane %v2214_v56, 5  ;;  %v6926_v5 = vld [vmem:[%s8548_s6 + $0xc] sm:$0xe]  ;;  %v6928_v6 = vld [vmem:[%s8548_s6 + $0x14] sm:$0x1] }
  0xb6   : > { %v6911_v26 = vcombine.low %v2135_v13, %v2145_v14  ;;  %v9002_v48 = vrot.slane %v2204_v37, 5  ;;  %v6904_v13 = vld [vmem:[%s8548_s6 + $0x74] sm:$0x1]  ;;  %v6953_v24 = vrot.slane %v6926_v5, 9  ;;  %v2525_v25 = vrot.slane %v6928_v6, 5 }
  0xb7   : > { %7750 = vmatmul.mubr.msk.bf16.gmra.mrb[76].mxu0 %vm259_vm2, %v8292_v49  ;;  %v2106_v49 = vrot.slane %v2105_v39, 4  ;;  %v2190_v39 = vshll.u32 %v6898_v30, 16  ;;  %v2238_v30 = vshll.u32 %v6904_v13, 16  ;;  %v6930_v37 = vld [vmem:[%s8548_s6 + $0x1c] sm:$0xf] }
  0xb8   : > { %7753 = vmatprep.mubr.msk.bf16.mxu0 %vm8424_vm1, %v8423_v0 }
  0xb9   : > { %v2192_v51 = vrot.slane %v2190_v39, 5 }
  0xbb   : > { %7784 = vmatmul.mubr.msk.bf16.vlgmr.msra.gmra.mrb[72].mxu1 %vm259_vm2, %v6907_v61  ;;  %v2111_v61 = vsel %vm8569_vm5, %v2106_v49, %v2110_v28  ;;  %v2173_v28 = vrot.slane %v2171_v17, 4  ;;  %v2210_v49 = vrot.slane %v2208_v38, 4 }
  0xbc   : > { %7858 = vmatpush3.bf16.msra.mxu1 %v3149_v7  ;;  %7787 = vmatprep.mubr.msk.bf16.mxu1 %vm8424_vm1, %v8423_v0  ;;  %v6910_v3 = vcombine.low %v2111_v61, %v2121_v62  ;;  %v6895_v7 = vld [vmem:[%s8548_s6 + $0x50] sm:$0x1]  ;;  %v2222_v61 = vshll.u32 %v6902_v50, 16  ;;  %v2228_v62 = vshll.u32 %v6903_v52, 16  ;;  %v8301_v52 = vld [vmem:[%s10820_s1 + $0x40] sm:$0x3f]  }
  0xbd   : > { %7933 = vmatprep.subr.bf16.mxu1 %v8423_v0  ;;  %v2166_v15 = vshll.u32 %v6895_v7, 16  ;;  %v2177_v43 = vor.u32 %v2176_v31, %v2173_v28  ;;  %v6983_v7 = vld [vmem:[%s8548_s6 + $0xc] sm:$0xe] }
  0xbe   : > { %v9024_v17 = vrot.slane %v2228_v62, 5  ;;  %v2838_v20 = vshll.u32 %v6983_v7, 16  ;;  %v8300_v31 = vld [vmem:[%s8548_s6 + $0x6c] sm:$0xff]   ;;  %v6954_v62 = vrot.slane %v6929_v45, 9 }
  0xbf   : > { %7754 = vmatmul.mubr.msk.bf16.gmra.mrb[80].mxu0 %vm259_vm2, %v8294_v9  ;;  %v2162_v9 = vrot.slane %v2160_v60, 4  ;;  %v2168_v27 = vrot.slane %v2166_v15, 5  ;;  %v2178_v54 = vrot.slane %v2177_v43, 4  ;;  %v2219_v60 = vshrl.u32 %v6902_v50, 16 }
  0xc0   : > { %7757 = vmatprep.mubr.msk.bf16.mxu0 %vm8424_vm1, %v8423_v0  ;;  %v2224_v15 = vrot.slane %v2222_v61, 5  ;;  %v2529_v50 = vrot.slane %v6930_v37, 5 }
  0xc1   : > { %v2163_v19 = vor.u32 %v2162_v9, %v2158_v8  ;;  %v6984_v8 = vld [vmem:[%s8548_s6 + $0x10] sm:$0xf]  ;;  %v2221_v14 = vrot.slane %v2219_v60, 4 }
  0xc2   : > { %v2844_v22 = vshrl.u32 %v6984_v8, 16 }
  0xc3   : > { %7788 = vmatmul.mubr.msk.bf16.gmra.mrb[76].mxu1 %vm259_vm2, %v6908_v21  ;;  %v2180_v21 = vshll.u32 %v6897_v11, 16  ;;  %v2164_v29 = vrot.slane %v2163_v19, 4  ;;  %v2835_v19 = vshrl.u32 %v6983_v7, 16  ;;  %v2531_v7 = vrot.slane %v2529_v50, 4 }
  0xc4   : > { %7791 = vmatprep.mubr.msk.bf16.mxu1 %vm8424_vm1, %v8423_v0  ;;  %v2846_v38 = vrot.slane %v2844_v22, 5 }
  0xc5   : > { %v2182_v32 = vrot.slane %v2180_v21, 5  ;;  %v2169_v42 = vsel %vm8569_vm5, %v2164_v29, %v2168_v27  ;;  %v2837_v35 = vrot.slane %v2835_v19, 5 }
  0xc6   : > { %v6912_v53 = vcombine.low %v2159_v41, %v2169_v42 }
  0xc7   : > { %7758 = vmatmul.mubr.msk.bf16.gmra.mrb[84].mxu0 %vm259_vm2, %v8295_v36  ;;  %v2198_v36 = vshll.u32 %v6899_v23, 16  ;;  %v2187_v44 = vor.u32 %v2186_v34, %v2182_v32  ;;  %v2183_v9 = vsel %vm8569_vm5, %v2178_v54, %v2182_v32  ;;  %v2847_v23 = vshll.u32 %v6984_v8, 16 }
  0xc8   : > { %7761 = vmatprep.mubr.msk.bf16.mxu0 %vm8424_vm1, %v8423_v0  ;;  %v2225_v32 = vor.u32 %v2224_v15, %v2221_v14  ;;  %v6934_v14 = vld [vmem:[%s8548_s6 + $0x2c] sm:$0x1] }
  0xc9   : > { %v2188_v55 = vrot.slane %v2187_v44, 4  ;;  %v2849_v39 = vrot.slane %v2847_v23, 6  ;;  %v3413_v23 = vsel %vm287_vm0, %v8301_v52, 0  ;;  %v9110_v52 = vld [vmem:[%s8548_s6 + $0x30] sm:$0xe] }
  0xcb   : > { %7792 = vmatmul.mubr.msk.bf16.gmra.mrb[80].mxu1 %vm259_vm2, %v6909_v47  ;;  %v2200_v47 = vrot.slane %v2198_v36, 5  ;;  %v2193_v10 = vsel %vm8569_vm5, %v2188_v55, %v2192_v51  ;;  %v2840_v36 = vrot.slane %v2838_v20, 6  ;;  %v6987_v51 = vld [vmem:[%s8548_s6 + $0x1c] sm:$0xf]  ;;  %v9053_v55 = vor.u32 %v2849_v39, %v2846_v38 }
  0xcc   : > { %7795 = vmatprep.mubr.msk.bf16.mxu1 %vm8424_vm1, %v8423_v0  ;;  %v6913_v21 = vcombine.low %v2183_v9, %v2193_v10  ;;  %v6932_v9 = vld [vmem:[%s8548_s6 + $0x24] sm:$0xe] }
  0xcd   : > { %v2201_v57 = vor.u32 %v2200_v47, %v2197_v46  ;;  %v6986_v46 = vld [vmem:[%s8548_s6 + $0x18] sm:$0xe]  ;;  %v2226_v47 = vrot.slane %v2225_v32, 4  ;;  %v2841_v54 = vor.u32 %v2840_v36, %v2837_v35  ;;  %v6955_v32 = vrot.slane %v6932_v9, 9 }
  0xce   : > { %v2866_v60 = vshll.u32 %v6986_v46, 16  ;;  %v2539_v35 = vrot.slane %v6934_v14, 5 }
  0xcf   : > { %7762 = vmatmul.mubr.msk.bf16.gmra.mrb[88].mxu0 %vm259_vm2, %v8296_v58  ;;  %v2211_v58 = vor.u32 %v2210_v49, %v9002_v48  ;;  %v2202_v11 = vrot.slane %v2201_v57, 4  ;;  %v2240_v49 = vrot.slane %v2238_v30, 5  ;;  %v2231_v6 = vsel %vm8569_vm5, %v2226_v47, %v9024_v17  ;;  %v6990_v30 = vld [vmem:[%s8548_s6 + $0x28] sm:$0xf] }
  0xd0   : > { %7765 = vmatprep.mubr.msk.bf16.mxu0 %vm8424_vm1, %v8423_v0  ;;  %v2868_v19 = vrot.slane %v2866_v60, 6  ;;  %v2903_v47 = vshll.u32 %v6990_v30, 16 }
  0xd1   : > { %v2212_v12 = vrot.slane %v2211_v58, 4  ;;  %v2207_v27 = vsel %vm8569_vm5, %v2202_v11, %v9002_v48  ;;  %v9058_v58 = vld [vmem:[%s8548_s6 + $0x28] sm:$0xf]  ;;  %v2842_v11 = vrot.slane %v2841_v54, 4  ;;  %v6991_v54 = vld [vmem:[%s8548_s6 + $0x2c] sm:$0x3] }
  0xd2   : > { %v2536_v15 = vrot.slane %v9058_v58, 5  ;;  %v2913_v9 = vshll.u32 %v6991_v54, 16 }
  0xd3   : > { %7796 = vmatmul.mubr.msk.bf16.gmra.mrb[84].mxu1 %vm259_vm2, %v6910_v3  ;;  %v2522_v3 = vrot.slane %v6927_v59, 5  ;;  %v2217_v28 = vsel %vm8569_vm5, %v2212_v12, %v2216_v4  ;;  %v2863_v59 = vshrl.u32 %v6986_v46, 16  ;;  %v2875_v4 = vshll.u32 %v6987_v51, 16  ;;  %v8302_v46 = vld [vmem:[%s10820_s1 + $0x48] sm:$0x3f]  }
  0xd4   : > { %7799 = vmatprep.mubr.msk.bf16.mxu1 %vm8424_vm1, %v8423_v0  ;;  %v6914_v42 = vcombine.low %v2207_v27, %v2217_v28  ;;  %v2852_v12 = vrot.slane %v9053_v55, 4  ;;  %v2530_v27 = vsel %vm8689_vm8, %v6954_v62, %v2529_v50  ;;  %v9103_v50 = vsel %vm8689_vm8, %v6955_v32, %v2536_v15 }
  0xd5   : > { %v2524_v29 = vrot.slane %v2522_v3, 4  ;;  %v2523_v43 = vsel %vm8689_vm8, %v6953_v24, %v2522_v3 }
  0xd7   : > { %7766 = vmatmul.mubr.msk.bf16.gmra.mrb[92].mxu0 %vm259_vm2, %v8297_v18  ;;  %v2234_v18 = vrot.slane %v2232_v63, 4  ;;  %v2526_v44 = vsel %vm8689_vm8, %v2524_v29, %v2525_v25  ;;  %v6988_v63 = vld [vmem:[%s8548_s6 + $0x20] sm:$0x3]  ;;  %v2877_v25 = vrot.slane %v2875_v4, 6  ;;  %v6989_v29 = vld [vmem:[%s8548_s6 + $0x24] sm:$0xe] }
  0xd8   : > { %7769 = vmatprep.mubr.msk.bf16.mxu0 %vm8424_vm1, %v8423_v0  ;;  %v6964_v61 = vcombine.low %v2523_v43, %v2526_v44  ;;  %v2882_v20 = vshrl.u32 %v6988_v63, 16  ;;  %v2894_v43 = vshll.u32 %v6989_v29, 16  ;;  %v2900_v44 = vshrl.u32 %v6990_v30, 16 }
  0xd9   : > { %v2235_v34 = vor.u32 %v2234_v18, %v9024_v17  ;;  %v2865_v18 = vrot.slane %v2863_v59, 5 }
  0xda   : > { %v2884_v38 = vrot.slane %v2882_v20, 5  ;;  %v2896_v4 = vrot.slane %v2894_v43, 6 }
  0xdb   : > { %7800 = vmatmul.mubr.msk.bf16.gmra.mrb[88].mxu1 %vm259_vm2, %v6911_v26  ;;  %v6985_v26 = vld [vmem:[%s8548_s6 + $0x14] sm:$0x3]  ;;  %v2236_v48 = vrot.slane %v2235_v34, 4  ;;  %v2538_v34 = vrot.slane %v2536_v15, 4  ;;  %v2869_v37 = vor.u32 %v2868_v19, %v2865_v18  ;;  %v3880_v19 = vsel %vm287_vm0, %v8302_v46, 0 }
  0xdc   : > { %7803 = vmatprep.mubr.msk.bf16.mxu1 %vm8424_vm1, %v8423_v0  ;;  %v2857_v41 = vshll.u32 %v6985_v26, 16 }
  0xdd   : > { %v2241_v3 = vsel %vm8569_vm5, %v2236_v48, %v2240_v49  ;;  %v9119_v58 = vrot.slane %v2869_v37, 4 }
  0xde   : > { %v2859_v57 = vrot.slane %v2857_v41, 6  ;;  %v9093_v41 = vld [vmem:[%s8548_s6 + $0x34] sm:$0xf] }
  0xdf   : > { %7770 = vmatmul.mubr.msk.bf16.gmra.mrb[96].mxu0 %vm259_vm2, %v8298_v40  ;;  %v2854_v40 = vshrl.u32 %v6985_v26, 16  ;;  %v6915_v26 = vcombine.low %v2231_v6, %v2241_v3  ;;  %v2543_v60 = vrot.slane %v9093_v41, 5 }
  0xe0   : > { %7773 = vmatprep.mubr.msk.bf16.mxu0 %vm8424_vm1, %v8423_v0 }
  0xe1   : > { %v2856_v56 = vrot.slane %v2854_v40, 5 }
  0xe3   : > { %7804 = vmatmul.mubr.msk.bf16.gmra.mrb[92].mxu1 %vm259_vm2, %v6912_v53  ;;  %v6931_v53 = vld [vmem:[%s8548_s6 + $0x20] sm:$0x1]  ;;  %v2860_v13 = vor.u32 %v2859_v57, %v2856_v56 }
  0xe4   : > { %7807 = vmatprep.mubr.msk.bf16.mxu1 %vm8424_vm1, %v8423_v0  ;;  %v2532_v8 = vrot.slane %v6931_v53, 5  ;;  %v9113_v53 = vld [vmem:[%s8548_s6 + $0x38] sm:$0x1] }
  0xe5   : > { %v2861_v36 = vsel %vm8726_vm11, %v2852_v12, %v2860_v13 }
  0xe6   : > { %v2533_v28 = vsel %vm8689_vm8, %v2531_v7, %v2532_v8  ;;  %v2905_v7 = vrot.slane %v2903_v47, 6  ;;  %v2910_v8 = vshrl.u32 %v6991_v54, 16  ;;  %v9163_v47 = vld [vmem:[%s8548_s6 + $0x3c] sm:$0xe] }
  0xe7   : > { %7774 = vmatmul.mubr.msk.bf16.gmra.mrb[100].mxu0 %vm259_vm2, %v8299_v1  ;;  %v2872_v1 = vshrl.u32 %v6987_v51, 16  ;;  %v6965_v49 = vcombine.low %v2530_v27, %v2533_v28  ;;  %v9107_v51 = vsel %vm8689_vm8, %v2538_v34, %v2539_v35  ;;  %v2545_v27 = vrot.slane %v2543_v60, 4  ;;  %v6994_v28 = vld [vmem:[%s8548_s6 + $0x38] sm:$0x3]  ;;  %v9146_v35 = vld [vmem:[%s8548_s6 + $0x40] sm:$0xf] }
  0xe8   : > { %7777 = vmatprep.mubr.msk.bf16.mxu0 %vm8424_vm1, %v8423_v0  ;;  %v6966_v20 = vcombine.low %v9103_v50, %v9107_v51  ;;  %v9143_v32 = vrot.slane %v2910_v8, 5  ;;  %v2915_v34 = vrot.slane %v2913_v9, 6  ;;  %v2941_v43 = vshll.u32 %v6994_v28, 16 }
  0xe9   : > { %v2874_v24 = vrot.slane %v2872_v1, 5  ;;  %v2550_v54 = vrot.slane %v9146_v35, 5 }
  0xeb   : > { %7808 = vmatmul.mubr.msk.bf16.gmra.mrb[96].mxu1 %vm259_vm2, %v6913_v21  ;;  %v2885_v21 = vshll.u32 %v6988_v63, 16  ;;  %v9090_v40 = vor.u32 %v2877_v25, %v2874_v24 }
  0xec   : > { %7811 = vmatprep.mubr.msk.bf16.mxu1 %vm8424_vm1, %v8423_v0 }
  0xed   : > { %v2887_v39 = vrot.slane %v2885_v21, 6  ;;  %v2880_v63 = vrot.slane %v9090_v40, 4  ;;  %v6956_v21 = vrot.slane %v9110_v52, 9  ;;  %v2879_v25 = vsel %vm8726_vm11, %v9119_v58, %v9090_v40 }
  0xef   : > { %7778 = vmatmul.mubr.msk.bf16.gmra.mrb[104].mxu0 %vm259_vm2, %v8300_v31  ;;  %v2851_v31 = vsel %vm8726_vm11, %v2842_v11, %v9053_v55  ;;  %v6992_v55 = vld [vmem:[%s8548_s6 + $0x30] sm:$0xe]  ;;  %v2888_v59 = vor.u32 %v2887_v39, %v2884_v38 }
  0xf0   : > { %7821 = vmatprep.mubr.msk.bf16.mxu0 %vm8424_vm1, %v8423_v0  ;;  %v7012_v57 = vcombine.low %v2851_v31, %v2861_v36  ;;  %v2922_v13 = vshll.u32 %v6992_v55, 16 }
  0xf2   : > { %v325_v5 = vpop.f32.mrb[0].mxu0  ;;  %v2924_v38 = vrot.slane %v2922_v13, 6 }
  0xf3   : > { %7812 = vmatmul.mubr.msk.bf16.gmra.mrb[100].mxu1 %vm259_vm2, %v6914_v42  ;;  %397 = vst.msk [vmem:[#allocation2] sm:$0xff] %vm396_vm12, %v325_v5  ;;  %v7595_v10 = vpop.f32.mrb[1].mxu0  ;;  %v2891_v42 = vshrl.u32 %v6989_v29, 16  ;;  %v2902_v5 = vrot.slane %v2900_v44, 5 }
  0xf4   : > { %v328_v17 = vpop.f32.mrb[2].mxu0  ;;  %7815 = vmatprep.mubr.msk.bf16.mxu1 %vm8424_vm1, %v8423_v0  ;;  %v2919_v10 = vshrl.u32 %v6992_v55, 16  ;;  %v6996_v55 = vld [vmem:[%s8548_s6 + $0x40] sm:$0xf] }
  0xf5   : > { %398 = vst.msk [vmem:[#allocation2 + $0x8] sm:$0xff] %vm396_vm12, %v328_v17  ;;  %v7596_v22 = vpop.f32.mrb[3].mxu0  ;;  %v2893_v1 = vrot.slane %v2891_v42, 5  ;;  %v9141_v31 = vor.u32 %v2905_v7, %v2902_v5  ;;  %v2938_v42 = vshrl.u32 %v6994_v28, 16  ;;  %v2943_v5 = vrot.slane %v2941_v43, 6 }
  0xf6   : > { %v2546_v22 = vrot.slane %v9113_v53, 5  ;;  %v2921_v37 = vrot.slane %v2919_v10, 5  ;;  %v2916_v53 = vor.u32 %v2915_v34, %v9143_v32  ;;  %v6997_v10 = vld [vmem:[%s8548_s6 + $0x44] sm:$0x3] }
  0xf7   : > { %7822 = vmatmul.mubr.msk.bf16.vlgmr.msra.gmra.mrb[108].mxu0 %vm259_vm2, %v6964_v61  ;;  %v6993_v61 = vld [vmem:[%s8548_s6 + $0x34] sm:$0xf]  ;;  %v2897_v30 = vor.u32 %v2896_v4, %v2893_v1  ;;  %v2908_v58 = vrot.slane %v9141_v31, 4  ;;  %v2940_v4 = vrot.slane %v2938_v42, 5  ;;  %v2969_v35 = vshll.u32 %v6997_v10, 16 }
  0xf8   : > { %7896 = vmatpush3.bf16.msra.mxu0 %v3413_v23  ;;  %7825 = vmatprep.mubr.msk.bf16.mxu0 %vm8424_vm1, %v8423_v0  ;;  %v2928_v14 = vshrl.u32 %v6993_v61, 16  ;;  %v2931_v15 = vshll.u32 %v6993_v61, 16  ;;  %v9160_v46 = vsel %vm8689_vm8, %v2545_v27, %v2546_v22  ;;  %v6943_v27 = vld [vmem:[%s8548_s6 + $0x50] sm:$0x1] }
  0xf9   : > { %7971 = vmatprep.subr.bf16.mxu0 %v8423_v0  ;;  %v2898_v52 = vrot.slane %v2897_v30, 4  ;;  %v2966_v30 = vshrl.u32 %v6997_v10, 16  ;;  %v9238_v10 = vld [vmem:[%s8548_s6 + $0x5c] sm:$0x1] }
  0xfa   : > { %v333_v45 = vpop.f32.mrb[4].mxu0  ;;  %v831_v3 = vld [vmem:[#allocation2] sm:$0xff]  ;;  %v2930_v39 = vrot.slane %v2928_v14, 5  ;;  %v2933_v40 = vrot.slane %v2931_v15, 6  ;;  %v6957_v15 = vrot.slane %v9163_v47, 9 }
  0xfb   : > { %7816 = vmatmul.mubr.msk.bf16.gmra.mrb[104].mxu1 %vm259_vm2, %v6915_v26  ;;  %399 = vst.msk [vmem:[#allocation2 + $0x10] sm:$0xff] %vm396_vm12, %v333_v45  ;;  %v7599_v48 = vpop.f32.mrb[5].mxu0  ;;  %v2889_v26 = vsel %vm8726_vm11, %v2880_v63, %v2888_v59  ;;  %v9156_v45 = vsel %vm8689_vm8, %v6956_v21, %v2543_v60  ;;  %v6940_v59 = vld [vmem:[%s8548_s6 + $0x44] sm:$0x1]  ;;  %v2925_v60 = vor.u32 %v2924_v38, %v2921_v37  ;;  %v6999_v47 = vld [vmem:[%s8548_s6 + $0x4c] sm:$0xf] }
  0xfc   : > { %v336_v56 = vpop.f32.mrb[6].mxu0  ;;  %7859 = vmatprep.mubr.msk.bf16.mxu1 %vm8424_vm1, %v8423_v0  ;;  %v832_v18 = vld [vmem:[#allocation2 + $0x8] sm:$0xff]  ;;  %v6995_v48 = vld [vmem:[%s8548_s6 + $0x3c] sm:$0xe]  ;;  %v7013_v51 = vcombine.low %v2879_v25, %v2889_v26  ;;  %v9173_v61 = vor.u32 %v2933_v40, %v2930_v39  ;;  %v6967_v9 = vcombine.low %v9156_v45, %v9160_v46  ;;  %v2907_v14 = vsel %vm8726_vm11, %v2898_v52, %v9141_v31 }
  0xfd   : > { %400 = vst.msk [vmem:[#allocation2 + $0x18] sm:$0xff] %vm396_vm12, %v336_v56  ;;  %v7600_v62 = vpop.f32.mrb[7].mxu0  ;;  %v2926_v21 = vrot.slane %v2925_v60, 4  ;;  %v2944_v26 = vor.u32 %v2943_v5, %v2940_v4  ;;  %v2551_v39 = vsel %vm8689_vm8, %v6957_v15, %v2550_v54  ;;  %v2560_v46 = vrot.slane %v6943_v27, 5  ;;  %v7000_v4 = vld [vmem:[%s8548_s6 + $0x50] sm:$0x3] }
  0xfe   : > { %v760_v6 = vpop.f32.mrb[0].mxu1  ;;  %v9176_v62 = vld [vmem:[%s8548_s6 + $0x4c] sm:$0xf]  ;;  %v2936_v22 = vrot.slane %v9173_v61, 4  ;;  %v2987_v5 = vshll.u32 %v6999_v47, 16 }
  0xff   : > { %v849_v11 = vadd.f32 %v831_v3, %v760_v6  ;;  %v7633_v12 = vpop.f32.mrb[1].mxu1  ;;  %7826 = vmatmul.mubr.msk.bf16.gmra.mrb[112].mxu0 %vm259_vm2, %v6965_v49  ;;  %v2947_v6 = vshrl.u32 %v6995_v48, 16  ;;  %v2950_v3 = vshll.u32 %v6995_v48, 16 }
 0x100   : > { %v763_v17 = vpop.f32.mrb[2].mxu1  ;;  %7829 = vmatprep.mubr.msk.bf16.mxu0 %vm8424_vm1, %v8423_v0  ;;  %v2959_v12 = vshll.u32 %v6996_v55, 16 }
 0x101   : > { %867 = vst.msk [vmem:[#allocation2] sm:$0xff] %vm396_vm12, %v849_v11  ;;  %v850_v23 = vadd.f32 %v832_v18, %v763_v17  ;;  %v7634_v24 = vpop.f32.mrb[3].mxu1  ;;  %v2956_v11 = vshrl.u32 %v6996_v55, 16  ;;  %v2552_v17 = vrot.slane %v2550_v54, 4  ;;  %v2553_v18 = vrot.slane %v6940_v59, 5 }
 0x102   : > { %v341_v29 = vpop.f32.mrb[8].mxu0  ;;  %v833_v50 = vld [vmem:[#allocation2 + $0x10] sm:$0xff]  ;;  %v2557_v24 = vrot.slane %v9176_v62, 5  ;;  %v2949_v28 = vrot.slane %v2947_v6, 5  ;;  %v2961_v34 = vrot.slane %v2959_v12, 6  ;;  %v2984_v62 = vshrl.u32 %v6999_v47, 16 }
 0x103   : > { %868 = vst.msk [vmem:[#allocation2 + $0x8] sm:$0xff] %vm396_vm12, %v850_v23  ;;  %7860 = vmatmul.mubr.msk.bf16.vlgmr.msra.gmra.mrb[108].mxu1 %vm259_vm2, %v7012_v57  ;;  %401 = vst.msk [vmem:[#allocation2 + $0x20] sm:$0xff] %vm396_vm12, %v341_v29  ;;  %v7603_v36 = vpop.f32.mrb[9].mxu0  ;;  %v6941_v23 = vld [vmem:[%s8548_s6 + $0x48] sm:$0xe]  ;;  %v2952_v29 = vrot.slane %v2950_v3, 6  ;;  %v2554_v40 = vsel %vm8689_vm8, %v2552_v17, %v2553_v18 }
 0x104   : > { %7934 = vmatpush3.bf16.msra.mxu1 %v3880_v19  ;;  %v344_v41 = vpop.f32.mrb[10].mxu0  ;;  %7863 = vmatprep.mubr.msk.bf16.mxu1 %vm8424_vm1, %v8423_v0  ;;  %v834_v1 = vld [vmem:[#allocation2 + $0x18] sm:$0xff]  ;;  %v2958_v32 = vrot.slane %v2956_v11, 5  ;;  %v6958_v45 = vrot.slane %v6941_v23, 9  ;;  %v7001_v12 = vld [vmem:[%s8548_s6 + $0x54] sm:$0xe] }
 0x105   : > { %402 = vst.msk [vmem:[#allocation2 + $0x28] sm:$0xff] %vm396_vm12, %v344_v41  ;;  %v7604_v44 = vpop.f32.mrb[11].mxu0  ;;  %8009 = vmatprep.subr.bf16.mxu1 %v8423_v0  ;;  %v6998_v41 = vld [vmem:[%s8548_s6 + $0x48] sm:$0xe]  ;;  %v2953_v52 = vor.u32 %v2952_v29, %v2949_v28  ;;  %v2986_v23 = vrot.slane %v2984_v62, 5  ;;  %v2989_v28 = vrot.slane %v2987_v5, 6 }
 0x106   : > { %v768_v49 = vpop.f32.mrb[4].mxu1  ;;  %v2935_v44 = vsel %vm8726_vm11, %v2926_v21, %v9173_v61  ;;  %v2975_v59 = vshrl.u32 %v6998_v41, 16  ;;  %v2978_v61 = vshll.u32 %v6998_v41, 16  ;;  %v3003_v29 = vshrl.u32 %v7001_v12, 16 }
 0x107   : > { %v851_v56 = vadd.f32 %v833_v50, %v768_v49  ;;  %v7637_v57 = vpop.f32.mrb[5].mxu1  ;;  %7830 = vmatmul.mubr.msk.bf16.gmra.mrb[116].mxu0 %vm259_vm2, %v6966_v20  ;;  %v2917_v20 = vsel %vm8726_vm11, %v2908_v58, %v2916_v53  ;;  %v2945_v50 = vsel %vm8726_vm11, %v2936_v22, %v2944_v26  ;;  %v9214_v53 = vrot.slane %v2966_v30, 5  ;;  %v9220_v58 = vld [vmem:[%s8548_s6 + $0x58] sm:$0xf] }
 0x108   : > { %v771_v63 = vpop.f32.mrb[6].mxu1  ;;  %7833 = vmatprep.mubr.msk.bf16.mxu0 %vm8424_vm1, %v8423_v0  ;;  %v7014_v38 = vcombine.low %v2907_v14, %v2917_v20  ;;  %v2971_v57 = vrot.slane %v2969_v35, 6  ;;  %v7015_v3 = vcombine.low %v2935_v44, %v2945_v50  ;;  %v2564_v11 = vrot.slane %v9220_v58, 5 }
 0x109   : > { %869 = vst.msk [vmem:[#allocation2 + $0x10] sm:$0xff] %vm396_vm12, %v851_v56  ;;  %v852_v7 = vadd.f32 %v834_v1, %v771_v63  ;;  %v7638_v8 = vpop.f32.mrb[7].mxu1  ;;  %v9217_v56 = vor.u32 %v2961_v34, %v2958_v32  ;;  %v6968_v1 = vcombine.low %v2551_v39, %v2554_v40  ;;  %v2954_v14 = vrot.slane %v2953_v52, 4 }
 0x10a   : > { %v349_v13 = vpop.f32.mrb[12].mxu0  ;;  %v835_v37 = vld [vmem:[#allocation2 + $0x20] sm:$0xff]  ;;  %v2972_v17 = vor.u32 %v2971_v57, %v9214_v53  ;;  %v2977_v18 = vrot.slane %v2975_v59, 5  ;;  %v2980_v22 = vrot.slane %v2978_v61, 6  ;;  %v3006_v30 = vshll.u32 %v7001_v12, 16 }
 0x10b   : > { %870 = vst.msk [vmem:[#allocation2 + $0x18] sm:$0xff] %vm396_vm12, %v852_v7  ;;  %7864 = vmatmul.mubr.msk.bf16.gmra.mrb[112].mxu1 %vm259_vm2, %v7013_v51  ;;  %403 = vst.msk [vmem:[#allocation2 + $0x30] sm:$0xff] %vm396_vm12, %v349_v13  ;;  %v7607_v19 = vpop.f32.mrb[13].mxu0  ;;  %v2559_v51 = vrot.slane %v2557_v24, 4  ;;  %v9230_v7 = vsel %vm8689_vm8, %v6958_v45, %v2557_v24  ;;  %v2964_v15 = vrot.slane %v9217_v56, 4  ;;  %v2994_v24 = vshrl.u32 %v7000_v4, 16 }
 0x10c   : > { %v352_v25 = vpop.f32.mrb[14].mxu0  ;;  %7867 = vmatprep.mubr.msk.bf16.mxu1 %vm8424_vm1, %v8423_v0  ;;  %v836_v49 = vld [vmem:[#allocation2 + $0x28] sm:$0xff]  ;;  %v7002_v19 = vld [vmem:[%s8548_s6 + $0x58] sm:$0xf]  ;;  %v2566_v40 = vrot.slane %v2564_v11, 4  ;;  %v2567_v41 = vrot.slane %v9238_v10, 5  ;;  %v2963_v44 = vsel %vm8726_vm11, %v2954_v14, %v9217_v56 }
 0x10d   : > { %404 = vst.msk [vmem:[#allocation2 + $0x38] sm:$0xff] %vm396_vm12, %v352_v25  ;;  %v7608_v31 = vpop.f32.mrb[15].mxu0  ;;  %v9234_v8 = vsel %vm8689_vm8, %v2559_v51, %v2560_v46  ;;  %v2997_v25 = vshll.u32 %v7000_v4, 16  ;;  %v3012_v35 = vshrl.u32 %v7002_v19, 16  ;;  %v2973_v45 = vsel %vm8726_vm11, %v2964_v15, %v2972_v17  ;;  %v9265_v51 = vld [vmem:[%s8548_s6 + $0x64] sm:$0xf] }
 0x10e   : > { %v776_v36 = vpop.f32.mrb[8].mxu1  ;;  %v6969_v34 = vcombine.low %v9230_v7, %v9234_v8  ;;  %v2981_v46 = vor.u32 %v2980_v22, %v2977_v18  ;;  %v2996_v47 = vrot.slane %v2994_v24, 5  ;;  %v3005_v52 = vrot.slane %v3003_v29, 5  ;;  %v7004_v61 = vld [vmem:[%s8548_s6 + $0x60] sm:$0xe] }
 0x10f   : > { %v853_v42 = vadd.f32 %v835_v37, %v776_v36  ;;  %v7641_v43 = vpop.f32.mrb[9].mxu1  ;;  %7834 = vmatmul.mubr.msk.bf16.gmra.mrb[120].mxu0 %vm259_vm2, %v6967_v9  ;;  %v6944_v9 = vld [vmem:[%s8548_s6 + $0x54] sm:$0xe]  ;;  %v3015_v36 = vshll.u32 %v7002_v19, 16  ;;  %v2999_v50 = vrot.slane %v2997_v25, 6  ;;  %v3008_v53 = vrot.slane %v3006_v30, 6 }
 0x110   : > { %v779_v48 = vpop.f32.mrb[10].mxu1  ;;  %7837 = vmatprep.mubr.msk.bf16.mxu0 %vm8424_vm1, %v8423_v0  ;;  %v6959_v39 = vrot.slane %v6944_v9, 9  ;;  %v2568_v4 = vsel %vm8689_vm8, %v2566_v40, %v2567_v41  ;;  %v2982_v5 = vrot.slane %v2981_v46, 4  ;;  %v6949_v12 = vld [vmem:[%s8548_s6 + $0x68] sm:$0x1]  ;;  %v3034_v24 = vshll.u32 %v7004_v61, 16 }
 0x111   : > { %871 = vst.msk [vmem:[#allocation2 + $0x20] sm:$0xff] %vm396_vm12, %v853_v42  ;;  %v854_v54 = vadd.f32 %v836_v49, %v779_v48  ;;  %v7642_v55 = vpop.f32.mrb[11].mxu1  ;;  %v7003_v42 = vld [vmem:[%s8548_s6 + $0x5c] sm:$0x3]  ;;  %v9262_v49 = vor.u32 %v2989_v28, %v2986_v23  ;;  %v3017_v56 = vrot.slane %v3015_v36, 6  ;;  %v3000_v10 = vor.u32 %v2999_v50, %v2996_v47 }
 0x112   : > { %v357_v60 = vpop.f32.mrb[16].mxu0  ;;  %v837_v21 = vld [vmem:[#allocation2 + $0x30] sm:$0xff]  ;;  %v3014_v55 = vrot.slane %v3012_v35, 5  ;;  %v3022_v57 = vshrl.u32 %v7003_v42, 16  ;;  %v3025_v58 = vshll.u32 %v7003_v42, 16  ;;  %v2574_v35 = vrot.slane %v6949_v12, 5 }
 0x113   : > { %872 = vst.msk [vmem:[#allocation2 + $0x28] sm:$0xff] %vm396_vm12, %v854_v54  ;;  %7868 = vmatmul.mubr.msk.bf16.gmra.mrb[116].mxu1 %vm259_vm2, %v7014_v38  ;;  %405 = vst.msk [vmem:[#allocation2 + $0x40] sm:$0xff] %vm396_vm12, %v357_v60  ;;  %v7611_v63 = vpop.f32.mrb[17].mxu0  ;;  %v9272_v60 = vsel %vm8689_vm8, %v6959_v39, %v2564_v11  ;;  %v2992_v9 = vrot.slane %v9262_v49, 4  ;;  %v6947_v11 = vld [vmem:[%s8548_s6 + $0x60] sm:$0xe] }
 0x114   : > { %v360_v6 = vpop.f32.mrb[18].mxu0  ;;  %7871 = vmatprep.mubr.msk.bf16.mxu1 %vm8424_vm1, %v8423_v0  ;;  %v838_v32 = vld [vmem:[#allocation2 + $0x38] sm:$0xff]  ;;  %v9285_v17 = vor.u32 %v3017_v56, %v3014_v55  ;;  %v3024_v18 = vrot.slane %v3022_v57, 5  ;;  %v3027_v19 = vrot.slane %v3025_v58, 6  ;;  %v9289_v23 = vld [vmem:[%s8548_s6 + $0x70] sm:$0xf]  ;;  %v6970_v28 = vcombine.low %v9272_v60, %v2568_v4 }
 0x115   : > { %406 = vst.msk [vmem:[#allocation2 + $0x48] sm:$0xff] %vm396_vm12, %v360_v6  ;;  %v7612_v13 = vpop.f32.mrb[19].mxu0  ;;  %v2571_v6 = vrot.slane %v9265_v51, 5  ;;  %v6960_v29 = vrot.slane %v6947_v11, 9  ;;  %v6950_v36 = vld [vmem:[%s8548_s6 + $0x6c] sm:$0xe] }
 0x116   : > { %v784_v20 = vpop.f32.mrb[12].mxu1  ;;  %v3009_v13 = vor.u32 %v3008_v53, %v3005_v52  ;;  %v3020_v40 = vrot.slane %v9285_v17, 4  ;;  %v3028_v41 = vor.u32 %v3027_v19, %v3024_v18  ;;  %v6952_v42 = vld [vmem:[%s8548_s6 + $0x74] sm:$0x1]  ;;  %v3036_v46 = vrot.slane %v3034_v24, 6 }
 0x117   : > { %v855_v26 = vadd.f32 %v837_v21, %v784_v20  ;;  %v7645_v27 = vpop.f32.mrb[13].mxu1  ;;  %7838 = vmatmul.mubr.msk.bf16.gmra.mrb[124].mxu0 %vm259_vm2, %v6968_v1  ;;  %v7016_v1 = vcombine.low %v2963_v44, %v2973_v45  ;;  %v3031_v20 = vshrl.u32 %v7004_v61, 16  ;;  %v2572_v56 = vsel %vm8689_vm8, %v6960_v29, %v2571_v6  ;;  %v7007_v58 = vld [vmem:[%s8548_s6 + $0x6c] sm:$0xe] }
 0x118   : > { %v787_v31 = vpop.f32.mrb[14].mxu1  ;;  %7841 = vmatprep.mubr.msk.bf16.mxu0 %vm8424_vm1, %v8423_v0  ;;  %v3010_v39 = vrot.slane %v3009_v13, 4  ;;  %v2581_v4 = vrot.slane %v6952_v42, 5  ;;  %v3059_v12 = vshrl.u32 %v7007_v58, 16  ;;  %v3062_v13 = vshll.u32 %v7007_v58, 16 }
 0x119   : > { %873 = vst.msk [vmem:[#allocation2 + $0x30] sm:$0xff] %vm396_vm12, %v855_v26  ;;  %v856_v37 = vadd.f32 %v838_v32, %v787_v31  ;;  %v7646_v38 = vpop.f32.mrb[15].mxu1  ;;  %v2991_v31 = vsel %vm8726_vm11, %v2982_v5, %v9262_v49  ;;  %v3001_v32 = vsel %vm8726_vm11, %v2992_v9, %v3000_v10  ;;  %v3033_v45 = vrot.slane %v3031_v20, 5 }
 0x11a   : > { %v365_v43 = vpop.f32.mrb[20].mxu0  ;;  %v839_v63 = vld [vmem:[#allocation2 + $0x40] sm:$0xff]  ;;  %v7017_v55 = vcombine.low %v2991_v31, %v3001_v32  ;;  %v3064_v31 = vrot.slane %v3062_v13, 6 }
 0x11b   : > { %874 = vst.msk [vmem:[#allocation2 + $0x38] sm:$0xff] %vm396_vm12, %v856_v37  ;;  %7872 = vmatmul.mubr.msk.bf16.gmra.mrb[120].mxu1 %vm259_vm2, %v7015_v3  ;;  %407 = vst.msk [vmem:[#allocation2 + $0x50] sm:$0xff] %vm396_vm12, %v365_v43  ;;  %v7615_v48 = vpop.f32.mrb[21].mxu0  ;;  %v7005_v3 = vld [vmem:[%s8548_s6 + $0x64] sm:$0xf]  ;;  %v2578_v43 = vrot.slane %v9289_v23, 5 }
 0x11c   : > { %v368_v54 = vpop.f32.mrb[22].mxu0  ;;  %7875 = vmatprep.mubr.msk.bf16.mxu1 %vm8424_vm1, %v8423_v0  ;;  %v840_v15 = vld [vmem:[#allocation2 + $0x48] sm:$0xff]  ;;  %v3040_v25 = vshrl.u32 %v7005_v3, 16  ;;  %v3043_v26 = vshll.u32 %v7005_v3, 16  ;;  %v3029_v3 = vsel %vm8726_vm11, %v3020_v40, %v3028_v41  ;;  %v7075_v13 = vld [vmem:[%s8548_s6 + $0x24] sm:$0xf] }
 0x11d   : > { %408 = vst.msk [vmem:[#allocation2 + $0x58] sm:$0xff] %vm396_vm12, %v368_v54  ;;  %v7616_v59 = vpop.f32.mrb[23].mxu0  ;;  %v7006_v37 = vld [vmem:[%s8548_s6 + $0x68] sm:$0x3] }
 0x11e   : > { %v792_v62 = vpop.f32.mrb[16].mxu1  ;;  %v3042_v47 = vrot.slane %v3040_v25, 5  ;;  %v3045_v48 = vrot.slane %v3043_v26, 6  ;;  %v3050_v51 = vshrl.u32 %v7006_v37, 16  ;;  %v3053_v52 = vshll.u32 %v7006_v37, 16 }
 0x11f   : > { %v857_v7 = vadd.f32 %v839_v63, %v792_v62  ;;  %v7649_v8 = vpop.f32.mrb[17].mxu1  ;;  %7842 = vmatmul.mubr.msk.bf16.gmra.mrb[128].mxu0 %vm259_vm2, %v6969_v34  ;;  %v2573_v34 = vrot.slane %v2571_v6, 4  ;;  %v7008_v59 = vld [vmem:[%s8548_s6 + $0x70] sm:$0xf]  ;;  %v3019_v62 = vsel %vm8726_vm11, %v3010_v39, %v9285_v17  ;;  %v6961_v63 = vrot.slane %v6950_v36, 9 }
 0x120   : > { %v795_v14 = vpop.f32.mrb[18].mxu1  ;;  %7845 = vmatprep.mubr.msk.bf16.mxu0 %vm8424_vm1, %v8423_v0  ;;  %v9323_v8 = vor.u32 %v3045_v48, %v3042_v47  ;;  %v3052_v10 = vrot.slane %v3050_v51, 5  ;;  %v3055_v11 = vrot.slane %v3053_v52, 6  ;;  %v7009_v17 = vld [vmem:[%s8548_s6 + $0x74] sm:$0x3]  ;;  %v3068_v18 = vshrl.u32 %v7008_v59, 16 }
 0x121   : > { %875 = vst.msk [vmem:[#allocation2 + $0x40] sm:$0xff] %vm396_vm12, %v857_v7  ;;  %v858_v21 = vadd.f32 %v840_v15, %v795_v14  ;;  %v7650_v22 = vpop.f32.mrb[19].mxu1  ;;  %v2575_v57 = vsel %vm8689_vm8, %v2573_v34, %v2574_v35  ;;  %v3037_v7 = vor.u32 %v3036_v46, %v3033_v45  ;;  %v3071_v19 = vshll.u32 %v7008_v59, 16  ;;  %v7072_v39 = vld [vmem:[%s8548_s6 + $0x18] sm:$0xf] }
 0x122   : > { %v373_v27 = vpop.f32.mrb[24].mxu0  ;;  %v841_v50 = vld [vmem:[#allocation2 + $0x50] sm:$0xff]  ;;  %v6971_v15 = vcombine.low %v2572_v56, %v2575_v57  ;;  %v7018_v23 = vcombine.low %v3019_v62, %v3029_v3  ;;  %v3048_v26 = vrot.slane %v9323_v8, 4  ;;  %v3056_v29 = vor.u32 %v3055_v11, %v3052_v10  ;;  %v7073_v45 = vld [vmem:[%s8548_s6 + $0x1c] sm:$0xf] }
 0x123   : > { %876 = vst.msk [vmem:[#allocation2 + $0x48] sm:$0xff] %vm396_vm12, %v858_v21  ;;  %7876 = vmatmul.mubr.msk.bf16.gmra.mrb[124].mxu1 %vm259_vm2, %v7016_v1  ;;  %409 = vst.msk [vmem:[#allocation2 + $0x60] sm:$0xff] %vm396_vm12, %v373_v27  ;;  %v7619_v30 = vpop.f32.mrb[25].mxu0  ;;  %v2580_v1 = vrot.slane %v2578_v43, 4  ;;  %v2579_v21 = vsel %vm8689_vm8, %v6961_v63, %v2578_v43  ;;  %v3038_v25 = vrot.slane %v3037_v7, 4  ;;  %v3078_v32 = vshrl.u32 %v7009_v17, 16 }
 0x124   : > { %v376_v38 = vpop.f32.mrb[26].mxu0  ;;  %7879 = vmatprep.mubr.msk.bf16.mxu1 %vm8424_vm1, %v8423_v0  ;;  %v842_v61 = vld [vmem:[#allocation2 + $0x58] sm:$0xff]  ;;  %v3061_v30 = vrot.slane %v3059_v12, 5  ;;  %v3070_v36 = vrot.slane %v3068_v18, 5  ;;  %v3073_v37 = vrot.slane %v3071_v19, 6  ;;  %v3057_v52 = vsel %vm8726_vm11, %v3048_v26, %v3056_v29 }
 0x125   : > { %410 = vst.msk [vmem:[#allocation2 + $0x68] sm:$0xff] %vm396_vm12, %v376_v38  ;;  %v7620_v44 = vpop.f32.mrb[27].mxu0  ;;  %v2582_v24 = vsel %vm8689_vm8, %v2580_v1, %v2581_v4  ;;  %v3081_v38 = vshll.u32 %v7009_v17, 16  ;;  %v3047_v47 = vsel %vm8726_vm11, %v3038_v25, %v9323_v8  ;;  %v3611_v57 = vshll.u32 %v7073_v45, 16  ;;  %v7074_v7 = vld [vmem:[%s8548_s6 + $0x20] sm:$0x1] }
 0x126   : > { %v800_v49 = vpop.f32.mrb[20].mxu1  ;;  %v6972_v44 = vcombine.low %v2579_v21, %v2582_v24  ;;  %v3065_v48 = vor.u32 %v3064_v31, %v3061_v30  ;;  %v3615_v58 = vshrl.u32 %v7073_v45, 16  ;;  %v7019_v62 = vcombine.low %v3047_v47, %v3057_v52  ;;  %v8304_v17 = vld [vmem:[%s10820_s1 + $0x50] sm:$0x3f]   ;;  %v7076_v18 = vld [vmem:[%s8548_s6 + $0x28] sm:$0xf] }
 0x127   : > { %v859_v53 = vadd.f32 %v841_v50, %v800_v49  ;;  %v7653_v54 = vpop.f32.mrb[21].mxu1  ;;  %7846 = vmatmul.mubr.msk.bf16.gmra.mrb[132].mxu0 %vm259_vm2, %v6970_v28  ;;  %v3080_v49 = vrot.slane %v3078_v32, 5  ;;  %v3602_v50 = vshrl.u32 %v7072_v39, 16  ;;  %v9361_v11 = vrot.slane %v3611_v57, 5  ;;  %v8303_v25 = vld [vmem:[%s8548_s6 + $0x18] sm:$0xff]   ;;  %v1176_v30 = vld [vmem:[#allocation2 + $0x8] sm:$0xff] }
 0x128   : > { %v803_v60 = vpop.f32.mrb[22].mxu1  ;;  %7849 = vmatprep.mubr.msk.bf16.mxu0 %vm8424_vm1, %v8423_v0  ;;  %v3083_v54 = vrot.slane %v3081_v38, 6  ;;  %v3066_v63 = vrot.slane %v3065_v48, 4  ;;  %v3617_v12 = vrot.slane %v3615_v58, 4  ;;  %v3629_v32 = vshll.u32 %v7075_v13, 16 }
 0x129   : > { %877 = vst.msk [vmem:[#allocation2 + $0x50] sm:$0xff] %vm396_vm12, %v859_v53  ;;  %v860_v5 = vadd.f32 %v842_v61, %v803_v60  ;;  %v7654_v6 = vpop.f32.mrb[23].mxu1  ;;  %v9351_v53 = vor.u32 %v3073_v37, %v3070_v36  ;;  %v3604_v1 = vrot.slane %v3602_v50, 4  ;;  %v4221_v38 = vsel %vm287_vm0, %v8304_v17, 0  ;;  %v8306_v17 = vld [vmem:[%s10820_s1 + $0x58] sm:$0x3f]  }
 0x12a   : > { %v381_v9 = vpop.f32.mrb[28].mxu0  ;;  %v843_v28 = vld [vmem:[#allocation2 + $0x60] sm:$0xff]  ;;  %v3084_v3 = vor.u32 %v3083_v54, %v3080_v49  ;;  %v3618_v31 = vor.u32 %v3617_v12, %v9361_v11  ;;  %v7079_v49 = vld [vmem:[%s8548_s6 + $0x34] sm:$0xf] }
 0x12b   : > { %878 = vst.msk [vmem:[#allocation2 + $0x58] sm:$0xff] %vm396_vm12, %v860_v5  ;;  %7880 = vmatmul.mubr.msk.bf16.gmra.mrb[128].mxu1 %vm259_vm2, %v7017_v55  ;;  %411 = vst.msk [vmem:[#allocation2 + $0x70] sm:$0xff] %vm396_vm12, %v381_v9  ;;  %v7623_v14 = vpop.f32.mrb[29].mxu0  ;;  %v3605_v55 = vshll.u32 %v7072_v39, 16  ;;  %v3076_v6 = vrot.slane %v9351_v53, 4  ;;  %v3075_v21 = vsel %vm8726_vm11, %v3066_v63, %v9351_v53  ;;  %v3631_v53 = vrot.slane %v3629_v32, 5 }
 0x12c   : > { %v384_v20 = vpop.f32.mrb[30].mxu0  ;;  %7883 = vmatprep.mubr.msk.bf16.mxu1 %vm8424_vm1, %v8423_v0  ;;  %v844_v41 = vld [vmem:[#allocation2 + $0x68] sm:$0xff]  ;;  %v3619_v52 = vrot.slane %v3618_v31, 4  ;;  %v7080_v31 = vld [vmem:[%s8548_s6 + $0x38] sm:$0x1] }
 0x12d   : > { %412 = vst.msk [vmem:[#allocation2 + $0x78] sm:$0xff] %vm396_vm12, %v384_v20  ;;  %v7624_v22 = vpop.f32.mrb[31].mxu0  ;;  %v3607_v8 = vrot.slane %v3605_v55, 5  ;;  %v1175_v20 = vld [vmem:[#allocation2] sm:$0xff]  ;;  %v3085_v26 = vsel %vm8726_vm11, %v3076_v6, %v3084_v3  ;;  %v3663_v6 = vshrl.u32 %v7079_v49, 16 }
 0x12e   : > { %v808_v27 = vpop.f32.mrb[24].mxu1  ;;  %v3621_v22 = vshll.u32 %v7074_v7, 16 }
 0x12f   : > { %v861_v34 = vadd.f32 %v843_v28, %v808_v27  ;;  %v7657_v35 = vpop.f32.mrb[25].mxu1  ;;  %7850 = vmatmul.mubr.msk.bf16.gmra.mrb[136].mxu0 %vm259_vm2, %v6971_v15  ;;  %v3608_v27 = vor.u32 %v3607_v8, %v3604_v1  ;;  %v3626_v28 = vshrl.u32 %v7075_v13, 16  ;;  %v8305_v1 = vld [vmem:[%s8548_s6 + $0x24] sm:$0xff]   ;;  %v1178_v8 = vld [vmem:[#allocation2 + $0x18] sm:$0xff] }
 0x130   : > { %v811_v40 = vpop.f32.mrb[26].mxu1  ;;  %7853 = vmatprep.mubr.msk.bf16.mxu0 %vm8424_vm1, %v8423_v0  ;;  %v3639_v35 = vshrl.u32 %v7076_v18, 16 }
 0x131   : > { %879 = vst.msk [vmem:[#allocation2 + $0x60] sm:$0xff] %vm396_vm12, %v861_v34  ;;  %v862_v42 = vadd.f32 %v844_v41, %v811_v40  ;;  %v7658_v43 = vpop.f32.mrb[27].mxu1  ;;  %v3635_v34 = vshll.u32 %v7076_v18, 16  ;;  %v3623_v41 = vrot.slane %v3621_v22, 5  ;;  %v3609_v47 = vrot.slane %v3608_v27, 4 }
 0x132   : > { %v389_v46 = vpop.f32.mrb[32].mxu0  ;;  %v845_v61 = vld [vmem:[#allocation2 + $0x70] sm:$0xff]  ;;  %v3628_v48 = vrot.slane %v3626_v28, 4  ;;  %v3641_v55 = vrot.slane %v3639_v35, 4  ;;  %v4724_v35 = vsel %vm287_vm0, %v8306_v17, 0 }
 0x133   : > { %880 = vst.msk [vmem:[#allocation2 + $0x68] sm:$0xff] %vm396_vm12, %v862_v42  ;;  %7884 = vmatmul.mubr.msk.bf16.gmra.mrb[132].mxu1 %vm259_vm2, %v7018_v23  ;;  %413 = vst.msk [vmem:[#allocation2 + $0x80] sm:$0xff] %vm396_vm12, %v389_v46  ;;  %v7627_v51 = vpop.f32.mrb[33].mxu0  ;;  %v7077_v42 = vld [vmem:[%s8548_s6 + $0x2c] sm:$0x1]  ;;  %v7020_v46 = vcombine.low %v3075_v21, %v3085_v26  ;;  %v9389_v54 = vrot.slane %v3635_v34, 5 }
 0x134   : > { %v392_v56 = vpop.f32.mrb[34].mxu0  ;;  %7887 = vmatprep.mubr.msk.bf16.mxu1 %vm8424_vm1, %v8423_v0  ;;  %v846_v10 = vld [vmem:[#allocation2 + $0x78] sm:$0xff]  ;;  %v7078_v43 = vld [vmem:[%s8548_s6 + $0x30] sm:$0xf]  ;;  %v3632_v12 = vor.u32 %v3631_v53, %v3628_v48 }
 0x135   : > { %414 = vst.msk [vmem:[#allocation2 + $0x88] sm:$0xff] %vm396_vm12, %v392_v56  ;;  %v7628_v59 = vpop.f32.mrb[35].mxu0  ;;  %v3642_v13 = vor.u32 %v3641_v55, %v9389_v54  ;;  %v7081_v26 = vld [vmem:[%s8548_s6 + $0x3c] sm:$0xf] }
 0x136   : > { %v816_v60 = vpop.f32.mrb[28].mxu1  ;;  %v1177_v59 = vld [vmem:[#allocation2 + $0x10] sm:$0xff]  ;;  %v3633_v28 = vrot.slane %v3632_v12, 4  ;;  %v7085_v12 = vld [vmem:[%s8548_s6 + $0x4c] sm:$0xf] }
 0x137   : > { %v863_v4 = vadd.f32 %v845_v61, %v816_v60  ;;  %v7661_v5 = vpop.f32.mrb[29].mxu1  ;;  %7854 = vmatmul.mubr.msk.bf16.gmra.mrb[140].mxu0 %vm259_vm2, %v6972_v44  ;;  %v3650_v60 = vshrl.u32 %v7078_v43, 16  ;;  %v3653_v61 = vshll.u32 %v7078_v43, 16 }
 0x138   : > { %v819_v9 = vpop.f32.mrb[30].mxu1  ;;  %7897 = vmatprep.mubr.msk.bf16.mxu0 %vm8424_vm1, %v8423_v0  ;;  %v3659_v5 = vshll.u32 %v7079_v49, 16  ;;  %v1180_v49 = vld [vmem:[#allocation2 + $0x28] sm:$0xff] }
 0x139   : > { %881 = vst.msk [vmem:[#allocation2 + $0x70] sm:$0xff] %vm396_vm12, %v863_v4  ;;  %v864_v14 = vadd.f32 %v846_v10, %v819_v9  ;;  %v7662_v15 = vpop.f32.mrb[31].mxu1  ;;  %v3645_v4 = vshll.u32 %v7077_v42, 16  ;;  %v3614_v9 = vsel %vm8569_vm5, %v3609_v47, %v9361_v11  ;;  %v3624_v10 = vsel %vm8569_vm5, %v3619_v52, %v3623_v41 }
 0x13a   : > { %v1104_v19 = vpop.f32.mrb[36].mxu0  ;;  %v847_v40 = vld [vmem:[#allocation2 + $0x80] sm:$0xff]  ;;  %v3655_v11 = vrot.slane %v3653_v61, 5  ;;  %v3677_v41 = vshll.u32 %v7081_v26, 16 }
 0x13b   : > { %882 = vst.msk [vmem:[#allocation2 + $0x78] sm:$0xff] %vm396_vm12, %v864_v14  ;;  %7888 = vmatmul.mubr.msk.bf16.gmra.mrb[136].mxu1 %vm259_vm2, %v7019_v62  ;;  %v1193_v23 = vadd.f32 %v1175_v20, %v1104_v19  ;;  %v7671_v24 = vpop.f32.mrb[37].mxu0  ;;  %v3652_v20 = vrot.slane %v3650_v60, 4 }
 0x13c   : > { %v1107_v29 = vpop.f32.mrb[38].mxu0  ;;  %7891 = vmatprep.mubr.msk.bf16.mxu1 %vm8424_vm1, %v8423_v0  ;;  %v848_v51 = vld [vmem:[#allocation2 + $0x88] sm:$0xff]  ;;  %v9410_v24 = vrot.slane %v3659_v5, 5  ;;  %v3679_v61 = vrot.slane %v3677_v41, 5 }
 0x13d   : > { %1211 = vst.msk [vmem:[#allocation2] sm:$0xff] %vm396_vm12, %v1193_v23  ;;  %v1194_v36 = vadd.f32 %v1176_v30, %v1107_v29  ;;  %v7672_v37 = vpop.f32.mrb[39].mxu0  ;;  %v7101_v23 = vcombine.low %v3614_v9, %v3624_v10  ;;  %v3643_v29 = vrot.slane %v3642_v13, 4  ;;  %v3647_v30 = vrot.slane %v3645_v4, 5  ;;  %v7083_v10 = vld [vmem:[%s8548_s6 + $0x44] sm:$0x1] }
 0x13e   : > { %v824_v39 = vpop.f32.mrb[32].mxu1 }
 0x13f   : > { %v865_v44 = vadd.f32 %v847_v40, %v824_v39  ;;  %v7665_v45 = vpop.f32.mrb[33].mxu1  ;;  %1212 = vst.msk [vmem:[#allocation2 + $0x8] sm:$0xff] %vm396_vm12, %v1194_v36  ;;  %7898 = vmatmul.mubr.msk.bf16.vlgmr.msra.gmra.mrb[144].mxu0 %vm259_vm2, %v8303_v25  ;;  %v3665_v25 = vrot.slane %v3663_v6, 4  ;;  %v7082_v36 = vld [vmem:[%s8548_s6 + $0x40] sm:$0xf]  ;;  %v3656_v39 = vor.u32 %v3655_v11, %v3652_v20  ;;  %v3674_v40 = vshrl.u32 %v7081_v26, 16 }
 0x140   : > { %v827_v50 = vpop.f32.mrb[34].mxu1  ;;  %7972 = vmatpush3.bf16.msra.mxu0 %v4221_v38  ;;  %7901 = vmatprep.mubr.msk.bf16.mxu0 %vm8424_vm1, %v8423_v0  ;;  %v1179_v38 = vld [vmem:[#allocation2 + $0x20] sm:$0xff]  ;;  %v3683_v52 = vshll.u32 %v7082_v36, 16  ;;  %v3687_v53 = vshrl.u32 %v7082_v36, 16  ;;  %v1182_v26 = vld [vmem:[#allocation2 + $0x38] sm:$0xff] }
 0x141   : > { %883 = vst.msk [vmem:[#allocation2 + $0x80] sm:$0xff] %vm396_vm12, %v865_v44  ;;  %v866_v56 = vadd.f32 %v848_v51, %v827_v50  ;;  %v7666_v57 = vpop.f32.mrb[35].mxu1  ;;  %8047 = vmatprep.subr.bf16.mxu0 %v8423_v0  ;;  %v8307_v44 = vld [vmem:[%s8548_s6 + $0x30] sm:$0xff]   ;;  %v3666_v45 = vor.u32 %v3665_v25, %v9410_v24  ;;  %v3638_v50 = vsel %vm8569_vm5, %v3633_v28, %v9389_v54  ;;  %v3676_v60 = vrot.slane %v3674_v40, 4  ;;  %v8308_v20 = vld [vmem:[%s8548_s6 + $0x3c] sm:$0xff]  }
 0x142   : > { %v1112_v58 = vpop.f32.mrb[40].mxu0  ;;  %v3648_v51 = vsel %vm8569_vm5, %v3643_v29, %v3647_v30  ;;  %v9436_v6 = vrot.slane %v3683_v52, 5  ;;  %v3707_v28 = vshll.u32 %v7085_v12, 16  ;;  %v3711_v29 = vshrl.u32 %v7085_v12, 16  ;;  %v7086_v36 = vld [vmem:[%s8548_s6 + $0x50] sm:$0x1] }
 0x143   : > { %884 = vst.msk [vmem:[#allocation2 + $0x88] sm:$0xff] %vm396_vm12, %v866_v56  ;;  %7892 = vmatmul.mubr.msk.bf16.gmra.mrb[140].mxu1 %vm259_vm2, %v7020_v46  ;;  %v1195_v62 = vadd.f32 %v1177_v59, %v1112_v58  ;;  %v7675_v63 = vpop.f32.mrb[41].mxu0  ;;  %v3669_v46 = vshll.u32 %v7080_v31, 16  ;;  %v3657_v59 = vrot.slane %v3656_v39, 4  ;;  %v3680_v17 = vor.u32 %v3679_v61, %v3676_v60  ;;  %v1183_v52 = vld [vmem:[#allocation2 + $0x40] sm:$0xff] }
 0x144   : > { %v1681_v3 = vld [vmem:[#allocation2] sm:$0xff]  ;;  %v1115_v7 = vpop.f32.mrb[42].mxu0  ;;  %7935 = vmatprep.mubr.msk.bf16.mxu1 %vm8424_vm1, %v8423_v0  ;;  %v7102_v63 = vcombine.low %v3638_v50, %v3648_v51  ;;  %v7088_v50 = vld [vmem:[%s8548_s6 + $0x58] sm:$0xf]  ;;  %v3717_v61 = vshll.u32 %v7086_v36, 16 }
 0x145   : > { %1213 = vst.msk [vmem:[#allocation2 + $0x10] sm:$0xff] %vm396_vm12, %v1195_v62  ;;  %v1196_v14 = vadd.f32 %v1178_v8, %v1115_v7  ;;  %v7676_v15 = vpop.f32.mrb[43].mxu0  ;;  %v3671_v4 = vrot.slane %v3669_v46, 5  ;;  %v7084_v7 = vld [vmem:[%s8548_s6 + $0x48] sm:$0xf]  ;;  %v3681_v39 = vrot.slane %v3680_v17, 4 }
 0x146   : > { %v1610_v18 = vpop.f32.mrb[36].mxu1  ;;  %v1682_v19 = vld [vmem:[#allocation2 + $0x8] sm:$0xff]  ;;  %v3662_v15 = vsel %vm8569_vm5, %v3657_v59, %v9410_v24  ;;  %v9460_v46 = vrot.slane %v3707_v28, 5  ;;  %v1185_v28 = vld [vmem:[#allocation2 + $0x50] sm:$0xff] }
 0x147   : > { %v1699_v21 = vadd.f32 %v1681_v3, %v1610_v18  ;;  %1214 = vst.msk [vmem:[#allocation2 + $0x18] sm:$0xff] %vm396_vm12, %v1196_v14  ;;  %v7709_v22 = vpop.f32.mrb[37].mxu1  ;;  %7902 = vmatmul.mubr.msk.bf16.gmra.mrb[148].mxu0 %vm259_vm2, %v8305_v1  ;;  %v3667_v1 = vrot.slane %v3666_v45, 4  ;;  %v3689_v3 = vrot.slane %v3687_v53, 4  ;;  %v1181_v14 = vld [vmem:[#allocation2 + $0x30] sm:$0xff]  ;;  %v3686_v59 = vsel %vm8569_vm5, %v3681_v39, %v9436_v6 }
 0x148   : > { %v1613_v27 = vpop.f32.mrb[38].mxu1  ;;  %7905 = vmatprep.mubr.msk.bf16.mxu0 %vm8424_vm1, %v8423_v0  ;;  %v3701_v22 = vshll.u32 %v7084_v7, 16 }
 0x149   : > { %1717 = vst.msk [vmem:[#allocation2] sm:$0xff] %vm396_vm12, %v1699_v21  ;;  %v1700_v32 = vadd.f32 %v1682_v19, %v1613_v27  ;;  %v7710_v34 = vpop.f32.mrb[39].mxu1  ;;  %v3672_v11 = vsel %vm8569_vm5, %v3667_v1, %v3671_v4  ;;  %v3698_v21 = vshrl.u32 %v7084_v7, 16  ;;  %v3690_v24 = vor.u32 %v3689_v3, %v9436_v6 }
 0x14a   : > { %v1120_v37 = vpop.f32.mrb[44].mxu0  ;;  %v3693_v27 = vshll.u32 %v7083_v10, 16  ;;  %v3703_v41 = vrot.slane %v3701_v22, 5  ;;  %v3735_v3 = vshrl.u32 %v7088_v50, 16 }
 0x14b   : > { %1718 = vst.msk [vmem:[#allocation2 + $0x8] sm:$0xff] %vm396_vm12, %v1700_v32  ;;  %7936 = vmatmul.mubr.msk.bf16.vlgmr.msra.gmra.mrb[144].mxu1 %vm259_vm2, %v7101_v23  ;;  %v1197_v42 = vadd.f32 %v1179_v38, %v1120_v37  ;;  %v7679_v43 = vpop.f32.mrb[45].mxu0  ;;  %v3700_v40 = vrot.slane %v3698_v21, 4  ;;  %v3719_v21 = vrot.slane %v3717_v61, 5 }
 0x14c   : > { %8010 = vmatpush3.bf16.msra.mxu1 %v4724_v35  ;;  %v1683_v47 = vld [vmem:[#allocation2 + $0x10] sm:$0xff]  ;;  %v1123_v48 = vpop.f32.mrb[46].mxu0  ;;  %7939 = vmatprep.mubr.msk.bf16.mxu1 %vm8424_vm1, %v8423_v0  ;;  %v7103_v35 = vcombine.low %v3662_v15, %v3672_v11  ;;  %v3695_v45 = vrot.slane %v3693_v27, 5 }
 0x14d   : > { %1215 = vst.msk [vmem:[#allocation2 + $0x20] sm:$0xff] %vm396_vm12, %v1197_v42  ;;  %v1198_v55 = vadd.f32 %v1180_v49, %v1123_v48  ;;  %v7680_v56 = vpop.f32.mrb[47].mxu0  ;;  %8085 = vmatprep.subr.bf16.mxu1 %v8423_v0  ;;  %v7087_v42 = vld [vmem:[%s8548_s6 + $0x54] sm:$0xf]  ;;  %v3704_v60 = vor.u32 %v3703_v41, %v3700_v40  ;;  %v1186_v40 = vld [vmem:[#allocation2 + $0x58] sm:$0xff] }
 0x14e   : > { %v1618_v57 = vpop.f32.mrb[40].mxu1  ;;  %v1684_v58 = vld [vmem:[#allocation2 + $0x18] sm:$0xff]  ;;  %v3722_v53 = vshrl.u32 %v7087_v42, 16 }
 0x14f   : > { %v1701_v62 = vadd.f32 %v1683_v47, %v1618_v57  ;;  %1216 = vst.msk [vmem:[#allocation2 + $0x28] sm:$0xff] %vm396_vm12, %v1198_v55  ;;  %v7713_v54 = vpop.f32.mrb[41].mxu1  ;;  %7906 = vmatmul.mubr.msk.bf16.gmra.mrb[152].mxu0 %vm259_vm2, %v8307_v44  ;;  %v3691_v44 = vrot.slane %v3690_v24, 4  ;;  %v3713_v47 = vrot.slane %v3711_v29, 4  ;;  %v3725_v55 = vshll.u32 %v7087_v42, 16 }
 0x150   : > { %v1621_v5 = vpop.f32.mrb[42].mxu1  ;;  %7909 = vmatprep.mubr.msk.bf16.mxu0 %vm8424_vm1, %v8423_v0  ;;  %v3724_v10 = vrot.slane %v3722_v53, 4  ;;  %v3705_v17 = vrot.slane %v3704_v60, 4  ;;  %v7091_v24 = vld [vmem:[%s8548_s6 + $0x64] sm:$0xf] }
 0x151   : > { %1719 = vst.msk [vmem:[#allocation2 + $0x10] sm:$0xff] %vm396_vm12, %v1701_v62  ;;  %v1702_v8 = vadd.f32 %v1684_v58, %v1621_v5  ;;  %v7714_v9 = vpop.f32.mrb[43].mxu1  ;;  %v8309_v58 = vld [vmem:[%s8548_s6 + $0x48] sm:$0xff]   ;;  %v3696_v1 = vsel %vm8569_vm5, %v3691_v44, %v3695_v45  ;;  %v3714_v4 = vor.u32 %v3713_v47, %v9460_v46  ;;  %v3731_v5 = vshll.u32 %v7088_v50, 16 }
 0x152   : > { %v1128_v13 = vpop.f32.mrb[48].mxu0  ;;  %v3727_v12 = vrot.slane %v3725_v55, 5  ;;  %v7104_v15 = vcombine.low %v3686_v59, %v3696_v1  ;;  %v3759_v44 = vshrl.u32 %v7091_v24, 16  ;;  %v7093_v50 = vld [vmem:[%s8548_s6 + $0x6c] sm:$0xf] }
 0x153   : > { %1720 = vst.msk [vmem:[#allocation2 + $0x18] sm:$0xff] %vm396_vm12, %v1702_v8  ;;  %7940 = vmatmul.mubr.msk.bf16.gmra.mrb[148].mxu1 %vm259_vm2, %v7102_v63  ;;  %v1199_v18 = vadd.f32 %v1181_v14, %v1128_v13  ;;  %v7683_v19 = vpop.f32.mrb[49].mxu0  ;;  %v1184_v63 = vld [vmem:[#allocation2 + $0x48] sm:$0xff]  ;;  %v3715_v11 = vrot.slane %v3714_v4, 4  ;;  %v9482_v22 = vrot.slane %v3731_v5, 5  ;;  %v3770_v4 = vshrl.u32 %v7093_v50, 16 }
 0x154   : > { %v1685_v23 = vld [vmem:[#allocation2 + $0x20] sm:$0xff]  ;;  %v1131_v25 = vpop.f32.mrb[50].mxu0  ;;  %7943 = vmatprep.mubr.msk.bf16.mxu1 %vm8424_vm1, %v8423_v0  ;;  %v3728_v29 = vor.u32 %v3727_v12, %v3724_v10  ;;  %v7092_v55 = vld [vmem:[%s8548_s6 + $0x68] sm:$0x1]  ;;  %v7094_v1 = vld [vmem:[%s8548_s6 + $0x70] sm:$0xf] }
 0x155   : > { %1217 = vst.msk [vmem:[#allocation2 + $0x30] sm:$0xff] %vm396_vm12, %v1199_v18  ;;  %v1200_v30 = vadd.f32 %v1182_v26, %v1131_v25  ;;  %v7684_v31 = vpop.f32.mrb[51].mxu0  ;;  %v7089_v18 = vld [vmem:[%s8548_s6 + $0x5c] sm:$0x1]  ;;  %v7090_v19 = vld [vmem:[%s8548_s6 + $0x60] sm:$0xf]  ;;  %v3720_v41 = vsel %vm8569_vm5, %v3715_v11, %v3719_v21 }
 0x156   : > { %v1626_v32 = vpop.f32.mrb[44].mxu1  ;;  %v1686_v34 = vld [vmem:[#allocation2 + $0x28] sm:$0xff]  ;;  %v3746_v36 = vshrl.u32 %v7090_v19, 16  ;;  %v3773_v5 = vshll.u32 %v7093_v50, 16  ;;  %v3783_v11 = vshrl.u32 %v7094_v1, 16 }
 0x157   : > { %v1703_v37 = vadd.f32 %v1685_v23, %v1626_v32  ;;  %1218 = vst.msk [vmem:[#allocation2 + $0x38] sm:$0xff] %vm396_vm12, %v1200_v30  ;;  %v7717_v38 = vpop.f32.mrb[45].mxu1  ;;  %7910 = vmatmul.mubr.msk.bf16.gmra.mrb[156].mxu0 %vm259_vm2, %v8308_v20  ;;  %v3737_v23 = vrot.slane %v3735_v3, 4  ;;  %v3741_v30 = vshll.u32 %v7089_v18, 16 }
 0x158   : > { %v1629_v43 = vpop.f32.mrb[46].mxu1  ;;  %7913 = vmatprep.mubr.msk.bf16.mxu0 %vm8424_vm1, %v8423_v0 }
 0x159   : > { %1721 = vst.msk [vmem:[#allocation2 + $0x20] sm:$0xff] %vm396_vm12, %v1703_v37  ;;  %v1704_v48 = vadd.f32 %v1686_v34, %v1629_v43  ;;  %v7718_v49 = vpop.f32.mrb[47].mxu1  ;;  %v8310_v34 = vld [vmem:[%s8548_s6 + $0x54] sm:$0xff]   ;;  %v3749_v37 = vshll.u32 %v7090_v19, 16  ;;  %v3738_v42 = vor.u32 %v3737_v23, %v9482_v22  ;;  %v3755_v43 = vshll.u32 %v7091_v24, 16 }
 0x15a   : > { %v1136_v51 = vpop.f32.mrb[52].mxu0  ;;  %v3729_v49 = vrot.slane %v3728_v29, 4  ;;  %v3743_v60 = vrot.slane %v3741_v30, 5  ;;  %v3772_v23 = vrot.slane %v3770_v4, 4 }
 0x15b   : > { %1722 = vst.msk [vmem:[#allocation2 + $0x28] sm:$0xff] %vm396_vm12, %v1704_v48  ;;  %7944 = vmatmul.mubr.msk.bf16.gmra.mrb[152].mxu1 %vm259_vm2, %v7103_v35  ;;  %v1201_v56 = vadd.f32 %v1183_v52, %v1136_v51  ;;  %v7687_v57 = vpop.f32.mrb[53].mxu0  ;;  %v3710_v35 = vsel %vm8569_vm5, %v3705_v17, %v9460_v46  ;;  %v3739_v59 = vrot.slane %v3738_v42, 4  ;;  %v9504_v61 = vrot.slane %v3755_v43, 5  ;;  %v1188_v17 = vld [vmem:[#allocation2 + $0x68] sm:$0xff] }
 0x15c   : > { %v1687_v62 = vld [vmem:[#allocation2 + $0x30] sm:$0xff]  ;;  %v1139_v54 = vpop.f32.mrb[54].mxu0  ;;  %7947 = vmatprep.mubr.msk.bf16.mxu1 %vm8424_vm1, %v8423_v0  ;;  %v7105_v53 = vcombine.low %v3710_v35, %v3720_v41  ;;  %v3751_v57 = vrot.slane %v3749_v37, 5  ;;  %v3734_v10 = vsel %vm8569_vm5, %v3729_v49, %v9482_v22 }
 0x15d   : > { %1219 = vst.msk [vmem:[#allocation2 + $0x40] sm:$0xff] %vm396_vm12, %v1201_v56  ;;  %v1202_v6 = vadd.f32 %v1184_v63, %v1139_v54  ;;  %v7688_v7 = vpop.f32.mrb[55].mxu0  ;;  %v3748_v56 = vrot.slane %v3746_v36, 4  ;;  %v3744_v18 = vsel %vm8569_vm5, %v3739_v59, %v3743_v60 }
 0x15e   : > { %v1634_v8 = vpop.f32.mrb[48].mxu1  ;;  %v1688_v9 = vld [vmem:[#allocation2 + $0x38] sm:$0xff]  ;;  %v7106_v30 = vcombine.low %v3734_v10, %v3744_v18  ;;  %v7098_v18 = vld [vmem:[%s8548_s6 + $0x80] sm:$0x1] }
 0x15f   : > { %v1705_v13 = vadd.f32 %v1687_v62, %v1634_v8  ;;  %1220 = vst.msk [vmem:[#allocation2 + $0x48] sm:$0xff] %vm396_vm12, %v1202_v6  ;;  %v7721_v14 = vpop.f32.mrb[49].mxu1  ;;  %7914 = vmatmul.mubr.msk.bf16.gmra.mrb[160].mxu0 %vm259_vm2, %v8309_v58  ;;  %v3761_v62 = vrot.slane %v3759_v44, 4  ;;  %v1187_v6 = vld [vmem:[#allocation2 + $0x60] sm:$0xff]  ;;  %v3752_v12 = vor.u32 %v3751_v57, %v3748_v56  ;;  %v9531_v44 = vld [vmem:[%s8548_s6 + $0x1c] sm:$0xf] }
 0x160   : > { %v1637_v20 = vpop.f32.mrb[50].mxu1  ;;  %7917 = vmatprep.mubr.msk.bf16.mxu0 %vm8424_vm1, %v8423_v0  ;;  %v1190_v57 = vld [vmem:[#allocation2 + $0x78] sm:$0xff] }
 0x161   : > { %1723 = vst.msk [vmem:[#allocation2 + $0x30] sm:$0xff] %vm396_vm12, %v1705_v13  ;;  %v1706_v25 = vadd.f32 %v1688_v9, %v1637_v20  ;;  %v7722_v26 = vpop.f32.mrb[51].mxu1  ;;  %v8311_v9 = vld [vmem:[%s8548_s6 + $0x60] sm:$0xff]   ;;  %v3765_v13 = vshll.u32 %v7092_v55, 16  ;;  %v3762_v19 = vor.u32 %v3761_v62, %v9504_v61  ;;  %v3779_v20 = vshll.u32 %v7094_v1, 16 }
 0x162   : > { %v1144_v27 = vpop.f32.mrb[56].mxu0  ;;  %v9545_v62 = vld [vmem:[%s8548_s6 + $0x18] sm:$0xe] }
 0x163   : > { %1724 = vst.msk [vmem:[#allocation2 + $0x38] sm:$0xff] %vm396_vm12, %v1706_v25  ;;  %7948 = vmatmul.mubr.msk.bf16.gmra.mrb[156].mxu1 %vm259_vm2, %v7104_v15  ;;  %v1203_v31 = vadd.f32 %v1185_v28, %v1144_v27  ;;  %v7691_v32 = vpop.f32.mrb[57].mxu0  ;;  %v3775_v25 = vrot.slane %v3773_v5, 5  ;;  %v7095_v27 = vld [vmem:[%s8548_s6 + $0x74] sm:$0x1]  ;;  %v3763_v36 = vrot.slane %v3762_v19, 4 }
 0x164   : > { %v1689_v38 = vld [vmem:[#allocation2 + $0x40] sm:$0xff]  ;;  %v1147_v39 = vpop.f32.mrb[58].mxu0  ;;  %7951 = vmatprep.mubr.msk.bf16.mxu1 %vm8424_vm1, %v8423_v0  ;;  %v7096_v32 = vld [vmem:[%s8548_s6 + $0x78] sm:$0xf]  ;;  %v3767_v37 = vrot.slane %v3765_v13, 5  ;;  %v3789_v43 = vshll.u32 %v7095_v27, 16 }
 0x165   : > { %1221 = vst.msk [vmem:[#allocation2 + $0x50] sm:$0xff] %vm396_vm12, %v1203_v31  ;;  %v1204_v45 = vadd.f32 %v1186_v40, %v1147_v39  ;;  %v7692_v46 = vpop.f32.mrb[59].mxu0  ;;  %v3753_v31 = vrot.slane %v3752_v12, 4  ;;  %v3785_v39 = vrot.slane %v3783_v11, 4  ;;  %v3776_v42 = vor.u32 %v3775_v25, %v3772_v23 }
 0x166   : > { %v1642_v47 = vpop.f32.mrb[52].mxu1  ;;  %v1690_v48 = vld [vmem:[#allocation2 + $0x48] sm:$0xff]  ;;  %v1189_v46 = vld [vmem:[#allocation2 + $0x70] sm:$0xff]  ;;  %v3768_v59 = vsel %vm8569_vm5, %v3763_v36, %v3767_v37  ;;  %v7147_v27 = vrot.slane %v9545_v62, 9 }
 0x167   : > { %v1707_v51 = vadd.f32 %v1689_v38, %v1642_v47  ;;  %1222 = vst.msk [vmem:[#allocation2 + $0x58] sm:$0xff] %vm396_vm12, %v1204_v45  ;;  %v7725_v52 = vpop.f32.mrb[53].mxu1  ;;  %7918 = vmatmul.mubr.msk.bf16.gmra.mrb[164].mxu0 %vm259_vm2, %v8310_v34  ;;  %v7097_v34 = vld [vmem:[%s8548_s6 + $0x7c] sm:$0xf]  ;;  %v9527_v38 = vrot.slane %v3779_v20, 5  ;;  %v3794_v47 = vshrl.u32 %v7096_v32, 16 }
 0x168   : > { %v1645_v58 = vpop.f32.mrb[54].mxu1  ;;  %7921 = vmatprep.mubr.msk.bf16.mxu0 %vm8424_vm1, %v8423_v0  ;;  %v3803_v49 = vshll.u32 %v7097_v34, 16  ;;  %v3807_v50 = vshrl.u32 %v7097_v34, 16  ;;  %v9552_v5 = vrot.slane %v3776_v42, 4  ;;  %v8313_v34 = vld [vmem:[%s8548_s6 + $0x78] sm:$0xff]  }
 0x169   : > { %1725 = vst.msk [vmem:[#allocation2 + $0x40] sm:$0xff] %vm396_vm12, %v1707_v51  ;;  %v1708_v54 = vadd.f32 %v1690_v48, %v1645_v58  ;;  %v7726_v63 = vpop.f32.mrb[55].mxu1  ;;  %v3797_v48 = vshll.u32 %v7096_v32, 16  ;;  %v3758_v58 = vsel %vm8569_vm5, %v3753_v31, %v9504_v61  ;;  %v3786_v60 = vor.u32 %v3785_v39, %v9527_v38  ;;  %v1191_v32 = vld [vmem:[#allocation2 + $0x80] sm:$0xff] }
 0x16a   : > { %v1152_v3 = vpop.f32.mrb[60].mxu0  ;;  %v7177_v63 = vld [vmem:[%s8548_s6 + $0x18] sm:$0xe]  ;;  %v4097_v61 = vrot.slane %v9531_v44, 5  ;;  %v9558_v12 = vrot.slane %v3803_v49, 5  ;;  %v9560_v13 = vrot.slane %v3807_v50, 4 }
 0x16b   : > { %1726 = vst.msk [vmem:[#allocation2 + $0x48] sm:$0xff] %vm396_vm12, %v1708_v54  ;;  %7952 = vmatmul.mubr.msk.bf16.gmra.mrb[160].mxu1 %vm259_vm2, %v7105_v53  ;;  %v1205_v7 = vadd.f32 %v1187_v6, %v1152_v3  ;;  %v7695_v8 = vpop.f32.mrb[61].mxu0  ;;  %v8312_v53 = vld [vmem:[%s8548_s6 + $0x6c] sm:$0xff]   ;;  %v9548_v54 = vld [vmem:[%s8548_s6 + $0x20] sm:$0x1]  ;;  %v9554_v3 = vrot.slane %v3789_v43, 5 }
 0x16c   : > { %v1691_v14 = vld [vmem:[#allocation2 + $0x50] sm:$0xff]  ;;  %v1155_v15 = vpop.f32.mrb[62].mxu0  ;;  %7955 = vmatprep.mubr.msk.bf16.mxu1 %vm8424_vm1, %v8423_v0  ;;  %v7178_v6 = vld [vmem:[%s8548_s6 + $0x1c] sm:$0xf]  ;;  %v3799_v10 = vrot.slane %v3797_v48, 5  ;;  %v4410_v19 = vshrl.u32 %v7177_v63, 16  ;;  %v3810_v37 = vor.u32 %v9560_v13, %v9558_v12  ;;  %v9603_v62 = vsel %vm8689_vm8, %v7147_v27, %v4097_v61 }
 0x16d   : > { %1223 = vst.msk [vmem:[#allocation2 + $0x60] sm:$0xff] %vm396_vm12, %v1205_v7  ;;  %v1206_v21 = vadd.f32 %v1188_v17, %v1155_v15  ;;  %v7696_v22 = vpop.f32.mrb[63].mxu0  ;;  %v7107_v17 = vcombine.low %v3758_v58, %v3768_v59  ;;  %v4413_v20 = vshll.u32 %v7177_v63, 16  ;;  %v4419_v23 = vshrl.u32 %v7178_v6, 16  ;;  %v7123_v43 = vld [vmem:[%s8548_s6 + $0x24] sm:$0xe] }
 0x16e   : > { %v1650_v26 = vpop.f32.mrb[56].mxu1  ;;  %v1692_v24 = vld [vmem:[#allocation2 + $0x58] sm:$0xff]  ;;  %v7179_v22 = vld [vmem:[%s8548_s6 + $0x20] sm:$0x3]  ;;  %v4422_v25 = vshll.u32 %v7178_v6, 16  ;;  %v3813_v39 = vshll.u32 %v7098_v18, 16 }
 0x16f   : > { %v1709_v28 = vadd.f32 %v1691_v14, %v1650_v26  ;;  %1224 = vst.msk [vmem:[#allocation2 + $0x68] sm:$0xff] %vm396_vm12, %v1206_v21  ;;  %v7729_v29 = vpop.f32.mrb[57].mxu1  ;;  %7922 = vmatmul.mubr.msk.bf16.gmra.mrb[168].mxu0 %vm259_vm2, %v8311_v9  ;;  %v3796_v9 = vrot.slane %v3794_v47, 4  ;;  %v3787_v21 = vrot.slane %v3786_v60, 4  ;;  %v9585_v44 = vrot.slane %v4410_v19, 5  ;;  %v1192_v48 = vld [vmem:[#allocation2 + $0x88] sm:$0xff] }
 0x170   : > { %v1653_v35 = vpop.f32.mrb[58].mxu1  ;;  %7925 = vmatprep.mubr.msk.bf16.mxu0 %vm8424_vm1, %v8423_v0  ;;  %v4100_v29 = vrot.slane %v9548_v54, 5  ;;  %v4421_v50 = vrot.slane %v4419_v23, 5 }
 0x171   : > { %1727 = vst.msk [vmem:[#allocation2 + $0x50] sm:$0xff] %vm396_vm12, %v1709_v28  ;;  %v1710_v40 = vadd.f32 %v1692_v24, %v1653_v35  ;;  %v7730_v41 = vpop.f32.mrb[59].mxu1  ;;  %v4099_v28 = vrot.slane %v4097_v61, 4  ;;  %v3782_v35 = vsel %vm8569_vm5, %v9552_v5, %v9527_v38  ;;  %v3800_v36 = vor.u32 %v3799_v10, %v3796_v9  ;;  %v9613_v61 = vld [vmem:[%s8548_s6 + $0x34] sm:$0xf] }
 0x172   : > { %v1160_v45 = vpop.f32.mrb[64].mxu0  ;;  %v3792_v49 = vsel %vm8569_vm5, %v3787_v21, %v9554_v3  ;;  %v9626_v21 = vld [vmem:[%s8548_s6 + $0x30] sm:$0xe] }
 0x173   : > { %1728 = vst.msk [vmem:[#allocation2 + $0x58] sm:$0xff] %vm396_vm12, %v1710_v40  ;;  %7956 = vmatmul.mubr.msk.bf16.gmra.mrb[164].mxu1 %vm259_vm2, %v7106_v30  ;;  %v1207_v51 = vadd.f32 %v1189_v46, %v1160_v45  ;;  %v7699_v52 = vpop.f32.mrb[65].mxu0  ;;  %v8314_v30 = vld [vmem:[%s10820_s1 + $0x60] sm:$0x3f]   ;;  %v7124_v40 = vld [vmem:[%s8548_s6 + $0x28] sm:$0xf]  ;;  %v9607_v54 = vsel %vm8689_vm8, %v4099_v28, %v4100_v29  ;;  %v7108_v6 = vcombine.low %v3782_v35, %v3792_v49 }
 0x174   : > { %v1693_v55 = vld [vmem:[#allocation2 + $0x60] sm:$0xff]  ;;  %v1163_v56 = vpop.f32.mrb[66].mxu0  ;;  %7959 = vmatprep.mubr.msk.bf16.mxu1 %vm8424_vm1, %v8423_v0  ;;  %v9587_v45 = vrot.slane %v4413_v20, 6  ;;  %v4429_v46 = vshrl.u32 %v7179_v22, 16  ;;  %v4432_v52 = vshll.u32 %v7179_v22, 16  ;;  %v4104_v58 = vrot.slane %v7124_v40, 5 }
 0x175   : > { %1225 = vst.msk [vmem:[#allocation2 + $0x70] sm:$0xff] %vm396_vm12, %v1207_v51  ;;  %v1208_v1 = vadd.f32 %v1190_v57, %v1163_v56  ;;  %v7700_v4 = vpop.f32.mrb[67].mxu0  ;;  %v4424_v51 = vrot.slane %v4422_v25, 6  ;;  %v9596_v56 = vsel %vm287_vm0, %v8314_v30, 0  ;;  %v9599_v57 = vld [vmem:[%s8548_s6 + $0x2c] sm:$0x1]  ;;  %v7158_v20 = vcombine.low %v9603_v62, %v9607_v54 }
 0x176   : > { %v1658_v7 = vpop.f32.mrb[60].mxu1  ;;  %v1694_v8 = vld [vmem:[#allocation2 + $0x68] sm:$0xff]  ;;  %v3801_v63 = vrot.slane %v3800_v36, 4  ;;  %v7180_v4 = vld [vmem:[%s8548_s6 + $0x24] sm:$0xe]  ;;  %v4416_v10 = vor.u32 %v9587_v45, %v9585_v44  ;;  %v4107_v27 = vrot.slane %v9599_v57, 5 }
 0x177   : > { %v1711_v14 = vadd.f32 %v1693_v55, %v1658_v7  ;;  %1226 = vst.msk [vmem:[#allocation2 + $0x78] sm:$0xff] %vm396_vm12, %v1208_v1  ;;  %v7733_v15 = vpop.f32.mrb[61].mxu1  ;;  %7926 = vmatmul.mubr.msk.bf16.gmra.mrb[172].mxu0 %vm259_vm2, %v8312_v53  ;;  %v7148_v1 = vrot.slane %v7123_v43, 9  ;;  %v3811_v7 = vrot.slane %v3810_v37, 4  ;;  %v9619_v13 = vor.u32 %v4424_v51, %v4421_v50  ;;  %v1945_v25 = vld [vmem:[#allocation2] sm:$0xff] }
 0x178   : > { %v1661_v11 = vpop.f32.mrb[62].mxu1  ;;  %7929 = vmatprep.mubr.msk.bf16.mxu0 %vm8424_vm1, %v8423_v0  ;;  %v4434_v15 = vrot.slane %v4432_v52, 6  ;;  %v4438_v22 = vshrl.u32 %v7180_v4, 16  ;;  %v9637_v28 = vld [vmem:[%s8548_s6 + $0x38] sm:$0x1]  ;;  %v4441_v29 = vshll.u32 %v7180_v4, 16 }
 0x179   : > { %1729 = vst.msk [vmem:[#allocation2 + $0x60] sm:$0xff] %vm396_vm12, %v1711_v14  ;;  %v1712_v26 = vadd.f32 %v1694_v8, %v1661_v11  ;;  %v7734_v24 = vpop.f32.mrb[63].mxu1  ;;  %v3815_v8 = vrot.slane %v3813_v39, 5  ;;  %v4431_v14 = vrot.slane %v4429_v46, 5  ;;  %v4106_v11 = vrot.slane %v4104_v58, 4  ;;  %v1946_v39 = vld [vmem:[#allocation2 + $0x8] sm:$0xff] }
 0x17a   : > { %v1168_v31 = vpop.f32.mrb[68].mxu0  ;;  %v9633_v24 = vsel %vm8689_vm8, %v7148_v1, %v4104_v58  ;;  %v4417_v40 = vrot.slane %v4416_v10, 4  ;;  %v4111_v43 = vrot.slane %v9613_v61, 5  ;;  %v7149_v46 = vrot.slane %v9626_v21, 9  ;;  %v7184_v57 = vld [vmem:[%s8548_s6 + $0x34] sm:$0xf] }
 0x17b   : > { %1730 = vst.msk [vmem:[#allocation2 + $0x68] sm:$0xff] %vm396_vm12, %v1712_v26  ;;  %7960 = vmatmul.mubr.msk.bf16.gmra.mrb[168].mxu1 %vm259_vm2, %v7107_v17  ;;  %v1209_v41 = vadd.f32 %v1191_v32, %v1168_v31  ;;  %v7703_v42 = vpop.f32.mrb[69].mxu0  ;;  %v7181_v17 = vld [vmem:[%s8548_s6 + $0x28] sm:$0xf]  ;;  %v3806_v26 = vsel %vm8569_vm5, %v3801_v63, %v9558_v12  ;;  %v3816_v32 = vsel %vm8569_vm5, %v3811_v7, %v3815_v8  ;;  %v4478_v10 = vshll.u32 %v7184_v57, 16 }
 0x17c   : > { %v1695_v38 = vld [vmem:[#allocation2 + $0x70] sm:$0xff]  ;;  %v1171_v47 = vpop.f32.mrb[70].mxu0  ;;  %7963 = vmatprep.mubr.msk.bf16.mxu1 %vm8424_vm1, %v8423_v0  ;;  %v4447_v12 = vshrl.u32 %v7181_v17, 16  ;;  %v4450_v35 = vshll.u32 %v7181_v17, 16  ;;  %v4435_v42 = vor.u32 %v4434_v15, %v4431_v14  ;;  %v7109_v51 = vcombine.low %v3806_v26, %v3816_v32  ;;  %v8315_v17 = vld [vmem:[%s10820_s1 + $0x68] sm:$0x3f]  }
 0x17d   : > { %1227 = vst.msk [vmem:[#allocation2 + $0x80] sm:$0xff] %vm396_vm12, %v1209_v41  ;;  %v1210_v53 = vadd.f32 %v1192_v48, %v1171_v47  ;;  %v7704_v55 = vpop.f32.mrb[71].mxu0  ;;  %v4427_v41 = vrot.slane %v9619_v13, 4  ;;  %v9651_v47 = vrot.slane %v4438_v22, 5  ;;  %v7183_v48 = vld [vmem:[%s8548_s6 + $0x30] sm:$0xe]  ;;  %v9656_v52 = vsel %vm8689_vm8, %v4106_v11, %v4107_v27 }
 0x17e   : > { %v1666_v59 = vpop.f32.mrb[64].mxu1  ;;  %v1696_v60 = vld [vmem:[#allocation2 + $0x78] sm:$0xff]  ;;  %v4452_v62 = vrot.slane %v4450_v35, 6  ;;  %v4426_v1 = vsel %vm8726_vm11, %v4417_v40, %v9619_v13  ;;  %v4469_v61 = vshll.u32 %v7183_v48, 16  ;;  %v1947_v14 = vld [vmem:[#allocation2 + $0x10] sm:$0xff]  ;;  %v7159_v15 = vcombine.low %v9633_v24, %v9656_v52 }
 0x17f   : > { %v1713_v5 = vadd.f32 %v1695_v38, %v1666_v59  ;;  %1228 = vst.msk [vmem:[#allocation2 + $0x88] sm:$0xff] %vm396_vm12, %v1210_v53  ;;  %v7737_v3 = vpop.f32.mrb[65].mxu1  ;;  %7930 = vmatmul.mubr.msk.bf16.gmra.mrb[176].mxu0 %vm259_vm2, %v8313_v34  ;;  %v7182_v34 = vld [vmem:[%s8548_s6 + $0x2c] sm:$0x3]  ;;  %v4114_v38 = vrot.slane %v9637_v28, 5  ;;  %v4443_v53 = vrot.slane %v4441_v29, 6  ;;  %v4436_v4 = vsel %vm8726_vm11, %v4427_v41, %v4435_v42 }
 0x180   : > { %v1669_v9 = vpop.f32.mrb[66].mxu1  ;;  %7973 = vmatprep.mubr.msk.bf16.mxu0 %vm8424_vm1, %v8423_v0  ;;  %v4457_v55 = vshrl.u32 %v7182_v34, 16  ;;  %v4460_v54 = vshll.u32 %v7182_v34, 16  ;;  %v9670_v3 = vld [vmem:[%s8548_s6 + $0x40] sm:$0xf]  ;;  %v1948_v29 = vld [vmem:[#allocation2 + $0x18] sm:$0xff] }
 0x181   : > { %1731 = vst.msk [vmem:[#allocation2 + $0x70] sm:$0xff] %vm396_vm12, %v1713_v5  ;;  %v1714_v18 = vadd.f32 %v1696_v60, %v1669_v9  ;;  %v7738_v19 = vpop.f32.mrb[67].mxu1  ;;  %v4449_v60 = vrot.slane %v4447_v12, 5  ;;  %v4113_v5 = vrot.slane %v4111_v43, 4  ;;  %v4475_v9 = vshrl.u32 %v7184_v57, 16 }
 0x182   : > { %v1874_v23 = vpop.f32.mrb[72].mxu0  ;;  %v4444_v19 = vor.u32 %v4443_v53, %v9651_v47  ;;  %v7131_v11 = vld [vmem:[%s8548_s6 + $0x44] sm:$0x1]  ;;  %v4118_v26 = vrot.slane %v9670_v3, 5  ;;  %v7185_v24 = vld [vmem:[%s8548_s6 + $0x38] sm:$0x3] }
 0x183   : > { %1732 = vst.msk [vmem:[#allocation2 + $0x78] sm:$0xff] %vm396_vm12, %v1714_v18  ;;  %7964 = vmatmul.mubr.msk.bf16.gmra.mrb[172].mxu1 %vm259_vm2, %v7108_v6  ;;  %v1963_v30 = vadd.f32 %v1945_v25, %v1874_v23  ;;  %v7747_v31 = vpop.f32.mrb[73].mxu0  ;;  %v4466_v6 = vshrl.u32 %v7183_v48, 16  ;;  %v9684_v18 = vsel %vm8689_vm8, %v7149_v46, %v4111_v43  ;;  %v9690_v23 = vor.u32 %v4452_v62, %v4449_v60  ;;  %v7186_v52 = vld [vmem:[%s8548_s6 + $0x3c] sm:$0xe] }
 0x184   : > { %v1697_v36 = vld [vmem:[#allocation2 + $0x80] sm:$0xff]  ;;  %v1877_v37 = vpop.f32.mrb[74].mxu0  ;;  %7967 = vmatprep.mubr.msk.bf16.mxu1 %vm8424_vm1, %v8423_v0  ;;  %v4462_v25 = vrot.slane %v4460_v54, 6  ;;  %v9698_v31 = vsel %vm8689_vm8, %v4113_v5, %v4114_v38  ;;  %v4445_v42 = vrot.slane %v4444_v19, 4  ;;  %v4121_v43 = vrot.slane %v7131_v11, 5 }
 0x185   : > { %1981 = vst.msk [vmem:[#allocation2] sm:$0xff] %vm396_vm12, %v1963_v30  ;;  %v1964_v44 = vadd.f32 %v1946_v39, %v1877_v37  ;;  %v7748_v45 = vpop.f32.mrb[75].mxu0  ;;  %v7206_v30 = vcombine.low %v4426_v1, %v4436_v4  ;;  %v4468_v34 = vrot.slane %v4466_v6, 5  ;;  %v4477_v37 = vrot.slane %v4475_v9, 5  ;;  %v7187_v60 = vld [vmem:[%s8548_s6 + $0x40] sm:$0xf] }
 0x186   : > { %v1674_v49 = vpop.f32.mrb[68].mxu1  ;;  %v1698_v50 = vld [vmem:[#allocation2 + $0x88] sm:$0xff]  ;;  %v4480_v39 = vrot.slane %v4478_v10, 6  ;;  %v4488_v45 = vshll.u32 %v7185_v24, 16  ;;  %v4455_v47 = vrot.slane %v9690_v23, 4  ;;  %v7160_v57 = vcombine.low %v9684_v18, %v9698_v31  ;;  %v1949_v54 = vld [vmem:[#allocation2 + $0x20] sm:$0xff] }
 0x187   : > { %v1715_v58 = vadd.f32 %v1697_v36, %v1674_v49  ;;  %v7741_v59 = vpop.f32.mrb[69].mxu1  ;;  %1982 = vst.msk [vmem:[#allocation2 + $0x8] sm:$0xff] %vm396_vm12, %v1964_v44  ;;  %7974 = vmatmul.mubr.msk.bf16.vlgmr.msra.gmra.mrb[180].mxu0 %vm259_vm2, %v7158_v20  ;;  %v4459_v20 = vrot.slane %v4457_v55, 5  ;;  %v4471_v36 = vrot.slane %v4469_v61, 6  ;;  %v4485_v44 = vshrl.u32 %v7185_v24, 16 }
 0x188   : > { %v1677_v63 = vpop.f32.mrb[70].mxu1  ;;  %8048 = vmatpush3.bf16.msra.mxu0 %v9596_v56  ;;  %7977 = vmatprep.mubr.msk.bf16.mxu0 %vm8424_vm1, %v8423_v0  ;;  %v9674_v56 = vld [vmem:[%s8548_s6 + $0x3c] sm:$0xe]  ;;  %v4120_v49 = vrot.slane %v4118_v26, 4  ;;  %v9712_v59 = vor.u32 %v4480_v39, %v4477_v37  ;;  %v4490_v5 = vrot.slane %v4488_v45, 6  ;;  %v4494_v10 = vshrl.u32 %v7186_v52, 16 }
 0x189   : > { %1733 = vst.msk [vmem:[#allocation2 + $0x80] sm:$0xff] %vm396_vm12, %v1715_v58  ;;  %v1716_v7 = vadd.f32 %v1698_v50, %v1677_v63  ;;  %v7742_v8 = vpop.f32.mrb[71].mxu1  ;;  %8123 = vmatprep.subr.bf16.mxu0 %v8423_v0  ;;  %v7150_v32 = vrot.slane %v9674_v56, 9  ;;  %v4463_v48 = vor.u32 %v4462_v25, %v4459_v20  ;;  %v4472_v58 = vor.u32 %v4471_v36, %v4468_v34  ;;  %v9723_v3 = vld [vmem:[%s8548_s6 + $0x4c] sm:$0xf] }
 0x18a   : > { %v1882_v13 = vpop.f32.mrb[76].mxu0  ;;  %v4454_v63 = vsel %vm8726_vm11, %v4445_v42, %v9690_v23  ;;  %v4487_v4 = vrot.slane %v4485_v44, 5  ;;  %v9731_v56 = vsel %vm8689_vm8, %v4120_v49, %v4121_v43  ;;  %v9734_v61 = vld [vmem:[%s8548_s6 + $0x48] sm:$0xe]  ;;  %v9737_v9 = vld [vmem:[%s8548_s6 + $0x44] sm:$0x3] }
 0x18b   : > { %1734 = vst.msk [vmem:[#allocation2 + $0x88] sm:$0xff] %vm396_vm12, %v1716_v7  ;;  %7968 = vmatmul.mubr.msk.bf16.gmra.mrb[176].mxu1 %vm259_vm2, %v7109_v51  ;;  %v1965_v21 = vadd.f32 %v1947_v14, %v1882_v13  ;;  %v7751_v22 = vpop.f32.mrb[77].mxu0  ;;  %v5455_v51 = vsel %vm287_vm0, %v8315_v17, 0  ;;  %v9720_v1 = vsel %vm8689_vm8, %v7150_v32, %v4118_v26  ;;  %v4464_v8 = vsel %vm8726_vm11, %v4455_v47, %v4463_v48  ;;  %v9746_v23 = vld [vmem:[%s8548_s6 + $0x50] sm:$0x1] }
 0x18c   : > { %v2412_v27 = vld [vmem:[#allocation2] sm:$0xff]  ;;  %v1885_v28 = vpop.f32.mrb[78].mxu0  ;;  %8011 = vmatprep.mubr.msk.bf16.mxu1 %vm8424_vm1, %v8423_v0  ;;  %v4497_v17 = vshll.u32 %v7186_v52, 16  ;;  %v4503_v18 = vshrl.u32 %v7187_v60, 16  ;;  %v4506_v19 = vshll.u32 %v7187_v60, 16  ;;  %v4483_v22 = vrot.slane %v9712_v59, 4 }
 0x18d   : > { %1983 = vst.msk [vmem:[#allocation2 + $0x10] sm:$0xff] %vm396_vm12, %v1965_v21  ;;  %v1966_v12 = vadd.f32 %v1948_v29, %v1885_v28  ;;  %v7752_v35 = vpop.f32.mrb[79].mxu0  ;;  %v9742_v21 = vrot.slane %v4472_v58, 4  ;;  %v4125_v25 = vrot.slane %v9723_v3, 5  ;;  %v7161_v28 = vcombine.low %v9720_v1, %v9731_v56  ;;  %v7189_v31 = vld [vmem:[%s8548_s6 + $0x48] sm:$0xe] }
 0x18e   : > { %v2341_v40 = vpop.f32.mrb[72].mxu1  ;;  %v2413_v41 = vld [vmem:[#allocation2 + $0x8] sm:$0xff]  ;;  %v4491_v29 = vor.u32 %v4490_v5, %v4487_v4  ;;  %v4496_v35 = vrot.slane %v4494_v10, 5  ;;  %v4513_v36 = vshrl.u32 %v9737_v9, 16  ;;  %v4508_v42 = vrot.slane %v4506_v19, 6  ;;  %v1951_v49 = vld [vmem:[#allocation2 + $0x30] sm:$0xff] }
 0x18f   : > { %v2430_v46 = vadd.f32 %v2412_v27, %v2341_v40  ;;  %1984 = vst.msk [vmem:[#allocation2 + $0x18] sm:$0xff] %vm396_vm12, %v1966_v12  ;;  %v7785_v38 = vpop.f32.mrb[73].mxu1  ;;  %7978 = vmatmul.mubr.msk.bf16.gmra.mrb[184].mxu0 %vm259_vm2, %v7159_v15  ;;  %v1950_v15 = vld [vmem:[#allocation2 + $0x28] sm:$0xff]  ;;  %v7207_v27 = vcombine.low %v4454_v63, %v4464_v8  ;;  %v7151_v12 = vrot.slane %v9734_v61, 9  ;;  %v4499_v40 = vrot.slane %v4497_v17, 6  ;;  %v1952_v5 = vld [vmem:[#allocation2 + $0x38] sm:$0xff] }
 0x190   : > { %v2344_v50 = vpop.f32.mrb[74].mxu1  ;;  %7981 = vmatprep.mubr.msk.bf16.mxu0 %vm8424_vm1, %v8423_v0  ;;  %v7190_v37 = vld [vmem:[%s8548_s6 + $0x4c] sm:$0xf]  ;;  %v4516_v43 = vshll.u32 %v9737_v9, 16  ;;  %v4522_v38 = vshrl.u32 %v7189_v31, 16  ;;  %v4525_v47 = vshll.u32 %v7189_v31, 16 }
 0x191   : > { %2448 = vst.msk [vmem:[#allocation2] sm:$0xff] %vm396_vm12, %v2430_v46  ;;  %v2431_v53 = vadd.f32 %v2413_v41, %v2344_v50  ;;  %v7786_v55 = vpop.f32.mrb[75].mxu1  ;;  %v4505_v41 = vrot.slane %v4503_v18, 5  ;;  %v4128_v46 = vrot.slane %v9746_v23, 5  ;;  %v4482_v50 = vsel %vm8726_vm11, %v9742_v21, %v9712_v59  ;;  %v7191_v61 = vld [vmem:[%s8548_s6 + $0x50] sm:$0x3] }
 0x192   : > { %v1890_v62 = vpop.f32.mrb[80].mxu0  ;;  %v4127_v52 = vrot.slane %v4125_v25, 4  ;;  %v4531_v55 = vshrl.u32 %v7190_v37, 16  ;;  %v9775_v60 = vrot.slane %v4513_v36, 5  ;;  %v4534_v59 = vshll.u32 %v7190_v37, 16 }
 0x193   : > { %2449 = vst.msk [vmem:[#allocation2 + $0x8] sm:$0xff] %vm396_vm12, %v2431_v53  ;;  %8012 = vmatmul.mubr.msk.bf16.vlgmr.msra.gmra.mrb[180].mxu1 %vm259_vm2, %v7206_v30  ;;  %v1967_v6 = vadd.f32 %v1949_v54, %v1890_v62  ;;  %v7755_v7 = vpop.f32.mrb[81].mxu0  ;;  %v9753_v30 = vld [vmem:[%s8548_s6 + $0x58] sm:$0xf]  ;;  %v7135_v53 = vld [vmem:[%s8548_s6 + $0x54] sm:$0xe]  ;;  %v9785_v3 = vsel %vm8689_vm8, %v7151_v12, %v4125_v25 }
 0x194   : > { %8086 = vmatpush3.bf16.msra.mxu1 %v5455_v51  ;;  %v2414_v13 = vld [vmem:[#allocation2 + $0x10] sm:$0xff]  ;;  %v1893_v14 = vpop.f32.mrb[82].mxu0  ;;  %8015 = vmatprep.mubr.msk.bf16.mxu1 %vm8424_vm1, %v8423_v0  ;;  %v4492_v51 = vsel %vm8726_vm11, %v4483_v22, %v4491_v29  ;;  %v9778_v62 = vld [vmem:[%s8548_s6 + $0x5c] sm:$0x1]  ;;  %v4132_v54 = vrot.slane %v9753_v30, 5  ;;  %v9787_v7 = vor.u32 %v4508_v42, %v4505_v41  ;;  %v4518_v8 = vrot.slane %v4516_v43, 6 }
 0x195   : > { %1985 = vst.msk [vmem:[#allocation2 + $0x20] sm:$0xff] %vm396_vm12, %v1967_v6  ;;  %v1968_v20 = vadd.f32 %v1950_v15, %v1893_v14  ;;  %v7756_v11 = vpop.f32.mrb[83].mxu0  ;;  %8161 = vmatprep.subr.bf16.mxu1 %v8423_v0  ;;  %v4500_v6 = vor.u32 %v4499_v40, %v4496_v35  ;;  %v4524_v14 = vrot.slane %v4522_v38, 5  ;;  %v4527_v15 = vrot.slane %v4525_v47, 6  ;;  %v7192_v22 = vld [vmem:[%s8548_s6 + $0x54] sm:$0xe] }
 0x196   : > { %v2349_v26 = vpop.f32.mrb[76].mxu1  ;;  %v2415_v24 = vld [vmem:[#allocation2 + $0x18] sm:$0xff]  ;;  %v7208_v19 = vcombine.low %v4482_v50, %v4492_v51  ;;  %v4135_v11 = vrot.slane %v9778_v62, 5  ;;  %v4533_v21 = vrot.slane %v4531_v55, 5  ;;  %v4134_v12 = vrot.slane %v4132_v54, 4  ;;  %v1953_v40 = vld [vmem:[#allocation2 + $0x40] sm:$0xff] }
 0x197   : > { %v2432_v32 = vadd.f32 %v2414_v13, %v2349_v26  ;;  %1986 = vst.msk [vmem:[#allocation2 + $0x28] sm:$0xff] %vm396_vm12, %v1968_v20  ;;  %v7789_v34 = vpop.f32.mrb[77].mxu1  ;;  %7982 = vmatmul.mubr.msk.bf16.gmra.mrb[188].mxu0 %vm259_vm2, %v7160_v57  ;;  %v7152_v13 = vrot.slane %v7135_v53, 9  ;;  %v9793_v20 = vsel %vm8689_vm8, %v4127_v52, %v4128_v46  ;;  %v4536_v26 = vrot.slane %v4534_v59, 6  ;;  %v7193_v29 = vld [vmem:[%s8548_s6 + $0x58] sm:$0xf] }
 0x198   : > { %v2352_v39 = vpop.f32.mrb[78].mxu1  ;;  %7985 = vmatprep.mubr.msk.bf16.mxu0 %vm8424_vm1, %v8423_v0  ;;  %v4501_v31 = vrot.slane %v4500_v6, 4  ;;  %v4519_v34 = vor.u32 %v4518_v8, %v9775_v60  ;;  %v4528_v35 = vor.u32 %v4527_v15, %v4524_v14  ;;  %v4550_v36 = vshrl.u32 %v7192_v22, 16  ;;  %v1954_v52 = vld [vmem:[#allocation2 + $0x48] sm:$0xff] }
 0x199   : > { %2450 = vst.msk [vmem:[#allocation2 + $0x10] sm:$0xff] %vm396_vm12, %v2432_v32  ;;  %v2433_v44 = vadd.f32 %v2415_v24, %v2352_v39  ;;  %v7790_v45 = vpop.f32.mrb[79].mxu1  ;;  %v4541_v24 = vshrl.u32 %v7191_v61, 16  ;;  %v4511_v32 = vrot.slane %v9787_v7, 4  ;;  %v4553_v37 = vshll.u32 %v7192_v22, 16 }
 0x19a   : > { %v1898_v48 = vpop.f32.mrb[84].mxu0  ;;  %v7162_v41 = vcombine.low %v9785_v3, %v9793_v20  ;;  %v9815_v42 = vsel %vm8689_vm8, %v7152_v13, %v4132_v54  ;;  %v4559_v43 = vshrl.u32 %v7193_v29, 16  ;;  %v9819_v38 = vor.u32 %v4536_v26, %v4533_v21 }
 0x19b   : > { %2451 = vst.msk [vmem:[#allocation2 + $0x18] sm:$0xff] %vm396_vm12, %v2433_v44  ;;  %8016 = vmatmul.mubr.msk.bf16.gmra.mrb[184].mxu1 %vm259_vm2, %v7207_v27  ;;  %v1969_v57 = vadd.f32 %v1951_v49, %v1898_v48  ;;  %v7759_v58 = vpop.f32.mrb[85].mxu0  ;;  %v4544_v27 = vshll.u32 %v7191_v61, 16  ;;  %v4562_v44 = vshll.u32 %v7193_v29, 16  ;;  %v4543_v47 = vrot.slane %v4541_v24, 5  ;;  %v1955_v29 = vld [vmem:[#allocation2 + $0x50] sm:$0xff] }
 0x19c   : > { %v2416_v63 = vld [vmem:[#allocation2 + $0x20] sm:$0xff]  ;;  %v1901_v4 = vpop.f32.mrb[86].mxu0  ;;  %8019 = vmatprep.mubr.msk.bf16.mxu1 %vm8424_vm1, %v8423_v0  ;;  %v7194_v49 = vld [vmem:[%s8548_s6 + $0x5c] sm:$0x3]  ;;  %v4510_v53 = vsel %vm8726_vm11, %v4501_v31, %v9787_v7  ;;  %v4520_v55 = vsel %vm8726_vm11, %v4511_v32, %v4519_v34  ;;  %v4529_v59 = vrot.slane %v4528_v35, 4  ;;  %v4561_v7 = vrot.slane %v4559_v43, 5 }
 0x19d   : > { %1987 = vst.msk [vmem:[#allocation2 + $0x30] sm:$0xff] %vm396_vm12, %v1969_v57  ;;  %v1970_v9 = vadd.f32 %v1952_v5, %v1901_v4  ;;  %v7760_v10 = vpop.f32.mrb[87].mxu0  ;;  %v4546_v48 = vrot.slane %v4544_v27, 6  ;;  %v9831_v57 = vsel %vm8689_vm8, %v4134_v12, %v4135_v11  ;;  %v7138_v58 = vld [vmem:[%s8548_s6 + $0x60] sm:$0xe]  ;;  %v4552_v4 = vrot.slane %v4550_v36, 5 }
 0x19e   : > { %v2357_v17 = vpop.f32.mrb[80].mxu1  ;;  %v2417_v18 = vld [vmem:[#allocation2 + $0x28] sm:$0xff]  ;;  %v4555_v5 = vrot.slane %v4553_v37, 6  ;;  %v4564_v8 = vrot.slane %v4562_v44, 6  ;;  %v4569_v61 = vshrl.u32 %v7194_v49, 16  ;;  %v7209_v14 = vcombine.low %v4510_v53, %v4520_v55 }
 0x19f   : > { %v2434_v23 = vadd.f32 %v2416_v63, %v2357_v17  ;;  %1988 = vst.msk [vmem:[#allocation2 + $0x38] sm:$0xff] %vm396_vm12, %v1970_v9  ;;  %v7793_v25 = vpop.f32.mrb[81].mxu1  ;;  %7986 = vmatmul.mubr.msk.bf16.gmra.mrb[192].mxu0 %vm259_vm2, %v7161_v28  ;;  %v9809_v28 = vld [vmem:[%s8548_s6 + $0x64] sm:$0xf]  ;;  %v7140_v63 = vld [vmem:[%s8548_s6 + $0x68] sm:$0x1]  ;;  %v4547_v17 = vor.u32 %v4546_v48, %v4543_v47 }
 0x1a0   : > { %v2360_v30 = vpop.f32.mrb[82].mxu1  ;;  %7989 = vmatprep.mubr.msk.bf16.mxu0 %vm8424_vm1, %v8423_v0  ;;  %v4139_v60 = vrot.slane %v9809_v28, 5  ;;  %v4572_v9 = vshll.u32 %v7194_v49, 16  ;;  %v4539_v15 = vrot.slane %v9819_v38, 4  ;;  %v7153_v20 = vrot.slane %v7138_v58, 9 }
 0x1a1   : > { %2452 = vst.msk [vmem:[#allocation2 + $0x20] sm:$0xff] %vm396_vm12, %v2434_v23  ;;  %v2435_v1 = vadd.f32 %v2417_v18, %v2360_v30  ;;  %v7794_v56 = vpop.f32.mrb[83].mxu1  ;;  %v7195_v11 = vld [vmem:[%s8548_s6 + $0x60] sm:$0xe]  ;;  %v4538_v23 = vsel %vm8726_vm11, %v4529_v59, %v9819_v38  ;;  %v4142_v26 = vrot.slane %v7140_v63, 5  ;;  %v4556_v30 = vor.u32 %v4555_v5, %v4552_v4 }
 0x1a2   : > { %v1906_v39 = vpop.f32.mrb[88].mxu0  ;;  %v4141_v25 = vrot.slane %v4139_v60, 4  ;;  %v7196_v24 = vld [vmem:[%s8548_s6 + $0x64] sm:$0xf]  ;;  %v9850_v31 = vor.u32 %v4564_v8, %v4561_v7  ;;  %v9852_v32 = vrot.slane %v4569_v61, 5  ;;  %v4574_v34 = vrot.slane %v4572_v9, 6 }
 0x1a3   : > { %2453 = vst.msk [vmem:[#allocation2 + $0x28] sm:$0xff] %vm396_vm12, %v2435_v1  ;;  %8020 = vmatmul.mubr.msk.bf16.gmra.mrb[188].mxu1 %vm259_vm2, %v7208_v19  ;;  %v1971_v45 = vadd.f32 %v1953_v40, %v1906_v39  ;;  %v7763_v46 = vpop.f32.mrb[89].mxu0  ;;  %v7163_v19 = vcombine.low %v9815_v42, %v9831_v57  ;;  %v9855_v12 = vld [vmem:[%s8548_s6 + $0x70] sm:$0xf]  ;;  %v4548_v35 = vsel %vm8726_vm11, %v4539_v15, %v4547_v17  ;;  %v9862_v28 = vld [vmem:[%s8548_s6 + $0x68] sm:$0x3] }
 0x1a4   : > { %v2418_v50 = vld [vmem:[#allocation2 + $0x30] sm:$0xff]  ;;  %v1909_v51 = vpop.f32.mrb[90].mxu0  ;;  %8023 = vmatprep.mubr.msk.bf16.mxu1 %vm8424_vm1, %v8423_v0  ;;  %v4578_v36 = vshrl.u32 %v7195_v11, 16  ;;  %v4581_v37 = vshll.u32 %v7195_v11, 16  ;;  %v4587_v42 = vshrl.u32 %v7196_v24, 16  ;;  %v4590_v43 = vshll.u32 %v7196_v24, 16 }
 0x1a5   : > { %1989 = vst.msk [vmem:[#allocation2 + $0x40] sm:$0xff] %vm396_vm12, %v1971_v45  ;;  %v1972_v62 = vadd.f32 %v1954_v52, %v1909_v51  ;;  %v7764_v54 = vpop.f32.mrb[91].mxu0  ;;  %v9869_v46 = vsel %vm8689_vm8, %v7153_v20, %v4139_v60  ;;  %v9873_v38 = vsel %vm8689_vm8, %v4141_v25, %v4142_v26  ;;  %v7141_v47 = vld [vmem:[%s8548_s6 + $0x6c] sm:$0xe]  ;;  %v4146_v48 = vrot.slane %v9855_v12, 5  ;;  %v1957_v15 = vld [vmem:[#allocation2 + $0x60] sm:$0xff] }
 0x1a6   : > { %v2365_v3 = vpop.f32.mrb[84].mxu1  ;;  %v2419_v6 = vld [vmem:[#allocation2 + $0x38] sm:$0xff]  ;;  %v7210_v51 = vcombine.low %v4538_v23, %v4548_v35  ;;  %v4557_v52 = vrot.slane %v4556_v30, 4  ;;  %v4567_v53 = vrot.slane %v9850_v31, 4  ;;  %v4575_v55 = vor.u32 %v4574_v34, %v9852_v32  ;;  %v7143_v57 = vld [vmem:[%s8548_s6 + $0x74] sm:$0x1] }
 0x1a7   : > { %v2436_v10 = vadd.f32 %v2418_v50, %v2365_v3  ;;  %1990 = vst.msk [vmem:[#allocation2 + $0x48] sm:$0xff] %vm396_vm12, %v1972_v62  ;;  %v7797_v13 = vpop.f32.mrb[85].mxu1  ;;  %7990 = vmatmul.mubr.msk.bf16.gmra.mrb[196].mxu0 %vm259_vm2, %v7162_v41  ;;  %v1956_v41 = vld [vmem:[#allocation2 + $0x58] sm:$0xff]  ;;  %v4580_v62 = vrot.slane %v4578_v36, 5  ;;  %v4583_v54 = vrot.slane %v4581_v37, 6  ;;  %v4597_v59 = vshrl.u32 %v9862_v28, 16 }
 0x1a8   : > { %v2368_v18 = vpop.f32.mrb[86].mxu1  ;;  %7993 = vmatprep.mubr.msk.bf16.mxu0 %vm8424_vm1, %v8423_v0  ;;  %v7198_v63 = vld [vmem:[%s8548_s6 + $0x6c] sm:$0xe]  ;;  %v4589_v5 = vrot.slane %v4587_v42, 5  ;;  %v4592_v3 = vrot.slane %v4590_v43, 6  ;;  %v7154_v61 = vrot.slane %v7141_v47, 9  ;;  %v7164_v17 = vcombine.low %v9869_v46, %v9873_v38 }
 0x1a9   : > { %2454 = vst.msk [vmem:[#allocation2 + $0x30] sm:$0xff] %vm396_vm12, %v2436_v10  ;;  %v2437_v21 = vadd.f32 %v2419_v6, %v2368_v18  ;;  %v7798_v22 = vpop.f32.mrb[87].mxu1  ;;  %v4600_v6 = vshll.u32 %v9862_v28, 16  ;;  %v4148_v9 = vrot.slane %v4146_v48, 4  ;;  %v4149_v10 = vrot.slane %v7143_v57, 5  ;;  %v1958_v30 = vld [vmem:[#allocation2 + $0x68] sm:$0xff] }
 0x1aa   : > { %v1914_v27 = vpop.f32.mrb[92].mxu0  ;;  %v7199_v13 = vld [vmem:[%s8548_s6 + $0x70] sm:$0xf]  ;;  %v4566_v18 = vsel %vm8726_vm11, %v4557_v52, %v9850_v31  ;;  %v4609_v20 = vshll.u32 %v7198_v63, 16  ;;  %v4576_v22 = vsel %vm8726_vm11, %v4567_v53, %v4575_v55  ;;  %v4584_v23 = vor.u32 %v4583_v54, %v4580_v62  ;;  %v9901_v26 = vld [vmem:[%s8548_s6 + $0x7c] sm:$0xf] }
 0x1ab   : > { %2455 = vst.msk [vmem:[#allocation2 + $0x38] sm:$0xff] %vm396_vm12, %v2437_v21  ;;  %8024 = vmatmul.mubr.msk.bf16.gmra.mrb[192].mxu1 %vm259_vm2, %v7209_v14  ;;  %v1973_v1 = vadd.f32 %v1955_v29, %v1914_v27  ;;  %v7767_v56 = vpop.f32.mrb[93].mxu0  ;;  %v9898_v25 = vrot.slane %v4597_v59, 5  ;;  %v7200_v24 = vld [vmem:[%s8548_s6 + $0x74] sm:$0x3]  ;;  %v9906_v31 = vor.u32 %v4592_v3, %v4589_v5  ;;  %v4602_v32 = vrot.slane %v4600_v6, 6 }
 0x1ac   : > { %v2420_v39 = vld [vmem:[#allocation2 + $0x40] sm:$0xff]  ;;  %v1917_v40 = vpop.f32.mrb[94].mxu0  ;;  %8027 = vmatprep.mubr.msk.bf16.mxu1 %vm8424_vm1, %v8423_v0  ;;  %v4615_v34 = vshrl.u32 %v7199_v13, 16  ;;  %v4618_v12 = vshll.u32 %v7199_v13, 16  ;;  %v9911_v35 = vsel %vm8689_vm8, %v7154_v61, %v4146_v48  ;;  %v9915_v28 = vsel %vm8689_vm8, %v4148_v9, %v4149_v10  ;;  %v7144_v36 = vld [vmem:[%s8548_s6 + $0x78] sm:$0xe] }
 0x1ad   : > { %1991 = vst.msk [vmem:[#allocation2 + $0x50] sm:$0xff] %vm396_vm12, %v1973_v1  ;;  %v1974_v44 = vadd.f32 %v1956_v41, %v1917_v40  ;;  %v7768_v45 = vpop.f32.mrb[95].mxu0  ;;  %v7146_v37 = vld [vmem:[%s8548_s6 + $0x80] sm:$0x1]  ;;  %v7211_v41 = vcombine.low %v4566_v18, %v4576_v22  ;;  %v4153_v42 = vrot.slane %v9901_v26, 5  ;;  %v4585_v38 = vrot.slane %v4584_v23, 4 }
 0x1ae   : > { %v2373_v49 = vpop.f32.mrb[88].mxu1  ;;  %v2421_v50 = vld [vmem:[#allocation2 + $0x48] sm:$0xff]  ;;  %v4625_v47 = vshrl.u32 %v7200_v24, 16  ;;  %v4628_v48 = vshll.u32 %v7200_v24, 16  ;;  %v4603_v52 = vor.u32 %v4602_v32, %v9898_v25  ;;  %v4617_v53 = vrot.slane %v4615_v34, 5 }
 0x1af   : > { %v2438_v58 = vadd.f32 %v2420_v39, %v2373_v49  ;;  %1992 = vst.msk [vmem:[#allocation2 + $0x58] sm:$0xff] %vm396_vm12, %v1974_v44  ;;  %v7801_v60 = vpop.f32.mrb[89].mxu1  ;;  %7994 = vmatmul.mubr.msk.bf16.gmra.mrb[200].mxu0 %vm259_vm2, %v7163_v19  ;;  %v4606_v19 = vshrl.u32 %v7198_v63, 16  ;;  %v4611_v44 = vrot.slane %v4609_v20, 6  ;;  %v7201_v49 = vld [vmem:[%s8548_s6 + $0x78] sm:$0xe]  ;;  %v7165_v62 = vcombine.low %v9911_v35, %v9915_v28 }
 0x1b0   : > { %v2376_v4 = vpop.f32.mrb[90].mxu1  ;;  %7997 = vmatprep.mubr.msk.bf16.mxu0 %vm8424_vm1, %v8423_v0  ;;  %v4620_v55 = vrot.slane %v4618_v12, 6  ;;  %v7202_v57 = vld [vmem:[%s8548_s6 + $0x7c] sm:$0xf]  ;;  %v7155_v54 = vrot.slane %v7144_v36, 9  ;;  %v4156_v59 = vrot.slane %v7146_v37, 5  ;;  %v4594_v18 = vsel %vm8726_vm11, %v4585_v38, %v9906_v31 }
 0x1b1   : > { %2456 = vst.msk [vmem:[#allocation2 + $0x40] sm:$0xff] %vm396_vm12, %v2438_v58  ;;  %v2439_v7 = vadd.f32 %v2421_v50, %v2376_v4  ;;  %v7802_v8 = vpop.f32.mrb[91].mxu1  ;;  %v4608_v43 = vrot.slane %v4606_v19, 5  ;;  %v1959_v4 = vld [vmem:[#allocation2 + $0x70] sm:$0xff]  ;;  %v4155_v5 = vrot.slane %v4153_v42, 4  ;;  %v4634_v6 = vshrl.u32 %v7201_v49, 16 }
 0x1b2   : > { %v1922_v14 = vpop.f32.mrb[96].mxu0  ;;  %v4627_v9 = vrot.slane %v4625_v47, 5  ;;  %v4630_v10 = vrot.slane %v4628_v48, 6  ;;  %v4643_v13 = vshrl.u32 %v7202_v57, 16  ;;  %v9940_v20 = vor.u32 %v4620_v55, %v4617_v53  ;;  %v7203_v25 = vld [vmem:[%s8548_s6 + $0x80] sm:$0x3] }
 0x1b3   : > { %2457 = vst.msk [vmem:[#allocation2 + $0x48] sm:$0xff] %vm396_vm12, %v2439_v7  ;;  %8028 = vmatmul.mubr.msk.bf16.gmra.mrb[196].mxu1 %vm259_vm2, %v7210_v51  ;;  %v1975_v11 = vadd.f32 %v1957_v15, %v1922_v14  ;;  %v7771_v21 = vpop.f32.mrb[97].mxu0  ;;  %v4595_v51 = vrot.slane %v9906_v31, 4  ;;  %v4612_v3 = vor.u32 %v4611_v44, %v4608_v43  ;;  %v4637_v7 = vshll.u32 %v7201_v49, 16  ;;  %v7266_v35 = vld [vmem:[%s8548_s6 + $0x24] sm:$0xf] }
 0x1b4   : > { %v2422_v27 = vld [vmem:[#allocation2 + $0x50] sm:$0xff]  ;;  %v1925_v29 = vpop.f32.mrb[98].mxu0  ;;  %8031 = vmatprep.mubr.msk.bf16.mxu1 %vm8424_vm1, %v8423_v0  ;;  %v4154_v23 = vsel %vm8689_vm8, %v7155_v54, %v4153_v42  ;;  %v7267_v28 = vld [vmem:[%s8548_s6 + $0x28] sm:$0xf]  ;;  %v4623_v37 = vrot.slane %v9940_v20, 4  ;;  %v5180_v38 = vshll.u32 %v7266_v35, 16 }
 0x1b5   : > { %1993 = vst.msk [vmem:[#allocation2 + $0x60] sm:$0xff] %vm396_vm12, %v1975_v11  ;;  %v1976_v1 = vadd.f32 %v1958_v30, %v1925_v29  ;;  %v7772_v56 = vpop.f32.mrb[99].mxu0  ;;  %v4604_v19 = vsel %vm8726_vm11, %v4595_v51, %v4603_v52  ;;  %v4646_v11 = vshll.u32 %v7202_v57, 16  ;;  %v4613_v29 = vrot.slane %v4612_v3, 4 }
 0x1b6   : > { %v2381_v39 = vpop.f32.mrb[92].mxu1  ;;  %v2423_v40 = vld [vmem:[#allocation2 + $0x58] sm:$0xff]  ;;  %v4636_v30 = vrot.slane %v4634_v6, 5  ;;  %v4639_v31 = vrot.slane %v4637_v7, 6  ;;  %v7212_v12 = vcombine.low %v4594_v18, %v4604_v19  ;;  %v4645_v56 = vrot.slane %v4643_v13, 5 }
 0x1b7   : > { %v2440_v45 = vadd.f32 %v2422_v27, %v2381_v39  ;;  %1994 = vst.msk [vmem:[#allocation2 + $0x68] sm:$0xff] %vm396_vm12, %v1976_v1  ;;  %v7805_v46 = vpop.f32.mrb[93].mxu1  ;;  %7998 = vmatmul.mubr.msk.bf16.gmra.mrb[204].mxu0 %vm259_vm2, %v7164_v17  ;;  %v1960_v17 = vld [vmem:[#allocation2 + $0x78] sm:$0xff]  ;;  %v4157_v27 = vsel %vm8689_vm8, %v4155_v5, %v4156_v59  ;;  %v4631_v1 = vor.u32 %v4630_v10, %v4627_v9  ;;  %v4648_v39 = vrot.slane %v4646_v11, 6 }
 0x1b8   : > { %v2384_v50 = vpop.f32.mrb[94].mxu1  ;;  %8001 = vmatprep.mubr.msk.bf16.mxu0 %vm8424_vm1, %v8423_v0  ;;  %v5177_v46 = vshrl.u32 %v7266_v35, 16  ;;  %v5186_v47 = vshll.u32 %v7267_v28, 16  ;;  %v5190_v48 = vshrl.u32 %v7267_v28, 16  ;;  %v7166_v51 = vcombine.low %v4154_v23, %v4157_v27  ;;  %v7270_v23 = vld [vmem:[%s8548_s6 + $0x34] sm:$0xf] }
 0x1b9   : > { %2458 = vst.msk [vmem:[#allocation2 + $0x50] sm:$0xff] %vm396_vm12, %v2440_v45  ;;  %v2441_v58 = vadd.f32 %v2423_v40, %v2384_v50  ;;  %v7806_v60 = vpop.f32.mrb[95].mxu1  ;;  %v4653_v40 = vshrl.u32 %v7203_v25, 16  ;;  %v1961_v45 = vld [vmem:[#allocation2 + $0x80] sm:$0xff]  ;;  %v4622_v52 = vsel %vm8726_vm11, %v4613_v29, %v9940_v20  ;;  %v4640_v53 = vor.u32 %v4639_v31, %v4636_v30  ;;  %v7269_v20 = vld [vmem:[%s8548_s6 + $0x30] sm:$0xf] }
 0x1ba   : > { %v1930_v63 = vpop.f32.mrb[100].mxu0  ;;  %v4632_v60 = vsel %vm8726_vm11, %v4623_v37, %v4631_v1  ;;  %v5179_v6 = vrot.slane %v5177_v46, 4  ;;  %v5182_v7 = vrot.slane %v5180_v38, 5  ;;  %v2754_v35 = vld [vmem:[#allocation2 + $0x8] sm:$0xff]  ;;  %v5210_v37 = vshll.u32 %v7270_v23, 16 }
 0x1bb   : > { %2459 = vst.msk [vmem:[#allocation2 + $0x58] sm:$0xff] %vm396_vm12, %v2441_v58  ;;  %8032 = vmatmul.mubr.msk.bf16.gmra.mrb[200].mxu1 %vm259_vm2, %v7211_v41  ;;  %v1977_v8 = vadd.f32 %v1959_v4, %v1930_v63  ;;  %v7775_v61 = vpop.f32.mrb[101].mxu0  ;;  %v4656_v41 = vshll.u32 %v7203_v25, 16  ;;  %v1962_v58 = vld [vmem:[#allocation2 + $0x88] sm:$0xff]  ;;  %v4655_v54 = vrot.slane %v4653_v40, 5  ;;  %v7213_v13 = vcombine.low %v4622_v52, %v4632_v60 }
 0x1bc   : > { %v2424_v14 = vld [vmem:[#allocation2 + $0x60] sm:$0xff]  ;;  %v1933_v15 = vpop.f32.mrb[102].mxu0  ;;  %8035 = vmatprep.mubr.msk.bf16.mxu1 %vm8424_vm1, %v8423_v0  ;;  %v5192_v61 = vrot.slane %v5190_v48, 4  ;;  %v7272_v52 = vld [vmem:[%s8548_s6 + $0x3c] sm:$0xf] }
 0x1bd   : > { %1995 = vst.msk [vmem:[#allocation2 + $0x70] sm:$0xff] %vm396_vm12, %v1977_v8  ;;  %v1978_v21 = vadd.f32 %v1960_v17, %v1933_v15  ;;  %v7776_v22 = vpop.f32.mrb[103].mxu0  ;;  %v4658_v59 = vrot.slane %v4656_v41, 6  ;;  %v9968_v8 = vrot.slane %v5186_v47, 5  ;;  %v4641_v17 = vrot.slane %v4640_v53, 4 }
 0x1be   : > { %v2389_v26 = vpop.f32.mrb[96].mxu1  ;;  %v2425_v24 = vld [vmem:[#allocation2 + $0x68] sm:$0xff]  ;;  %v8317_v22 = vld [vmem:[%s10820_s1 + $0x70] sm:$0x3f]  }
 0x1bf   : > { %v2442_v32 = vadd.f32 %v2424_v14, %v2389_v26  ;;  %1996 = vst.msk [vmem:[#allocation2 + $0x78] sm:$0xff] %vm396_vm12, %v1978_v21  ;;  %v7809_v34 = vpop.f32.mrb[97].mxu1  ;;  %8002 = vmatmul.mubr.msk.bf16.gmra.mrb[208].mxu0 %vm259_vm2, %v7165_v62  ;;  %v9965_v62 = vor.u32 %v4648_v39, %v4645_v56  ;;  %v7268_v14 = vld [vmem:[%s8548_s6 + $0x2c] sm:$0x1]  ;;  %v4659_v19 = vor.u32 %v4658_v59, %v4655_v54  ;;  %v2753_v26 = vld [vmem:[#allocation2] sm:$0xff]  ;;  %v5214_v39 = vshrl.u32 %v7270_v23, 16 }
 0x1c0   : > { %v2392_v36 = vpop.f32.mrb[98].mxu1  ;;  %8005 = vmatprep.mubr.msk.bf16.mxu0 %vm8424_vm1, %v8423_v0  ;;  %v5193_v27 = vor.u32 %v5192_v61, %v9968_v8  ;;  %v5196_v29 = vshll.u32 %v7268_v14, 16  ;;  %v5201_v34 = vshrl.u32 %v7269_v20, 16  ;;  %v7271_v54 = vld [vmem:[%s8548_s6 + $0x38] sm:$0x1] }
 0x1c1   : > { %2460 = vst.msk [vmem:[#allocation2 + $0x60] sm:$0xff] %vm396_vm12, %v2442_v32  ;;  %v2443_v42 = vadd.f32 %v2425_v24, %v2392_v36  ;;  %v7810_v43 = vpop.f32.mrb[99].mxu1  ;;  %v4651_v18 = vrot.slane %v9965_v62, 4  ;;  %v5183_v24 = vor.u32 %v5182_v7, %v5179_v6  ;;  %v8316_v32 = vld [vmem:[%s8548_s6 + $0x24] sm:$0xff]   ;;  %v4650_v28 = vsel %vm8726_vm11, %v4641_v17, %v9965_v62 }
 0x1c2   : > { %v1938_v44 = vpop.f32.mrb[104].mxu0  ;;  %v5194_v46 = vrot.slane %v5193_v27, 4  ;;  %v5198_v38 = vrot.slane %v5196_v29, 5  ;;  %v5228_v6 = vshll.u32 %v7272_v52, 16 }
 0x1c3   : > { %2461 = vst.msk [vmem:[#allocation2 + $0x68] sm:$0xff] %vm396_vm12, %v2443_v42  ;;  %8036 = vmatmul.mubr.msk.bf16.gmra.mrb[204].mxu1 %vm259_vm2, %v7212_v12  ;;  %v1979_v49 = vadd.f32 %v1961_v45, %v1938_v44  ;;  %v7779_v50 = vpop.f32.mrb[105].mxu0  ;;  %v5204_v12 = vshll.u32 %v7269_v20, 16  ;;  %v4660_v36 = vsel %vm8726_vm11, %v4651_v18, %v4659_v19  ;;  %v5796_v42 = vsel %vm287_vm0, %v8317_v22, 0  ;;  %v2756_v18 = vld [vmem:[#allocation2 + $0x18] sm:$0xff] }
 0x1c4   : > { %v2426_v55 = vld [vmem:[#allocation2 + $0x70] sm:$0xff]  ;;  %v1941_v57 = vpop.f32.mrb[106].mxu0  ;;  %8039 = vmatprep.mubr.msk.bf16.mxu1 %vm8424_vm1, %v8423_v0  ;;  %v5184_v45 = vrot.slane %v5183_v24, 4  ;;  %v5203_v50 = vrot.slane %v5201_v34, 4  ;;  %v5220_v19 = vshll.u32 %v7271_v54, 16  ;;  %v5230_v24 = vrot.slane %v5228_v6, 5 }
 0x1c5   : > { %1997 = vst.msk [vmem:[#allocation2 + $0x80] sm:$0xff] %vm396_vm12, %v1979_v49  ;;  %v1980_v63 = vadd.f32 %v1962_v58, %v1941_v57  ;;  %v7780_v4 = vpop.f32.mrb[107].mxu0  ;;  %v7214_v49 = vcombine.low %v4650_v28, %v4660_v36  ;;  %v5216_v57 = vrot.slane %v5214_v39, 4  ;;  %v7273_v58 = vld [vmem:[%s8548_s6 + $0x40] sm:$0xf] }
 0x1c6   : > { %v2397_v5 = vpop.f32.mrb[100].mxu1  ;;  %v2427_v3 = vld [vmem:[#allocation2 + $0x78] sm:$0xff]  ;;  %v5189_v4 = vsel %vm8569_vm5, %v5184_v45, %v9968_v8  ;;  %v5238_v14 = vshrl.u32 %v7273_v58, 16  ;;  %v7276_v39 = vld [vmem:[%s8548_s6 + $0x4c] sm:$0xf] }
 0x1c7   : > { %v2444_v9 = vadd.f32 %v2426_v55, %v2397_v5  ;;  %1998 = vst.msk [vmem:[#allocation2 + $0x88] sm:$0xff] %vm396_vm12, %v1980_v63  ;;  %v7813_v10 = vpop.f32.mrb[101].mxu1  ;;  %8006 = vmatmul.mubr.msk.bf16.gmra.mrb[212].mxu0 %vm259_vm2, %v7166_v51  ;;  %v5206_v51 = vrot.slane %v5204_v12, 5  ;;  %v10000_v55 = vrot.slane %v5210_v37, 5  ;;  %v2755_v63 = vld [vmem:[#allocation2 + $0x10] sm:$0xff]  ;;  %v5199_v5 = vsel %vm8569_vm5, %v5194_v46, %v5198_v38  ;;  %v8320_v46 = vld [vmem:[%s8548_s6 + $0x3c] sm:$0xff]  }
 0x1c8   : > { %v2400_v15 = vpop.f32.mrb[102].mxu1  ;;  %8049 = vmatprep.mubr.msk.bf16.mxu0 %vm8424_vm1, %v8423_v0  ;;  %v5240_v34 = vrot.slane %v5238_v14, 4 }
 0x1c9   : > { %2462 = vst.msk [vmem:[#allocation2 + $0x70] sm:$0xff] %vm396_vm12, %v2444_v9  ;;  %v2445_v11 = vadd.f32 %v2427_v3, %v2400_v15  ;;  %v7814_v21 = vpop.f32.mrb[103].mxu1  ;;  %v5225_v3 = vshrl.u32 %v7272_v52, 16  ;;  %v8318_v9 = vld [vmem:[%s8548_s6 + $0x30] sm:$0xff]   ;;  %v5207_v10 = vor.u32 %v5206_v51, %v5203_v50  ;;  %v5217_v8 = vor.u32 %v5216_v57, %v10000_v55  ;;  %v2758_v51 = vld [vmem:[#allocation2 + $0x28] sm:$0xff] }
 0x1ca   : > { %v2682_v25 = vpop.f32.mrb[108].mxu0  ;;  %v8319_v21 = vld [vmem:[%s10820_s1 + $0x78] sm:$0x3f]   ;;  %v5258_v57 = vshll.u32 %v7276_v39, 16 }
 0x1cb   : > { %2463 = vst.msk [vmem:[#allocation2 + $0x78] sm:$0xff] %vm396_vm12, %v2445_v11  ;;  %8040 = vmatmul.mubr.msk.bf16.gmra.mrb[208].mxu1 %vm259_vm2, %v7213_v13  ;;  %v2771_v30 = vadd.f32 %v2753_v26, %v2682_v25  ;;  %v7823_v31 = vpop.f32.mrb[109].mxu0  ;;  %v5234_v13 = vshll.u32 %v7273_v58, 16  ;;  %v7295_v25 = vcombine.low %v5189_v4, %v5199_v5  ;;  %v5227_v26 = vrot.slane %v5225_v3, 4 }
 0x1cc   : > { %v2428_v1 = vld [vmem:[#allocation2 + $0x80] sm:$0xff]  ;;  %v2685_v56 = vpop.f32.mrb[110].mxu0  ;;  %8043 = vmatprep.mubr.msk.bf16.mxu1 %vm8424_vm1, %v8423_v0  ;;  %v6299_v37 = vsel %vm287_vm0, %v8319_v21, 0  ;;  %v5262_v58 = vshrl.u32 %v7276_v39, 16  ;;  %v10049_v14 = vrot.slane %v5258_v57, 5 }
 0x1cd   : > { %2789 = vst.msk [vmem:[#allocation2] sm:$0xff] %vm396_vm12, %v2771_v30  ;;  %v2772_v40 = vadd.f32 %v2754_v35, %v2685_v56  ;;  %v7824_v41 = vpop.f32.mrb[111].mxu0  ;;  %v5208_v30 = vrot.slane %v5207_v10, 4  ;;  %v7274_v31 = vld [vmem:[%s8548_s6 + $0x44] sm:$0x1]  ;;  %v5222_v56 = vrot.slane %v5220_v19, 5 }
 0x1ce   : > { %v2405_v43 = vpop.f32.mrb[104].mxu1  ;;  %v2429_v44 = vld [vmem:[#allocation2 + $0x88] sm:$0xff]  ;;  %v2757_v41 = vld [vmem:[#allocation2 + $0x20] sm:$0xff] }
 0x1cf   : > { %v2446_v47 = vadd.f32 %v2428_v1, %v2405_v43  ;;  %v7817_v48 = vpop.f32.mrb[105].mxu1  ;;  %2790 = vst.msk [vmem:[#allocation2 + $0x8] sm:$0xff] %vm396_vm12, %v2772_v40  ;;  %8050 = vmatmul.mubr.msk.bf16.vlgmr.msra.gmra.mrb[216].mxu0 %vm259_vm2, %v8316_v32  ;;  %v10023_v32 = vrot.slane %v5234_v13, 5  ;;  %v5218_v1 = vrot.slane %v5217_v8, 4  ;;  %v7275_v35 = vld [vmem:[%s8548_s6 + $0x48] sm:$0xf]  ;;  %v5213_v38 = vsel %vm8569_vm5, %v5208_v30, %v10000_v55 }
 0x1d0   : > { %v2408_v53 = vpop.f32.mrb[106].mxu1  ;;  %8124 = vmatpush3.bf16.msra.mxu0 %v5796_v42  ;;  %8053 = vmatprep.mubr.msk.bf16.mxu0 %vm8424_vm1, %v8423_v0  ;;  %v5231_v42 = vor.u32 %v5230_v24, %v5227_v26  ;;  %v5244_v43 = vshll.u32 %v7274_v31, 16  ;;  %v5249_v48 = vshrl.u32 %v7275_v35, 16  ;;  %v7277_v8 = vld [vmem:[%s8548_s6 + $0x50] sm:$0x1]  ;;  %v8321_v24 = vld [vmem:[%s8548_s6 + $0x48] sm:$0xff]  }
 0x1d1   : > { %2464 = vst.msk [vmem:[#allocation2 + $0x80] sm:$0xff] %vm396_vm12, %v2446_v47  ;;  %v2447_v60 = vadd.f32 %v2429_v44, %v2408_v53  ;;  %v7818_v62 = vpop.f32.mrb[107].mxu1  ;;  %v5241_v47 = vor.u32 %v5240_v34, %v10023_v32  ;;  %v5223_v52 = vsel %vm8569_vm5, %v5218_v1, %v5222_v56  ;;  %v5252_v53 = vshll.u32 %v7275_v35, 16  ;;  %v2760_v31 = vld [vmem:[#allocation2 + $0x38] sm:$0xff]  ;;  %v2761_v57 = vld [vmem:[#allocation2 + $0x40] sm:$0xff] }
 0x1d2   : > { %v2690_v59 = vpop.f32.mrb[112].mxu0  ;;  %v7296_v3 = vcombine.low %v5213_v38, %v5223_v52  ;;  %v5251_v10 = vrot.slane %v5249_v48, 4  ;;  %v5268_v56 = vshll.u32 %v7277_v8, 16  ;;  %v7282_v52 = vld [vmem:[%s8548_s6 + $0x64] sm:$0xf] }
 0x1d3   : > { %2465 = vst.msk [vmem:[#allocation2 + $0x88] sm:$0xff] %vm396_vm12, %v2447_v60  ;;  %8044 = vmatmul.mubr.msk.bf16.gmra.mrb[212].mxu1 %vm259_vm2, %v7214_v49  ;;  %v2773_v7 = vadd.f32 %v2755_v63, %v2690_v59  ;;  %v7827_v61 = vpop.f32.mrb[113].mxu0  ;;  %v5232_v59 = vrot.slane %v5231_v42, 4  ;;  %v5246_v63 = vrot.slane %v5244_v43, 5  ;;  %v5242_v6 = vrot.slane %v5241_v47, 4 }
 0x1d4   : > { %v3256_v15 = vld [vmem:[#allocation2] sm:$0xff]  ;;  %v2693_v17 = vpop.f32.mrb[114].mxu0  ;;  %8087 = vmatprep.mubr.msk.bf16.mxu1 %vm8424_vm1, %v8423_v0  ;;  %v7279_v61 = vld [vmem:[%s8548_s6 + $0x58] sm:$0xf]  ;;  %v5254_v13 = vrot.slane %v5252_v53, 5  ;;  %v5270_v48 = vrot.slane %v5268_v56, 5 }
 0x1d5   : > { %2791 = vst.msk [vmem:[#allocation2 + $0x10] sm:$0xff] %vm396_vm12, %v2773_v7  ;;  %v2774_v20 = vadd.f32 %v2756_v18, %v2693_v17  ;;  %v7828_v11 = vpop.f32.mrb[115].mxu0  ;;  %v7278_v7 = vld [vmem:[%s8548_s6 + $0x54] sm:$0xf]  ;;  %v5247_v34 = vsel %vm8569_vm5, %v5242_v6, %v5246_v63  ;;  %v2762_v6 = vld [vmem:[#allocation2 + $0x48] sm:$0xff] }
 0x1d6   : > { %v3185_v22 = vpop.f32.mrb[108].mxu1  ;;  %v3257_v23 = vld [vmem:[#allocation2 + $0x8] sm:$0xff]  ;;  %v5273_v11 = vshrl.u32 %v7278_v7, 16  ;;  %v5276_v21 = vshll.u32 %v7278_v7, 16 }
 0x1d7   : > { %v3274_v27 = vadd.f32 %v3256_v15, %v3185_v22  ;;  %2792 = vst.msk [vmem:[#allocation2 + $0x18] sm:$0xff] %vm396_vm12, %v2774_v20  ;;  %v7861_v29 = vpop.f32.mrb[109].mxu1  ;;  %8054 = vmatmul.mubr.msk.bf16.gmra.mrb[220].mxu0 %vm259_vm2, %v8318_v9  ;;  %v5264_v15 = vrot.slane %v5262_v58, 4  ;;  %v2759_v20 = vld [vmem:[#allocation2 + $0x30] sm:$0xff]  ;;  %v5282_v22 = vshll.u32 %v7279_v61, 16 }
 0x1d8   : > { %v3188_v12 = vpop.f32.mrb[110].mxu1  ;;  %8057 = vmatprep.mubr.msk.bf16.mxu0 %vm8424_vm1, %v8423_v0  ;;  %v5278_v39 = vrot.slane %v5276_v21, 5 }
 0x1d9   : > { %3292 = vst.msk [vmem:[#allocation2] sm:$0xff] %vm396_vm12, %v3274_v27  ;;  %v3275_v28 = vadd.f32 %v3257_v23, %v3188_v12  ;;  %v7862_v36 = vpop.f32.mrb[111].mxu1  ;;  %v5286_v23 = vshrl.u32 %v7279_v61, 16  ;;  %v5237_v27 = vsel %vm8569_vm5, %v5232_v59, %v10023_v32  ;;  %v5255_v12 = vor.u32 %v5254_v13, %v5251_v10  ;;  %v8322_v59 = vld [vmem:[%s8548_s6 + $0x54] sm:$0xff]  }
 0x1da   : > { %v2698_v40 = vpop.f32.mrb[116].mxu0  ;;  %v5265_v1 = vor.u32 %v5264_v15, %v10049_v14  ;;  %v5310_v10 = vshrl.u32 %v7282_v52, 16 }
 0x1db   : > { %3293 = vst.msk [vmem:[#allocation2 + $0x8] sm:$0xff] %vm396_vm12, %v3275_v28  ;;  %8088 = vmatmul.mubr.msk.bf16.vlgmr.msra.gmra.mrb[216].mxu1 %vm259_vm2, %v7295_v25  ;;  %v2775_v44 = vadd.f32 %v2757_v41, %v2698_v40  ;;  %v7831_v45 = vpop.f32.mrb[117].mxu0  ;;  %v10065_v40 = vrot.slane %v5282_v22, 5  ;;  %v5288_v41 = vrot.slane %v5286_v23, 4  ;;  %v5256_v38 = vrot.slane %v5255_v12, 4 }
 0x1dc   : > { %8162 = vmatpush3.bf16.msra.mxu1 %v6299_v37  ;;  %v3258_v49 = vld [vmem:[#allocation2 + $0x10] sm:$0xff]  ;;  %v2701_v50 = vpop.f32.mrb[118].mxu0  ;;  %8091 = vmatprep.mubr.msk.bf16.mxu1 %vm8424_vm1, %v8423_v0  ;;  %v5275_v37 = vrot.slane %v5273_v11, 4  ;;  %v7280_v45 = vld [vmem:[%s8548_s6 + $0x5c] sm:$0x1]  ;;  %v5266_v47 = vrot.slane %v5265_v1, 4 }
 0x1dd   : > { %2793 = vst.msk [vmem:[#allocation2 + $0x20] sm:$0xff] %vm396_vm12, %v2775_v44  ;;  %v2776_v55 = vadd.f32 %v2758_v51, %v2701_v50  ;;  %v7832_v60 = vpop.f32.mrb[119].mxu0  ;;  %v7297_v44 = vcombine.low %v5237_v27, %v5247_v34  ;;  %v5261_v7 = vsel %vm8569_vm5, %v5256_v38, %v10049_v14  ;;  %v7284_v27 = vld [vmem:[%s8548_s6 + $0x6c] sm:$0xf]  ;;  %v7285_v34 = vld [vmem:[%s8548_s6 + $0x70] sm:$0xf] }
 0x1de   : > { %v3193_v62 = vpop.f32.mrb[112].mxu1  ;;  %v3259_v54 = vld [vmem:[#allocation2 + $0x18] sm:$0xff]  ;;  %v5279_v58 = vor.u32 %v5278_v39, %v5275_v37  ;;  %v5292_v60 = vshll.u32 %v7280_v45, 16  ;;  %v5271_v61 = vsel %vm8569_vm5, %v5266_v47, %v5270_v48  ;;  %v2763_v1 = vld [vmem:[#allocation2 + $0x50] sm:$0xff]  ;;  %v5321_v39 = vshrl.u32 %v7284_v27, 16 }
 0x1df   : > { %v3276_v4 = vadd.f32 %v3258_v49, %v3193_v62  ;;  %2794 = vst.msk [vmem:[#allocation2 + $0x28] sm:$0xff] %vm396_vm12, %v2776_v55  ;;  %v7865_v5 = vpop.f32.mrb[113].mxu1  ;;  %8058 = vmatmul.mubr.msk.bf16.gmra.mrb[224].mxu0 %vm259_vm2, %v8320_v46  ;;  %v7281_v49 = vld [vmem:[%s8548_s6 + $0x60] sm:$0xf]  ;;  %v5289_v55 = vor.u32 %v5288_v41, %v10065_v40  ;;  %v7298_v21 = vcombine.low %v5261_v7, %v5271_v61  ;;  %v5324_v41 = vshll.u32 %v7284_v27, 16  ;;  %v2764_v45 = vld [vmem:[#allocation2 + $0x58] sm:$0xff] }
 0x1e0   : > { %v3196_v9 = vpop.f32.mrb[114].mxu1  ;;  %8061 = vmatprep.mubr.msk.bf16.mxu0 %vm8424_vm1, %v8423_v0  ;;  %v5297_v63 = vshrl.u32 %v7281_v49, 16  ;;  %v5280_v8 = vrot.slane %v5279_v58, 4  ;;  %v5330_v38 = vshll.u32 %v7285_v34, 16  ;;  %v5334_v47 = vshrl.u32 %v7285_v34, 16 }
 0x1e1   : > { %3294 = vst.msk [vmem:[#allocation2 + $0x10] sm:$0xff] %vm396_vm12, %v3276_v4  ;;  %v3277_v17 = vadd.f32 %v3259_v54, %v3196_v9  ;;  %v7866_v18 = vpop.f32.mrb[115].mxu1  ;;  %v5300_v4 = vshll.u32 %v7281_v49, 16  ;;  %v5306_v9 = vshll.u32 %v7282_v52, 16 }
 0x1e2   : > { %v2706_v19 = vpop.f32.mrb[120].mxu0  ;;  %v5299_v22 = vrot.slane %v5297_v63, 4  ;;  %v5285_v56 = vsel %vm8569_vm5, %v5280_v8, %v10065_v40 }
 0x1e3   : > { %3295 = vst.msk [vmem:[#allocation2 + $0x18] sm:$0xff] %vm396_vm12, %v3277_v17  ;;  %8092 = vmatmul.mubr.msk.bf16.gmra.mrb[220].mxu1 %vm259_vm2, %v7296_v3  ;;  %v2777_v25 = vadd.f32 %v2759_v20, %v2706_v19  ;;  %v7835_v26 = vpop.f32.mrb[121].mxu0  ;;  %v5290_v19 = vrot.slane %v5289_v55, 4  ;;  %v5294_v20 = vrot.slane %v5292_v60, 5  ;;  %v5302_v23 = vrot.slane %v5300_v4, 5 }
 0x1e4   : > { %v3260_v29 = vld [vmem:[#allocation2 + $0x20] sm:$0xff]  ;;  %v2709_v30 = vpop.f32.mrb[122].mxu0  ;;  %8095 = vmatprep.mubr.msk.bf16.mxu1 %vm8424_vm1, %v8423_v0  ;;  %v10091_v26 = vrot.slane %v5306_v9, 5  ;;  %v7286_v9 = vld [vmem:[%s8548_s6 + $0x74] sm:$0x1] }
 0x1e5   : > { %2795 = vst.msk [vmem:[#allocation2 + $0x30] sm:$0xff] %vm396_vm12, %v2777_v25  ;;  %v2778_v35 = vadd.f32 %v2760_v31, %v2709_v30  ;;  %v7836_v28 = vpop.f32.mrb[123].mxu0  ;;  %v7283_v31 = vld [vmem:[%s8548_s6 + $0x68] sm:$0x1]  ;;  %v5303_v37 = vor.u32 %v5302_v23, %v5299_v22 }
 0x1e6   : > { %v3201_v36 = vpop.f32.mrb[116].mxu1  ;;  %v3261_v32 = vld [vmem:[#allocation2 + $0x28] sm:$0xff] }
 0x1e7   : > { %v3278_v42 = vadd.f32 %v3260_v29, %v3201_v36  ;;  %2796 = vst.msk [vmem:[#allocation2 + $0x38] sm:$0xff] %vm396_vm12, %v2778_v35  ;;  %v7869_v43 = vpop.f32.mrb[117].mxu1  ;;  %8062 = vmatmul.mubr.msk.bf16.gmra.mrb[228].mxu0 %vm259_vm2, %v8321_v24  ;;  %v5312_v24 = vrot.slane %v5310_v10, 4  ;;  %v5295_v35 = vsel %vm8569_vm5, %v5290_v19, %v5294_v20 }
 0x1e8   : > { %v3204_v46 = vpop.f32.mrb[118].mxu1  ;;  %8065 = vmatprep.mubr.msk.bf16.mxu0 %vm8424_vm1, %v8423_v0  ;;  %v7299_v52 = vcombine.low %v5285_v56, %v5295_v35 }
 0x1e9   : > { %3296 = vst.msk [vmem:[#allocation2 + $0x20] sm:$0xff] %vm396_vm12, %v3278_v42  ;;  %v3279_v50 = vadd.f32 %v3261_v32, %v3204_v46  ;;  %v7870_v51 = vpop.f32.mrb[119].mxu1  ;;  %v8323_v32 = vld [vmem:[%s8548_s6 + $0x60] sm:$0xff]   ;;  %v7287_v42 = vld [vmem:[%s8548_s6 + $0x78] sm:$0xf]  ;;  %v5313_v40 = vor.u32 %v5312_v24, %v10091_v26  ;;  %v5316_v46 = vshll.u32 %v7283_v31, 16 }
 0x1ea   : > { %v2714_v53 = vpop.f32.mrb[124].mxu0  ;;  %v5348_v58 = vshll.u32 %v7287_v42, 16 }
 0x1eb   : > { %3297 = vst.msk [vmem:[#allocation2 + $0x28] sm:$0xff] %vm396_vm12, %v3279_v50  ;;  %8096 = vmatmul.mubr.msk.bf16.gmra.mrb[224].mxu1 %vm259_vm2, %v7297_v44  ;;  %v2779_v62 = vadd.f32 %v2761_v57, %v2714_v53  ;;  %v7839_v54 = vpop.f32.mrb[125].mxu0  ;;  %v7288_v53 = vld [vmem:[%s8548_s6 + $0x7c] sm:$0xf]  ;;  %v5345_v57 = vshrl.u32 %v7287_v42, 16  ;;  %v5314_v4 = vrot.slane %v5313_v40, 4 }
 0x1ec   : > { %v3262_v5 = vld [vmem:[#allocation2 + $0x30] sm:$0xff]  ;;  %v2717_v3 = vpop.f32.mrb[126].mxu0  ;;  %8099 = vmatprep.mubr.msk.bf16.mxu1 %vm8424_vm1, %v8423_v0  ;;  %v5323_v54 = vrot.slane %v5321_v39, 4  ;;  %v5354_v10 = vshll.u32 %v7288_v53, 16  ;;  %v5358_v8 = vshrl.u32 %v7288_v53, 16  ;;  %v8325_v53 = vld [vmem:[%s8548_s6 + $0x78] sm:$0xff]  }
 0x1ed   : > { %2797 = vst.msk [vmem:[#allocation2 + $0x40] sm:$0xff] %vm396_vm12, %v2779_v62  ;;  %v2780_v13 = vadd.f32 %v2762_v6, %v2717_v3  ;;  %v7840_v15 = vpop.f32.mrb[127].mxu0  ;;  %v5304_v62 = vrot.slane %v5303_v37, 4  ;;  %v10115_v3 = vrot.slane %v5330_v38, 5  ;;  %v5336_v6 = vrot.slane %v5334_v47, 4 }
 0x1ee   : > { %v3209_v17 = vpop.f32.mrb[120].mxu1  ;;  %v3263_v18 = vld [vmem:[#allocation2 + $0x38] sm:$0xff]  ;;  %v2765_v15 = vld [vmem:[#allocation2 + $0x60] sm:$0xff]  ;;  %v10141_v40 = vld [vmem:[%s8548_s6 + $0x28] sm:$0xf] }
 0x1ef   : > { %v3280_v11 = vadd.f32 %v3262_v5, %v3209_v17  ;;  %2798 = vst.msk [vmem:[#allocation2 + $0x48] sm:$0xff] %vm396_vm12, %v2780_v13  ;;  %v7873_v14 = vpop.f32.mrb[121].mxu1  ;;  %8066 = vmatmul.mubr.msk.bf16.gmra.mrb[232].mxu0 %vm259_vm2, %v8322_v59  ;;  %v5326_v59 = vrot.slane %v5324_v41, 5  ;;  %v5318_v5 = vrot.slane %v5316_v46, 5  ;;  %v5347_v17 = vrot.slane %v5345_v57, 4 }
 0x1f0   : > { %v3212_v25 = vpop.f32.mrb[122].mxu1  ;;  %8069 = vmatprep.mubr.msk.bf16.mxu0 %vm8424_vm1, %v8423_v0  ;;  %v5309_v24 = vsel %vm8569_vm5, %v5304_v62, %v10091_v26  ;;  %v7291_v26 = vld [vmem:[%s8548_s6 + $0x88] sm:$0xf] }
 0x1f1   : > { %3298 = vst.msk [vmem:[#allocation2 + $0x30] sm:$0xff] %vm396_vm12, %v3280_v11  ;;  %v3281_v29 = vadd.f32 %v3263_v18, %v3212_v25  ;;  %v7874_v30 = vpop.f32.mrb[123].mxu1  ;;  %v5350_v18 = vrot.slane %v5348_v58, 5  ;;  %v8324_v11 = vld [vmem:[%s8548_s6 + $0x6c] sm:$0xff]   ;;  %v5327_v14 = vor.u32 %v5326_v59, %v5323_v54  ;;  %v5319_v27 = vsel %vm8569_vm5, %v5314_v4, %v5318_v5  ;;  %v10153_v54 = vld [vmem:[%s8548_s6 + $0x24] sm:$0xe] }
 0x1f2   : > { %v2722_v12 = vpop.f32.mrb[128].mxu0  ;;  %v2766_v25 = vld [vmem:[#allocation2 + $0x68] sm:$0xff]  ;;  %v5340_v30 = vshll.u32 %v7286_v9, 16  ;;  %v7300_v41 = vcombine.low %v5309_v24, %v5319_v27  ;;  %v5672_v59 = vrot.slane %v10141_v40, 5 }
 0x1f3   : > { %3299 = vst.msk [vmem:[#allocation2 + $0x38] sm:$0xff] %vm396_vm12, %v3281_v29  ;;  %8100 = vmatmul.mubr.msk.bf16.gmra.mrb[228].mxu1 %vm259_vm2, %v7298_v21  ;;  %v2781_v28 = vadd.f32 %v2763_v1, %v2722_v12  ;;  %v7843_v36 = vpop.f32.mrb[129].mxu0  ;;  %v7289_v21 = vld [vmem:[%s8548_s6 + $0x80] sm:$0x1]  ;;  %v5337_v29 = vor.u32 %v5336_v6, %v10115_v3  ;;  %v10132_v12 = vrot.slane %v5354_v10, 5  ;;  %v5328_v42 = vrot.slane %v5327_v14, 4 }
 0x1f4   : > { %v3264_v43 = vld [vmem:[#allocation2 + $0x40] sm:$0xff]  ;;  %v2725_v44 = vpop.f32.mrb[130].mxu0  ;;  %8103 = vmatprep.mubr.msk.bf16.mxu1 %vm8424_vm1, %v8423_v0  ;;  %v5360_v36 = vrot.slane %v5358_v8, 4  ;;  %v7372_v4 = vld [vmem:[%s8548_s6 + $0x28] sm:$0xf] }
 0x1f5   : > { %2799 = vst.msk [vmem:[#allocation2 + $0x50] sm:$0xff] %vm396_vm12, %v2781_v28  ;;  %v2782_v48 = vadd.f32 %v2764_v45, %v2725_v44  ;;  %v7844_v49 = vpop.f32.mrb[131].mxu0  ;;  %v7290_v1 = vld [vmem:[%s8548_s6 + $0x84] sm:$0xf]  ;;  %v5351_v28 = vor.u32 %v5350_v18, %v5347_v17  ;;  %v5338_v44 = vrot.slane %v5337_v29, 4  ;;  %v5342_v45 = vrot.slane %v5340_v30, 5 }
 0x1f6   : > { %v3217_v50 = vpop.f32.mrb[124].mxu1  ;;  %v3265_v51 = vld [vmem:[#allocation2 + $0x48] sm:$0xff]  ;;  %v5369_v46 = vshrl.u32 %v7290_v1, 16  ;;  %v5378_v49 = vshll.u32 %v7291_v26, 16  ;;  %v5361_v58 = vor.u32 %v5360_v36, %v10132_v12  ;;  %v5997_v29 = vshll.u32 %v7372_v4, 16 }
 0x1f7   : > { %v3282_v55 = vadd.f32 %v3264_v43, %v3217_v50  ;;  %2800 = vst.msk [vmem:[#allocation2 + $0x58] sm:$0xff] %vm396_vm12, %v2782_v48  ;;  %v7877_v60 = vpop.f32.mrb[125].mxu1  ;;  %8070 = vmatmul.mubr.msk.bf16.gmra.mrb[236].mxu0 %vm259_vm2, %v8323_v32  ;;  %v5364_v32 = vshll.u32 %v7289_v21, 16  ;;  %v5372_v48 = vshll.u32 %v7290_v1, 16  ;;  %v5382_v50 = vshrl.u32 %v7291_v26, 16 }
 0x1f8   : > { %v3220_v63 = vpop.f32.mrb[126].mxu1  ;;  %8073 = vmatprep.mubr.msk.bf16.mxu0 %vm8424_vm1, %v8423_v0  ;;  %v10145_v57 = vrot.slane %v5351_v28, 4  ;;  %v5343_v9 = vsel %vm8569_vm5, %v5338_v44, %v5342_v45  ;;  %v7316_v10 = vld [vmem:[%s8548_s6 + $0x2c] sm:$0x1]  ;;  %v5362_v21 = vrot.slane %v5361_v58, 4  ;;  %v5674_v1 = vrot.slane %v5672_v59, 4 }
 0x1f9   : > { %3300 = vst.msk [vmem:[#allocation2 + $0x40] sm:$0xff] %vm396_vm12, %v3282_v55  ;;  %v3283_v7 = vadd.f32 %v3265_v51, %v3220_v63  ;;  %v7878_v61 = vpop.f32.mrb[127].mxu1  ;;  %v10148_v55 = vrot.slane %v5364_v32, 5  ;;  %v7371_v63 = vld [vmem:[%s8548_s6 + $0x24] sm:$0xe]  ;;  %v5374_v8 = vrot.slane %v5372_v48, 5 }
 0x1fa   : > { %v2730_v13 = vpop.f32.mrb[132].mxu0  ;;  %v5333_v61 = vsel %vm8569_vm5, %v5328_v42, %v10115_v3  ;;  %v7292_v18 = vld [vmem:[%s8548_s6 + $0x8c] sm:$0x1]  ;;  %v5988_v3 = vshll.u32 %v7371_v63, 16  ;;  %v8326_v42 = vld [vmem:[%s8548_s6 + $0x84] sm:$0xff]   ;;  %v5999_v48 = vrot.slane %v5997_v29, 6 }
 0x1fb   : > { %3301 = vst.msk [vmem:[#allocation2 + $0x48] sm:$0xff] %vm396_vm12, %v3283_v7  ;;  %8104 = vmatmul.mubr.msk.bf16.gmra.mrb[232].mxu1 %vm259_vm2, %v7299_v52  ;;  %v2783_v19 = vadd.f32 %v2765_v15, %v2730_v13  ;;  %v7847_v20 = vpop.f32.mrb[133].mxu0  ;;  %v2767_v52 = vld [vmem:[#allocation2 + $0x70] sm:$0xff]  ;;  %v2768_v7 = vld [vmem:[#allocation2 + $0x78] sm:$0xff]  ;;  %v5371_v13 = vrot.slane %v5369_v46, 4  ;;  %v7301_v27 = vcombine.low %v5333_v61, %v5343_v9  ;;  %v3520_v29 = vld [vmem:[#allocation2] sm:$0xff] }
 0x1fc   : > { %v3266_v22 = vld [vmem:[#allocation2 + $0x50] sm:$0xff]  ;;  %v2733_v23 = vpop.f32.mrb[134].mxu0  ;;  %8107 = vmatprep.mubr.msk.bf16.mxu1 %vm8424_vm1, %v8423_v0  ;;  %v5384_v20 = vrot.slane %v5382_v50, 4  ;;  %v5990_v44 = vrot.slane %v5988_v3, 6 }
 0x1fd   : > { %2801 = vst.msk [vmem:[#allocation2 + $0x60] sm:$0xff] %vm396_vm12, %v2783_v19  ;;  %v2784_v31 = vadd.f32 %v2766_v25, %v2733_v23  ;;  %v7848_v34 = vpop.f32.mrb[135].mxu0  ;;  %v10168_v19 = vrot.slane %v5378_v49, 5  ;;  %v5994_v23 = vshrl.u32 %v7372_v4, 16  ;;  %v5375_v32 = vor.u32 %v5374_v8, %v5371_v13  ;;  %v7374_v4 = vld [vmem:[%s8548_s6 + $0x30] sm:$0xe] }
 0x1fe   : > { %v3225_v56 = vpop.f32.mrb[128].mxu1  ;;  %v3267_v35 = vld [vmem:[#allocation2 + $0x58] sm:$0xff]  ;;  %v7341_v34 = vrot.slane %v10153_v54, 9 }
 0x1ff   : > { %v3284_v37 = vadd.f32 %v3266_v22, %v3225_v56  ;;  %2802 = vst.msk [vmem:[#allocation2 + $0x68] sm:$0xff] %vm396_vm12, %v2784_v31  ;;  %v7881_v39 = vpop.f32.mrb[129].mxu1  ;;  %8074 = vmatmul.mubr.msk.bf16.gmra.mrb[240].mxu0 %vm259_vm2, %v8324_v11  ;;  %v5985_v22 = vshrl.u32 %v7371_v63, 16  ;;  %v5357_v31 = vsel %vm8569_vm5, %v10145_v57, %v10132_v12  ;;  %v5675_v56 = vrot.slane %v7316_v10, 5  ;;  %v7319_v13 = vld [vmem:[%s8548_s6 + $0x38] sm:$0x1] }
 0x200   : > { %v3228_v43 = vpop.f32.mrb[130].mxu1  ;;  %8077 = vmatprep.mubr.msk.bf16.mxu0 %vm8424_vm1, %v8423_v0  ;;  %v5385_v26 = vor.u32 %v5384_v20, %v10168_v19  ;;  %v5367_v12 = vsel %vm8569_vm5, %v5362_v21, %v10148_v55  ;;  %v5996_v45 = vrot.slane %v5994_v23, 5  ;;  %v10199_v57 = vsel %vm8689_vm8, %v7341_v34, %v5672_v59 }
 0x201   : > { %3302 = vst.msk [vmem:[#allocation2 + $0x50] sm:$0xff] %vm396_vm12, %v3284_v37  ;;  %v3285_v38 = vadd.f32 %v3267_v35, %v3228_v43  ;;  %v7882_v47 = vpop.f32.mrb[131].mxu1  ;;  %v7373_v35 = vld [vmem:[%s8548_s6 + $0x2c] sm:$0x3]  ;;  %v5388_v37 = vshll.u32 %v7292_v18, 16  ;;  %v5987_v43 = vrot.slane %v5985_v22, 5  ;;  %v10203_v58 = vsel %vm8689_vm8, %v5674_v1, %v5675_v56 }
 0x202   : > { %v2738_v51 = vpop.f32.mrb[136].mxu0  ;;  %v10191_v47 = vld [vmem:[%s8548_s6 + $0x34] sm:$0xf]  ;;  %v6004_v49 = vshrl.u32 %v7373_v35, 16  ;;  %v6007_v50 = vshll.u32 %v7373_v35, 16  ;;  %v5386_v54 = vrot.slane %v5385_v26, 4  ;;  %v7302_v40 = vcombine.low %v5357_v31, %v5367_v12 }
 0x203   : > { %3303 = vst.msk [vmem:[#allocation2 + $0x58] sm:$0xff] %vm396_vm12, %v3285_v38  ;;  %8108 = vmatmul.mubr.msk.bf16.gmra.mrb[236].mxu1 %vm259_vm2, %v7300_v41  ;;  %v2785_v60 = vadd.f32 %v2767_v52, %v2738_v51  ;;  %v7851_v62 = vpop.f32.mrb[137].mxu0  ;;  %v2769_v41 = vld [vmem:[#allocation2 + $0x80] sm:$0xff]  ;;  %v5390_v63 = vrot.slane %v5388_v37, 5  ;;  %v5679_v59 = vrot.slane %v10191_v47, 5  ;;  %v5991_v61 = vor.u32 %v5990_v44, %v5987_v43  ;;  %v3521_v37 = vld [vmem:[#allocation2 + $0x8] sm:$0xff] }
 0x204   : > { %v3268_v5 = vld [vmem:[#allocation2 + $0x60] sm:$0xff]  ;;  %v2741_v6 = vpop.f32.mrb[138].mxu0  ;;  %8111 = vmatprep.mubr.msk.bf16.mxu1 %vm8424_vm1, %v8423_v0  ;;  %v5376_v62 = vrot.slane %v5375_v32, 4  ;;  %v6009_v18 = vrot.slane %v6007_v50, 6  ;;  %v7352_v20 = vcombine.low %v10199_v57, %v10203_v58  ;;  %v5682_v34 = vrot.slane %v7319_v13, 5 }
 0x205   : > { %2803 = vst.msk [vmem:[#allocation2 + $0x70] sm:$0xff] %vm396_vm12, %v2785_v60  ;;  %v2786_v15 = vadd.f32 %v2768_v7, %v2741_v6  ;;  %v7852_v17 = vpop.f32.mrb[139].mxu0  ;;  %v7317_v7 = vld [vmem:[%s8548_s6 + $0x30] sm:$0xe]  ;;  %v5391_v23 = vsel %vm8569_vm5, %v5386_v54, %v5390_v63  ;;  %v5681_v31 = vrot.slane %v5679_v59, 4  ;;  %v10228_v1 = vrot.slane %v5991_v61, 4 }
 0x206   : > { %v3233_v11 = vpop.f32.mrb[132].mxu1  ;;  %v3269_v14 = vld [vmem:[#allocation2 + $0x68] sm:$0xff]  ;;  %v6006_v17 = vrot.slane %v6004_v49, 5  ;;  %v5381_v3 = vsel %vm8569_vm5, %v5376_v62, %v10168_v19  ;;  %v7320_v44 = vld [vmem:[%s8548_s6 + $0x3c] sm:$0xe] }
 0x207   : > { %v3286_v25 = vadd.f32 %v3268_v5, %v3233_v11  ;;  %2804 = vst.msk [vmem:[#allocation2 + $0x78] sm:$0xff] %vm396_vm12, %v2786_v15  ;;  %v7885_v24 = vpop.f32.mrb[133].mxu1  ;;  %8078 = vmatmul.mubr.msk.bf16.gmra.mrb[244].mxu0 %vm259_vm2, %v8325_v53  ;;  %v2770_v53 = vld [vmem:[#allocation2 + $0x88] sm:$0xff]  ;;  %v10212_v15 = vor.u32 %v5999_v48, %v5996_v45  ;;  %v10219_v11 = vld [vmem:[%s8548_s6 + $0x40] sm:$0xf]  ;;  %v7303_v48 = vcombine.low %v5381_v3, %v5391_v23  ;;  %v7343_v63 = vrot.slane %v7320_v44, 9 }
 0x208   : > { %v3236_v30 = vpop.f32.mrb[134].mxu1  ;;  %8081 = vmatprep.mubr.msk.bf16.mxu0 %vm8424_vm1, %v8423_v0  ;;  %v6016_v24 = vshll.u32 %v7374_v4, 16  ;;  %v6010_v35 = vor.u32 %v6009_v18, %v6006_v17  ;;  %v7322_v45 = vld [vmem:[%s8548_s6 + $0x44] sm:$0x1]  ;;  %v5683_v58 = vsel %vm8689_vm8, %v5681_v31, %v5682_v34  ;;  %v7378_v62 = vld [vmem:[%s8548_s6 + $0x40] sm:$0xf] }
 0x209   : > { %3304 = vst.msk [vmem:[#allocation2 + $0x60] sm:$0xff] %vm396_vm12, %v3286_v25  ;;  %v3287_v28 = vadd.f32 %v3269_v14, %v3236_v30  ;;  %v7886_v36 = vpop.f32.mrb[135].mxu1  ;;  %v6013_v14 = vshrl.u32 %v7374_v4, 16  ;;  %v7375_v25 = vld [vmem:[%s8548_s6 + $0x34] sm:$0xf]  ;;  %v7342_v30 = vrot.slane %v7317_v7, 9 }
 0x20a   : > { %v2746_v39 = vpop.f32.mrb[140].mxu0  ;;  %v6002_v33 = vrot.slane %v10212_v15, 4  ;;  %v7376_v36 = vld [vmem:[%s8548_s6 + $0x38] sm:$0x3]  ;;  %v10264_v61 = vld [vmem:[%s8548_s6 + $0x4c] sm:$0xf] }
 0x20b   : > { %3305 = vst.msk [vmem:[#allocation2 + $0x68] sm:$0xff] %vm396_vm12, %v3287_v28  ;;  %8112 = vmatmul.mubr.msk.bf16.gmra.mrb[240].mxu1 %vm259_vm2, %v7301_v27  ;;  %v2787_v46 = vadd.f32 %v2769_v41, %v2746_v39  ;;  %v7855_v38 = vpop.f32.mrb[141].mxu0  ;;  %v5686_v28 = vrot.slane %v10219_v11, 5  ;;  %v10237_v39 = vrot.slane %v6013_v14, 5  ;;  %v6022_v41 = vshrl.u32 %v7375_v25, 16 }
 0x20c   : > { %v3270_v51 = vld [vmem:[#allocation2 + $0x70] sm:$0xff]  ;;  %v2749_v52 = vpop.f32.mrb[142].mxu0  ;;  %8115 = vmatprep.mubr.msk.bf16.mxu1 %vm8424_vm1, %v8423_v0  ;;  %v10244_v49 = vsel %vm8689_vm8, %v7342_v30, %v5679_v59  ;;  %v6032_v50 = vshrl.u32 %v7376_v36, 16  ;;  %v5689_v59 = vrot.slane %v7322_v45, 5  ;;  %v7379_v3 = vld [vmem:[%s8548_s6 + $0x44] sm:$0x3] }
 0x20d   : > { %2805 = vst.msk [vmem:[#allocation2 + $0x80] sm:$0xff] %vm396_vm12, %v2787_v46  ;;  %v2788_v55 = vadd.f32 %v2770_v53, %v2749_v52  ;;  %v7856_v60 = vpop.f32.mrb[143].mxu0  ;;  %v6018_v46 = vrot.slane %v6016_v24, 6  ;;  %v7377_v52 = vld [vmem:[%s8548_s6 + $0x3c] sm:$0xe]  ;;  %v5688_v4 = vrot.slane %v5686_v28, 4 }
 0x20e   : > { %v3241_v5 = vpop.f32.mrb[136].mxu1  ;;  %v3271_v6 = vld [vmem:[#allocation2 + $0x78] sm:$0xff]  ;;  %v6011_v60 = vsel %vm8726_vm11, %v6002_v33, %v6010_v35  ;;  %v10267_v18 = vrot.slane %v6032_v50, 5  ;;  %v6053_v23 = vshll.u32 %v7378_v62, 16  ;;  %v7323_v31 = vld [vmem:[%s8548_s6 + $0x48] sm:$0xe] }
 0x20f   : > { %v3288_v9 = vadd.f32 %v3270_v51, %v3241_v5  ;;  %2806 = vst.msk [vmem:[#allocation2 + $0x88] sm:$0xff] %vm396_vm12, %v2788_v55  ;;  %v7889_v10 = vpop.f32.mrb[137].mxu1  ;;  %8082 = vmatmul.mubr.msk.bf16.gmra.mrb[248].mxu0 %vm259_vm2, %v8326_v42  ;;  %v6025_v42 = vshll.u32 %v7375_v25, 16  ;;  %v6035_v51 = vshll.u32 %v7376_v36, 16  ;;  %v6001_v55 = vsel %vm8726_vm11, %v10228_v1, %v10212_v15  ;;  %v3522_v15 = vld [vmem:[#allocation2 + $0x10] sm:$0xff] }
 0x210   : > { %v3244_v8 = vpop.f32.mrb[138].mxu1  ;;  %8125 = vmatprep.mubr.msk.bf16.mxu0 %vm8424_vm1, %v8423_v0  ;;  %v6024_v5 = vrot.slane %v6022_v41, 5  ;;  %v6044_v10 = vshll.u32 %v7377_v52, 16  ;;  %v6019_v17 = vor.u32 %v6018_v46, %v10237_v39  ;;  %v5693_v34 = vrot.slane %v10264_v61, 5  ;;  %v7325_v33 = vld [vmem:[%s8548_s6 + $0x50] sm:$0x1] }
 0x211   : > { %3306 = vst.msk [vmem:[#allocation2 + $0x70] sm:$0xff] %vm396_vm12, %v3288_v9  ;;  %v3289_v21 = vadd.f32 %v3271_v6, %v3244_v8  ;;  %v7890_v22 = vpop.f32.mrb[139].mxu1  ;;  %v6027_v6 = vrot.slane %v6025_v42, 6  ;;  %v6041_v9 = vshrl.u32 %v7377_v52, 16  ;;  %v10269_v8 = vrot.slane %v6035_v51, 6 }
 0x212   : > { %v3449_v27 = vpop.f32.mrb[144].mxu0  ;;  %v7353_v22 = vcombine.low %v10244_v49, %v5683_v58  ;;  %v6046_v36 = vrot.slane %v6044_v10, 6  ;;  %v10293_v39 = vrot.slane %v6019_v17, 4  ;;  %v7380_v42 = vld [vmem:[%s8548_s6 + $0x48] sm:$0xe]  ;;  %v6060_v44 = vshrl.u32 %v7379_v3, 16 }
 0x213   : > { %3307 = vst.msk [vmem:[#allocation2 + $0x78] sm:$0xff] %vm396_vm12, %v3289_v21  ;;  %8116 = vmatmul.mubr.msk.bf16.gmra.mrb[244].mxu1 %vm259_vm2, %v7302_v40  ;;  %v3538_v56 = vadd.f32 %v3520_v29, %v3449_v27  ;;  %v7899_v19 = vpop.f32.mrb[145].mxu0  ;;  %v3523_v27 = vld [vmem:[#allocation2 + $0x18] sm:$0xff]  ;;  %v7400_v29 = vcombine.low %v6001_v55, %v6011_v60  ;;  %v10277_v30 = vor.u32 %v6027_v6, %v6024_v5  ;;  %v6043_v35 = vrot.slane %v6041_v9, 5  ;;  %v7381_v46 = vld [vmem:[%s8548_s6 + $0x4c] sm:$0xf] }
 0x214   : > { %v3272_v32 = vld [vmem:[#allocation2 + $0x80] sm:$0xff]  ;;  %v3452_v26 = vpop.f32.mrb[146].mxu0  ;;  %8119 = vmatprep.mubr.msk.bf16.mxu1 %vm8424_vm1, %v8423_v0  ;;  %v10286_v19 = vsel %vm8689_vm8, %v7343_v63, %v5686_v28  ;;  %v6038_v41 = vor.u32 %v10269_v8, %v10267_v18  ;;  %v6063_v45 = vshll.u32 %v7379_v3, 16  ;;  %v5695_v49 = vrot.slane %v5693_v34, 4  ;;  %v10320_v10 = vld [vmem:[%s8548_s6 + $0x54] sm:$0xe] }
 0x215   : > { %3556 = vst.msk [vmem:[#allocation2] sm:$0xff] %vm396_vm12, %v3538_v56  ;;  %v3539_v12 = vadd.f32 %v3521_v37, %v3452_v26  ;;  %v7900_v43 = vpop.f32.mrb[147].mxu0  ;;  %v10291_v37 = vsel %vm8689_vm8, %v5688_v4, %v5689_v59  ;;  %v5696_v50 = vrot.slane %v7325_v33, 5  ;;  %v6069_v58 = vshrl.u32 %v7380_v42, 16  ;;  %v7382_v4 = vld [vmem:[%s8548_s6 + $0x50] sm:$0x3] }
 0x216   : > { %v3249_v38 = vpop.f32.mrb[140].mxu1  ;;  %v3273_v47 = vld [vmem:[#allocation2 + $0x88] sm:$0xff]  ;;  %v6055_v43 = vrot.slane %v6053_v23, 6  ;;  %v6072_v55 = vshll.u32 %v7380_v42, 16  ;;  %v6029_v63 = vsel %vm8726_vm11, %v10293_v39, %v10277_v30  ;;  %v6078_v5 = vshrl.u32 %v7381_v46, 16 }
 0x217   : > { %v3290_v53 = vadd.f32 %v3272_v32, %v3249_v38  ;;  %v7893_v57 = vpop.f32.mrb[141].mxu1  ;;  %3557 = vst.msk [vmem:[#allocation2 + $0x8] sm:$0xff] %vm396_vm12, %v3539_v12  ;;  %8126 = vmatmul.mubr.msk.bf16.vlgmr.msra.gmra.mrb[252].mxu0 %vm259_vm2, %v7352_v20  ;;  %v6050_v20 = vshrl.u32 %v7378_v62, 16  ;;  %v3524_v62 = vld [vmem:[#allocation2 + $0x20] sm:$0xff]  ;;  %v6081_v6 = vshll.u32 %v7381_v46, 16  ;;  %v6062_v61 = vrot.slane %v6060_v44, 5 }
 0x218   : > { %v3252_v54 = vpop.f32.mrb[142].mxu1  ;;  %8129 = vmatprep.mubr.msk.bf16.mxu0 %vm8424_vm1, %v8423_v0  ;;  %v10306_v57 = vld [vmem:[%s8548_s6 + $0x58] sm:$0xf]  ;;  %v6065_v9 = vrot.slane %v6063_v45, 6  ;;  %v3525_v17 = vld [vmem:[#allocation2 + $0x28] sm:$0xff]  ;;  %v7345_v39 = vrot.slane %v10320_v10, 9 }
 0x219   : > { %3308 = vst.msk [vmem:[#allocation2 + $0x80] sm:$0xff] %vm396_vm12, %v3290_v53  ;;  %v3291_v40 = vadd.f32 %v3273_v47, %v3252_v54  ;;  %v7894_v7 = vpop.f32.mrb[143].mxu1  ;;  %v6052_v11 = vrot.slane %v6050_v20, 5  ;;  %v6030_v47 = vrot.slane %v10277_v30, 4  ;;  %v6047_v53 = vor.u32 %v6046_v36, %v6043_v35  ;;  %v7384_v42 = vld [vmem:[%s8548_s6 + $0x58] sm:$0xf] }
 0x21a   : > { %v3457_v13 = vpop.f32.mrb[148].mxu0  ;;  %v7354_v54 = vcombine.low %v10286_v19, %v10291_v37  ;;  %v10332_v20 = vsel %vm8689_vm8, %v5695_v49, %v5696_v50 }
 0x21b   : > { %3309 = vst.msk [vmem:[#allocation2 + $0x88] sm:$0xff] %vm396_vm12, %v3291_v40  ;;  %8120 = vmatmul.mubr.msk.bf16.gmra.mrb[248].mxu1 %vm259_vm2, %v7303_v48  ;;  %v3540_v14 = vadd.f32 %v3522_v15, %v3457_v13  ;;  %v7903_v21 = vpop.f32.mrb[149].mxu0  ;;  %v7344_v48 = vrot.slane %v7323_v31, 9  ;;  %v10317_v59 = vor.u32 %v6055_v43, %v6052_v11  ;;  %v6039_v18 = vsel %vm8726_vm11, %v6030_v47, %v6038_v41 }
 0x21c   : > { %v3987_v25 = vld [vmem:[#allocation2] sm:$0xff]  ;;  %v3460_v24 = vpop.f32.mrb[150].mxu0  ;;  %8163 = vmatprep.mubr.msk.bf16.mxu1 %vm8424_vm1, %v8423_v0  ;;  %v5700_v21 = vrot.slane %v10306_v57, 5  ;;  %v6048_v23 = vrot.slane %v6047_v53, 4  ;;  %v6080_v31 = vrot.slane %v6078_v5, 5  ;;  %v7401_v35 = vcombine.low %v6029_v63, %v6039_v18  ;;  %v3527_v63 = vld [vmem:[#allocation2 + $0x38] sm:$0xff] }
 0x21d   : > { %3558 = vst.msk [vmem:[#allocation2 + $0x10] sm:$0xff] %vm396_vm12, %v3540_v14  ;;  %v3541_v1 = vadd.f32 %v3523_v27, %v3460_v24  ;;  %v7904_v56 = vpop.f32.mrb[151].mxu0  ;;  %v10328_v8 = vsel %vm8689_vm8, %v7344_v48, %v5693_v34  ;;  %v7328_v14 = vld [vmem:[%s8548_s6 + $0x5c] sm:$0x1]  ;;  %v6074_v24 = vrot.slane %v6072_v55, 6  ;;  %v6083_v34 = vrot.slane %v6081_v6, 6 }
 0x21e   : > { %v3916_v32 = vpop.f32.mrb[144].mxu1  ;;  %v3988_v26 = vld [vmem:[#allocation2 + $0x8] sm:$0xff]  ;;  %v7383_v27 = vld [vmem:[%s8548_s6 + $0x54] sm:$0xe]  ;;  %v6091_v56 = vshll.u32 %v7382_v4, 16  ;;  %v6058_v36 = vrot.slane %v10317_v59, 4  ;;  %v7355_v37 = vcombine.low %v10328_v8, %v10332_v20  ;;  %v6057_v43 = vsel %vm8726_vm11, %v6048_v23, %v10317_v59 }
 0x21f   : > { %v4005_v12 = vadd.f32 %v3987_v25, %v3916_v32  ;;  %3559 = vst.msk [vmem:[#allocation2 + $0x18] sm:$0xff] %vm396_vm12, %v3541_v1  ;;  %v7937_v28 = vpop.f32.mrb[145].mxu1  ;;  %8130 = vmatmul.mubr.msk.bf16.gmra.mrb[0].mxu0 %vm259_vm2, %v7353_v22  ;;  %v6071_v25 = vrot.slane %v6069_v58, 5  ;;  %v6088_v1 = vshrl.u32 %v7382_v4, 16  ;;  %v6066_v32 = vor.u32 %v6065_v9, %v6062_v61  ;;  %v10361_v58 = vld [vmem:[%s8548_s6 + $0x5c] sm:$0x3] }
 0x220   : > { %v3919_v38 = vpop.f32.mrb[146].mxu1  ;;  %8133 = vmatprep.mubr.msk.bf16.mxu0 %vm8424_vm1, %v8423_v0  ;;  %v5702_v41 = vrot.slane %v5700_v21, 4  ;;  %v5703_v11 = vrot.slane %v7328_v14, 5  ;;  %v6097_v44 = vshrl.u32 %v7383_v27, 16  ;;  %v6100_v45 = vshll.u32 %v7383_v27, 16 }
 0x221   : > { %4023 = vst.msk [vmem:[#allocation2] sm:$0xff] %vm396_vm12, %v4005_v12  ;;  %v4006_v51 = vadd.f32 %v3988_v26, %v3919_v38  ;;  %v7938_v52 = vpop.f32.mrb[147].mxu1  ;;  %v3526_v38 = vld [vmem:[#allocation2 + $0x30] sm:$0xff]  ;;  %v6075_v47 = vor.u32 %v6074_v24, %v6071_v25  ;;  %v10351_v48 = vor.u32 %v6083_v34, %v6080_v31  ;;  %v6090_v49 = vrot.slane %v6088_v1, 5  ;;  %v7329_v6 = vld [vmem:[%s8548_s6 + $0x60] sm:$0xe] }
 0x222   : > { %v3465_v60 = vpop.f32.mrb[152].mxu0  ;;  %v6093_v50 = vrot.slane %v6091_v56, 6  ;;  %v6067_v57 = vsel %vm8726_vm11, %v6058_v36, %v6066_v32  ;;  %v6106_v55 = vshrl.u32 %v7384_v42, 16  ;;  %v10367_v4 = vsel %vm8689_vm8, %v7345_v39, %v5700_v21  ;;  %v10376_v59 = vld [vmem:[%s8548_s6 + $0x68] sm:$0x1]  ;;  %v3528_v32 = vld [vmem:[#allocation2 + $0x40] sm:$0xff] }
 0x223   : > { %4024 = vst.msk [vmem:[#allocation2 + $0x8] sm:$0xff] %vm396_vm12, %v4006_v51  ;;  %8164 = vmatmul.mubr.msk.bf16.vlgmr.msra.gmra.mrb[252].mxu1 %vm259_vm2, %v7400_v29  ;;  %v3542_v40 = vadd.f32 %v3524_v62, %v3465_v60  ;;  %v7907_v7 = vpop.f32.mrb[153].mxu0  ;;  %v10354_v51 = vld [vmem:[%s8548_s6 + $0x64] sm:$0xf]  ;;  %v6109_v60 = vshll.u32 %v7384_v42, 16  ;;  %v10371_v5 = vsel %vm8689_vm8, %v5702_v41, %v5703_v11  ;;  %v6099_v9 = vrot.slane %v6097_v44, 5 }
 0x224   : > { %v3989_v13 = vld [vmem:[#allocation2 + $0x10] sm:$0xff]  ;;  %v3468_v15 = vpop.f32.mrb[154].mxu0  ;;  %8167 = vmatprep.mubr.msk.bf16.mxu1 %vm8424_vm1, %v8423_v0  ;;  %v5707_v61 = vrot.slane %v10354_v51, 5  ;;  %v6102_v10 = vrot.slane %v6100_v45, 6  ;;  %v6076_v18 = vrot.slane %v6075_v47, 4  ;;  %v6086_v8 = vrot.slane %v10351_v48, 4 }
 0x225   : > { %3560 = vst.msk [vmem:[#allocation2 + $0x20] sm:$0xff] %vm396_vm12, %v3542_v40  ;;  %v3543_v22 = vadd.f32 %v3525_v17, %v3468_v15  ;;  %v7908_v3 = vpop.f32.mrb[155].mxu0  ;;  %v7402_v17 = vcombine.low %v6057_v43, %v6067_v57  ;;  %v6094_v20 = vor.u32 %v6093_v50, %v6090_v49  ;;  %v7386_v14 = vld [vmem:[%s8548_s6 + $0x60] sm:$0xe]  ;;  %v6111_v23 = vrot.slane %v6109_v60, 6  ;;  %v3529_v47 = vld [vmem:[#allocation2 + $0x48] sm:$0xff] }
 0x226   : > { %v3924_v29 = vpop.f32.mrb[148].mxu1  ;;  %v3990_v30 = vld [vmem:[#allocation2 + $0x18] sm:$0xff]  ;;  %v6108_v3 = vrot.slane %v6106_v55, 5  ;;  %v6116_v25 = vshrl.u32 %v10361_v58, 16  ;;  %v10385_v24 = vld [vmem:[%s8548_s6 + $0x70] sm:$0xf] }
 0x227   : > { %v4007_v19 = vadd.f32 %v3989_v13, %v3924_v29  ;;  %3561 = vst.msk [vmem:[#allocation2 + $0x28] sm:$0xff] %vm396_vm12, %v3543_v22  ;;  %v7941_v33 = vpop.f32.mrb[149].mxu1  ;;  %8134 = vmatmul.mubr.msk.bf16.gmra.mrb[4].mxu0 %vm259_vm2, %v7354_v54  ;;  %v7356_v29 = vcombine.low %v10367_v4, %v10371_v5  ;;  %v6119_v31 = vshll.u32 %v10361_v58, 16  ;;  %v5709_v56 = vrot.slane %v5707_v61, 4  ;;  %v10401_v39 = vld [vmem:[%s8548_s6 + $0x6c] sm:$0xe] }
 0x228   : > { %v3927_v26 = vpop.f32.mrb[150].mxu1  ;;  %8137 = vmatprep.mubr.msk.bf16.mxu0 %vm8424_vm1, %v8423_v0  ;;  %v6103_v33 = vor.u32 %v6102_v10, %v6099_v9  ;;  %v5714_v41 = vrot.slane %v10385_v24, 5  ;;  %v6125_v11 = vshrl.u32 %v7386_v14, 16  ;;  %v10408_v43 = vrot.slane %v6116_v25, 5  ;;  %v10411_v44 = vld [vmem:[%s8548_s6 + $0x68] sm:$0x3] }
 0x229   : > { %4025 = vst.msk [vmem:[#allocation2 + $0x10] sm:$0xff] %vm396_vm12, %v4007_v19  ;;  %v4008_v12 = vadd.f32 %v3990_v30, %v3927_v26  ;;  %v7942_v28 = vpop.f32.mrb[151].mxu1  ;;  %v7346_v30 = vrot.slane %v7329_v6, 9  ;;  %v5710_v19 = vrot.slane %v10376_v59, 5  ;;  %v6085_v26 = vsel %vm8726_vm11, %v6076_v18, %v10351_v48  ;;  %v10423_v58 = vld [vmem:[%s8548_s6 + $0x74] sm:$0x1] }
 0x22a   : > { %v3473_v46 = vpop.f32.mrb[156].mxu0  ;;  %v10406_v28 = vor.u32 %v6111_v23, %v6108_v3  ;;  %v6128_v45 = vshll.u32 %v7386_v14, 16  ;;  %v6121_v48 = vrot.slane %v6119_v31, 6  ;;  %v10420_v57 = vrot.slane %v6103_v33, 4  ;;  %v7389_v6 = vld [vmem:[%s8548_s6 + $0x6c] sm:$0xe] }
 0x22b   : > { %4026 = vst.msk [vmem:[#allocation2 + $0x18] sm:$0xff] %vm396_vm12, %v4008_v12  ;;  %8168 = vmatmul.mubr.msk.bf16.gmra.mrb[0].mxu1 %vm259_vm2, %v7401_v35  ;;  %v3544_v52 = vadd.f32 %v3526_v38, %v3473_v46  ;;  %v7911_v53 = vpop.f32.mrb[157].mxu0  ;;  %v7387_v35 = vld [vmem:[%s8548_s6 + $0x64] sm:$0xf]  ;;  %v7347_v55 = vrot.slane %v10401_v39, 9  ;;  %v10432_v4 = vrot.slane %v5714_v41, 4 }
 0x22c   : > { %v3991_v62 = vld [vmem:[#allocation2 + $0x20] sm:$0xff]  ;;  %v3476_v54 = vpop.f32.mrb[158].mxu0  ;;  %8171 = vmatprep.mubr.msk.bf16.mxu1 %vm8424_vm1, %v8423_v0  ;;  %v6134_v49 = vshrl.u32 %v7387_v35, 16  ;;  %v6137_v50 = vshll.u32 %v7387_v35, 16  ;;  %v10418_v53 = vsel %vm8689_vm8, %v7346_v30, %v5707_v61  ;;  %v10434_v5 = vrot.slane %v6125_v11, 5 }
 0x22d   : > { %3562 = vst.msk [vmem:[#allocation2 + $0x30] sm:$0xff] %vm396_vm12, %v3544_v52  ;;  %v3545_v40 = vadd.f32 %v3527_v63, %v3476_v54  ;;  %v7912_v7 = vpop.f32.mrb[159].mxu0  ;;  %v10428_v63 = vsel %vm8689_vm8, %v5709_v56, %v5710_v19  ;;  %v6114_v59 = vrot.slane %v10406_v28, 4  ;;  %v6130_v61 = vrot.slane %v6128_v45, 6  ;;  %v7390_v10 = vld [vmem:[%s8548_s6 + $0x70] sm:$0xf] }
 0x22e   : > { %v3932_v13 = vpop.f32.mrb[152].mxu1  ;;  %v3992_v15 = vld [vmem:[#allocation2 + $0x28] sm:$0xff]  ;;  %v6144_v9 = vshrl.u32 %v10411_v44, 16  ;;  %v6139_v18 = vrot.slane %v6137_v50, 6  ;;  %v6153_v3 = vshrl.u32 %v7389_v6, 16  ;;  %v6156_v23 = vshll.u32 %v7389_v6, 16 }
 0x22f   : > { %v4009_v21 = vadd.f32 %v3991_v62, %v3932_v13  ;;  %3563 = vst.msk [vmem:[#allocation2 + $0x38] sm:$0xff] %vm396_vm12, %v3545_v40  ;;  %v7945_v22 = vpop.f32.mrb[153].mxu1  ;;  %8138 = vmatmul.mubr.msk.bf16.gmra.mrb[8].mxu0 %vm259_vm2, %v7355_v37  ;;  %v6095_v37 = vsel %vm8726_vm11, %v6086_v8, %v6094_v20  ;;  %v6147_v8 = vshll.u32 %v10411_v44, 16  ;;  %v10447_v20 = vld [vmem:[%s8548_s6 + $0x7c] sm:$0xf]  ;;  %v6162_v31 = vshrl.u32 %v7390_v10, 16 }
 0x230   : > { %v3935_v27 = vpop.f32.mrb[154].mxu1  ;;  %8141 = vmatprep.mubr.msk.bf16.mxu0 %vm8424_vm1, %v8423_v0  ;;  %v7403_v54 = vcombine.low %v6085_v26, %v6095_v37  ;;  %v5717_v22 = vrot.slane %v10423_v58, 5  ;;  %v7391_v30 = vld [vmem:[%s8548_s6 + $0x74] sm:$0x3]  ;;  %v6131_v19 = vor.u32 %v6130_v61, %v10434_v5  ;;  %v10457_v33 = vrot.slane %v6144_v9, 5  ;;  %v3531_v26 = vld [vmem:[#allocation2 + $0x58] sm:$0xff] }
 0x231   : > { %4027 = vst.msk [vmem:[#allocation2 + $0x20] sm:$0xff] %vm396_vm12, %v4009_v21  ;;  %v4010_v34 = vadd.f32 %v3992_v15, %v3935_v27  ;;  %v7946_v1 = vpop.f32.mrb[155].mxu1  ;;  %v6122_v15 = vor.u32 %v6121_v48, %v10408_v43  ;;  %v3530_v27 = vld [vmem:[#allocation2 + $0x50] sm:$0xff]  ;;  %v5721_v35 = vrot.slane %v10447_v20, 5  ;;  %v6113_v37 = vsel %vm8726_vm11, %v10420_v57, %v10406_v28  ;;  %v7337_v45 = vld [vmem:[%s8548_s6 + $0x80] sm:$0x1] }
 0x232   : > { %v3481_v36 = vpop.f32.mrb[160].mxu0  ;;  %v10477_v28 = vsel %vm8689_vm8, %v7347_v55, %v5714_v41  ;;  %v6164_v50 = vrot.slane %v6162_v31, 5  ;;  %v6132_v24 = vrot.slane %v6131_v19, 4  ;;  %v7393_v6 = vld [vmem:[%s8548_s6 + $0x7c] sm:$0xf] }
 0x233   : > { %4028 = vst.msk [vmem:[#allocation2 + $0x28] sm:$0xff] %vm396_vm12, %v4010_v34  ;;  %8172 = vmatmul.mubr.msk.bf16.gmra.mrb[4].mxu1 %vm259_vm2, %v7402_v17  ;;  %v3546_v42 = vadd.f32 %v3528_v32, %v3481_v36  ;;  %v7915_v12 = vpop.f32.mrb[161].mxu0  ;;  %v6136_v17 = vrot.slane %v6134_v49, 5  ;;  %v6165_v34 = vshll.u32 %v7390_v10, 16  ;;  %v6123_v39 = vsel %vm8726_vm11, %v6114_v59, %v6122_v15  ;;  %v10494_v9 = vld [vmem:[%s8548_s6 + $0x88] sm:$0xf] }
 0x234   : > { %v3993_v46 = vld [vmem:[#allocation2 + $0x30] sm:$0xff]  ;;  %v3484_v38 = vpop.f32.mrb[162].mxu0  ;;  %8175 = vmatprep.mubr.msk.bf16.mxu1 %vm8424_vm1, %v8423_v0  ;;  %v7335_v12 = vld [vmem:[%s8548_s6 + $0x78] sm:$0xe]  ;;  %v7404_v58 = vcombine.low %v6113_v37, %v6123_v39  ;;  %v5723_v5 = vrot.slane %v5721_v35, 4 }
 0x235   : > { %3564 = vst.msk [vmem:[#allocation2 + $0x40] sm:$0xff] %vm396_vm12, %v3546_v42  ;;  %v3547_v51 = vadd.f32 %v3529_v47, %v3484_v38  ;;  %v7916_v52 = vpop.f32.mrb[163].mxu0  ;;  %v10468_v11 = vor.u32 %v6139_v18, %v6136_v17  ;;  %v6149_v42 = vrot.slane %v6147_v8, 6  ;;  %v6158_v38 = vrot.slane %v6156_v23, 6  ;;  %v7394_v37 = vld [vmem:[%s8548_s6 + $0x80] sm:$0x3] }
 0x236   : > { %v3940_v60 = vpop.f32.mrb[156].mxu1  ;;  %v3994_v62 = vld [vmem:[#allocation2 + $0x38] sm:$0xff]  ;;  %v6172_v47 = vshrl.u32 %v7391_v30, 16  ;;  %v6175_v52 = vshll.u32 %v7391_v30, 16  ;;  %v6193_v23 = vshll.u32 %v7393_v6, 16 }
 0x237   : > { %v4011_v40 = vadd.f32 %v3993_v46, %v3940_v60  ;;  %3565 = vst.msk [vmem:[#allocation2 + $0x48] sm:$0xff] %vm396_vm12, %v3547_v51  ;;  %v7949_v7 = vpop.f32.mrb[157].mxu1  ;;  %8142 = vmatmul.mubr.msk.bf16.gmra.mrb[12].mxu0 %vm259_vm2, %v7356_v29  ;;  %v7357_v29 = vcombine.low %v10418_v53, %v10428_v63  ;;  %v6155_v46 = vrot.slane %v6153_v3, 5  ;;  %v6167_v51 = vrot.slane %v6165_v34, 6  ;;  %v7338_v34 = vld [vmem:[%s8548_s6 + $0x84] sm:$0xe] }
 0x238   : > { %v3943_v13 = vpop.f32.mrb[158].mxu1  ;;  %8145 = vmatprep.mubr.msk.bf16.mxu0 %vm8424_vm1, %v8423_v0  ;;  %v5718_v60 = vsel %vm8689_vm8, %v10432_v4, %v5717_v22  ;;  %v6142_v55 = vrot.slane %v10468_v11, 4  ;;  %v7348_v63 = vrot.slane %v7335_v12, 9  ;;  %v5724_v7 = vrot.slane %v7337_v45, 5 }
 0x239   : > { %4029 = vst.msk [vmem:[#allocation2 + $0x30] sm:$0xff] %vm396_vm12, %v4011_v40  ;;  %v4012_v14 = vadd.f32 %v3994_v62, %v3943_v13  ;;  %v7950_v21 = vpop.f32.mrb[159].mxu1  ;;  %v7392_v62 = vld [vmem:[%s8548_s6 + $0x78] sm:$0xe]  ;;  %v6159_v59 = vor.u32 %v6158_v38, %v6155_v46  ;;  %v6174_v61 = vrot.slane %v6172_v47, 5  ;;  %v3532_v13 = vld [vmem:[#allocation2 + $0x60] sm:$0xff]  ;;  %v10496_v15 = vor.u32 %v6167_v51, %v6164_v50 }
 0x23a   : > { %v3489_v25 = vpop.f32.mrb[164].mxu0  ;;  %v6177_v17 = vrot.slane %v6175_v52, 6  ;;  %v6181_v18 = vshrl.u32 %v7392_v62, 16  ;;  %v6184_v8 = vshll.u32 %v7392_v62, 16  ;;  %v7358_v22 = vcombine.low %v10477_v28, %v5718_v60  ;;  %v7395_v47 = vld [vmem:[%s8548_s6 + $0x84] sm:$0xe] }
 0x23b   : > { %4030 = vst.msk [vmem:[#allocation2 + $0x38] sm:$0xff] %vm396_vm12, %v4012_v14  ;;  %8176 = vmatmul.mubr.msk.bf16.gmra.mrb[8].mxu1 %vm259_vm2, %v7403_v54  ;;  %v3548_v1 = vadd.f32 %v3530_v27, %v3489_v25  ;;  %v7919_v56 = vpop.f32.mrb[165].mxu0  ;;  %v6150_v54 = vor.u32 %v6149_v42, %v10457_v33  ;;  %v6190_v3 = vshrl.u32 %v7393_v6, 16  ;;  %v6141_v30 = vsel %vm8726_vm11, %v6132_v24, %v10468_v11  ;;  %v7396_v51 = vld [vmem:[%s8548_s6 + $0x88] sm:$0xf]  ;;  %v3534_v62 = vld [vmem:[#allocation2 + $0x70] sm:$0xff] }
 0x23c   : > { %v3995_v36 = vld [vmem:[#allocation2 + $0x40] sm:$0xff]  ;;  %v3492_v32 = vpop.f32.mrb[166].mxu0  ;;  %8179 = vmatprep.mubr.msk.bf16.mxu1 %vm8424_vm1, %v8423_v0  ;;  %v10515_v33 = vsel %vm8689_vm8, %v7348_v63, %v5721_v35  ;;  %v6170_v42 = vrot.slane %v10496_v15, 4  ;;  %v6178_v12 = vor.u32 %v6177_v17, %v6174_v61  ;;  %v6186_v20 = vrot.slane %v6184_v8, 6 }
 0x23d   : > { %3566 = vst.msk [vmem:[#allocation2 + $0x50] sm:$0xff] %vm396_vm12, %v3548_v1  ;;  %v3549_v43 = vadd.f32 %v3531_v26, %v3492_v32  ;;  %v7920_v44 = vpop.f32.mrb[167].mxu0  ;;  %v6151_v31 = vsel %vm8726_vm11, %v6142_v55, %v6150_v54  ;;  %v5728_v1 = vrot.slane %v10494_v9, 5  ;;  %v6160_v32 = vrot.slane %v6159_v59, 4  ;;  %v7340_v26 = vld [vmem:[%s8548_s6 + $0x8c] sm:$0x1] }
 0x23e   : > { %v3948_v48 = vpop.f32.mrb[160].mxu1  ;;  %v3996_v49 = vld [vmem:[#allocation2 + $0x48] sm:$0xff]  ;;  %v7405_v45 = vcombine.low %v6141_v30, %v6151_v31  ;;  %v6192_v46 = vrot.slane %v6190_v3, 5  ;;  %v6195_v38 = vrot.slane %v6193_v23, 6  ;;  %v6200_v28 = vshrl.u32 %v7394_v37, 16  ;;  %v3535_v9 = vld [vmem:[#allocation2 + $0x78] sm:$0xff] }
 0x23f   : > { %v4013_v53 = vadd.f32 %v3995_v36, %v3948_v48  ;;  %3567 = vst.msk [vmem:[#allocation2 + $0x58] sm:$0xff] %vm396_vm12, %v3549_v43  ;;  %v7953_v57 = vpop.f32.mrb[161].mxu1  ;;  %8146 = vmatmul.mubr.msk.bf16.gmra.mrb[16].mxu0 %vm259_vm2, %v7357_v29  ;;  %v3533_v29 = vld [vmem:[#allocation2 + $0x68] sm:$0xff]  ;;  %v10519_v36 = vsel %vm8689_vm8, %v5723_v5, %v5724_v7  ;;  %v6183_v43 = vrot.slane %v6181_v18, 5  ;;  %v6203_v50 = vshll.u32 %v7394_v37, 16 }
 0x240   : > { %v3951_v41 = vpop.f32.mrb[162].mxu1  ;;  %8149 = vmatprep.mubr.msk.bf16.mxu0 %vm8424_vm1, %v8423_v0  ;;  %v7349_v57 = vrot.slane %v7338_v34, 9  ;;  %v5731_v60 = vrot.slane %v7340_v26, 5  ;;  %v6179_v55 = vsel %vm8726_vm11, %v6170_v42, %v6178_v12  ;;  %v6209_v63 = vshrl.u32 %v7395_v47, 16 }
 0x241   : > { %4031 = vst.msk [vmem:[#allocation2 + $0x40] sm:$0xff] %vm396_vm12, %v4013_v53  ;;  %v4014_v40 = vadd.f32 %v3996_v49, %v3951_v41  ;;  %v7954_v4 = vpop.f32.mrb[163].mxu1  ;;  %v7359_v49 = vcombine.low %v10515_v33, %v10519_v36  ;;  %v6169_v41 = vsel %vm8726_vm11, %v6160_v32, %v10496_v15  ;;  %v6187_v54 = vor.u32 %v6186_v20, %v6183_v43 }
 0x242   : > { %v3497_v10 = vpop.f32.mrb[168].mxu0  ;;  %v6212_v4 = vshll.u32 %v7395_v47, 16  ;;  %v6218_v7 = vshrl.u32 %v7396_v51, 16  ;;  %v6221_v15 = vshll.u32 %v7396_v51, 16  ;;  %v5729_v8 = vsel %vm8689_vm8, %v7349_v57, %v5728_v1 }
 0x243   : > { %4032 = vst.msk [vmem:[#allocation2 + $0x48] sm:$0xff] %vm396_vm12, %v4014_v40  ;;  %8180 = vmatmul.mubr.msk.bf16.gmra.mrb[12].mxu1 %vm259_vm2, %v7404_v58  ;;  %v3550_v14 = vadd.f32 %v3532_v13, %v3497_v10  ;;  %v7923_v21 = vpop.f32.mrb[169].mxu0  ;;  %v5730_v58 = vrot.slane %v5728_v1, 4  ;;  %v10540_v40 = vor.u32 %v6195_v38, %v6192_v46  ;;  %v6202_v10 = vrot.slane %v6200_v28, 5 }
 0x244   : > { %v3997_v25 = vld [vmem:[#allocation2 + $0x50] sm:$0xff]  ;;  %v3500_v27 = vpop.f32.mrb[170].mxu0  ;;  %8183 = vmatprep.mubr.msk.bf16.mxu1 %vm8424_vm1, %v8423_v0  ;;  %v6205_v13 = vrot.slane %v6203_v50, 6  ;;  %v7406_v3 = vcombine.low %v6169_v41, %v6179_v55  ;;  %v6214_v34 = vrot.slane %v6212_v4, 6  ;;  %v6223_v33 = vrot.slane %v6221_v15, 6 }
 0x245   : > { %3568 = vst.msk [vmem:[#allocation2 + $0x60] sm:$0xff] %vm396_vm12, %v3550_v14  ;;  %v3551_v56 = vadd.f32 %v3533_v29, %v3500_v27  ;;  %v7924_v19 = vpop.f32.mrb[171].mxu0  ;;  %v7397_v14 = vld [vmem:[%s8548_s6 + $0x8c] sm:$0x3]  ;;  %v5732_v23 = vsel %vm8689_vm8, %v5730_v58, %v5731_v60  ;;  %v6211_v27 = vrot.slane %v6209_v63, 5  ;;  %v6198_v31 = vrot.slane %v10540_v40, 4 }
 0x246   : > { %v3956_v39 = vpop.f32.mrb[164].mxu1  ;;  %v3998_v11 = vld [vmem:[#allocation2 + $0x58] sm:$0xff]  ;;  %v6206_v19 = vor.u32 %v6205_v13, %v6202_v10  ;;  %v6228_v16 = vshrl.u32 %v7397_v14, 16  ;;  %v6231_v36 = vshll.u32 %v7397_v14, 16  ;;  %v7360_v12 = vcombine.low %v5729_v8, %v5732_v23  ;;  %v4328_v63 = vld [vmem:[#allocation2] sm:$0xff] }
 0x247   : > { %v4015_v44 = vadd.f32 %v3997_v25, %v3956_v39  ;;  %3569 = vst.msk [vmem:[#allocation2 + $0x68] sm:$0xff] %vm396_vm12, %v3551_v56  ;;  %v7957_v35 = vpop.f32.mrb[165].mxu1  ;;  %8150 = vmatmul.mubr.msk.bf16.gmra.mrb[20].mxu0 %vm259_vm2, %v7358_v22  ;;  %v6188_v25 = vrot.slane %v6187_v54, 4  ;;  %v6220_v56 = vrot.slane %v6218_v7, 5  ;;  %v3536_v39 = vld [vmem:[#allocation2 + $0x80] sm:$0xff]  ;;  %v6215_v20 = vor.u32 %v6214_v34, %v6211_v27  ;;  %v4329_v7 = vld [vmem:[#allocation2 + $0x8] sm:$0xff] }
 0x248   : > { %v3959_v48 = vpop.f32.mrb[166].mxu1  ;;  %8153 = vmatprep.mubr.msk.bf16.mxu0 %vm8424_vm1, %v8423_v0  ;;  %v6207_v46 = vsel %vm8726_vm11, %v6198_v31, %v6206_v19  ;;  %v6230_v47 = vrot.slane %v6228_v16, 5 }
 0x249   : > { %4033 = vst.msk [vmem:[#allocation2 + $0x50] sm:$0xff] %vm396_vm12, %v4015_v44  ;;  %v4016_v52 = vadd.f32 %v3998_v11, %v3959_v48  ;;  %v7958_v53 = vpop.f32.mrb[167].mxu1  ;;  %v6197_v43 = vsel %vm8726_vm11, %v6188_v25, %v10540_v40  ;;  %v6224_v38 = vor.u32 %v6223_v33, %v6220_v56  ;;  %v6233_v48 = vrot.slane %v6231_v36, 6 }
 0x24a   : > { %v3505_v24 = vpop.f32.mrb[172].mxu0  ;;  %v7407_v57 = vcombine.low %v6197_v43, %v6207_v46  ;;  %v6216_v60 = vrot.slane %v6215_v20, 4 }
 0x24b   : > { %4034 = vst.msk [vmem:[#allocation2 + $0x58] sm:$0xff] %vm396_vm12, %v4016_v52  ;;  %8184 = vmatmul.mubr.msk.bf16.gmra.mrb[16].mxu1 %vm259_vm2, %v7405_v45  ;;  %v3552_v5 = vadd.f32 %v3534_v62, %v3505_v24  ;;  %v7927_v6 = vpop.f32.mrb[173].mxu0  ;;  %v3537_v45 = vld [vmem:[#allocation2 + $0x88] sm:$0xff]  ;;  %v6226_v24 = vrot.slane %v6224_v38, 4  ;;  %v6234_v62 = vor.u32 %v6233_v48, %v6230_v47 }
 0x24c   : > { %v3999_v59 = vld [vmem:[#allocation2 + $0x60] sm:$0xff]  ;;  %v3508_v61 = vpop.f32.mrb[174].mxu0  ;;  %8187 = vmatprep.mubr.msk.bf16.mxu1 %vm8424_vm1, %v8423_v0 }
 0x24d   : > { %3570 = vst.msk [vmem:[#allocation2 + $0x70] sm:$0xff] %vm396_vm12, %v3552_v5  ;;  %v3553_v17 = vadd.f32 %v3535_v9, %v3508_v61  ;;  %v7928_v18 = vpop.f32.mrb[175].mxu0  ;;  %v6235_v61 = vsel %vm8726_vm11, %v6226_v24, %v6234_v62 }
 0x24e   : > { %v3964_v21 = vpop.f32.mrb[168].mxu1  ;;  %v4000_v22 = vld [vmem:[#allocation2 + $0x68] sm:$0xff] }
 0x24f   : > { %v4017_v29 = vadd.f32 %v3999_v59, %v3964_v21  ;;  %3571 = vst.msk [vmem:[#allocation2 + $0x78] sm:$0xff] %vm396_vm12, %v3553_v17  ;;  %v7961_v30 = vpop.f32.mrb[169].mxu1  ;;  %8154 = vmatmul.mubr.msk.bf16.gmra.mrb[24].mxu0 %vm259_vm2, %v7359_v49  ;;  %v6225_v59 = vsel %vm8726_vm11, %v6216_v60, %v6224_v38 }
 0x250   : > { %v3967_v1 = vpop.f32.mrb[170].mxu1  ;;  %8157 = vmatprep.mubr.msk.bf16.mxu0 %vm8424_vm1, %v8423_v0  ;;  %v7408_v8 = vcombine.low %v6225_v59, %v6235_v61 }
 0x251   : > { %4035 = vst.msk [vmem:[#allocation2 + $0x60] sm:$0xff] %vm396_vm12, %v4017_v29  ;;  %v4018_v32 = vadd.f32 %v4000_v22, %v3967_v1  ;;  %v7962_v26 = vpop.f32.mrb[171].mxu1  ;;  %v4331_v29 = vld [vmem:[#allocation2 + $0x18] sm:$0xff] }
 0x252   : > { %v3513_v37 = vpop.f32.mrb[176].mxu0  ;;  %v4332_v26 = vld [vmem:[#allocation2 + $0x20] sm:$0xff] }
 0x253   : > { %4036 = vst.msk [vmem:[#allocation2 + $0x68] sm:$0xff] %vm396_vm12, %v4018_v32  ;;  %8188 = vmatmul.mubr.msk.bf16.gmra.mrb[20].mxu1 %vm259_vm2, %v7406_v3  ;;  %v3554_v11 = vadd.f32 %v3536_v39, %v3513_v37  ;;  %v7931_v42 = vpop.f32.mrb[177].mxu0  ;;  %v4330_v3 = vld [vmem:[#allocation2 + $0x10] sm:$0xff] }
 0x254   : > { %v4001_v44 = vld [vmem:[#allocation2 + $0x70] sm:$0xff]  ;;  %v3516_v35 = vpop.f32.mrb[178].mxu0  ;;  %8191 = vmatprep.mubr.msk.bf16.mxu1 %vm8424_vm1, %v8423_v0 }
 0x255   : > { %3572 = vst.msk [vmem:[#allocation2 + $0x80] sm:$0xff] %vm396_vm12, %v3554_v11  ;;  %v3555_v49 = vadd.f32 %v3537_v45, %v3516_v35  ;;  %v7932_v28 = vpop.f32.mrb[179].mxu0 }
 0x256   : > { %v3972_v50 = vpop.f32.mrb[172].mxu1  ;;  %v4002_v51 = vld [vmem:[#allocation2 + $0x78] sm:$0xff]  ;;  %v4334_v28 = vld [vmem:[#allocation2 + $0x30] sm:$0xff] }
 0x257   : > { %v4019_v52 = vadd.f32 %v4001_v44, %v3972_v50  ;;  %3573 = vst.msk [vmem:[#allocation2 + $0x88] sm:$0xff] %vm396_vm12, %v3555_v49  ;;  %v7965_v53 = vpop.f32.mrb[173].mxu1  ;;  %8158 = vmatmul.mubr.msk.bf16.gmra.mrb[28].mxu0 %vm259_vm2, %v7360_v12  ;;  %v4333_v12 = vld [vmem:[#allocation2 + $0x28] sm:$0xff] }
 0x258   : > { %v3975_v58 = vpop.f32.mrb[174].mxu1 }
 0x259   : > { %4037 = vst.msk [vmem:[#allocation2 + $0x70] sm:$0xff] %vm396_vm12, %v4019_v52  ;;  %v4020_v41 = vadd.f32 %v4002_v51, %v3975_v58  ;;  %v7966_v55 = vpop.f32.mrb[175].mxu1 }
 0x25a   : > { %v4257_v54 = vpop.f32.mrb[180].mxu0 }
 0x25b   : > { %4038 = vst.msk [vmem:[#allocation2 + $0x78] sm:$0xff] %vm396_vm12, %v4020_v41  ;;  %8192 = vmatmul.mubr.msk.bf16.gmra.mrb[24].mxu1 %vm259_vm2, %v7407_v57  ;;  %v4346_v5 = vadd.f32 %v4328_v63, %v4257_v54  ;;  %v7975_v6 = vpop.f32.mrb[181].mxu0  ;;  %v4335_v57 = vld [vmem:[#allocation2 + $0x38] sm:$0xff] }
 0x25c   : > { %v4003_v40 = vld [vmem:[#allocation2 + $0x80] sm:$0xff]  ;;  %v4260_v4 = vpop.f32.mrb[182].mxu0  ;;  %8195 = vmatprep.mubr.msk.bf16.mxu1 %vm8424_vm1, %v8423_v0 }
 0x25d   : > { %4364 = vst.msk [vmem:[#allocation2] sm:$0xff] %vm396_vm12, %v4346_v5  ;;  %v4347_v9 = vadd.f32 %v4329_v7, %v4260_v4  ;;  %v7976_v10 = vpop.f32.mrb[183].mxu0 }
 0x25e   : > { %v3980_v13 = vpop.f32.mrb[176].mxu1  ;;  %v4004_v15 = vld [vmem:[#allocation2 + $0x88] sm:$0xff] }
 0x25f   : > { %v4021_v17 = vadd.f32 %v4003_v40, %v3980_v13  ;;  %v7969_v18 = vpop.f32.mrb[177].mxu1  ;;  %4365 = vst.msk [vmem:[#allocation2 + $0x8] sm:$0xff] %vm396_vm12, %v4347_v9  ;;  %v4336_v40 = vld [vmem:[#allocation2 + $0x40] sm:$0xff]  ;;  %v4337_v9 = vld [vmem:[#allocation2 + $0x48] sm:$0xff] }
 0x260   : > { %v3983_v14 = vpop.f32.mrb[178].mxu1 }
 0x261   : > { %4039 = vst.msk [vmem:[#allocation2 + $0x80] sm:$0xff] %vm396_vm12, %v4021_v17  ;;  %v4022_v0 = vadd.f32 %v4004_v15, %v3983_v14  ;;  %v7970_v21 = vpop.f32.mrb[179].mxu1 }
 0x262   : > { %v4265_v22 = vpop.f32.mrb[184].mxu0 }
 0x263   : > { %4040 = vst.msk [vmem:[#allocation2 + $0x88] sm:$0xff] %vm396_vm12, %v4022_v0  ;;  %8196 = vmatmul.mubr.msk.bf16.gmra.mrb[28].mxu1 %vm259_vm2, %v7408_v8  ;;  %v4348_v2 = vadd.f32 %v4330_v3, %v4265_v22  ;;  %v7979_v23 = vpop.f32.mrb[185].mxu0  ;;  %v4338_v3 = vld [vmem:[#allocation2 + $0x50] sm:$0xff] }
 0x264   : > { %v4831_v25 = vld [vmem:[#allocation2] sm:$0xff]  ;;  %v4268_v27 = vpop.f32.mrb[186].mxu0 }
 0x265   : > { %4366 = vst.msk [vmem:[#allocation2 + $0x10] sm:$0xff] %vm396_vm12, %v4348_v2  ;;  %v4349_v30 = vadd.f32 %v4331_v29, %v4268_v27  ;;  %v7980_v31 = vpop.f32.mrb[187].mxu0  ;;  %v4339_v29 = vld [vmem:[#allocation2 + $0x58] sm:$0xff] }
 0x266   : > { %v4760_v34 = vpop.f32.mrb[180].mxu1  ;;  %v4832_v56 = vld [vmem:[#allocation2 + $0x8] sm:$0xff] }
 0x267   : > { %v4849_v1 = vadd.f32 %v4831_v25, %v4760_v34  ;;  %4367 = vst.msk [vmem:[#allocation2 + $0x18] sm:$0xff] %vm396_vm12, %v4349_v30  ;;  %v8013_v19 = vpop.f32.mrb[181].mxu1 }
 0x268   : > { %v4763_v33 = vpop.f32.mrb[182].mxu1 }
 0x269   : > { %4867 = vst.msk [vmem:[#allocation2] sm:$0xff] %vm396_vm12, %v4849_v1  ;;  %v4850_v16 = vadd.f32 %v4832_v56, %v4763_v33  ;;  %v8014_v36 = vpop.f32.mrb[183].mxu1 }
 0x26a   : > { %v4273_v32 = vpop.f32.mrb[188].mxu0 }
 0x26b   : > { %4868 = vst.msk [vmem:[#allocation2 + $0x8] sm:$0xff] %vm396_vm12, %v4850_v16  ;;  %v4350_v37 = vadd.f32 %v4332_v26, %v4273_v32  ;;  %v7983_v39 = vpop.f32.mrb[189].mxu0  ;;  %v4340_v26 = vld [vmem:[#allocation2 + $0x60] sm:$0xff] }
 0x26c   : > { %v4833_v11 = vld [vmem:[#allocation2 + $0x10] sm:$0xff]  ;;  %v4276_v42 = vpop.f32.mrb[190].mxu0 }
 0x26d   : > { %4368 = vst.msk [vmem:[#allocation2 + $0x20] sm:$0xff] %vm396_vm12, %v4350_v37  ;;  %v4351_v43 = vadd.f32 %v4333_v12, %v4276_v42  ;;  %v7984_v20 = vpop.f32.mrb[191].mxu0  ;;  %v4341_v12 = vld [vmem:[#allocation2 + $0x68] sm:$0xff] }
 0x26e   : > { %v4768_v44 = vpop.f32.mrb[184].mxu1  ;;  %v4834_v35 = vld [vmem:[#allocation2 + $0x18] sm:$0xff] }
 0x26f   : > { %v4851_v45 = vadd.f32 %v4833_v11, %v4768_v44  ;;  %4369 = vst.msk [vmem:[#allocation2 + $0x28] sm:$0xff] %vm396_vm12, %v4351_v43  ;;  %v8017_v46 = vpop.f32.mrb[185].mxu1 }
 0x270   : > { %v4771_v38 = vpop.f32.mrb[186].mxu1 }
 0x271   : > { %4869 = vst.msk [vmem:[#allocation2 + $0x10] sm:$0xff] %vm396_vm12, %v4851_v45  ;;  %v4852_v47 = vadd.f32 %v4834_v35, %v4771_v38  ;;  %v8018_v48 = vpop.f32.mrb[187].mxu1 }
 0x272   : > { %v4281_v49 = vpop.f32.mrb[192].mxu0 }
 0x273   : > { %4870 = vst.msk [vmem:[#allocation2 + $0x18] sm:$0xff] %vm396_vm12, %v4852_v47  ;;  %v4352_v50 = vadd.f32 %v4334_v28, %v4281_v49  ;;  %v7987_v51 = vpop.f32.mrb[193].mxu0  ;;  %v4342_v28 = vld [vmem:[#allocation2 + $0x70] sm:$0xff] }
 0x274   : > { %v4835_v52 = vld [vmem:[#allocation2 + $0x20] sm:$0xff]  ;;  %v4284_v53 = vpop.f32.mrb[194].mxu0 }
 0x275   : > { %4370 = vst.msk [vmem:[#allocation2 + $0x30] sm:$0xff] %vm396_vm12, %v4352_v50  ;;  %v4353_v58 = vadd.f32 %v4335_v57, %v4284_v53  ;;  %v7988_v60 = vpop.f32.mrb[195].mxu0  ;;  %v4343_v57 = vld [vmem:[#allocation2 + $0x78] sm:$0xff] }
 0x276   : > { %v4776_v24 = vpop.f32.mrb[188].mxu1  ;;  %v4836_v62 = vld [vmem:[#allocation2 + $0x28] sm:$0xff] }
 0x277   : > { %v4853_v41 = vadd.f32 %v4835_v52, %v4776_v24  ;;  %4371 = vst.msk [vmem:[#allocation2 + $0x38] sm:$0xff] %vm396_vm12, %v4353_v58  ;;  %v8021_v55 = vpop.f32.mrb[189].mxu1 }
 0x278   : > { %v4779_v54 = vpop.f32.mrb[190].mxu1 }
 0x279   : > { %4871 = vst.msk [vmem:[#allocation2 + $0x20] sm:$0xff] %vm396_vm12, %v4853_v41  ;;  %v4854_v63 = vadd.f32 %v4836_v62, %v4779_v54  ;;  %v8022_v5 = vpop.f32.mrb[191].mxu1 }
 0x27a   : > { %v4289_v6 = vpop.f32.mrb[196].mxu0 }
 0x27b   : > { %4872 = vst.msk [vmem:[#allocation2 + $0x28] sm:$0xff] %vm396_vm12, %v4854_v63  ;;  %v4354_v4 = vadd.f32 %v4336_v40, %v4289_v6  ;;  %v7991_v7 = vpop.f32.mrb[197].mxu0  ;;  %v4344_v40 = vld [vmem:[#allocation2 + $0x80] sm:$0xff] }
 0x27c   : > { %v4837_v59 = vld [vmem:[#allocation2 + $0x30] sm:$0xff]  ;;  %v4292_v61 = vpop.f32.mrb[198].mxu0 }
 0x27d   : > { %4372 = vst.msk [vmem:[#allocation2 + $0x40] sm:$0xff] %vm396_vm12, %v4354_v4  ;;  %v4355_v10 = vadd.f32 %v4337_v9, %v4292_v61  ;;  %v7992_v13 = vpop.f32.mrb[199].mxu0  ;;  %v4345_v9 = vld [vmem:[#allocation2 + $0x88] sm:$0xff] }
 0x27e   : > { %v4784_v15 = vpop.f32.mrb[192].mxu1  ;;  %v4838_v17 = vld [vmem:[#allocation2 + $0x38] sm:$0xff] }
 0x27f   : > { %v4855_v18 = vadd.f32 %v4837_v59, %v4784_v15  ;;  %4373 = vst.msk [vmem:[#allocation2 + $0x48] sm:$0xff] %vm396_vm12, %v4355_v10  ;;  %v8025_v8 = vpop.f32.mrb[193].mxu1 }
 0x280   : > { %v4787_v14 = vpop.f32.mrb[194].mxu1 }
 0x281   : > { %4873 = vst.msk [vmem:[#allocation2 + $0x30] sm:$0xff] %vm396_vm12, %v4855_v18  ;;  %v4856_v0 = vadd.f32 %v4838_v17, %v4787_v14  ;;  %v8026_v21 = vpop.f32.mrb[195].mxu1 }
 0x282   : > { %v4297_v22 = vpop.f32.mrb[200].mxu0 }
 0x283   : > { %4874 = vst.msk [vmem:[#allocation2 + $0x38] sm:$0xff] %vm396_vm12, %v4856_v0  ;;  %v4356_v2 = vadd.f32 %v4338_v3, %v4297_v22  ;;  %v7995_v23 = vpop.f32.mrb[201].mxu0  ;;  %v5095_v3 = vld [vmem:[#allocation2] sm:$0xff] }
 0x284   : > { %v4839_v25 = vld [vmem:[#allocation2 + $0x40] sm:$0xff]  ;;  %v4300_v27 = vpop.f32.mrb[202].mxu0 }
 0x285   : > { %4374 = vst.msk [vmem:[#allocation2 + $0x50] sm:$0xff] %vm396_vm12, %v4356_v2  ;;  %v4357_v30 = vadd.f32 %v4339_v29, %v4300_v27  ;;  %v7996_v31 = vpop.f32.mrb[203].mxu0  ;;  %v5096_v29 = vld [vmem:[#allocation2 + $0x8] sm:$0xff] }
 0x286   : > { %v4792_v34 = vpop.f32.mrb[196].mxu1  ;;  %v4840_v56 = vld [vmem:[#allocation2 + $0x48] sm:$0xff] }
 0x287   : > { %v4857_v1 = vadd.f32 %v4839_v25, %v4792_v34  ;;  %4375 = vst.msk [vmem:[#allocation2 + $0x58] sm:$0xff] %vm396_vm12, %v4357_v30  ;;  %v8029_v19 = vpop.f32.mrb[197].mxu1 }
 0x288   : > { %v4795_v33 = vpop.f32.mrb[198].mxu1 }
 0x289   : > { %4875 = vst.msk [vmem:[#allocation2 + $0x40] sm:$0xff] %vm396_vm12, %v4857_v1  ;;  %v4858_v16 = vadd.f32 %v4840_v56, %v4795_v33  ;;  %v8030_v36 = vpop.f32.mrb[199].mxu1 }
 0x28a   : > { %v4305_v32 = vpop.f32.mrb[204].mxu0 }
 0x28b   : > { %4876 = vst.msk [vmem:[#allocation2 + $0x48] sm:$0xff] %vm396_vm12, %v4858_v16  ;;  %v4358_v37 = vadd.f32 %v4340_v26, %v4305_v32  ;;  %v7999_v39 = vpop.f32.mrb[205].mxu0  ;;  %v5097_v26 = vld [vmem:[#allocation2 + $0x10] sm:$0xff] }
 0x28c   : > { %v4841_v11 = vld [vmem:[#allocation2 + $0x50] sm:$0xff]  ;;  %v4308_v42 = vpop.f32.mrb[206].mxu0 }
 0x28d   : > { %4376 = vst.msk [vmem:[#allocation2 + $0x60] sm:$0xff] %vm396_vm12, %v4358_v37  ;;  %v4359_v43 = vadd.f32 %v4341_v12, %v4308_v42  ;;  %v8000_v20 = vpop.f32.mrb[207].mxu0  ;;  %v5098_v12 = vld [vmem:[#allocation2 + $0x18] sm:$0xff] }
 0x28e   : > { %v4800_v44 = vpop.f32.mrb[200].mxu1  ;;  %v4842_v35 = vld [vmem:[#allocation2 + $0x58] sm:$0xff] }
 0x28f   : > { %v4859_v45 = vadd.f32 %v4841_v11, %v4800_v44  ;;  %4377 = vst.msk [vmem:[#allocation2 + $0x68] sm:$0xff] %vm396_vm12, %v4359_v43  ;;  %v8033_v46 = vpop.f32.mrb[201].mxu1 }
 0x290   : > { %v4803_v38 = vpop.f32.mrb[202].mxu1 }
 0x291   : > { %4877 = vst.msk [vmem:[#allocation2 + $0x50] sm:$0xff] %vm396_vm12, %v4859_v45  ;;  %v4860_v47 = vadd.f32 %v4842_v35, %v4803_v38  ;;  %v8034_v48 = vpop.f32.mrb[203].mxu1 }
 0x292   : > { %v4313_v49 = vpop.f32.mrb[208].mxu0 }
 0x293   : > { %4878 = vst.msk [vmem:[#allocation2 + $0x58] sm:$0xff] %vm396_vm12, %v4860_v47  ;;  %v4360_v50 = vadd.f32 %v4342_v28, %v4313_v49  ;;  %v8003_v51 = vpop.f32.mrb[209].mxu0  ;;  %v5099_v28 = vld [vmem:[#allocation2 + $0x20] sm:$0xff] }
 0x294   : > { %v4843_v52 = vld [vmem:[#allocation2 + $0x60] sm:$0xff]  ;;  %v4316_v53 = vpop.f32.mrb[210].mxu0 }
 0x295   : > { %4378 = vst.msk [vmem:[#allocation2 + $0x70] sm:$0xff] %vm396_vm12, %v4360_v50  ;;  %v4361_v58 = vadd.f32 %v4343_v57, %v4316_v53  ;;  %v8004_v60 = vpop.f32.mrb[211].mxu0  ;;  %v5100_v57 = vld [vmem:[#allocation2 + $0x28] sm:$0xff] }
 0x296   : > { %v4808_v24 = vpop.f32.mrb[204].mxu1  ;;  %v4844_v62 = vld [vmem:[#allocation2 + $0x68] sm:$0xff] }
 0x297   : > { %v4861_v41 = vadd.f32 %v4843_v52, %v4808_v24  ;;  %4379 = vst.msk [vmem:[#allocation2 + $0x78] sm:$0xff] %vm396_vm12, %v4361_v58  ;;  %v8037_v55 = vpop.f32.mrb[205].mxu1 }
 0x298   : > { %v4811_v54 = vpop.f32.mrb[206].mxu1 }
 0x299   : > { %4879 = vst.msk [vmem:[#allocation2 + $0x60] sm:$0xff] %vm396_vm12, %v4861_v41  ;;  %v4862_v63 = vadd.f32 %v4844_v62, %v4811_v54  ;;  %v8038_v5 = vpop.f32.mrb[207].mxu1 }
 0x29a   : > { %v4321_v6 = vpop.f32.mrb[212].mxu0 }
 0x29b   : > { %4880 = vst.msk [vmem:[#allocation2 + $0x68] sm:$0xff] %vm396_vm12, %v4862_v63  ;;  %v4362_v4 = vadd.f32 %v4344_v40, %v4321_v6  ;;  %v8007_v7 = vpop.f32.mrb[213].mxu0  ;;  %v5101_v40 = vld [vmem:[#allocation2 + $0x30] sm:$0xff] }
 0x29c   : > { %v4845_v59 = vld [vmem:[#allocation2 + $0x70] sm:$0xff]  ;;  %v4324_v61 = vpop.f32.mrb[214].mxu0 }
 0x29d   : > { %4380 = vst.msk [vmem:[#allocation2 + $0x80] sm:$0xff] %vm396_vm12, %v4362_v4  ;;  %v4363_v10 = vadd.f32 %v4345_v9, %v4324_v61  ;;  %v8008_v13 = vpop.f32.mrb[215].mxu0  ;;  %v5102_v9 = vld [vmem:[#allocation2 + $0x38] sm:$0xff] }
 0x29e   : > { %v4816_v15 = vpop.f32.mrb[208].mxu1  ;;  %v4846_v17 = vld [vmem:[#allocation2 + $0x78] sm:$0xff] }
 0x29f   : > { %v4863_v18 = vadd.f32 %v4845_v59, %v4816_v15  ;;  %4381 = vst.msk [vmem:[#allocation2 + $0x88] sm:$0xff] %vm396_vm12, %v4363_v10  ;;  %v8041_v8 = vpop.f32.mrb[209].mxu1 }
 0x2a0   : > { %v4819_v14 = vpop.f32.mrb[210].mxu1 }
 0x2a1   : > { %4881 = vst.msk [vmem:[#allocation2 + $0x70] sm:$0xff] %vm396_vm12, %v4863_v18  ;;  %v4864_v0 = vadd.f32 %v4846_v17, %v4819_v14  ;;  %v8042_v21 = vpop.f32.mrb[211].mxu1 }
 0x2a2   : > { %v5024_v22 = vpop.f32.mrb[216].mxu0 }
 0x2a3   : > { %4882 = vst.msk [vmem:[#allocation2 + $0x78] sm:$0xff] %vm396_vm12, %v4864_v0  ;;  %v5113_v2 = vadd.f32 %v5095_v3, %v5024_v22  ;;  %v8051_v23 = vpop.f32.mrb[217].mxu0  ;;  %v5103_v3 = vld [vmem:[#allocation2 + $0x40] sm:$0xff] }
 0x2a4   : > { %v4847_v25 = vld [vmem:[#allocation2 + $0x80] sm:$0xff]  ;;  %v5027_v27 = vpop.f32.mrb[218].mxu0 }
 0x2a5   : > { %5131 = vst.msk [vmem:[#allocation2] sm:$0xff] %vm396_vm12, %v5113_v2  ;;  %v5114_v30 = vadd.f32 %v5096_v29, %v5027_v27  ;;  %v8052_v31 = vpop.f32.mrb[219].mxu0  ;;  %v5104_v29 = vld [vmem:[#allocation2 + $0x48] sm:$0xff] }
 0x2a6   : > { %v4824_v34 = vpop.f32.mrb[212].mxu1  ;;  %v4848_v56 = vld [vmem:[#allocation2 + $0x88] sm:$0xff] }
 0x2a7   : > { %v4865_v1 = vadd.f32 %v4847_v25, %v4824_v34  ;;  %v8045_v19 = vpop.f32.mrb[213].mxu1  ;;  %5132 = vst.msk [vmem:[#allocation2 + $0x8] sm:$0xff] %vm396_vm12, %v5114_v30 }
 0x2a8   : > { %v4827_v33 = vpop.f32.mrb[214].mxu1 }
 0x2a9   : > { %4883 = vst.msk [vmem:[#allocation2 + $0x80] sm:$0xff] %vm396_vm12, %v4865_v1  ;;  %v4866_v16 = vadd.f32 %v4848_v56, %v4827_v33  ;;  %v8046_v36 = vpop.f32.mrb[215].mxu1 }
 0x2aa   : > { %v5032_v32 = vpop.f32.mrb[220].mxu0 }
 0x2ab   : > { %4884 = vst.msk [vmem:[#allocation2 + $0x88] sm:$0xff] %vm396_vm12, %v4866_v16  ;;  %v5115_v37 = vadd.f32 %v5097_v26, %v5032_v32  ;;  %v8055_v39 = vpop.f32.mrb[221].mxu0  ;;  %v5105_v26 = vld [vmem:[#allocation2 + $0x50] sm:$0xff] }
 0x2ac   : > { %v5562_v11 = vld [vmem:[#allocation2] sm:$0xff]  ;;  %v5035_v42 = vpop.f32.mrb[222].mxu0 }
 0x2ad   : > { %5133 = vst.msk [vmem:[#allocation2 + $0x10] sm:$0xff] %vm396_vm12, %v5115_v37  ;;  %v5116_v43 = vadd.f32 %v5098_v12, %v5035_v42  ;;  %v8056_v20 = vpop.f32.mrb[223].mxu0  ;;  %v5106_v12 = vld [vmem:[#allocation2 + $0x58] sm:$0xff] }
 0x2ae   : > { %v5491_v44 = vpop.f32.mrb[216].mxu1  ;;  %v5563_v35 = vld [vmem:[#allocation2 + $0x8] sm:$0xff] }
 0x2af   : > { %v5580_v45 = vadd.f32 %v5562_v11, %v5491_v44  ;;  %5134 = vst.msk [vmem:[#allocation2 + $0x18] sm:$0xff] %vm396_vm12, %v5116_v43  ;;  %v8089_v46 = vpop.f32.mrb[217].mxu1 }
 0x2b0   : > { %v5494_v38 = vpop.f32.mrb[218].mxu1 }
 0x2b1   : > { %5598 = vst.msk [vmem:[#allocation2] sm:$0xff] %vm396_vm12, %v5580_v45  ;;  %v5581_v47 = vadd.f32 %v5563_v35, %v5494_v38  ;;  %v8090_v48 = vpop.f32.mrb[219].mxu1 }
 0x2b2   : > { %v5040_v49 = vpop.f32.mrb[224].mxu0 }
 0x2b3   : > { %5599 = vst.msk [vmem:[#allocation2 + $0x8] sm:$0xff] %vm396_vm12, %v5581_v47  ;;  %v5117_v50 = vadd.f32 %v5099_v28, %v5040_v49  ;;  %v8059_v51 = vpop.f32.mrb[225].mxu0  ;;  %v5107_v28 = vld [vmem:[#allocation2 + $0x60] sm:$0xff] }
 0x2b4   : > { %v5564_v52 = vld [vmem:[#allocation2 + $0x10] sm:$0xff]  ;;  %v5043_v53 = vpop.f32.mrb[226].mxu0 }
 0x2b5   : > { %5135 = vst.msk [vmem:[#allocation2 + $0x20] sm:$0xff] %vm396_vm12, %v5117_v50  ;;  %v5118_v58 = vadd.f32 %v5100_v57, %v5043_v53  ;;  %v8060_v60 = vpop.f32.mrb[227].mxu0  ;;  %v5108_v57 = vld [vmem:[#allocation2 + $0x68] sm:$0xff] }
 0x2b6   : > { %v5499_v24 = vpop.f32.mrb[220].mxu1  ;;  %v5565_v62 = vld [vmem:[#allocation2 + $0x18] sm:$0xff] }
 0x2b7   : > { %v5582_v41 = vadd.f32 %v5564_v52, %v5499_v24  ;;  %5136 = vst.msk [vmem:[#allocation2 + $0x28] sm:$0xff] %vm396_vm12, %v5118_v58  ;;  %v8093_v55 = vpop.f32.mrb[221].mxu1 }
 0x2b8   : > { %v5502_v54 = vpop.f32.mrb[222].mxu1 }
 0x2b9   : > { %5600 = vst.msk [vmem:[#allocation2 + $0x10] sm:$0xff] %vm396_vm12, %v5582_v41  ;;  %v5583_v63 = vadd.f32 %v5565_v62, %v5502_v54  ;;  %v8094_v5 = vpop.f32.mrb[223].mxu1 }
 0x2ba   : > { %v5048_v6 = vpop.f32.mrb[228].mxu0 }
 0x2bb   : > { %5601 = vst.msk [vmem:[#allocation2 + $0x18] sm:$0xff] %vm396_vm12, %v5583_v63  ;;  %v5119_v4 = vadd.f32 %v5101_v40, %v5048_v6  ;;  %v8063_v7 = vpop.f32.mrb[229].mxu0  ;;  %v5109_v40 = vld [vmem:[#allocation2 + $0x70] sm:$0xff] }
 0x2bc   : > { %v5566_v59 = vld [vmem:[#allocation2 + $0x20] sm:$0xff]  ;;  %v5051_v61 = vpop.f32.mrb[230].mxu0 }
 0x2bd   : > { %5137 = vst.msk [vmem:[#allocation2 + $0x30] sm:$0xff] %vm396_vm12, %v5119_v4  ;;  %v5120_v10 = vadd.f32 %v5102_v9, %v5051_v61  ;;  %v8064_v13 = vpop.f32.mrb[231].mxu0  ;;  %v5110_v9 = vld [vmem:[#allocation2 + $0x78] sm:$0xff] }
 0x2be   : > { %v5507_v15 = vpop.f32.mrb[224].mxu1  ;;  %v5567_v17 = vld [vmem:[#allocation2 + $0x28] sm:$0xff] }
 0x2bf   : > { %v5584_v18 = vadd.f32 %v5566_v59, %v5507_v15  ;;  %5138 = vst.msk [vmem:[#allocation2 + $0x38] sm:$0xff] %vm396_vm12, %v5120_v10  ;;  %v8097_v8 = vpop.f32.mrb[225].mxu1 }
 0x2c0   : > { %v5510_v14 = vpop.f32.mrb[226].mxu1 }
 0x2c1   : > { %5602 = vst.msk [vmem:[#allocation2 + $0x20] sm:$0xff] %vm396_vm12, %v5584_v18  ;;  %v5585_v0 = vadd.f32 %v5567_v17, %v5510_v14  ;;  %v8098_v21 = vpop.f32.mrb[227].mxu1 }
 0x2c2   : > { %v5056_v22 = vpop.f32.mrb[232].mxu0 }
 0x2c3   : > { %5603 = vst.msk [vmem:[#allocation2 + $0x28] sm:$0xff] %vm396_vm12, %v5585_v0  ;;  %v5121_v2 = vadd.f32 %v5103_v3, %v5056_v22  ;;  %v8067_v23 = vpop.f32.mrb[233].mxu0  ;;  %v5111_v3 = vld [vmem:[#allocation2 + $0x80] sm:$0xff] }
 0x2c4   : > { %v5568_v25 = vld [vmem:[#allocation2 + $0x30] sm:$0xff]  ;;  %v5059_v27 = vpop.f32.mrb[234].mxu0 }
 0x2c5   : > { %5139 = vst.msk [vmem:[#allocation2 + $0x40] sm:$0xff] %vm396_vm12, %v5121_v2  ;;  %v5122_v30 = vadd.f32 %v5104_v29, %v5059_v27  ;;  %v8068_v31 = vpop.f32.mrb[235].mxu0  ;;  %v5112_v29 = vld [vmem:[#allocation2 + $0x88] sm:$0xff] }
 0x2c6   : > { %v5515_v34 = vpop.f32.mrb[228].mxu1  ;;  %v5569_v56 = vld [vmem:[#allocation2 + $0x38] sm:$0xff] }
 0x2c7   : > { %v5586_v1 = vadd.f32 %v5568_v25, %v5515_v34  ;;  %5140 = vst.msk [vmem:[#allocation2 + $0x48] sm:$0xff] %vm396_vm12, %v5122_v30  ;;  %v8101_v19 = vpop.f32.mrb[229].mxu1 }
 0x2c8   : > { %v5518_v33 = vpop.f32.mrb[230].mxu1 }
 0x2c9   : > { %5604 = vst.msk [vmem:[#allocation2 + $0x30] sm:$0xff] %vm396_vm12, %v5586_v1  ;;  %v5587_v16 = vadd.f32 %v5569_v56, %v5518_v33  ;;  %v8102_v36 = vpop.f32.mrb[231].mxu1 }
 0x2ca   : > { %v5064_v32 = vpop.f32.mrb[236].mxu0 }
 0x2cb   : > { %5605 = vst.msk [vmem:[#allocation2 + $0x38] sm:$0xff] %vm396_vm12, %v5587_v16  ;;  %v5123_v37 = vadd.f32 %v5105_v26, %v5064_v32  ;;  %v8071_v39 = vpop.f32.mrb[237].mxu0  ;;  %v5903_v26 = vld [vmem:[#allocation2] sm:$0xff] }
 0x2cc   : > { %v5570_v11 = vld [vmem:[#allocation2 + $0x40] sm:$0xff]  ;;  %v5067_v42 = vpop.f32.mrb[238].mxu0 }
 0x2cd   : > { %5141 = vst.msk [vmem:[#allocation2 + $0x50] sm:$0xff] %vm396_vm12, %v5123_v37  ;;  %v5124_v43 = vadd.f32 %v5106_v12, %v5067_v42  ;;  %v8072_v20 = vpop.f32.mrb[239].mxu0  ;;  %v5904_v12 = vld [vmem:[#allocation2 + $0x8] sm:$0xff] }
 0x2ce   : > { %v5523_v44 = vpop.f32.mrb[232].mxu1  ;;  %v5571_v35 = vld [vmem:[#allocation2 + $0x48] sm:$0xff] }
 0x2cf   : > { %v5588_v45 = vadd.f32 %v5570_v11, %v5523_v44  ;;  %5142 = vst.msk [vmem:[#allocation2 + $0x58] sm:$0xff] %vm396_vm12, %v5124_v43  ;;  %v8105_v46 = vpop.f32.mrb[233].mxu1 }
 0x2d0   : > { %v5526_v38 = vpop.f32.mrb[234].mxu1 }
 0x2d1   : > { %5606 = vst.msk [vmem:[#allocation2 + $0x40] sm:$0xff] %vm396_vm12, %v5588_v45  ;;  %v5589_v47 = vadd.f32 %v5571_v35, %v5526_v38  ;;  %v8106_v48 = vpop.f32.mrb[235].mxu1 }
 0x2d2   : > { %v5072_v49 = vpop.f32.mrb[240].mxu0 }
 0x2d3   : > { %5607 = vst.msk [vmem:[#allocation2 + $0x48] sm:$0xff] %vm396_vm12, %v5589_v47  ;;  %v5125_v50 = vadd.f32 %v5107_v28, %v5072_v49  ;;  %v8075_v51 = vpop.f32.mrb[241].mxu0  ;;  %v5905_v28 = vld [vmem:[#allocation2 + $0x10] sm:$0xff] }
 0x2d4   : > { %v5572_v52 = vld [vmem:[#allocation2 + $0x50] sm:$0xff]  ;;  %v5075_v53 = vpop.f32.mrb[242].mxu0 }
 0x2d5   : > { %5143 = vst.msk [vmem:[#allocation2 + $0x60] sm:$0xff] %vm396_vm12, %v5125_v50  ;;  %v5126_v58 = vadd.f32 %v5108_v57, %v5075_v53  ;;  %v8076_v60 = vpop.f32.mrb[243].mxu0  ;;  %v5906_v57 = vld [vmem:[#allocation2 + $0x18] sm:$0xff] }
 0x2d6   : > { %v5531_v24 = vpop.f32.mrb[236].mxu1  ;;  %v5573_v62 = vld [vmem:[#allocation2 + $0x58] sm:$0xff] }
 0x2d7   : > { %v5590_v41 = vadd.f32 %v5572_v52, %v5531_v24  ;;  %5144 = vst.msk [vmem:[#allocation2 + $0x68] sm:$0xff] %vm396_vm12, %v5126_v58  ;;  %v8109_v55 = vpop.f32.mrb[237].mxu1 }
 0x2d8   : > { %v5534_v54 = vpop.f32.mrb[238].mxu1 }
 0x2d9   : > { %5608 = vst.msk [vmem:[#allocation2 + $0x50] sm:$0xff] %vm396_vm12, %v5590_v41  ;;  %v5591_v63 = vadd.f32 %v5573_v62, %v5534_v54  ;;  %v8110_v5 = vpop.f32.mrb[239].mxu1 }
 0x2da   : > { %v5080_v6 = vpop.f32.mrb[244].mxu0 }
 0x2db   : > { %5609 = vst.msk [vmem:[#allocation2 + $0x58] sm:$0xff] %vm396_vm12, %v5591_v63  ;;  %v5127_v4 = vadd.f32 %v5109_v40, %v5080_v6  ;;  %v8079_v7 = vpop.f32.mrb[245].mxu0  ;;  %v5907_v40 = vld [vmem:[#allocation2 + $0x20] sm:$0xff] }
 0x2dc   : > { %v5574_v59 = vld [vmem:[#allocation2 + $0x60] sm:$0xff]  ;;  %v5083_v61 = vpop.f32.mrb[246].mxu0 }
 0x2dd   : > { %5145 = vst.msk [vmem:[#allocation2 + $0x70] sm:$0xff] %vm396_vm12, %v5127_v4  ;;  %v5128_v10 = vadd.f32 %v5110_v9, %v5083_v61  ;;  %v8080_v13 = vpop.f32.mrb[247].mxu0  ;;  %v5908_v9 = vld [vmem:[#allocation2 + $0x28] sm:$0xff] }
 0x2de   : > { %v5539_v15 = vpop.f32.mrb[240].mxu1  ;;  %v5575_v17 = vld [vmem:[#allocation2 + $0x68] sm:$0xff] }
 0x2df   : > { %v5592_v18 = vadd.f32 %v5574_v59, %v5539_v15  ;;  %5146 = vst.msk [vmem:[#allocation2 + $0x78] sm:$0xff] %vm396_vm12, %v5128_v10  ;;  %v8113_v8 = vpop.f32.mrb[241].mxu1  ;;  %v10662_v15 = vld [vmem:[%s10821_s2] ss:$0 sm:$0xff] }
 0x2e0   : > { %v5542_v14 = vpop.f32.mrb[242].mxu1 }
 0x2e1   : > { %5610 = vst.msk [vmem:[#allocation2 + $0x60] sm:$0xff] %vm396_vm12, %v5592_v18  ;;  %v5593_v0 = vadd.f32 %v5575_v17, %v5542_v14  ;;  %v8114_v21 = vpop.f32.mrb[243].mxu1 }
 0x2e2   : > { %v5088_v22 = vpop.f32.mrb[248].mxu0 }
 0x2e3   : > { %5611 = vst.msk [vmem:[#allocation2 + $0x68] sm:$0xff] %vm396_vm12, %v5593_v0  ;;  %v5129_v2 = vadd.f32 %v5111_v3, %v5088_v22  ;;  %v8083_v23 = vpop.f32.mrb[249].mxu0 }
 0x2e4   : > { %v5576_v25 = vld [vmem:[#allocation2 + $0x70] sm:$0xff]  ;;  %v5091_v27 = vpop.f32.mrb[250].mxu0 }
 0x2e5   : > { %5147 = vst.msk [vmem:[#allocation2 + $0x80] sm:$0xff] %vm396_vm12, %v5129_v2  ;;  %v5130_v30 = vadd.f32 %v5112_v29, %v5091_v27  ;;  %v8084_v31 = vpop.f32.mrb[251].mxu0  ;;  %v5909_v27 = vld [vmem:[#allocation2 + $0x30] sm:$0xff] }
 0x2e6   : > { %v5547_v34 = vpop.f32.mrb[244].mxu1  ;;  %v5577_v56 = vld [vmem:[#allocation2 + $0x78] sm:$0xff] }
 0x2e7   : > { %v5594_v1 = vadd.f32 %v5576_v25, %v5547_v34  ;;  %5148 = vst.msk [vmem:[#allocation2 + $0x88] sm:$0xff] %vm396_vm12, %v5130_v30  ;;  %v8117_v19 = vpop.f32.mrb[245].mxu1 }
 0x2e8   : > { %v5550_v33 = vpop.f32.mrb[246].mxu1  ;;  %v5910_v19 = vld [vmem:[#allocation2 + $0x38] sm:$0xff] }
 0x2e9   : > { %5612 = vst.msk [vmem:[#allocation2 + $0x70] sm:$0xff] %vm396_vm12, %v5594_v1  ;;  %v5595_v16 = vadd.f32 %v5577_v56, %v5550_v33  ;;  %v8118_v36 = vpop.f32.mrb[247].mxu1 }
 0x2ea   : > { %v5832_v32 = vpop.f32.mrb[252].mxu0 }
 0x2eb   : > { %5613 = vst.msk [vmem:[#allocation2 + $0x78] sm:$0xff] %vm396_vm12, %v5595_v16  ;;  %v5921_v37 = vadd.f32 %v5903_v26, %v5832_v32  ;;  %v8127_v39 = vpop.f32.mrb[253].mxu0 }
 0x2ec   : > { %v5578_v11 = vld [vmem:[#allocation2 + $0x80] sm:$0xff]  ;;  %v5835_v42 = vpop.f32.mrb[254].mxu0 }
 0x2ed   : > { %5939 = vst.msk [vmem:[#allocation2] sm:$0xff] %vm396_vm12, %v5921_v37  ;;  %v5922_v43 = vadd.f32 %v5904_v12, %v5835_v42  ;;  %v8128_v20 = vpop.f32.mrb[255].mxu0 }
 0x2ee   : > { %v5555_v44 = vpop.f32.mrb[248].mxu1  ;;  %v5579_v35 = vld [vmem:[#allocation2 + $0x88] sm:$0xff] }
 0x2ef   : > { %v5596_v45 = vadd.f32 %v5578_v11, %v5555_v44  ;;  %v8121_v46 = vpop.f32.mrb[249].mxu1  ;;  %5940 = vst.msk [vmem:[#allocation2 + $0x8] sm:$0xff] %vm396_vm12, %v5922_v43 }
 0x2f0   : > { %v5558_v38 = vpop.f32.mrb[250].mxu1 }
 0x2f1   : > { %5614 = vst.msk [vmem:[#allocation2 + $0x80] sm:$0xff] %vm396_vm12, %v5596_v45  ;;  %v5597_v47 = vadd.f32 %v5579_v35, %v5558_v38  ;;  %v8122_v48 = vpop.f32.mrb[251].mxu1  ;;  %v5911_v45 = vld [vmem:[#allocation2 + $0x40] sm:$0xff] }
 0x2f2   : > { %v5840_v49 = vpop.f32.mrb[0].mxu0 }
 0x2f3   : > { %5615 = vst.msk [vmem:[#allocation2 + $0x88] sm:$0xff] %vm396_vm12, %v5597_v47  ;;  %v5923_v50 = vadd.f32 %v5905_v28, %v5840_v49  ;;  %v8131_v51 = vpop.f32.mrb[1].mxu0 }
 0x2f4   : > { %v6406_v52 = vld [vmem:[#allocation2] sm:$0xff]  ;;  %v5843_v53 = vpop.f32.mrb[2].mxu0 }
 0x2f5   : > { %5941 = vst.msk [vmem:[#allocation2 + $0x10] sm:$0xff] %vm396_vm12, %v5923_v50  ;;  %v5924_v58 = vadd.f32 %v5906_v57, %v5843_v53  ;;  %v8132_v60 = vpop.f32.mrb[3].mxu0  ;;  %v5912_v50 = vld [vmem:[#allocation2 + $0x48] sm:$0xff] }
 0x2f6   : > { %v6335_v24 = vpop.f32.mrb[252].mxu1  ;;  %v6407_v62 = vld [vmem:[#allocation2 + $0x8] sm:$0xff] }
 0x2f7   : > { %v6424_v41 = vadd.f32 %v6406_v52, %v6335_v24  ;;  %5942 = vst.msk [vmem:[#allocation2 + $0x18] sm:$0xff] %vm396_vm12, %v5924_v58  ;;  %v8165_v55 = vpop.f32.mrb[253].mxu1 }
 0x2f8   : > { %v6338_v54 = vpop.f32.mrb[254].mxu1 }
 0x2f9   : > { %6442 = vst.msk [vmem:[#allocation2] sm:$0xff] %vm396_vm12, %v6424_v41  ;;  %v6425_v63 = vadd.f32 %v6407_v62, %v6338_v54  ;;  %v8166_v5 = vpop.f32.mrb[255].mxu1 }
 0x2fa   : > { %v5848_v6 = vpop.f32.mrb[4].mxu0 }
 0x2fb   : > { %6443 = vst.msk [vmem:[#allocation2 + $0x8] sm:$0xff] %vm396_vm12, %v6425_v63  ;;  %v5925_v4 = vadd.f32 %v5907_v40, %v5848_v6  ;;  %v8135_v7 = vpop.f32.mrb[5].mxu0  ;;  %v5913_v40 = vld [vmem:[#allocation2 + $0x50] sm:$0xff] }
 0x2fc   : > { %v6408_v59 = vld [vmem:[#allocation2 + $0x10] sm:$0xff]  ;;  %v5851_v61 = vpop.f32.mrb[6].mxu0 }
 0x2fd   : > { %5943 = vst.msk [vmem:[#allocation2 + $0x20] sm:$0xff] %vm396_vm12, %v5925_v4  ;;  %v5926_v10 = vadd.f32 %v5908_v9, %v5851_v61  ;;  %v8136_v13 = vpop.f32.mrb[7].mxu0 }
 0x2fe   : > { %v6343_v17 = vpop.f32.mrb[0].mxu1  ;;  %v6409_v18 = vld [vmem:[#allocation2 + $0x18] sm:$0xff] }
 0x2ff   : > { %v6426_v8 = vadd.f32 %v6408_v59, %v6343_v17  ;;  %5944 = vst.msk [vmem:[#allocation2 + $0x28] sm:$0xff] %vm396_vm12, %v5926_v10  ;;  %v8169_v14 = vpop.f32.mrb[1].mxu1  ;;  %v5914_v13 = vld [vmem:[#allocation2 + $0x58] sm:$0xff] }
 0x300   : > { %v6460_v0 = vld [vmem:[#allocation2] sm:$0xff]  ;;  %v6346_v21 = vpop.f32.mrb[2].mxu1 }
 0x301   : > { %v6485_v22 = vadd.f32 %v10662_v15, %v6460_v0  ;;  %6444 = vst.msk [vmem:[#allocation2 + $0x10] sm:$0xff] %vm396_vm12, %v6426_v8  ;;  %v6427_v3 = vadd.f32 %v6409_v18, %v6346_v21  ;;  %v8170_v2 = vpop.f32.mrb[3].mxu1 }
 0x302   : > { %v6461_v23 = vld [vmem:[#allocation2 + $0x8] sm:$0xff]  ;;  %v5856_v25 = vpop.f32.mrb[8].mxu0 }
 0x303   : > { %v6503_v29 = vmax.f32 %v6485_v22, 0.0  ;;  %v6486_v30 = vadd.f32 %v10662_v15, %v6461_v23  ;;  %6445 = vst.msk [vmem:[#allocation2 + $0x18] sm:$0xff] %vm396_vm12, %v6427_v3  ;;  %v5927_v31 = vadd.f32 %v5909_v27, %v5856_v25  ;;  %v8139_v34 = vpop.f32.mrb[9].mxu0 }
 0x304   : > { %v6410_v56 = vld [vmem:[#allocation2 + $0x20] sm:$0xff]  ;;  %v5859_v1 = vpop.f32.mrb[10].mxu0 }
 0x305   : > { %6521 = vst.msk [vmem:[#allocation2] sm:$0xff] %vm396_vm12, %v6503_v29  ;;  %v6504_v33 = vmax.f32 %v6486_v30, 0.0  ;;  %5945 = vst.msk [vmem:[#allocation2 + $0x30] sm:$0xff] %vm396_vm12, %v5927_v31  ;;  %v5928_v16 = vadd.f32 %v5910_v19, %v5859_v1  ;;  %v8140_v36 = vpop.f32.mrb[11].mxu0  ;;  %v5915_v31 = vld [vmem:[#allocation2 + $0x60] sm:$0xff] }
 0x306   : > { %v6351_v32 = vpop.f32.mrb[4].mxu1  ;;  %v6411_v26 = vld [vmem:[#allocation2 + $0x28] sm:$0xff] }
 0x307   : > { %6522 = vst.msk [vmem:[#allocation2 + $0x8] sm:$0xff] %vm396_vm12, %v6504_v33  ;;  %v6428_v37 = vadd.f32 %v6410_v56, %v6351_v32  ;;  %5946 = vst.msk [vmem:[#allocation2 + $0x38] sm:$0xff] %vm396_vm12, %v5928_v16  ;;  %v8173_v39 = vpop.f32.mrb[5].mxu1  ;;  %v5916_v36 = vld [vmem:[#allocation2 + $0x68] sm:$0xff] }
 0x308   : > { %v6462_v11 = vld [vmem:[#allocation2 + $0x10] sm:$0xff]  ;;  %v6354_v42 = vpop.f32.mrb[6].mxu1 }
 0x309   : > { %v6487_v12 = vadd.f32 %v10662_v15, %v6462_v11  ;;  %6446 = vst.msk [vmem:[#allocation2 + $0x20] sm:$0xff] %vm396_vm12, %v6428_v37  ;;  %v6429_v43 = vadd.f32 %v6411_v26, %v6354_v42  ;;  %v8174_v20 = vpop.f32.mrb[7].mxu1 }
 0x30a   : > { %v6463_v44 = vld [vmem:[#allocation2 + $0x18] sm:$0xff]  ;;  %v5864_v35 = vpop.f32.mrb[12].mxu0 }
 0x30b   : > { %v6505_v46 = vmax.f32 %v6487_v12, 0.0  ;;  %v6488_v38 = vadd.f32 %v10662_v15, %v6463_v44  ;;  %6447 = vst.msk [vmem:[#allocation2 + $0x28] sm:$0xff] %vm396_vm12, %v6429_v43  ;;  %v5929_v47 = vadd.f32 %v5911_v45, %v5864_v35  ;;  %v8143_v48 = vpop.f32.mrb[13].mxu0 }
 0x30c   : > { %v6412_v49 = vld [vmem:[#allocation2 + $0x30] sm:$0xff]  ;;  %v5867_v28 = vpop.f32.mrb[14].mxu0 }
 0x30d   : > { %6523 = vst.msk [vmem:[#allocation2 + $0x10] sm:$0xff] %vm396_vm12, %v6505_v46  ;;  %v6506_v51 = vmax.f32 %v6488_v38, 0.0  ;;  %5947 = vst.msk [vmem:[#allocation2 + $0x40] sm:$0xff] %vm396_vm12, %v5929_v47  ;;  %v5930_v52 = vadd.f32 %v5912_v50, %v5867_v28  ;;  %v8144_v53 = vpop.f32.mrb[15].mxu0  ;;  %v5917_v47 = vld [vmem:[#allocation2 + $0x70] sm:$0xff] }
 0x30e   : > { %v6359_v57 = vpop.f32.mrb[8].mxu1  ;;  %v6413_v58 = vld [vmem:[#allocation2 + $0x38] sm:$0xff] }
 0x30f   : > { %6524 = vst.msk [vmem:[#allocation2 + $0x18] sm:$0xff] %vm396_vm12, %v6506_v51  ;;  %v6430_v60 = vadd.f32 %v6412_v49, %v6359_v57  ;;  %5948 = vst.msk [vmem:[#allocation2 + $0x48] sm:$0xff] %vm396_vm12, %v5930_v52  ;;  %v8177_v24 = vpop.f32.mrb[9].mxu1  ;;  %v5918_v53 = vld [vmem:[#allocation2 + $0x78] sm:$0xff] }
 0x310   : > { %v6464_v62 = vld [vmem:[#allocation2 + $0x20] sm:$0xff]  ;;  %v6362_v41 = vpop.f32.mrb[10].mxu1 }
 0x311   : > { %v6489_v55 = vadd.f32 %v10662_v15, %v6464_v62  ;;  %6448 = vst.msk [vmem:[#allocation2 + $0x30] sm:$0xff] %vm396_vm12, %v6430_v60  ;;  %v6431_v54 = vadd.f32 %v6413_v58, %v6362_v41  ;;  %v8178_v63 = vpop.f32.mrb[11].mxu1 }
 0x312   : > { %v6465_v5 = vld [vmem:[#allocation2 + $0x28] sm:$0xff]  ;;  %v5872_v6 = vpop.f32.mrb[16].mxu0 }
 0x313   : > { %v6507_v4 = vmax.f32 %v6489_v55, 0.0  ;;  %v6490_v7 = vadd.f32 %v10662_v15, %v6465_v5  ;;  %6449 = vst.msk [vmem:[#allocation2 + $0x38] sm:$0xff] %vm396_vm12, %v6431_v54  ;;  %v5931_v59 = vadd.f32 %v5913_v40, %v5872_v6  ;;  %v8147_v61 = vpop.f32.mrb[17].mxu0 }
 0x314   : > { %v6414_v9 = vld [vmem:[#allocation2 + $0x40] sm:$0xff]  ;;  %v5875_v10 = vpop.f32.mrb[18].mxu0 }
 0x315   : > { %6525 = vst.msk [vmem:[#allocation2 + $0x20] sm:$0xff] %vm396_vm12, %v6507_v4  ;;  %v6508_v17 = vmax.f32 %v6490_v7, 0.0  ;;  %5949 = vst.msk [vmem:[#allocation2 + $0x50] sm:$0xff] %vm396_vm12, %v5931_v59  ;;  %v5932_v18 = vadd.f32 %v5914_v13, %v5875_v10  ;;  %v8148_v8 = vpop.f32.mrb[19].mxu0  ;;  %v5919_v59 = vld [vmem:[#allocation2 + $0x80] sm:$0xff] }
 0x316   : > { %v6367_v14 = vpop.f32.mrb[12].mxu1  ;;  %v6415_v0 = vld [vmem:[#allocation2 + $0x48] sm:$0xff] }
 0x317   : > { %6526 = vst.msk [vmem:[#allocation2 + $0x28] sm:$0xff] %vm396_vm12, %v6508_v17  ;;  %v6432_v21 = vadd.f32 %v6414_v9, %v6367_v14  ;;  %5950 = vst.msk [vmem:[#allocation2 + $0x58] sm:$0xff] %vm396_vm12, %v5932_v18  ;;  %v8181_v22 = vpop.f32.mrb[13].mxu1  ;;  %v5920_v8 = vld [vmem:[#allocation2 + $0x88] sm:$0xff] }
 0x318   : > { %v6466_v3 = vld [vmem:[#allocation2 + $0x30] sm:$0xff]  ;;  %v6370_v2 = vpop.f32.mrb[14].mxu1 }
 0x319   : > { %v6491_v23 = vadd.f32 %v10662_v15, %v6466_v3  ;;  %6450 = vst.msk [vmem:[#allocation2 + $0x40] sm:$0xff] %vm396_vm12, %v6432_v21  ;;  %v6433_v25 = vadd.f32 %v6415_v0, %v6370_v2  ;;  %v8182_v27 = vpop.f32.mrb[15].mxu1 }
 0x31a   : > { %v6467_v29 = vld [vmem:[#allocation2 + $0x38] sm:$0xff]  ;;  %v5880_v30 = vpop.f32.mrb[20].mxu0 }
 0x31b   : > { %v6509_v34 = vmax.f32 %v6491_v23, 0.0  ;;  %v6492_v56 = vadd.f32 %v10662_v15, %v6467_v29  ;;  %6451 = vst.msk [vmem:[#allocation2 + $0x48] sm:$0xff] %vm396_vm12, %v6433_v25  ;;  %v5933_v1 = vadd.f32 %v5915_v31, %v5880_v30  ;;  %v8151_v19 = vpop.f32.mrb[21].mxu0 }
 0x31c   : > { %v6416_v33 = vld [vmem:[#allocation2 + $0x50] sm:$0xff]  ;;  %v5883_v16 = vpop.f32.mrb[22].mxu0 }
 0x31d   : > { %6527 = vst.msk [vmem:[#allocation2 + $0x30] sm:$0xff] %vm396_vm12, %v6509_v34  ;;  %v6510_v32 = vmax.f32 %v6492_v56, 0.0  ;;  %5951 = vst.msk [vmem:[#allocation2 + $0x60] sm:$0xff] %vm396_vm12, %v5933_v1  ;;  %v5934_v26 = vadd.f32 %v5916_v36, %v5883_v16  ;;  %v8152_v37 = vpop.f32.mrb[23].mxu0 }
 0x31e   : > { %v6375_v39 = vpop.f32.mrb[16].mxu1  ;;  %v6417_v11 = vld [vmem:[#allocation2 + $0x58] sm:$0xff] }
 0x31f   : > { %6528 = vst.msk [vmem:[#allocation2 + $0x38] sm:$0xff] %vm396_vm12, %v6510_v32  ;;  %v6434_v42 = vadd.f32 %v6416_v33, %v6375_v39  ;;  %5952 = vst.msk [vmem:[#allocation2 + $0x68] sm:$0xff] %vm396_vm12, %v5934_v26  ;;  %v8185_v12 = vpop.f32.mrb[17].mxu1 }
 0x320   : > { %v6468_v43 = vld [vmem:[#allocation2 + $0x40] sm:$0xff]  ;;  %v6378_v20 = vpop.f32.mrb[18].mxu1 }
 0x321   : > { %v6493_v44 = vadd.f32 %v10662_v15, %v6468_v43  ;;  %6452 = vst.msk [vmem:[#allocation2 + $0x50] sm:$0xff] %vm396_vm12, %v6434_v42  ;;  %v6435_v35 = vadd.f32 %v6417_v11, %v6378_v20  ;;  %v8186_v45 = vpop.f32.mrb[19].mxu1 }
 0x322   : > { %v6469_v46 = vld [vmem:[#allocation2 + $0x48] sm:$0xff]  ;;  %v5888_v38 = vpop.f32.mrb[24].mxu0 }
 0x323   : > { %v6511_v48 = vmax.f32 %v6493_v44, 0.0  ;;  %v6494_v49 = vadd.f32 %v10662_v15, %v6469_v46  ;;  %6453 = vst.msk [vmem:[#allocation2 + $0x58] sm:$0xff] %vm396_vm12, %v6435_v35  ;;  %v5935_v28 = vadd.f32 %v5917_v47, %v5888_v38  ;;  %v8155_v50 = vpop.f32.mrb[25].mxu0 }
 0x324   : > { %v6418_v51 = vld [vmem:[#allocation2 + $0x60] sm:$0xff]  ;;  %v5891_v52 = vpop.f32.mrb[26].mxu0  ;;  %v6544_v50 = vld [vmem:[#allocation2 + $0x18] sm:$0xff] (!%p7420_p13) }
 0x325   : > { %6529 = vst.msk [vmem:[#allocation2 + $0x40] sm:$0xff] %vm396_vm12, %v6511_v48  ;;  %v6512_v57 = vmax.f32 %v6494_v49, 0.0  ;;  %5953 = vst.msk [vmem:[#allocation2 + $0x70] sm:$0xff] %vm396_vm12, %v5935_v28  ;;  %v5936_v58 = vadd.f32 %v5918_v53, %v5891_v52  ;;  %v8156_v60 = vpop.f32.mrb[27].mxu0  ;;  %v6543_v28 = vld [vmem:[#allocation2 + $0x10] sm:$0xff] (!%p7420_p13) }
 0x326   : > { %v6383_v24 = vpop.f32.mrb[20].mxu1  ;;  %v6419_v62 = vld [vmem:[#allocation2 + $0x68] sm:$0xff]  ;;  %6545 = vst.msk [vmem:[#allocation2] sm:$0xff] (!%p7420_p13), %vm396_vm12, %v6543_v28  ;;  %6546 = vst.msk [vmem:[#allocation2 + $0x8] sm:$0xff] (!%p7420_p13), %vm396_vm12, %v6544_v50 }
 0x327   : > { %6530 = vst.msk [vmem:[#allocation2 + $0x48] sm:$0xff] %vm396_vm12, %v6512_v57  ;;  %v6436_v41 = vadd.f32 %v6418_v51, %v6383_v24  ;;  %5954 = vst.msk [vmem:[#allocation2 + $0x78] sm:$0xff] %vm396_vm12, %v5936_v58  ;;  %v8189_v55 = vpop.f32.mrb[21].mxu1 }
 0x328   : > { %v6470_v54 = vld [vmem:[#allocation2 + $0x50] sm:$0xff]  ;;  %v6386_v63 = vpop.f32.mrb[22].mxu1 }
 0x329   : > { %v6495_v5 = vadd.f32 %v10662_v15, %v6470_v54  ;;  %6454 = vst.msk [vmem:[#allocation2 + $0x60] sm:$0xff] %vm396_vm12, %v6436_v41  ;;  %v6437_v6 = vadd.f32 %v6419_v62, %v6386_v63  ;;  %v8190_v40 = vpop.f32.mrb[23].mxu1 }
 0x32a   : > { %v6471_v4 = vld [vmem:[#allocation2 + $0x58] sm:$0xff]  ;;  %v5896_v7 = vpop.f32.mrb[28].mxu0 }
 0x32b   : > { %v6513_v61 = vmax.f32 %v6495_v5, 0.0  ;;  %v6496_v9 = vadd.f32 %v10662_v15, %v6471_v4  ;;  %6455 = vst.msk [vmem:[#allocation2 + $0x68] sm:$0xff] %vm396_vm12, %v6437_v6  ;;  %v5937_v10 = vadd.f32 %v5919_v59, %v5896_v7  ;;  %v8159_v13 = vpop.f32.mrb[29].mxu0 }
 0x32c   : > { %v6420_v17 = vld [vmem:[#allocation2 + $0x70] sm:$0xff]  ;;  %v5899_v18 = vpop.f32.mrb[30].mxu0 }
 0x32d   : > { %6531 = vst.msk [vmem:[#allocation2 + $0x50] sm:$0xff] %vm396_vm12, %v6513_v61  ;;  %v6514_v14 = vmax.f32 %v6496_v9, 0.0  ;;  %5955 = vst.msk [vmem:[#allocation2 + $0x80] sm:$0xff] %vm396_vm12, %v5937_v10  ;;  %v5938_v0 = vadd.f32 %v5920_v8, %v5899_v18  ;;  %v8160_v21 = vpop.f32.mrb[31].mxu0 }
 0x32e   : > { %v6391_v22 = vpop.f32.mrb[24].mxu1  ;;  %v6421_v3 = vld [vmem:[#allocation2 + $0x78] sm:$0xff] }
 0x32f   : > { %6532 = vst.msk [vmem:[#allocation2 + $0x58] sm:$0xff] %vm396_vm12, %v6514_v14  ;;  %v6438_v2 = vadd.f32 %v6420_v17, %v6391_v22  ;;  %5956 = vst.msk [vmem:[#allocation2 + $0x88] sm:$0xff] %vm396_vm12, %v5938_v0  ;;  %v8193_v23 = vpop.f32.mrb[25].mxu1 }
 0x330   : > { %v6472_v25 = vld [vmem:[#allocation2 + $0x60] sm:$0xff]  ;;  %v6394_v27 = vpop.f32.mrb[26].mxu1 }
 0x331   : > { %v6497_v29 = vadd.f32 %v10662_v15, %v6472_v25  ;;  %6456 = vst.msk [vmem:[#allocation2 + $0x70] sm:$0xff] %vm396_vm12, %v6438_v2  ;;  %v6439_v30 = vadd.f32 %v6421_v3, %v6394_v27  ;;  %v8194_v31 = vpop.f32.mrb[27].mxu1 }
 0x332   : > { %v6473_v34 = vld [vmem:[#allocation2 + $0x68] sm:$0xff] }
 0x333   : > { %v6515_v56 = vmax.f32 %v6497_v29, 0.0  ;;  %v6498_v1 = vadd.f32 %v10662_v15, %v6473_v34  ;;  %6457 = vst.msk [vmem:[#allocation2 + $0x78] sm:$0xff] %vm396_vm12, %v6439_v30 }
 0x334   : > { %v6422_v19 = vld [vmem:[#allocation2 + $0x80] sm:$0xff] }
 0x335   : > { %6533 = vst.msk [vmem:[#allocation2 + $0x60] sm:$0xff] %vm396_vm12, %v6515_v56  ;;  %v6516_v33 = vmax.f32 %v6498_v1, 0.0 }
 0x336   : > { %v6399_v16 = vpop.f32.mrb[28].mxu1  ;;  %v6423_v36 = vld [vmem:[#allocation2 + $0x88] sm:$0xff] }
 0x337   : > { %6534 = vst.msk [vmem:[#allocation2 + $0x68] sm:$0xff] %vm396_vm12, %v6516_v33  ;;  %v6440_v32 = vadd.f32 %v6422_v19, %v6399_v16  ;;  %v8197_v26 = vpop.f32.mrb[29].mxu1 }
 0x338   : > { %v6474_v37 = vld [vmem:[#allocation2 + $0x70] sm:$0xff]  ;;  %v6402_v39 = vpop.f32.mrb[30].mxu1 }
 0x339   : > { %v6499_v11 = vadd.f32 %v10662_v15, %v6474_v37  ;;  %6458 = vst.msk [vmem:[#allocation2 + $0x80] sm:$0xff] %vm396_vm12, %v6440_v32  ;;  %v6441_v42 = vadd.f32 %v6423_v36, %v6402_v39  ;;  %v8198_v12 = vpop.f32.mrb[31].mxu1 }
 0x33a   : > { %v6475_v43 = vld [vmem:[#allocation2 + $0x78] sm:$0xff] }
 0x33b   : > { %v6517_v20 = vmax.f32 %v6499_v11, 0.0  ;;  %v6500_v44 = vadd.f32 %v10662_v15, %v6475_v43  ;;  %6459 = vst.msk [vmem:[#allocation2 + $0x88] sm:$0xff] %vm396_vm12, %v6441_v42 }
 0x33d   : > { %6535 = vst.msk [vmem:[#allocation2 + $0x70] sm:$0xff] %vm396_vm12, %v6517_v20  ;;  %v6518_v35 = vmax.f32 %v6500_v44, 0.0 }
 0x33f   : > { %6536 = vst.msk [vmem:[#allocation2 + $0x78] sm:$0xff] %vm396_vm12, %v6518_v35 }
 0x340   : > { %v6476_v45 = vld [vmem:[#allocation2 + $0x80] sm:$0xff] }
 0x341   : > { %v6501_v46 = vadd.f32 %v10662_v15, %v6476_v45  ;;  %6542 = sbr.rel (%p7420_p13) target bundleno = 840 (0x348), region = 36 }
 0x342   : > { %v6477_v38 = vld [vmem:[#allocation2 + $0x88] sm:$0xff] }
 0x343   : > { %v6519_v47 = vmax.f32 %v6501_v46, 0.0  ;;  %v6502_v48 = vadd.f32 %v10662_v15, %v6477_v38 }
 0x345   : > { %6537 = vst.msk [vmem:[#allocation2 + $0x80] sm:$0xff] %vm396_vm12, %v6519_v47  ;;  %v6520_v49 = vmax.f32 %v6502_v48, 0.0 }
 0x347   : > { %6538 = vst.msk [vmem:[#allocation2 + $0x88] sm:$0xff] %vm396_vm12, %v6520_v49 }
 0x348 PF: > { %v6547_v51 = vld [vmem:[#allocation2] sm:$0xff]  ;;  %v6549_v52 = vld [vmem:[#allocation2 + $0x10] sm:$0xff]  ;;  %v6548_v57 = vld [vmem:[#allocation2 + $0x8] sm:$0xff]  ;;  %v6563_v63 = vlaneseq  ;;  %s7425_s5 = sshll.u32 %s8405_s15, 2  ;;  %s7426_s21 = sshll.u32 %s8409_s16, 3 }
 0x349   : > { %v6551_v15 = vld [vmem:[#allocation2 + $0x20] sm:$0xff]  ;;  %v6553_v53 = vmax.f32 %v6547_v51, %v6549_v52  ;;  %v6550_v58 = vld [vmem:[#allocation2 + $0x18] sm:$0xff]  ;;  %v6552_v60 = vld [vmem:[#allocation2 + $0x28] sm:$0xff]  ;;  %s6643_s24 = sadd.s32 %s7426_s21, %s7425_s5  ;;  %s6646_s27 = sshll.u32 %s10730_s20, 4  ;;  %s10756_s27 = int_to_ptr.vmem [resolvable:$true] %s6646_s27 }
 0x34a   : > { %v6554_v24 = vmax.f32 %v6548_v57, %v6550_v58  ;;  %v6572_v41 = vld [vmem:[#allocation2 + $0x30] sm:$0xff]  ;;  %v6573_v55 = vld [vmem:[#allocation2 + $0x38] sm:$0xff]  ;;  %v6574_v40 = vld [vmem:[#allocation2 + $0x40] sm:$0xff]  ;;  %v6564_v7 = vshrl.u32 %v6563_v63, 7  ;;  %s7427_s28 = sshll.u32 %s6643_s24, 7  ;;  %s10767_s7 = scalar_lea.sflag [#allocation5], %s175_s4 }
 0x34b   : > { %v6555_v62 = vmax.f32 %v6553_v53, %v6551_v15  ;;  %v6576_v5 = vmax.f32 %v6551_v15, %v6572_v41  ;;  %v6577_v6 = vmax.f32 %v6552_v60, %v6573_v55  ;;  %v6575_v4 = vld [vmem:[#allocation2 + $0x48] sm:$0xff]  ;;  %v6592_v9 = vld [vmem:[#allocation2 + $0x50] sm:$0xff]  ;;  %v6593_v10 = vld [vmem:[#allocation2 + $0x58] sm:$0xff]  ;;  %s10761_s29 = scalar_lea.hbm %s10822_s3, %s7427_s28  ;;  %s8327_s8 = scalar_lea.vmem %s10756_s27, 512 }
 0x34c   : > { %v6556_v54 = vmax.f32 %v6554_v24, %v6552_v60  ;;  %vm6565_vm13 = vcmp.eq.s32.totalorder %v6564_v7, 0  ;;  %v6596_v14 = vmax.f32 %v6574_v40, %v6592_v9  ;;  %v6597_v0 = vmax.f32 %v6575_v4, %v6593_v10  ;;  %v6594_v21 = vld [vmem:[#allocation2 + $0x60] sm:$0xff]  ;;  %v6595_v22 = vld [vmem:[#allocation2 + $0x68] sm:$0xff]  ;;  %v6612_v27 = vld [vmem:[#allocation2 + $0x70] sm:$0xff]  ;;  %p8328_p0 = scmp.ne.s32.totalorder %s10756_s27, %s8327_s8  ;;  %s8425_s9 = smov [#allocation4]  }
 0x34d   : > { %6557 = vst.msk [vmem:[#allocation3] sm:$0xff] %vm396_vm12, %v6555_v62  ;;  %v6578_v59 = vmax.f32 %v6576_v5, %v6574_v40  ;;  %v6579_v61 = vmax.f32 %v6577_v6, %v6575_v4  ;;  %v6613_v29 = vld [vmem:[#allocation2 + $0x78] sm:$0xff]  ;;  %v6616_v1 = vmax.f32 %v6594_v21, %v6612_v27  ;;  %v6614_v33 = vld [vmem:[#allocation2 + $0x80] sm:$0xff]  ;;  %s8331_s10 = sshll.u32 %s8425_s9, 4  ;;  %s8332_s10 = int_to_ptr.vmem [resolvable:$false] %s8331_s10 }
 0x34e   : > { %6558 = vst.msk [vmem:[#allocation3 + $0x8] sm:$0xff] %vm396_vm12, %v6556_v54  ;;  %v6598_v23 = vmax.f32 %v6596_v14, %v6594_v21  ;;  %v6599_v25 = vmax.f32 %v6597_v0, %v6595_v22  ;;  %v6617_v19 = vmax.f32 %v6595_v22, %v6613_v29  ;;  %v6615_v16 = vld [vmem:[#allocation2 + $0x88] sm:$0xff]  ;;  %p8329_p1 = pnand %p8328_p0, %p8499_p3  ;;  %s8333_s6 = scalar_lea.vmem %s8332_s10, 1024 }
 0x34f   : > { %v6618_v26 = vmax.f32 %v6616_v1, %v6614_v33  ;;  %p8334_p4 = scmp.lt.s32.totalorder %s10756_s27, %s8332_s10  ;;  %p8335_p5 = scmp.lt.s32.totalorder %s8333_s6, %s8327_s8 }
 0x350   : > { %v6619_v37 = vmax.f32 %v6617_v19, %v6615_v16  ;;  %p8330_p2 = pneg %p8329_p1 }
 0x351   : > { %p8336_p6 = por %p8335_p5, %p8334_p4 }
 0x353   : > { %p8337_p7 = pnand %p8336_p6, %p8330_p2 }
 0x355   : > { %v6559_v13 = vld [vmem:[#allocation3] ss:$2 sm:$0xff]  ;;  %v6561_v17 = vld [vmem:[#allocation3 + $0x1] ss:$2 sm:$0xff] }
 0x356   : > { %6580 = vst.msk [vmem:[#allocation3] sm:$0xff] %vm396_vm12, %v6578_v59  ;;  %6581 = vst.msk [vmem:[#allocation3 + $0x8] sm:$0xff] %vm396_vm12, %v6579_v61  ;;  %v6562_v18 = vrot.slane %v6561_v17, 7  ;;  %v6567_v8 = vmax.f32 %v6559_v13, %v6561_v17 }
 0x358   : > { %v6566_v3 = vsel %vm6565_vm13, -inf, %v6562_v18 }
 0x359   : > { %v6568_v2 = vmax.f32 %v6567_v8, %v6566_v3 }
 0x35b   : > { %6569 = vst.msk [vmem:[%s10730_s20] sm:$0xff] %vm396_vm12, %v6568_v2 }
 0x35d   : > { %v6582_v30 = vld [vmem:[#allocation3] ss:$2 sm:$0xff]  ;;  %v6583_v31 = vld [vmem:[#allocation3 + $0x1] ss:$2 sm:$0xff] }
 0x35e   : > { %6600 = vst.msk [vmem:[#allocation3] sm:$0xff] %vm396_vm12, %v6598_v23  ;;  %6601 = vst.msk [vmem:[#allocation3 + $0x8] sm:$0xff] %vm396_vm12, %v6599_v25  ;;  %v6584_v34 = vrot.slane %v6583_v31, 7  ;;  %v6586_v56 = vmax.f32 %v6582_v30, %v6583_v31 }
 0x360   : > { %v6585_v36 = vsel %vm6565_vm13, -inf, %v6584_v34 }
 0x361   : > { %v6587_v32 = vmax.f32 %v6586_v56, %v6585_v36 }
 0x363   : > { %7421 = vst.msk [vmem:[%s10730_s20 + $0x8] sm:$0xff] %vm396_vm12, %v6587_v32 }
 0x365   : > { %v6602_v39 = vld [vmem:[#allocation3] ss:$2 sm:$0xff]  ;;  %v6603_v11 = vld [vmem:[#allocation3 + $0x1] ss:$2 sm:$0xff] }
 0x366   : > { %6620 = vst.msk [vmem:[#allocation3] sm:$0xff] %vm396_vm12, %v6618_v26  ;;  %6621 = vst.msk [vmem:[#allocation3 + $0x8] sm:$0xff] %vm396_vm12, %v6619_v37  ;;  %v6604_v42 = vrot.slane %v6603_v11, 7  ;;  %v6606_v12 = vmax.f32 %v6602_v39, %v6603_v11 }
 0x368   : > { %v6605_v43 = vsel %vm6565_vm13, -inf, %v6604_v42 }
 0x369   : > { %v6607_v20 = vmax.f32 %v6606_v12, %v6605_v43 }
 0x36b   : > { %7422 = vst.msk [vmem:[%s10730_s20 + $0x10] sm:$0xff] %vm396_vm12, %v6607_v20 }
 0x36d   : > { %v6622_v44 = vld [vmem:[#allocation3] ss:$2 sm:$0xff]  ;;  %v6623_v35 = vld [vmem:[#allocation3 + $0x1] ss:$2 sm:$0xff] }
 0x36e   : > { %v6624_v45 = vrot.slane %v6623_v35, 7  ;;  %v6626_v46 = vmax.f32 %v6622_v44, %v6623_v35 }
 0x370   : > { %v6625_v38 = vsel %vm6565_vm13, -inf, %v6624_v45 }
 0x371   : > { %v6627_v47 = vmax.f32 %v6626_v46, %v6625_v38 }
 0x373   : > { %7423 = vst.msk [vmem:[%s10730_s20 + $0x18] sm:$0xff] %vm396_vm12, %v6627_v47 }
 0x374   : > { %8340 = shalt.err (!%p8337_p7)
}
 0x375   : > { %s8341_s4 = scalar_lea.hbm %s10761_s29, 512  ;;  %s8345_s5 = scalar_lea.hbm %s10822_s3, 2048 }
 0x376   : > { %p8342_p9 = scmp.ne.s32.totalorder %s10761_s29, %s8341_s4  ;;  %p8346_p12 = scmp.lt.u32.totalorder %s10761_s29, %s10822_s3 }
 0x377   : > { %p8347_p13 = scmp.lt.u32.totalorder %s8345_s5, %s8341_s4  ;;  %p8349_p1 = scmp.lt.u32.totalorder %s8341_s4, %s10761_s29 }
 0x378   : > { %p8343_p10 = pnand %p8342_p9, %p8499_p3 }
 0x379   : > { %p8348_p0 = por %p8347_p13, %p8346_p12 }
 0x37a   : > { %p8344_p11 = pneg %p8343_p10 }
 0x37b   : > { %p8350_p2 = por %p8349_p1, %p8348_p0 }
 0x37d   : > { %p8351_p4 = pnand %p8350_p2, %p8344_p11 }
 0x37f   : > { %8354 = shalt.err (!%p8351_p4)
}
 0x380   : > { %s8426_s28 = smov 128   ;;  %s8427_s15 = smov 8  }
 0x381   : > { %8200 = dma.vmem_to_hbm [thread:$0]  (%p8499_p3), %s10756_s27, 512, %s10761_s29, %s10767_s7, %s8426_s28, %s8426_s28, %s8427_s15  }
 0x382 PF: > { %p8206_p5 = scmp.ge.s32.totalorder %s8421_s19, 2  ;;  %s6661_s16 = sand.u32 1, %s8393_s12  }
 0x383   : > { %s6662_s8 = scalar_lea.sflag [#allocation5], %s6661_s16 }
 0x384   : > { %p8203_p6 = pnand %p8206_p5, %p8508_p8 }
 0x386   : > { %8388 = dma.done.wait (!%p8203_p6), %s6662_s8, 512  }
 0x387   : > { %8390 = vsyncadd (!%p8203_p6), %s6662_s8, 4294966784  ;;  %s16_s19 = sadd.s32 1, %s8421_s19   ;;  %s10831_s12 = smov %s8397_s13 }
 0x388   : > { %p13_p7 = scmp.ge.s32.totalorder %s16_s19, 6   ;;  %s10832_s13 = smov %s8401_s14 }
 0x389   : > { %s10833_s14 = smov %s8517_s30  ;;  %s10834_s15 = smov %s8413_s17 }
 0x38a   : > { %s10835_s16 = smov %s8417_s18  ;;  %s10836_s17 = smov %s10839_s22 }
 0x38b   : > { %s10837_s18 = smov %s10843_s23  ;;  %15 = sbr.rel (!%p13_p7) target bundleno = 5 (0x5), region = 94 }
 0x392   :  { %6667 = vsyncpa [#allocation5], 1 }
 0x393   :  { %6669 = vsyncpa [#allocation5 + $0x1], 1 }

</bundles_post_ra>
